<compile_context>
chip_gen: v7x
topology: tpu7x:2x2x1
jax: 0.10.0
libtpu: 0.0.40
codegen_flags: <defaults>
</compile_context>

<pallas_src>
import functools

import jax
import jax.numpy as jnp
from jax.experimental import pallas as pl
from jax.experimental.pallas import tpu as pltpu


def _flow_kernel(x_ref, wsplat_ref, z_ref, ld_ref, *,
                 n_steps, c, hw_pixels, scale, inv_p):
    """Runs all flow steps on a lane-dense [N, C, HW] tile.

    x_ref     : [N, C, HW]        input activation (channels on sublanes)
    wsplat_ref: [S*C_in, C_out, HW] lane-replicated 1x1-conv columns
    z_ref     : [N, C, HW]        output activation (HBM buffer aliased with x)
    ld_ref    : [1, 1]            accumulated ActNorm log-determinant
    """
    x = x_ref[...]                                   # [N, C, HW] f32, 4 vregs
    ld_vec = jnp.zeros((1, c, 1), dtype=jnp.float32)  # per-channel logdet acc

    # Fully unrolled step loop (n_steps is small and static); the activation
    # stays in vregs across steps -- no per-step VMEM round trips.
    for s in range(n_steps):
        # --- ActNorm data-dependent init: one-pass statistics ------------
        # sum(x) and sum(x*x) are independent XLU lane reductions.
        x_sum = jnp.sum(jnp.sum(x, axis=2, keepdims=True),
                        axis=0, keepdims=True)                    # [1, C, 1]
        x2_sum = jnp.sum(jnp.sum(x * x, axis=2, keepdims=True),
                         axis=0, keepdims=True)                   # [1, C, 1]
        mean = x_sum * inv_p
        var = jnp.maximum(x2_sum * inv_p - mean * mean, 0.0)      # [1, C, 1]
        inv_std = scale * pl.reciprocal(jnp.sqrt(var) + 1e-6, approx=False)

        # logdet contribution deferred: accumulate per-channel, reduce once.
        ld_vec = ld_vec + jnp.log(inv_std)

        # --- ActNorm forward: center then scale ---------------------------
        y = (x - mean) * inv_std                                  # [N, C, HW]

        # --- InvertibleConv1x1: z[n,o,p] = sum_i W[o,i] * y[n,i,p] --------
        # 8x8 contraction as VPU broadcast-FMAs over pre-splatted columns
        # (straight vlds, no lane extracts); MXU would be pure latency here.
        def col(i):                       # [1, C_out, HW], lane-replicated
            return wsplat_ref[s * c + i][None, :, :]

        def row(i):                       # [N, 1, HW]
            return y[:, i:i + 1, :]

        half = c // 2
        acc_a = col(0) * row(0)
        for i in range(1, half):
            acc_a = acc_a + col(i) * row(i)
        acc_b = col(half) * row(half)
        for i in range(half + 1, c):
            acc_b = acc_b + col(i) * row(i)
        x = acc_a + acc_b

    z_ref[...] = x
    # Single cross-sublane reduce + single *H*W scaling for the logdet.
    ld = jnp.sum(ld_vec) * jnp.float32(hw_pixels)
    ld_ref[...] = jnp.full((1, 1), ld, dtype=jnp.float32)


def _prepare_splat_weights(weights, hw):
    """[S, C_out, C_in] -> [S*C_in, C_out, HW] lane-replicated columns.

    wsplat[s*C + i, o, p] == W_s[o, i] for every lane p.  In a real model the
    weights are constants, so this 512 KiB expansion is a one-time cost.
    """
    s, c_out, c_in = weights.shape
    cols = jnp.transpose(weights, (0, 2, 1))                  # [S, C_in, C_out]
    wsplat = jnp.broadcast_to(cols[:, :, :, None], (s, c_in, c_out, hw))
    return wsplat.reshape(s * c_in, c_out, hw).astype(jnp.float32)


def nfc_forward(x_nchw, weights, *, scale=1.0):
    """Runs the NFC encoder. Returns (z_nchw, logdet)."""
    n, c, h, w = x_nchw.shape
    n_steps = weights.shape[0]
    hw = h * w

    # Free, contiguous reshape (no transpose / extra HBM traffic).
    x3 = x_nchw.reshape(n, c, hw).astype(jnp.float32)          # [N, C, HW]
    wsplat = _prepare_splat_weights(weights.astype(jnp.float32), hw)

    kernel = functools.partial(
        _flow_kernel, n_steps=n_steps, c=c, hw_pixels=hw, scale=float(scale),
        inv_p=1.0 / float(n * hw))  # NOTE: assumes all of N*HW in one tile.

    z3, ld_actnorm = pl.pallas_call(
        kernel,
        out_shape=(
            jax.ShapeDtypeStruct((n, c, hw), jnp.float32),
            jax.ShapeDtypeStruct((1, 1), jnp.float32),
        ),
        grid_spec=pltpu.PrefetchScalarGridSpec(
            num_scalar_prefetch=0,
            grid=(1,),
            in_specs=[
                pl.BlockSpec((n, c, hw), lambda i: (0, 0, 0)),
                pl.BlockSpec((n_steps * c, c, hw), lambda i: (0, 0, 0)),
            ],
            out_specs=[
                pl.BlockSpec((n, c, hw), lambda i: (0, 0, 0)),
                pl.BlockSpec((1, 1), lambda i: (0, 0)),
            ],
        ),
        # Activation in == activation out: reuse the HBM buffer.
        input_output_aliases={0: 0},
        compiler_params=pltpu.CompilerParams(
            dimension_semantics=("arbitrary",)),
    )(x3, wsplat)

    # Data-independent logdet from the 1x1-conv weights (not the hot path):
    # dlogdet = slogdet(W)[1] * H * W per step, batched via vmap.
    conv_ld = jnp.sum(
        jax.vmap(lambda wm: jnp.linalg.slogdet(wm)[1])(
            weights.astype(jnp.float32))) * hw
    logdet = ld_actnorm[0, 0] + conv_ld

    z_nchw = z3.reshape(n, c, h, w)
    return z_nchw, logdet


def nfc_reference(x_nchw, weights, *, scale=1.0):
    """Pure-JAX reference of the intended encode path (module math)."""
    n, c, h, w = x_nchw.shape
    x = jnp.transpose(x_nchw, (0, 2, 3, 1)).reshape(-1, c).astype(jnp.float32)
    logdet = jnp.float32(0.0)
    for s in range(weights.shape[0]):
        mean = jnp.mean(x, axis=0, keepdims=True)
        xc = x - mean
        var = jnp.mean(xc * xc, axis=0, keepdims=True)
        logs = jnp.log(scale / (jnp.sqrt(var) + 1e-6))
        x = xc * jnp.exp(logs)
        logdet = logdet + jnp.sum(logs) * (h * w)
        W = weights[s]
        logdet = logdet + jnp.linalg.slogdet(W)[1] * (h * w)
        x = x @ W.T
    z = jnp.transpose(x.reshape(n, h, w, c), (0, 3, 1, 2))
    return z, logdet


def make_weights(key, n_steps, c):
    """Deterministic InvertibleConv1x1 init: W = QR(randn(C, C))[0] per step."""
    keys = jax.random.split(key, n_steps)
    ws = []
    for k in keys:
        q, _ = jnp.linalg.qr(jax.random.normal(k, (c, c), dtype=jnp.float32))
        ws.append(q)
    return jnp.stack(ws)          # [n_steps, C, C]


if __name__ == "__main__":
    # Small shapes consistent with the module's NCHW conv interface.
    N, C, H, W = 2, 8, 16, 16
    BLOCK_NUM, STEP_NUM = 2, 8
    N_STEPS = BLOCK_NUM * STEP_NUM

    root = jax.random.PRNGKey(0)
    kx, kw = jax.random.split(root)
    x = jax.random.normal(kx, (N, C, H, W), dtype=jnp.float32)
    weights = make_weights(kw, N_STEPS, C)

    # Run the reference first (also guards against the aliased/donated
    # activation buffer being touched before the reference reads x).
    z_ref, logdet_ref = nfc_reference(x, weights)
    z_ref = jax.block_until_ready(z_ref)

    z, logdet = nfc_forward(x, weights)
    z = jax.block_until_ready(z)
    logdet = jax.block_until_ready(logdet)

    assert z.shape == (N, C, H, W)
    # One-pass variance + in-kernel reduction order differ slightly from the
    # reference; logdet amplifies per-channel log differences by H*W, hence
    # the slightly looser logdet tolerance.
    assert jnp.allclose(z, z_ref, rtol=2e-4, atol=2e-4), "activation mismatch"
    assert jnp.allclose(logdet, logdet_ref, rtol=2e-3, atol=5e-2), "logdet mismatch"

    print("KERNEL_OK")
</pallas_src>

<mosaic_0001>
module attributes {stable_mosaic.version = 11 : i64} {
  func.func @_flow_kernel(%arg0: i32, %arg1: memref<2x8x256xf32, #tpu.memory_space<vmem>>, %arg2: memref<128x8x256xf32, #tpu.memory_space<vmem>>, %arg3: memref<2x8x256xf32, #tpu.memory_space<vmem>>, %arg4: memref<1x1xf32, #tpu.memory_space<vmem>>) attributes {dimension_semantics = [#tpu.dimension_semantics<arbitrary>], iteration_bounds = array<i64: 1>, scalar_prefetch = 0 : i64, scratch_operands = 0 : i64, tpu.core_type = #tpu.core_type<tc>, window_params = [{pipeline_mode = #tpu.pipeline_mode<synchronous>, transform_indices = @transform_0, window_bounds = array<i64: 2, 8, 256>}, {pipeline_mode = #tpu.pipeline_mode<synchronous>, transform_indices = @transform_1, window_bounds = array<i64: 128, 8, 256>}, {pipeline_mode = #tpu.pipeline_mode<synchronous>, transform_indices = @transform_2, window_bounds = array<i64: 2, 8, 256>}, {pipeline_mode = #tpu.pipeline_mode<synchronous>, transform_indices = @transform_3, window_bounds = array<i64: 1, 1>}]} {
    %c0 = arith.constant 0 : index
    %c0_0 = arith.constant 0 : index
    %c0_1 = arith.constant 0 : index
    %0 = vector.load %arg1[%c0, %c0_0, %c0_1] : memref<2x8x256xf32, #tpu.memory_space<vmem>>, vector<2x8x256xf32>
    %cst = arith.constant 0.000000e+00 : f32
    %1 = vector.broadcast %cst : f32 to vector<1x8x1xf32>
    %cst_2 = arith.constant dense<0.000000e+00> : vector<2x8xf32>
    %2 = vector.multi_reduction <add>, %0, %cst_2 [2] : vector<2x8x256xf32> to vector<2x8xf32>
    %3 = vector.shape_cast %2 : vector<2x8xf32> to vector<2x8x1xf32>
    %cst_3 = arith.constant dense<0.000000e+00> : vector<8x1xf32>
    %4 = vector.multi_reduction <add>, %3, %cst_3 [0] : vector<2x8x1xf32> to vector<8x1xf32>
    %5 = vector.shape_cast %4 : vector<8x1xf32> to vector<1x8x1xf32>
    %6 = arith.mulf %0, %0 : vector<2x8x256xf32>
    %cst_4 = arith.constant dense<0.000000e+00> : vector<2x8xf32>
    %7 = vector.multi_reduction <add>, %6, %cst_4 [2] : vector<2x8x256xf32> to vector<2x8xf32>
    %8 = vector.shape_cast %7 : vector<2x8xf32> to vector<2x8x1xf32>
    %cst_5 = arith.constant dense<0.000000e+00> : vector<8x1xf32>
    %9 = vector.multi_reduction <add>, %8, %cst_5 [0] : vector<2x8x1xf32> to vector<8x1xf32>
    %10 = vector.shape_cast %9 : vector<8x1xf32> to vector<1x8x1xf32>
    %cst_6 = arith.constant 0.001953125 : f32
    %11 = vector.broadcast %cst_6 : f32 to vector<1x8x1xf32>
    %12 = arith.mulf %5, %11 : vector<1x8x1xf32>
    %cst_7 = arith.constant 0.001953125 : f32
    %13 = vector.broadcast %cst_7 : f32 to vector<1x8x1xf32>
    %14 = arith.mulf %10, %13 : vector<1x8x1xf32>
    %15 = arith.mulf %12, %12 : vector<1x8x1xf32>
    %16 = arith.subf %14, %15 : vector<1x8x1xf32>
    %cst_8 = arith.constant 0.000000e+00 : f32
    %17 = vector.broadcast %cst_8 : f32 to vector<1x8x1xf32>
    %18 = arith.maximumf %16, %17 : vector<1x8x1xf32>
    %19 = math.sqrt %18 : vector<1x8x1xf32>
    %cst_9 = arith.constant 9.99999997E-7 : f32
    %20 = vector.broadcast %cst_9 : f32 to vector<1x8x1xf32>
    %21 = arith.addf %19, %20 : vector<1x8x1xf32>
    %22 = tpu.reciprocal %21 : vector<1x8x1xf32> -> vector<1x8x1xf32>
    %cst_10 = arith.constant 1.000000e+00 : f32
    %23 = vector.broadcast %cst_10 : f32 to vector<1x8x1xf32>
    %24 = arith.mulf %23, %22 : vector<1x8x1xf32>
    %25 = math.log %24 : vector<1x8x1xf32>
    %26 = arith.addf %1, %25 : vector<1x8x1xf32>
    %27 = vector.broadcast %12 : vector<1x8x1xf32> to vector<2x8x256xf32>
    %28 = arith.subf %0, %27 : vector<2x8x256xf32>
    %29 = vector.broadcast %24 : vector<1x8x1xf32> to vector<2x8x256xf32>
    %30 = arith.mulf %28, %29 : vector<2x8x256xf32>
    %c0_11 = arith.constant 0 : index
    %c0_12 = arith.constant 0 : index
    %c0_13 = arith.constant 0 : index
    %31 = vector.load %arg2[%c0_11, %c0_12, %c0_13] : memref<128x8x256xf32, #tpu.memory_space<vmem>>, vector<1x8x256xf32>
    %32 = vector.shape_cast %31 : vector<1x8x256xf32> to vector<8x256xf32>
    %33 = vector.shape_cast %32 : vector<8x256xf32> to vector<1x8x256xf32>
    %34 = vector.extract_strided_slice %30 {offsets = [0, 0, 0], sizes = [2, 1, 256], strides = [1, 1, 1]} : vector<2x8x256xf32> to vector<2x1x256xf32>
    %35 = vector.broadcast %33 : vector<1x8x256xf32> to vector<2x8x256xf32>
    %36 = vector.broadcast %34 : vector<2x1x256xf32> to vector<2x8x256xf32>
    %37 = arith.mulf %35, %36 : vector<2x8x256xf32>
    %c1 = arith.constant 1 : index
    %c0_14 = arith.constant 0 : index
    %c0_15 = arith.constant 0 : index
    %38 = vector.load %arg2[%c1, %c0_14, %c0_15] : memref<128x8x256xf32, #tpu.memory_space<vmem>>, vector<1x8x256xf32>
    %39 = vector.shape_cast %38 : vector<1x8x256xf32> to vector<8x256xf32>
    %40 = vector.shape_cast %39 : vector<8x256xf32> to vector<1x8x256xf32>
    %41 = vector.extract_strided_slice %30 {offsets = [0, 1, 0], sizes = [2, 1, 256], strides = [1, 1, 1]} : vector<2x8x256xf32> to vector<2x1x256xf32>
    %42 = vector.broadcast %40 : vector<1x8x256xf32> to vector<2x8x256xf32>
    %43 = vector.broadcast %41 : vector<2x1x256xf32> to vector<2x8x256xf32>
    %44 = arith.mulf %42, %43 : vector<2x8x256xf32>
    %45 = arith.addf %37, %44 : vector<2x8x256xf32>
    %c2 = arith.constant 2 : index
    %c0_16 = arith.constant 0 : index
    %c0_17 = arith.constant 0 : index
    %46 = vector.load %arg2[%c2, %c0_16, %c0_17] : memref<128x8x256xf32, #tpu.memory_space<vmem>>, vector<1x8x256xf32>
    %47 = vector.shape_cast %46 : vector<1x8x256xf32> to vector<8x256xf32>
    %48 = vector.shape_cast %47 : vector<8x256xf32> to vector<1x8x256xf32>
    %49 = vector.extract_strided_slice %30 {offsets = [0, 2, 0], sizes = [2, 1, 256], strides = [1, 1, 1]} : vector<2x8x256xf32> to vector<2x1x256xf32>
    %50 = vector.broadcast %48 : vector<1x8x256xf32> to vector<2x8x256xf32>
    %51 = vector.broadcast %49 : vector<2x1x256xf32> to vector<2x8x256xf32>
    %52 = arith.mulf %50, %51 : vector<2x8x256xf32>
    %53 = arith.addf %45, %52 : vector<2x8x256xf32>
    %c3 = arith.constant 3 : index
    %c0_18 = arith.constant 0 : index
    %c0_19 = arith.constant 0 : index
    %54 = vector.load %arg2[%c3, %c0_18, %c0_19] : memref<128x8x256xf32, #tpu.memory_space<vmem>>, vector<1x8x256xf32>
    %55 = vector.shape_cast %54 : vector<1x8x256xf32> to vector<8x256xf32>
    %56 = vector.shape_cast %55 : vector<8x256xf32> to vector<1x8x256xf32>
    %57 = vector.extract_strided_slice %30 {offsets = [0, 3, 0], sizes = [2, 1, 256], strides = [1, 1, 1]} : vector<2x8x256xf32> to vector<2x1x256xf32>
    %58 = vector.broadcast %56 : vector<1x8x256xf32> to vector<2x8x256xf32>
    %59 = vector.broadcast %57 : vector<2x1x256xf32> to vector<2x8x256xf32>
    %60 = arith.mulf %58, %59 : vector<2x8x256xf32>
    %61 = arith.addf %53, %60 : vector<2x8x256xf32>
    %c4 = arith.constant 4 : index
    %c0_20 = arith.constant 0 : index
    %c0_21 = arith.constant 0 : index
    %62 = vector.load %arg2[%c4, %c0_20, %c0_21] : memref<128x8x256xf32, #tpu.memory_space<vmem>>, vector<1x8x256xf32>
    %63 = vector.shape_cast %62 : vector<1x8x256xf32> to vector<8x256xf32>
    %64 = vector.shape_cast %63 : vector<8x256xf32> to vector<1x8x256xf32>
    %65 = vector.extract_strided_slice %30 {offsets = [0, 4, 0], sizes = [2, 1, 256], strides = [1, 1, 1]} : vector<2x8x256xf32> to vector<2x1x256xf32>
    %66 = vector.broadcast %64 : vector<1x8x256xf32> to vector<2x8x256xf32>
    %67 = vector.broadcast %65 : vector<2x1x256xf32> to vector<2x8x256xf32>
    %68 = arith.mulf %66, %67 : vector<2x8x256xf32>
    %c5 = arith.constant 5 : index
    %c0_22 = arith.constant 0 : index
    %c0_23 = arith.constant 0 : index
    %69 = vector.load %arg2[%c5, %c0_22, %c0_23] : memref<128x8x256xf32, #tpu.memory_space<vmem>>, vector<1x8x256xf32>
    %70 = vector.shape_cast %69 : vector<1x8x256xf32> to vector<8x256xf32>
    %71 = vector.shape_cast %70 : vector<8x256xf32> to vector<1x8x256xf32>
    %72 = vector.extract_strided_slice %30 {offsets = [0, 5, 0], sizes = [2, 1, 256], strides = [1, 1, 1]} : vector<2x8x256xf32> to vector<2x1x256xf32>
    %73 = vector.broadcast %71 : vector<1x8x256xf32> to vector<2x8x256xf32>
    %74 = vector.broadcast %72 : vector<2x1x256xf32> to vector<2x8x256xf32>
    %75 = arith.mulf %73, %74 : vector<2x8x256xf32>
    %76 = arith.addf %68, %75 : vector<2x8x256xf32>
    %c6 = arith.constant 6 : index
    %c0_24 = arith.constant 0 : index
    %c0_25 = arith.constant 0 : index
    %77 = vector.load %arg2[%c6, %c0_24, %c0_25] : memref<128x8x256xf32, #tpu.memory_space<vmem>>, vector<1x8x256xf32>
    %78 = vector.shape_cast %77 : vector<1x8x256xf32> to vector<8x256xf32>
    %79 = vector.shape_cast %78 : vector<8x256xf32> to vector<1x8x256xf32>
    %80 = vector.extract_strided_slice %30 {offsets = [0, 6, 0], sizes = [2, 1, 256], strides = [1, 1, 1]} : vector<2x8x256xf32> to vector<2x1x256xf32>
    %81 = vector.broadcast %79 : vector<1x8x256xf32> to vector<2x8x256xf32>
    %82 = vector.broadcast %80 : vector<2x1x256xf32> to vector<2x8x256xf32>
    %83 = arith.mulf %81, %82 : vector<2x8x256xf32>
    %84 = arith.addf %76, %83 : vector<2x8x256xf32>
    %c7 = arith.constant 7 : index
    %c0_26 = arith.constant 0 : index
    %c0_27 = arith.constant 0 : index
    %85 = vector.load %arg2[%c7, %c0_26, %c0_27] : memref<128x8x256xf32, #tpu.memory_space<vmem>>, vector<1x8x256xf32>
    %86 = vector.shape_cast %85 : vector<1x8x256xf32> to vector<8x256xf32>
    %87 = vector.shape_cast %86 : vector<8x256xf32> to vector<1x8x256xf32>
    %88 = vector.extract_strided_slice %30 {offsets = [0, 7, 0], sizes = [2, 1, 256], strides = [1, 1, 1]} : vector<2x8x256xf32> to vector<2x1x256xf32>
    %89 = vector.broadcast %87 : vector<1x8x256xf32> to vector<2x8x256xf32>
    %90 = vector.broadcast %88 : vector<2x1x256xf32> to vector<2x8x256xf32>
    %91 = arith.mulf %89, %90 : vector<2x8x256xf32>
    %92 = arith.addf %84, %91 : vector<2x8x256xf32>
    %93 = arith.addf %61, %92 : vector<2x8x256xf32>
    %cst_28 = arith.constant dense<0.000000e+00> : vector<2x8xf32>
    %94 = vector.multi_reduction <add>, %93, %cst_28 [2] : vector<2x8x256xf32> to vector<2x8xf32>
    %95 = vector.shape_cast %94 : vector<2x8xf32> to vector<2x8x1xf32>
    %cst_29 = arith.constant dense<0.000000e+00> : vector<8x1xf32>
    %96 = vector.multi_reduction <add>, %95, %cst_29 [0] : vector<2x8x1xf32> to vector<8x1xf32>
    %97 = vector.shape_cast %96 : vector<8x1xf32> to vector<1x8x1xf32>
    %98 = arith.mulf %93, %93 : vector<2x8x256xf32>
    %cst_30 = arith.constant dense<0.000000e+00> : vector<2x8xf32>
    %99 = vector.multi_reduction <add>, %98, %cst_30 [2] : vector<2x8x256xf32> to vector<2x8xf32>
    %100 = vector.shape_cast %99 : vector<2x8xf32> to vector<2x8x1xf32>
    %cst_31 = arith.constant dense<0.000000e+00> : vector<8x1xf32>
    %101 = vector.multi_reduction <add>, %100, %cst_31 [0] : vector<2x8x1xf32> to vector<8x1xf32>
    %102 = vector.shape_cast %101 : vector<8x1xf32> to vector<1x8x1xf32>
    %cst_32 = arith.constant 0.001953125 : f32
    %103 = vector.broadcast %cst_32 : f32 to vector<1x8x1xf32>
    %104 = arith.mulf %97, %103 : vector<1x8x1xf32>
    %cst_33 = arith.constant 0.001953125 : f32
    %105 = vector.broadcast %cst_33 : f32 to vector<1x8x1xf32>
    %106 = arith.mulf %102, %105 : vector<1x8x1xf32>
    %107 = arith.mulf %104, %104 : vector<1x8x1xf32>
    %108 = arith.subf %106, %107 : vector<1x8x1xf32>
    %cst_34 = arith.constant 0.000000e+00 : f32
    %109 = vector.broadcast %cst_34 : f32 to vector<1x8x1xf32>
    %110 = arith.maximumf %108, %109 : vector<1x8x1xf32>
    %111 = math.sqrt %110 : vector<1x8x1xf32>
    %cst_35 = arith.constant 9.99999997E-7 : f32
    %112 = vector.broadcast %cst_35 : f32 to vector<1x8x1xf32>
    %113 = arith.addf %111, %112 : vector<1x8x1xf32>
    %114 = tpu.reciprocal %113 : vector<1x8x1xf32> -> vector<1x8x1xf32>
    %cst_36 = arith.constant 1.000000e+00 : f32
    %115 = vector.broadcast %cst_36 : f32 to vector<1x8x1xf32>
    %116 = arith.mulf %115, %114 : vector<1x8x1xf32>
    %117 = math.log %116 : vector<1x8x1xf32>
    %118 = arith.addf %26, %117 : vector<1x8x1xf32>
    %119 = vector.broadcast %104 : vector<1x8x1xf32> to vector<2x8x256xf32>
    %120 = arith.subf %93, %119 : vector<2x8x256xf32>
    %121 = vector.broadcast %116 : vector<1x8x1xf32> to vector<2x8x256xf32>
    %122 = arith.mulf %120, %121 : vector<2x8x256xf32>
    %c8 = arith.constant 8 : index
    %c0_37 = arith.constant 0 : index
    %c0_38 = arith.constant 0 : index
    %123 = vector.load %arg2[%c8, %c0_37, %c0_38] : memref<128x8x256xf32, #tpu.memory_space<vmem>>, vector<1x8x256xf32>
    %124 = vector.shape_cast %123 : vector<1x8x256xf32> to vector<8x256xf32>
    %125 = vector.shape_cast %124 : vector<8x256xf32> to vector<1x8x256xf32>
    %126 = vector.extract_strided_slice %122 {offsets = [0, 0, 0], sizes = [2, 1, 256], strides = [1, 1, 1]} : vector<2x8x256xf32> to vector<2x1x256xf32>
    %127 = vector.broadcast %125 : vector<1x8x256xf32> to vector<2x8x256xf32>
    %128 = vector.broadcast %126 : vector<2x1x256xf32> to vector<2x8x256xf32>
    %129 = arith.mulf %127, %128 : vector<2x8x256xf32>
    %c9 = arith.constant 9 : index
    %c0_39 = arith.constant 0 : index
    %c0_40 = arith.constant 0 : index
    %130 = vector.load %arg2[%c9, %c0_39, %c0_40] : memref<128x8x256xf32, #tpu.memory_space<vmem>>, vector<1x8x256xf32>
    %131 = vector.shape_cast %130 : vector<1x8x256xf32> to vector<8x256xf32>
    %132 = vector.shape_cast %131 : vector<8x256xf32> to vector<1x8x256xf32>
    %133 = vector.extract_strided_slice %122 {offsets = [0, 1, 0], sizes = [2, 1, 256], strides = [1, 1, 1]} : vector<2x8x256xf32> to vector<2x1x256xf32>
    %134 = vector.broadcast %132 : vector<1x8x256xf32> to vector<2x8x256xf32>
    %135 = vector.broadcast %133 : vector<2x1x256xf32> to vector<2x8x256xf32>
    %136 = arith.mulf %134, %135 : vector<2x8x256xf32>
    %137 = arith.addf %129, %136 : vector<2x8x256xf32>
    %c10 = arith.constant 10 : index
    %c0_41 = arith.constant 0 : index
    %c0_42 = arith.constant 0 : index
    %138 = vector.load %arg2[%c10, %c0_41, %c0_42] : memref<128x8x256xf32, #tpu.memory_space<vmem>>, vector<1x8x256xf32>
    %139 = vector.shape_cast %138 : vector<1x8x256xf32> to vector<8x256xf32>
    %140 = vector.shape_cast %139 : vector<8x256xf32> to vector<1x8x256xf32>
    %141 = vector.extract_strided_slice %122 {offsets = [0, 2, 0], sizes = [2, 1, 256], strides = [1, 1, 1]} : vector<2x8x256xf32> to vector<2x1x256xf32>
    %142 = vector.broadcast %140 : vector<1x8x256xf32> to vector<2x8x256xf32>
    %143 = vector.broadcast %141 : vector<2x1x256xf32> to vector<2x8x256xf32>
    %144 = arith.mulf %142, %143 : vector<2x8x256xf32>
    %145 = arith.addf %137, %144 : vector<2x8x256xf32>
    %c11 = arith.constant 11 : index
    %c0_43 = arith.constant 0 : index
    %c0_44 = arith.constant 0 : index
    %146 = vector.load %arg2[%c11, %c0_43, %c0_44] : memref<128x8x256xf32, #tpu.memory_space<vmem>>, vector<1x8x256xf32>
    %147 = vector.shape_cast %146 : vector<1x8x256xf32> to vector<8x256xf32>
    %148 = vector.shape_cast %147 : vector<8x256xf32> to vector<1x8x256xf32>
    %149 = vector.extract_strided_slice %122 {offsets = [0, 3, 0], sizes = [2, 1, 256], strides = [1, 1, 1]} : vector<2x8x256xf32> to vector<2x1x256xf32>
    %150 = vector.broadcast %148 : vector<1x8x256xf32> to vector<2x8x256xf32>
    %151 = vector.broadcast %149 : vector<2x1x256xf32> to vector<2x8x256xf32>
    %152 = arith.mulf %150, %151 : vector<2x8x256xf32>
    %153 = arith.addf %145, %152 : vector<2x8x256xf32>
    %c12 = arith.constant 12 : index
    %c0_45 = arith.constant 0 : index
    %c0_46 = arith.constant 0 : index
    %154 = vector.load %arg2[%c12, %c0_45, %c0_46] : memref<128x8x256xf32, #tpu.memory_space<vmem>>, vector<1x8x256xf32>
    %155 = vector.shape_cast %154 : vector<1x8x256xf32> to vector<8x256xf32>
    %156 = vector.shape_cast %155 : vector<8x256xf32> to vector<1x8x256xf32>
    %157 = vector.extract_strided_slice %122 {offsets = [0, 4, 0], sizes = [2, 1, 256], strides = [1, 1, 1]} : vector<2x8x256xf32> to vector<2x1x256xf32>
    %158 = vector.broadcast %156 : vector<1x8x256xf32> to vector<2x8x256xf32>
    %159 = vector.broadcast %157 : vector<2x1x256xf32> to vector<2x8x256xf32>
    %160 = arith.mulf %158, %159 : vector<2x8x256xf32>
    %c13 = arith.constant 13 : index
    %c0_47 = arith.constant 0 : index
    %c0_48 = arith.constant 0 : index
    %161 = vector.load %arg2[%c13, %c0_47, %c0_48] : memref<128x8x256xf32, #tpu.memory_space<vmem>>, vector<1x8x256xf32>
    %162 = vector.shape_cast %161 : vector<1x8x256xf32> to vector<8x256xf32>
    %163 = vector.shape_cast %162 : vector<8x256xf32> to vector<1x8x256xf32>
    %164 = vector.extract_strided_slice %122 {offsets = [0, 5, 0], sizes = [2, 1, 256], strides = [1, 1, 1]} : vector<2x8x256xf32> to vector<2x1x256xf32>
    %165 = vector.broadcast %163 : vector<1x8x256xf32> to vector<2x8x256xf32>
    %166 = vector.broadcast %164 : vector<2x1x256xf32> to vector<2x8x256xf32>
    %167 = arith.mulf %165, %166 : vector<2x8x256xf32>
    %168 = arith.addf %160, %167 : vector<2x8x256xf32>
    %c14 = arith.constant 14 : index
    %c0_49 = arith.constant 0 : index
    %c0_50 = arith.constant 0 : index
    %169 = vector.load %arg2[%c14, %c0_49, %c0_50] : memref<128x8x256xf32, #tpu.memory_space<vmem>>, vector<1x8x256xf32>
    %170 = vector.shape_cast %169 : vector<1x8x256xf32> to vector<8x256xf32>
    %171 = vector.shape_cast %170 : vector<8x256xf32> to vector<1x8x256xf32>
    %172 = vector.extract_strided_slice %122 {offsets = [0, 6, 0], sizes = [2, 1, 256], strides = [1, 1, 1]} : vector<2x8x256xf32> to vector<2x1x256xf32>
    %173 = vector.broadcast %171 : vector<1x8x256xf32> to vector<2x8x256xf32>
    %174 = vector.broadcast %172 : vector<2x1x256xf32> to vector<2x8x256xf32>
    %175 = arith.mulf %173, %174 : vector<2x8x256xf32>
    %176 = arith.addf %168, %175 : vector<2x8x256xf32>
    %c15 = arith.constant 15 : index
    %c0_51 = arith.constant 0 : index
    %c0_52 = arith.constant 0 : index
    %177 = vector.load %arg2[%c15, %c0_51, %c0_52] : memref<128x8x256xf32, #tpu.memory_space<vmem>>, vector<1x8x256xf32>
    %178 = vector.shape_cast %177 : vector<1x8x256xf32> to vector<8x256xf32>
    %179 = vector.shape_cast %178 : vector<8x256xf32> to vector<1x8x256xf32>
    %180 = vector.extract_strided_slice %122 {offsets = [0, 7, 0], sizes = [2, 1, 256], strides = [1, 1, 1]} : vector<2x8x256xf32> to vector<2x1x256xf32>
    %181 = vector.broadcast %179 : vector<1x8x256xf32> to vector<2x8x256xf32>
    %182 = vector.broadcast %180 : vector<2x1x256xf32> to vector<2x8x256xf32>
    %183 = arith.mulf %181, %182 : vector<2x8x256xf32>
    %184 = arith.addf %176, %183 : vector<2x8x256xf32>
    %185 = arith.addf %153, %184 : vector<2x8x256xf32>
    %cst_53 = arith.constant dense<0.000000e+00> : vector<2x8xf32>
    %186 = vector.multi_reduction <add>, %185, %cst_53 [2] : vector<2x8x256xf32> to vector<2x8xf32>
    %187 = vector.shape_cast %186 : vector<2x8xf32> to vector<2x8x1xf32>
    %cst_54 = arith.constant dense<0.000000e+00> : vector<8x1xf32>
    %188 = vector.multi_reduction <add>, %187, %cst_54 [0] : vector<2x8x1xf32> to vector<8x1xf32>
    %189 = vector.shape_cast %188 : vector<8x1xf32> to vector<1x8x1xf32>
    %190 = arith.mulf %185, %185 : vector<2x8x256xf32>
    %cst_55 = arith.constant dense<0.000000e+00> : vector<2x8xf32>
    %191 = vector.multi_reduction <add>, %190, %cst_55 [2] : vector<2x8x256xf32> to vector<2x8xf32>
    %192 = vector.shape_cast %191 : vector<2x8xf32> to vector<2x8x1xf32>
    %cst_56 = arith.constant dense<0.000000e+00> : vector<8x1xf32>
    %193 = vector.multi_reduction <add>, %192, %cst_56 [0] : vector<2x8x1xf32> to vector<8x1xf32>
    %194 = vector.shape_cast %193 : vector<8x1xf32> to vector<1x8x1xf32>
    %cst_57 = arith.constant 0.001953125 : f32
    %195 = vector.broadcast %cst_57 : f32 to vector<1x8x1xf32>
    %196 = arith.mulf %189, %195 : vector<1x8x1xf32>
    %cst_58 = arith.constant 0.001953125 : f32
    %197 = vector.broadcast %cst_58 : f32 to vector<1x8x1xf32>
    %198 = arith.mulf %194, %197 : vector<1x8x1xf32>
    %199 = arith.mulf %196, %196 : vector<1x8x1xf32>
    %200 = arith.subf %198, %199 : vector<1x8x1xf32>
    %cst_59 = arith.constant 0.000000e+00 : f32
    %201 = vector.broadcast %cst_59 : f32 to vector<1x8x1xf32>
    %202 = arith.maximumf %200, %201 : vector<1x8x1xf32>
    %203 = math.sqrt %202 : vector<1x8x1xf32>
    %cst_60 = arith.constant 9.99999997E-7 : f32
    %204 = vector.broadcast %cst_60 : f32 to vector<1x8x1xf32>
    %205 = arith.addf %203, %204 : vector<1x8x1xf32>
    %206 = tpu.reciprocal %205 : vector<1x8x1xf32> -> vector<1x8x1xf32>
    %cst_61 = arith.constant 1.000000e+00 : f32
    %207 = vector.broadcast %cst_61 : f32 to vector<1x8x1xf32>
    %208 = arith.mulf %207, %206 : vector<1x8x1xf32>
    %209 = math.log %208 : vector<1x8x1xf32>
    %210 = arith.addf %118, %209 : vector<1x8x1xf32>
    %211 = vector.broadcast %196 : vector<1x8x1xf32> to vector<2x8x256xf32>
    %212 = arith.subf %185, %211 : vector<2x8x256xf32>
    %213 = vector.broadcast %208 : vector<1x8x1xf32> to vector<2x8x256xf32>
    %214 = arith.mulf %212, %213 : vector<2x8x256xf32>
    %c16 = arith.constant 16 : index
    %c0_62 = arith.constant 0 : index
    %c0_63 = arith.constant 0 : index
    %215 = vector.load %arg2[%c16, %c0_62, %c0_63] : memref<128x8x256xf32, #tpu.memory_space<vmem>>, vector<1x8x256xf32>
    %216 = vector.shape_cast %215 : vector<1x8x256xf32> to vector<8x256xf32>
    %217 = vector.shape_cast %216 : vector<8x256xf32> to vector<1x8x256xf32>
    %218 = vector.extract_strided_slice %214 {offsets = [0, 0, 0], sizes = [2, 1, 256], strides = [1, 1, 1]} : vector<2x8x256xf32> to vector<2x1x256xf32>
    %219 = vector.broadcast %217 : vector<1x8x256xf32> to vector<2x8x256xf32>
    %220 = vector.broadcast %218 : vector<2x1x256xf32> to vector<2x8x256xf32>
    %221 = arith.mulf %219, %220 : vector<2x8x256xf32>
    %c17 = arith.constant 17 : index
    %c0_64 = arith.constant 0 : index
    %c0_65 = arith.constant 0 : index
    %222 = vector.load %arg2[%c17, %c0_64, %c0_65] : memref<128x8x256xf32, #tpu.memory_space<vmem>>, vector<1x8x256xf32>
    %223 = vector.shape_cast %222 : vector<1x8x256xf32> to vector<8x256xf32>
    %224 = vector.shape_cast %223 : vector<8x256xf32> to vector<1x8x256xf32>
    %225 = vector.extract_strided_slice %214 {offsets = [0, 1, 0], sizes = [2, 1, 256], strides = [1, 1, 1]} : vector<2x8x256xf32> to vector<2x1x256xf32>
    %226 = vector.broadcast %224 : vector<1x8x256xf32> to vector<2x8x256xf32>
    %227 = vector.broadcast %225 : vector<2x1x256xf32> to vector<2x8x256xf32>
    %228 = arith.mulf %226, %227 : vector<2x8x256xf32>
    %229 = arith.addf %221, %228 : vector<2x8x256xf32>
    %c18 = arith.constant 18 : index
    %c0_66 = arith.constant 0 : index
    %c0_67 = arith.constant 0 : index
    %230 = vector.load %arg2[%c18, %c0_66, %c0_67] : memref<128x8x256xf32, #tpu.memory_space<vmem>>, vector<1x8x256xf32>
    %231 = vector.shape_cast %230 : vector<1x8x256xf32> to vector<8x256xf32>
    %232 = vector.shape_cast %231 : vector<8x256xf32> to vector<1x8x256xf32>
    %233 = vector.extract_strided_slice %214 {offsets = [0, 2, 0], sizes = [2, 1, 256], strides = [1, 1, 1]} : vector<2x8x256xf32> to vector<2x1x256xf32>
    %234 = vector.broadcast %232 : vector<1x8x256xf32> to vector<2x8x256xf32>
    %235 = vector.broadcast %233 : vector<2x1x256xf32> to vector<2x8x256xf32>
    %236 = arith.mulf %234, %235 : vector<2x8x256xf32>
    %237 = arith.addf %229, %236 : vector<2x8x256xf32>
    %c19 = arith.constant 19 : index
    %c0_68 = arith.constant 0 : index
    %c0_69 = arith.constant 0 : index
    %238 = vector.load %arg2[%c19, %c0_68, %c0_69] : memref<128x8x256xf32, #tpu.memory_space<vmem>>, vector<1x8x256xf32>
    %239 = vector.shape_cast %238 : vector<1x8x256xf32> to vector<8x256xf32>
    %240 = vector.shape_cast %239 : vector<8x256xf32> to vector<1x8x256xf32>
    %241 = vector.extract_strided_slice %214 {offsets = [0, 3, 0], sizes = [2, 1, 256], strides = [1, 1, 1]} : vector<2x8x256xf32> to vector<2x1x256xf32>
    %242 = vector.broadcast %240 : vector<1x8x256xf32> to vector<2x8x256xf32>
    %243 = vector.broadcast %241 : vector<2x1x256xf32> to vector<2x8x256xf32>
    %244 = arith.mulf %242, %243 : vector<2x8x256xf32>
    %245 = arith.addf %237, %244 : vector<2x8x256xf32>
    %c20 = arith.constant 20 : index
    %c0_70 = arith.constant 0 : index
    %c0_71 = arith.constant 0 : index
    %246 = vector.load %arg2[%c20, %c0_70, %c0_71] : memref<128x8x256xf32, #tpu.memory_space<vmem>>, vector<1x8x256xf32>
    %247 = vector.shape_cast %246 : vector<1x8x256xf32> to vector<8x256xf32>
    %248 = vector.shape_cast %247 : vector<8x256xf32> to vector<1x8x256xf32>
    %249 = vector.extract_strided_slice %214 {offsets = [0, 4, 0], sizes = [2, 1, 256], strides = [1, 1, 1]} : vector<2x8x256xf32> to vector<2x1x256xf32>
    %250 = vector.broadcast %248 : vector<1x8x256xf32> to vector<2x8x256xf32>
    %251 = vector.broadcast %249 : vector<2x1x256xf32> to vector<2x8x256xf32>
    %252 = arith.mulf %250, %251 : vector<2x8x256xf32>
    %c21 = arith.constant 21 : index
    %c0_72 = arith.constant 0 : index
    %c0_73 = arith.constant 0 : index
    %253 = vector.load %arg2[%c21, %c0_72, %c0_73] : memref<128x8x256xf32, #tpu.memory_space<vmem>>, vector<1x8x256xf32>
    %254 = vector.shape_cast %253 : vector<1x8x256xf32> to vector<8x256xf32>
    %255 = vector.shape_cast %254 : vector<8x256xf32> to vector<1x8x256xf32>
    %256 = vector.extract_strided_slice %214 {offsets = [0, 5, 0], sizes = [2, 1, 256], strides = [1, 1, 1]} : vector<2x8x256xf32> to vector<2x1x256xf32>
    %257 = vector.broadcast %255 : vector<1x8x256xf32> to vector<2x8x256xf32>
    %258 = vector.broadcast %256 : vector<2x1x256xf32> to vector<2x8x256xf32>
    %259 = arith.mulf %257, %258 : vector<2x8x256xf32>
    %260 = arith.addf %252, %259 : vector<2x8x256xf32>
    %c22 = arith.constant 22 : index
    %c0_74 = arith.constant 0 : index
    %c0_75 = arith.constant 0 : index
    %261 = vector.load %arg2[%c22, %c0_74, %c0_75] : memref<128x8x256xf32, #tpu.memory_space<vmem>>, vector<1x8x256xf32>
    %262 = vector.shape_cast %261 : vector<1x8x256xf32> to vector<8x256xf32>
    %263 = vector.shape_cast %262 : vector<8x256xf32> to vector<1x8x256xf32>
    %264 = vector.extract_strided_slice %214 {offsets = [0, 6, 0], sizes = [2, 1, 256], strides = [1, 1, 1]} : vector<2x8x256xf32> to vector<2x1x256xf32>
    %265 = vector.broadcast %263 : vector<1x8x256xf32> to vector<2x8x256xf32>
    %266 = vector.broadcast %264 : vector<2x1x256xf32> to vector<2x8x256xf32>
    %267 = arith.mulf %265, %266 : vector<2x8x256xf32>
    %268 = arith.addf %260, %267 : vector<2x8x256xf32>
    %c23 = arith.constant 23 : index
    %c0_76 = arith.constant 0 : index
    %c0_77 = arith.constant 0 : index
    %269 = vector.load %arg2[%c23, %c0_76, %c0_77] : memref<128x8x256xf32, #tpu.memory_space<vmem>>, vector<1x8x256xf32>
    %270 = vector.shape_cast %269 : vector<1x8x256xf32> to vector<8x256xf32>
    %271 = vector.shape_cast %270 : vector<8x256xf32> to vector<1x8x256xf32>
    %272 = vector.extract_strided_slice %214 {offsets = [0, 7, 0], sizes = [2, 1, 256], strides = [1, 1, 1]} : vector<2x8x256xf32> to vector<2x1x256xf32>
    %273 = vector.broadcast %271 : vector<1x8x256xf32> to vector<2x8x256xf32>
    %274 = vector.broadcast %272 : vector<2x1x256xf32> to vector<2x8x256xf32>
    %275 = arith.mulf %273, %274 : vector<2x8x256xf32>
    %276 = arith.addf %268, %275 : vector<2x8x256xf32>
    %277 = arith.addf %245, %276 : vector<2x8x256xf32>
    %cst_78 = arith.constant dense<0.000000e+00> : vector<2x8xf32>
    %278 = vector.multi_reduction <add>, %277, %cst_78 [2] : vector<2x8x256xf32> to vector<2x8xf32>
    %279 = vector.shape_cast %278 : vector<2x8xf32> to vector<2x8x1xf32>
    %cst_79 = arith.constant dense<0.000000e+00> : vector<8x1xf32>
    %280 = vector.multi_reduction <add>, %279, %cst_79 [0] : vector<2x8x1xf32> to vector<8x1xf32>
    %281 = vector.shape_cast %280 : vector<8x1xf32> to vector<1x8x1xf32>
    %282 = arith.mulf %277, %277 : vector<2x8x256xf32>
    %cst_80 = arith.constant dense<0.000000e+00> : vector<2x8xf32>
    %283 = vector.multi_reduction <add>, %282, %cst_80 [2] : vector<2x8x256xf32> to vector<2x8xf32>
    %284 = vector.shape_cast %283 : vector<2x8xf32> to vector<2x8x1xf32>
    %cst_81 = arith.constant dense<0.000000e+00> : vector<8x1xf32>
    %285 = vector.multi_reduction <add>, %284, %cst_81 [0] : vector<2x8x1xf32> to vector<8x1xf32>
    %286 = vector.shape_cast %285 : vector<8x1xf32> to vector<1x8x1xf32>
    %cst_82 = arith.constant 0.001953125 : f32
    %287 = vector.broadcast %cst_82 : f32 to vector<1x8x1xf32>
    %288 = arith.mulf %281, %287 : vector<1x8x1xf32>
    %cst_83 = arith.constant 0.001953125 : f32
    %289 = vector.broadcast %cst_83 : f32 to vector<1x8x1xf32>
    %290 = arith.mulf %286, %289 : vector<1x8x1xf32>
    %291 = arith.mulf %288, %288 : vector<1x8x1xf32>
    %292 = arith.subf %290, %291 : vector<1x8x1xf32>
    %cst_84 = arith.constant 0.000000e+00 : f32
    %293 = vector.broadcast %cst_84 : f32 to vector<1x8x1xf32>
    %294 = arith.maximumf %292, %293 : vector<1x8x1xf32>
    %295 = math.sqrt %294 : vector<1x8x1xf32>
    %cst_85 = arith.constant 9.99999997E-7 : f32
    %296 = vector.broadcast %cst_85 : f32 to vector<1x8x1xf32>
    %297 = arith.addf %295, %296 : vector<1x8x1xf32>
    %298 = tpu.reciprocal %297 : vector<1x8x1xf32> -> vector<1x8x1xf32>
    %cst_86 = arith.constant 1.000000e+00 : f32
    %299 = vector.broadcast %cst_86 : f32 to vector<1x8x1xf32>
    %300 = arith.mulf %299, %298 : vector<1x8x1xf32>
    %301 = math.log %300 : vector<1x8x1xf32>
    %302 = arith.addf %210, %301 : vector<1x8x1xf32>
    %303 = vector.broadcast %288 : vector<1x8x1xf32> to vector<2x8x256xf32>
    %304 = arith.subf %277, %303 : vector<2x8x256xf32>
    %305 = vector.broadcast %300 : vector<1x8x1xf32> to vector<2x8x256xf32>
    %306 = arith.mulf %304, %305 : vector<2x8x256xf32>
    %c24 = arith.constant 24 : index
    %c0_87 = arith.constant 0 : index
    %c0_88 = arith.constant 0 : index
    %307 = vector.load %arg2[%c24, %c0_87, %c0_88] : memref<128x8x256xf32, #tpu.memory_space<vmem>>, vector<1x8x256xf32>
    %308 = vector.shape_cast %307 : vector<1x8x256xf32> to vector<8x256xf32>
    %309 = vector.shape_cast %308 : vector<8x256xf32> to vector<1x8x256xf32>
    %310 = vector.extract_strided_slice %306 {offsets = [0, 0, 0], sizes = [2, 1, 256], strides = [1, 1, 1]} : vector<2x8x256xf32> to vector<2x1x256xf32>
    %311 = vector.broadcast %309 : vector<1x8x256xf32> to vector<2x8x256xf32>
    %312 = vector.broadcast %310 : vector<2x1x256xf32> to vector<2x8x256xf32>
    %313 = arith.mulf %311, %312 : vector<2x8x256xf32>
    %c25 = arith.constant 25 : index
    %c0_89 = arith.constant 0 : index
    %c0_90 = arith.constant 0 : index
    %314 = vector.load %arg2[%c25, %c0_89, %c0_90] : memref<128x8x256xf32, #tpu.memory_space<vmem>>, vector<1x8x256xf32>
    %315 = vector.shape_cast %314 : vector<1x8x256xf32> to vector<8x256xf32>
    %316 = vector.shape_cast %315 : vector<8x256xf32> to vector<1x8x256xf32>
    %317 = vector.extract_strided_slice %306 {offsets = [0, 1, 0], sizes = [2, 1, 256], strides = [1, 1, 1]} : vector<2x8x256xf32> to vector<2x1x256xf32>
    %318 = vector.broadcast %316 : vector<1x8x256xf32> to vector<2x8x256xf32>
    %319 = vector.broadcast %317 : vector<2x1x256xf32> to vector<2x8x256xf32>
    %320 = arith.mulf %318, %319 : vector<2x8x256xf32>
    %321 = arith.addf %313, %320 : vector<2x8x256xf32>
    %c26 = arith.constant 26 : index
    %c0_91 = arith.constant 0 : index
    %c0_92 = arith.constant 0 : index
    %322 = vector.load %arg2[%c26, %c0_91, %c0_92] : memref<128x8x256xf32, #tpu.memory_space<vmem>>, vector<1x8x256xf32>
    %323 = vector.shape_cast %322 : vector<1x8x256xf32> to vector<8x256xf32>
    %324 = vector.shape_cast %323 : vector<8x256xf32> to vector<1x8x256xf32>
    %325 = vector.extract_strided_slice %306 {offsets = [0, 2, 0], sizes = [2, 1, 256], strides = [1, 1, 1]} : vector<2x8x256xf32> to vector<2x1x256xf32>
    %326 = vector.broadcast %324 : vector<1x8x256xf32> to vector<2x8x256xf32>
    %327 = vector.broadcast %325 : vector<2x1x256xf32> to vector<2x8x256xf32>
    %328 = arith.mulf %326, %327 : vector<2x8x256xf32>
    %329 = arith.addf %321, %328 : vector<2x8x256xf32>
    %c27 = arith.constant 27 : index
    %c0_93 = arith.constant 0 : index
    %c0_94 = arith.constant 0 : index
    %330 = vector.load %arg2[%c27, %c0_93, %c0_94] : memref<128x8x256xf32, #tpu.memory_space<vmem>>, vector<1x8x256xf32>
    %331 = vector.shape_cast %330 : vector<1x8x256xf32> to vector<8x256xf32>
    %332 = vector.shape_cast %331 : vector<8x256xf32> to vector<1x8x256xf32>
    %333 = vector.extract_strided_slice %306 {offsets = [0, 3, 0], sizes = [2, 1, 256], strides = [1, 1, 1]} : vector<2x8x256xf32> to vector<2x1x256xf32>
    %334 = vector.broadcast %332 : vector<1x8x256xf32> to vector<2x8x256xf32>
    %335 = vector.broadcast %333 : vector<2x1x256xf32> to vector<2x8x256xf32>
    %336 = arith.mulf %334, %335 : vector<2x8x256xf32>
    %337 = arith.addf %329, %336 : vector<2x8x256xf32>
    %c28 = arith.constant 28 : index
    %c0_95 = arith.constant 0 : index
    %c0_96 = arith.constant 0 : index
    %338 = vector.load %arg2[%c28, %c0_95, %c0_96] : memref<128x8x256xf32, #tpu.memory_space<vmem>>, vector<1x8x256xf32>
    %339 = vector.shape_cast %338 : vector<1x8x256xf32> to vector<8x256xf32>
    %340 = vector.shape_cast %339 : vector<8x256xf32> to vector<1x8x256xf32>
    %341 = vector.extract_strided_slice %306 {offsets = [0, 4, 0], sizes = [2, 1, 256], strides = [1, 1, 1]} : vector<2x8x256xf32> to vector<2x1x256xf32>
    %342 = vector.broadcast %340 : vector<1x8x256xf32> to vector<2x8x256xf32>
    %343 = vector.broadcast %341 : vector<2x1x256xf32> to vector<2x8x256xf32>
    %344 = arith.mulf %342, %343 : vector<2x8x256xf32>
    %c29 = arith.constant 29 : index
    %c0_97 = arith.constant 0 : index
    %c0_98 = arith.constant 0 : index
    %345 = vector.load %arg2[%c29, %c0_97, %c0_98] : memref<128x8x256xf32, #tpu.memory_space<vmem>>, vector<1x8x256xf32>
    %346 = vector.shape_cast %345 : vector<1x8x256xf32> to vector<8x256xf32>
    %347 = vector.shape_cast %346 : vector<8x256xf32> to vector<1x8x256xf32>
    %348 = vector.extract_strided_slice %306 {offsets = [0, 5, 0], sizes = [2, 1, 256], strides = [1, 1, 1]} : vector<2x8x256xf32> to vector<2x1x256xf32>
    %349 = vector.broadcast %347 : vector<1x8x256xf32> to vector<2x8x256xf32>
    %350 = vector.broadcast %348 : vector<2x1x256xf32> to vector<2x8x256xf32>
    %351 = arith.mulf %349, %350 : vector<2x8x256xf32>
    %352 = arith.addf %344, %351 : vector<2x8x256xf32>
    %c30 = arith.constant 30 : index
    %c0_99 = arith.constant 0 : index
    %c0_100 = arith.constant 0 : index
    %353 = vector.load %arg2[%c30, %c0_99, %c0_100] : memref<128x8x256xf32, #tpu.memory_space<vmem>>, vector<1x8x256xf32>
    %354 = vector.shape_cast %353 : vector<1x8x256xf32> to vector<8x256xf32>
    %355 = vector.shape_cast %354 : vector<8x256xf32> to vector<1x8x256xf32>
    %356 = vector.extract_strided_slice %306 {offsets = [0, 6, 0], sizes = [2, 1, 256], strides = [1, 1, 1]} : vector<2x8x256xf32> to vector<2x1x256xf32>
    %357 = vector.broadcast %355 : vector<1x8x256xf32> to vector<2x8x256xf32>
    %358 = vector.broadcast %356 : vector<2x1x256xf32> to vector<2x8x256xf32>
    %359 = arith.mulf %357, %358 : vector<2x8x256xf32>
    %360 = arith.addf %352, %359 : vector<2x8x256xf32>
    %c31 = arith.constant 31 : index
    %c0_101 = arith.constant 0 : index
    %c0_102 = arith.constant 0 : index
    %361 = vector.load %arg2[%c31, %c0_101, %c0_102] : memref<128x8x256xf32, #tpu.memory_space<vmem>>, vector<1x8x256xf32>
    %362 = vector.shape_cast %361 : vector<1x8x256xf32> to vector<8x256xf32>
    %363 = vector.shape_cast %362 : vector<8x256xf32> to vector<1x8x256xf32>
    %364 = vector.extract_strided_slice %306 {offsets = [0, 7, 0], sizes = [2, 1, 256], strides = [1, 1, 1]} : vector<2x8x256xf32> to vector<2x1x256xf32>
    %365 = vector.broadcast %363 : vector<1x8x256xf32> to vector<2x8x256xf32>
    %366 = vector.broadcast %364 : vector<2x1x256xf32> to vector<2x8x256xf32>
    %367 = arith.mulf %365, %366 : vector<2x8x256xf32>
    %368 = arith.addf %360, %367 : vector<2x8x256xf32>
    %369 = arith.addf %337, %368 : vector<2x8x256xf32>
    %cst_103 = arith.constant dense<0.000000e+00> : vector<2x8xf32>
    %370 = vector.multi_reduction <add>, %369, %cst_103 [2] : vector<2x8x256xf32> to vector<2x8xf32>
    %371 = vector.shape_cast %370 : vector<2x8xf32> to vector<2x8x1xf32>
    %cst_104 = arith.constant dense<0.000000e+00> : vector<8x1xf32>
    %372 = vector.multi_reduction <add>, %371, %cst_104 [0] : vector<2x8x1xf32> to vector<8x1xf32>
    %373 = vector.shape_cast %372 : vector<8x1xf32> to vector<1x8x1xf32>
    %374 = arith.mulf %369, %369 : vector<2x8x256xf32>
    %cst_105 = arith.constant dense<0.000000e+00> : vector<2x8xf32>
    %375 = vector.multi_reduction <add>, %374, %cst_105 [2] : vector<2x8x256xf32> to vector<2x8xf32>
    %376 = vector.shape_cast %375 : vector<2x8xf32> to vector<2x8x1xf32>
    %cst_106 = arith.constant dense<0.000000e+00> : vector<8x1xf32>
    %377 = vector.multi_reduction <add>, %376, %cst_106 [0] : vector<2x8x1xf32> to vector<8x1xf32>
    %378 = vector.shape_cast %377 : vector<8x1xf32> to vector<1x8x1xf32>
    %cst_107 = arith.constant 0.001953125 : f32
    %379 = vector.broadcast %cst_107 : f32 to vector<1x8x1xf32>
    %380 = arith.mulf %373, %379 : vector<1x8x1xf32>
    %cst_108 = arith.constant 0.001953125 : f32
    %381 = vector.broadcast %cst_108 : f32 to vector<1x8x1xf32>
    %382 = arith.mulf %378, %381 : vector<1x8x1xf32>
    %383 = arith.mulf %380, %380 : vector<1x8x1xf32>
    %384 = arith.subf %382, %383 : vector<1x8x1xf32>
    %cst_109 = arith.constant 0.000000e+00 : f32
    %385 = vector.broadcast %cst_109 : f32 to vector<1x8x1xf32>
    %386 = arith.maximumf %384, %385 : vector<1x8x1xf32>
    %387 = math.sqrt %386 : vector<1x8x1xf32>
    %cst_110 = arith.constant 9.99999997E-7 : f32
    %388 = vector.broadcast %cst_110 : f32 to vector<1x8x1xf32>
    %389 = arith.addf %387, %388 : vector<1x8x1xf32>
    %390 = tpu.reciprocal %389 : vector<1x8x1xf32> -> vector<1x8x1xf32>
    %cst_111 = arith.constant 1.000000e+00 : f32
    %391 = vector.broadcast %cst_111 : f32 to vector<1x8x1xf32>
    %392 = arith.mulf %391, %390 : vector<1x8x1xf32>
    %393 = math.log %392 : vector<1x8x1xf32>
    %394 = arith.addf %302, %393 : vector<1x8x1xf32>
    %395 = vector.broadcast %380 : vector<1x8x1xf32> to vector<2x8x256xf32>
    %396 = arith.subf %369, %395 : vector<2x8x256xf32>
    %397 = vector.broadcast %392 : vector<1x8x1xf32> to vector<2x8x256xf32>
    %398 = arith.mulf %396, %397 : vector<2x8x256xf32>
    %c32 = arith.constant 32 : index
    %c0_112 = arith.constant 0 : index
    %c0_113 = arith.constant 0 : index
    %399 = vector.load %arg2[%c32, %c0_112, %c0_113] : memref<128x8x256xf32, #tpu.memory_space<vmem>>, vector<1x8x256xf32>
    %400 = vector.shape_cast %399 : vector<1x8x256xf32> to vector<8x256xf32>
    %401 = vector.shape_cast %400 : vector<8x256xf32> to vector<1x8x256xf32>
    %402 = vector.extract_strided_slice %398 {offsets = [0, 0, 0], sizes = [2, 1, 256], strides = [1, 1, 1]} : vector<2x8x256xf32> to vector<2x1x256xf32>
    %403 = vector.broadcast %401 : vector<1x8x256xf32> to vector<2x8x256xf32>
    %404 = vector.broadcast %402 : vector<2x1x256xf32> to vector<2x8x256xf32>
    %405 = arith.mulf %403, %404 : vector<2x8x256xf32>
    %c33 = arith.constant 33 : index
    %c0_114 = arith.constant 0 : index
    %c0_115 = arith.constant 0 : index
    %406 = vector.load %arg2[%c33, %c0_114, %c0_115] : memref<128x8x256xf32, #tpu.memory_space<vmem>>, vector<1x8x256xf32>
    %407 = vector.shape_cast %406 : vector<1x8x256xf32> to vector<8x256xf32>
    %408 = vector.shape_cast %407 : vector<8x256xf32> to vector<1x8x256xf32>
    %409 = vector.extract_strided_slice %398 {offsets = [0, 1, 0], sizes = [2, 1, 256], strides = [1, 1, 1]} : vector<2x8x256xf32> to vector<2x1x256xf32>
    %410 = vector.broadcast %408 : vector<1x8x256xf32> to vector<2x8x256xf32>
    %411 = vector.broadcast %409 : vector<2x1x256xf32> to vector<2x8x256xf32>
    %412 = arith.mulf %410, %411 : vector<2x8x256xf32>
    %413 = arith.addf %405, %412 : vector<2x8x256xf32>
    %c34 = arith.constant 34 : index
    %c0_116 = arith.constant 0 : index
    %c0_117 = arith.constant 0 : index
    %414 = vector.load %arg2[%c34, %c0_116, %c0_117] : memref<128x8x256xf32, #tpu.memory_space<vmem>>, vector<1x8x256xf32>
    %415 = vector.shape_cast %414 : vector<1x8x256xf32> to vector<8x256xf32>
    %416 = vector.shape_cast %415 : vector<8x256xf32> to vector<1x8x256xf32>
    %417 = vector.extract_strided_slice %398 {offsets = [0, 2, 0], sizes = [2, 1, 256], strides = [1, 1, 1]} : vector<2x8x256xf32> to vector<2x1x256xf32>
    %418 = vector.broadcast %416 : vector<1x8x256xf32> to vector<2x8x256xf32>
    %419 = vector.broadcast %417 : vector<2x1x256xf32> to vector<2x8x256xf32>
    %420 = arith.mulf %418, %419 : vector<2x8x256xf32>
    %421 = arith.addf %413, %420 : vector<2x8x256xf32>
    %c35 = arith.constant 35 : index
    %c0_118 = arith.constant 0 : index
    %c0_119 = arith.constant 0 : index
    %422 = vector.load %arg2[%c35, %c0_118, %c0_119] : memref<128x8x256xf32, #tpu.memory_space<vmem>>, vector<1x8x256xf32>
    %423 = vector.shape_cast %422 : vector<1x8x256xf32> to vector<8x256xf32>
    %424 = vector.shape_cast %423 : vector<8x256xf32> to vector<1x8x256xf32>
    %425 = vector.extract_strided_slice %398 {offsets = [0, 3, 0], sizes = [2, 1, 256], strides = [1, 1, 1]} : vector<2x8x256xf32> to vector<2x1x256xf32>
    %426 = vector.broadcast %424 : vector<1x8x256xf32> to vector<2x8x256xf32>
    %427 = vector.broadcast %425 : vector<2x1x256xf32> to vector<2x8x256xf32>
    %428 = arith.mulf %426, %427 : vector<2x8x256xf32>
    %429 = arith.addf %421, %428 : vector<2x8x256xf32>
    %c36 = arith.constant 36 : index
    %c0_120 = arith.constant 0 : index
    %c0_121 = arith.constant 0 : index
    %430 = vector.load %arg2[%c36, %c0_120, %c0_121] : memref<128x8x256xf32, #tpu.memory_space<vmem>>, vector<1x8x256xf32>
    %431 = vector.shape_cast %430 : vector<1x8x256xf32> to vector<8x256xf32>
    %432 = vector.shape_cast %431 : vector<8x256xf32> to vector<1x8x256xf32>
    %433 = vector.extract_strided_slice %398 {offsets = [0, 4, 0], sizes = [2, 1, 256], strides = [1, 1, 1]} : vector<2x8x256xf32> to vector<2x1x256xf32>
    %434 = vector.broadcast %432 : vector<1x8x256xf32> to vector<2x8x256xf32>
    %435 = vector.broadcast %433 : vector<2x1x256xf32> to vector<2x8x256xf32>
    %436 = arith.mulf %434, %435 : vector<2x8x256xf32>
    %c37 = arith.constant 37 : index
    %c0_122 = arith.constant 0 : index
    %c0_123 = arith.constant 0 : index
    %437 = vector.load %arg2[%c37, %c0_122, %c0_123] : memref<128x8x256xf32, #tpu.memory_space<vmem>>, vector<1x8x256xf32>
    %438 = vector.shape_cast %437 : vector<1x8x256xf32> to vector<8x256xf32>
    %439 = vector.shape_cast %438 : vector<8x256xf32> to vector<1x8x256xf32>
    %440 = vector.extract_strided_slice %398 {offsets = [0, 5, 0], sizes = [2, 1, 256], strides = [1, 1, 1]} : vector<2x8x256xf32> to vector<2x1x256xf32>
    %441 = vector.broadcast %439 : vector<1x8x256xf32> to vector<2x8x256xf32>
    %442 = vector.broadcast %440 : vector<2x1x256xf32> to vector<2x8x256xf32>
    %443 = arith.mulf %441, %442 : vector<2x8x256xf32>
    %444 = arith.addf %436, %443 : vector<2x8x256xf32>
    %c38 = arith.constant 38 : index
    %c0_124 = arith.constant 0 : index
    %c0_125 = arith.constant 0 : index
    %445 = vector.load %arg2[%c38, %c0_124, %c0_125] : memref<128x8x256xf32, #tpu.memory_space<vmem>>, vector<1x8x256xf32>
    %446 = vector.shape_cast %445 : vector<1x8x256xf32> to vector<8x256xf32>
    %447 = vector.shape_cast %446 : vector<8x256xf32> to vector<1x8x256xf32>
    %448 = vector.extract_strided_slice %398 {offsets = [0, 6, 0], sizes = [2, 1, 256], strides = [1, 1, 1]} : vector<2x8x256xf32> to vector<2x1x256xf32>
    %449 = vector.broadcast %447 : vector<1x8x256xf32> to vector<2x8x256xf32>
    %450 = vector.broadcast %448 : vector<2x1x256xf32> to vector<2x8x256xf32>
    %451 = arith.mulf %449, %450 : vector<2x8x256xf32>
    %452 = arith.addf %444, %451 : vector<2x8x256xf32>
    %c39 = arith.constant 39 : index
    %c0_126 = arith.constant 0 : index
    %c0_127 = arith.constant 0 : index
    %453 = vector.load %arg2[%c39, %c0_126, %c0_127] : memref<128x8x256xf32, #tpu.memory_space<vmem>>, vector<1x8x256xf32>
    %454 = vector.shape_cast %453 : vector<1x8x256xf32> to vector<8x256xf32>
    %455 = vector.shape_cast %454 : vector<8x256xf32> to vector<1x8x256xf32>
    %456 = vector.extract_strided_slice %398 {offsets = [0, 7, 0], sizes = [2, 1, 256], strides = [1, 1, 1]} : vector<2x8x256xf32> to vector<2x1x256xf32>
    %457 = vector.broadcast %455 : vector<1x8x256xf32> to vector<2x8x256xf32>
    %458 = vector.broadcast %456 : vector<2x1x256xf32> to vector<2x8x256xf32>
    %459 = arith.mulf %457, %458 : vector<2x8x256xf32>
    %460 = arith.addf %452, %459 : vector<2x8x256xf32>
    %461 = arith.addf %429, %460 : vector<2x8x256xf32>
    %cst_128 = arith.constant dense<0.000000e+00> : vector<2x8xf32>
    %462 = vector.multi_reduction <add>, %461, %cst_128 [2] : vector<2x8x256xf32> to vector<2x8xf32>
    %463 = vector.shape_cast %462 : vector<2x8xf32> to vector<2x8x1xf32>
    %cst_129 = arith.constant dense<0.000000e+00> : vector<8x1xf32>
    %464 = vector.multi_reduction <add>, %463, %cst_129 [0] : vector<2x8x1xf32> to vector<8x1xf32>
    %465 = vector.shape_cast %464 : vector<8x1xf32> to vector<1x8x1xf32>
    %466 = arith.mulf %461, %461 : vector<2x8x256xf32>
    %cst_130 = arith.constant dense<0.000000e+00> : vector<2x8xf32>
    %467 = vector.multi_reduction <add>, %466, %cst_130 [2] : vector<2x8x256xf32> to vector<2x8xf32>
    %468 = vector.shape_cast %467 : vector<2x8xf32> to vector<2x8x1xf32>
    %cst_131 = arith.constant dense<0.000000e+00> : vector<8x1xf32>
    %469 = vector.multi_reduction <add>, %468, %cst_131 [0] : vector<2x8x1xf32> to vector<8x1xf32>
    %470 = vector.shape_cast %469 : vector<8x1xf32> to vector<1x8x1xf32>
    %cst_132 = arith.constant 0.001953125 : f32
    %471 = vector.broadcast %cst_132 : f32 to vector<1x8x1xf32>
    %472 = arith.mulf %465, %471 : vector<1x8x1xf32>
    %cst_133 = arith.constant 0.001953125 : f32
    %473 = vector.broadcast %cst_133 : f32 to vector<1x8x1xf32>
    %474 = arith.mulf %470, %473 : vector<1x8x1xf32>
    %475 = arith.mulf %472, %472 : vector<1x8x1xf32>
    %476 = arith.subf %474, %475 : vector<1x8x1xf32>
    %cst_134 = arith.constant 0.000000e+00 : f32
    %477 = vector.broadcast %cst_134 : f32 to vector<1x8x1xf32>
    %478 = arith.maximumf %476, %477 : vector<1x8x1xf32>
    %479 = math.sqrt %478 : vector<1x8x1xf32>
    %cst_135 = arith.constant 9.99999997E-7 : f32
    %480 = vector.broadcast %cst_135 : f32 to vector<1x8x1xf32>
    %481 = arith.addf %479, %480 : vector<1x8x1xf32>
    %482 = tpu.reciprocal %481 : vector<1x8x1xf32> -> vector<1x8x1xf32>
    %cst_136 = arith.constant 1.000000e+00 : f32
    %483 = vector.broadcast %cst_136 : f32 to vector<1x8x1xf32>
    %484 = arith.mulf %483, %482 : vector<1x8x1xf32>
    %485 = math.log %484 : vector<1x8x1xf32>
    %486 = arith.addf %394, %485 : vector<1x8x1xf32>
    %487 = vector.broadcast %472 : vector<1x8x1xf32> to vector<2x8x256xf32>
    %488 = arith.subf %461, %487 : vector<2x8x256xf32>
    %489 = vector.broadcast %484 : vector<1x8x1xf32> to vector<2x8x256xf32>
    %490 = arith.mulf %488, %489 : vector<2x8x256xf32>
    %c40 = arith.constant 40 : index
    %c0_137 = arith.constant 0 : index
    %c0_138 = arith.constant 0 : index
    %491 = vector.load %arg2[%c40, %c0_137, %c0_138] : memref<128x8x256xf32, #tpu.memory_space<vmem>>, vector<1x8x256xf32>
    %492 = vector.shape_cast %491 : vector<1x8x256xf32> to vector<8x256xf32>
    %493 = vector.shape_cast %492 : vector<8x256xf32> to vector<1x8x256xf32>
    %494 = vector.extract_strided_slice %490 {offsets = [0, 0, 0], sizes = [2, 1, 256], strides = [1, 1, 1]} : vector<2x8x256xf32> to vector<2x1x256xf32>
    %495 = vector.broadcast %493 : vector<1x8x256xf32> to vector<2x8x256xf32>
    %496 = vector.broadcast %494 : vector<2x1x256xf32> to vector<2x8x256xf32>
    %497 = arith.mulf %495, %496 : vector<2x8x256xf32>
    %c41 = arith.constant 41 : index
    %c0_139 = arith.constant 0 : index
    %c0_140 = arith.constant 0 : index
    %498 = vector.load %arg2[%c41, %c0_139, %c0_140] : memref<128x8x256xf32, #tpu.memory_space<vmem>>, vector<1x8x256xf32>
    %499 = vector.shape_cast %498 : vector<1x8x256xf32> to vector<8x256xf32>
    %500 = vector.shape_cast %499 : vector<8x256xf32> to vector<1x8x256xf32>
    %501 = vector.extract_strided_slice %490 {offsets = [0, 1, 0], sizes = [2, 1, 256], strides = [1, 1, 1]} : vector<2x8x256xf32> to vector<2x1x256xf32>
    %502 = vector.broadcast %500 : vector<1x8x256xf32> to vector<2x8x256xf32>
    %503 = vector.broadcast %501 : vector<2x1x256xf32> to vector<2x8x256xf32>
    %504 = arith.mulf %502, %503 : vector<2x8x256xf32>
    %505 = arith.addf %497, %504 : vector<2x8x256xf32>
    %c42 = arith.constant 42 : index
    %c0_141 = arith.constant 0 : index
    %c0_142 = arith.constant 0 : index
    %506 = vector.load %arg2[%c42, %c0_141, %c0_142] : memref<128x8x256xf32, #tpu.memory_space<vmem>>, vector<1x8x256xf32>
    %507 = vector.shape_cast %506 : vector<1x8x256xf32> to vector<8x256xf32>
    %508 = vector.shape_cast %507 : vector<8x256xf32> to vector<1x8x256xf32>
    %509 = vector.extract_strided_slice %490 {offsets = [0, 2, 0], sizes = [2, 1, 256], strides = [1, 1, 1]} : vector<2x8x256xf32> to vector<2x1x256xf32>
    %510 = vector.broadcast %508 : vector<1x8x256xf32> to vector<2x8x256xf32>
    %511 = vector.broadcast %509 : vector<2x1x256xf32> to vector<2x8x256xf32>
    %512 = arith.mulf %510, %511 : vector<2x8x256xf32>
    %513 = arith.addf %505, %512 : vector<2x8x256xf32>
    %c43 = arith.constant 43 : index
    %c0_143 = arith.constant 0 : index
    %c0_144 = arith.constant 0 : index
    %514 = vector.load %arg2[%c43, %c0_143, %c0_144] : memref<128x8x256xf32, #tpu.memory_space<vmem>>, vector<1x8x256xf32>
    %515 = vector.shape_cast %514 : vector<1x8x256xf32> to vector<8x256xf32>
    %516 = vector.shape_cast %515 : vector<8x256xf32> to vector<1x8x256xf32>
    %517 = vector.extract_strided_slice %490 {offsets = [0, 3, 0], sizes = [2, 1, 256], strides = [1, 1, 1]} : vector<2x8x256xf32> to vector<2x1x256xf32>
    %518 = vector.broadcast %516 : vector<1x8x256xf32> to vector<2x8x256xf32>
    %519 = vector.broadcast %517 : vector<2x1x256xf32> to vector<2x8x256xf32>
    %520 = arith.mulf %518, %519 : vector<2x8x256xf32>
    %521 = arith.addf %513, %520 : vector<2x8x256xf32>
    %c44 = arith.constant 44 : index
    %c0_145 = arith.constant 0 : index
    %c0_146 = arith.constant 0 : index
    %522 = vector.load %arg2[%c44, %c0_145, %c0_146] : memref<128x8x256xf32, #tpu.memory_space<vmem>>, vector<1x8x256xf32>
    %523 = vector.shape_cast %522 : vector<1x8x256xf32> to vector<8x256xf32>
    %524 = vector.shape_cast %523 : vector<8x256xf32> to vector<1x8x256xf32>
    %525 = vector.extract_strided_slice %490 {offsets = [0, 4, 0], sizes = [2, 1, 256], strides = [1, 1, 1]} : vector<2x8x256xf32> to vector<2x1x256xf32>
    %526 = vector.broadcast %524 : vector<1x8x256xf32> to vector<2x8x256xf32>
    %527 = vector.broadcast %525 : vector<2x1x256xf32> to vector<2x8x256xf32>
    %528 = arith.mulf %526, %527 : vector<2x8x256xf32>
    %c45 = arith.constant 45 : index
    %c0_147 = arith.constant 0 : index
    %c0_148 = arith.constant 0 : index
    %529 = vector.load %arg2[%c45, %c0_147, %c0_148] : memref<128x8x256xf32, #tpu.memory_space<vmem>>, vector<1x8x256xf32>
    %530 = vector.shape_cast %529 : vector<1x8x256xf32> to vector<8x256xf32>
    %531 = vector.shape_cast %530 : vector<8x256xf32> to vector<1x8x256xf32>
    %532 = vector.extract_strided_slice %490 {offsets = [0, 5, 0], sizes = [2, 1, 256], strides = [1, 1, 1]} : vector<2x8x256xf32> to vector<2x1x256xf32>
    %533 = vector.broadcast %531 : vector<1x8x256xf32> to vector<2x8x256xf32>
    %534 = vector.broadcast %532 : vector<2x1x256xf32> to vector<2x8x256xf32>
    %535 = arith.mulf %533, %534 : vector<2x8x256xf32>
    %536 = arith.addf %528, %535 : vector<2x8x256xf32>
    %c46 = arith.constant 46 : index
    %c0_149 = arith.constant 0 : index
    %c0_150 = arith.constant 0 : index
    %537 = vector.load %arg2[%c46, %c0_149, %c0_150] : memref<128x8x256xf32, #tpu.memory_space<vmem>>, vector<1x8x256xf32>
    %538 = vector.shape_cast %537 : vector<1x8x256xf32> to vector<8x256xf32>
    %539 = vector.shape_cast %538 : vector<8x256xf32> to vector<1x8x256xf32>
    %540 = vector.extract_strided_slice %490 {offsets = [0, 6, 0], sizes = [2, 1, 256], strides = [1, 1, 1]} : vector<2x8x256xf32> to vector<2x1x256xf32>
    %541 = vector.broadcast %539 : vector<1x8x256xf32> to vector<2x8x256xf32>
    %542 = vector.broadcast %540 : vector<2x1x256xf32> to vector<2x8x256xf32>
    %543 = arith.mulf %541, %542 : vector<2x8x256xf32>
    %544 = arith.addf %536, %543 : vector<2x8x256xf32>
    %c47 = arith.constant 47 : index
    %c0_151 = arith.constant 0 : index
    %c0_152 = arith.constant 0 : index
    %545 = vector.load %arg2[%c47, %c0_151, %c0_152] : memref<128x8x256xf32, #tpu.memory_space<vmem>>, vector<1x8x256xf32>
    %546 = vector.shape_cast %545 : vector<1x8x256xf32> to vector<8x256xf32>
    %547 = vector.shape_cast %546 : vector<8x256xf32> to vector<1x8x256xf32>
    %548 = vector.extract_strided_slice %490 {offsets = [0, 7, 0], sizes = [2, 1, 256], strides = [1, 1, 1]} : vector<2x8x256xf32> to vector<2x1x256xf32>
    %549 = vector.broadcast %547 : vector<1x8x256xf32> to vector<2x8x256xf32>
    %550 = vector.broadcast %548 : vector<2x1x256xf32> to vector<2x8x256xf32>
    %551 = arith.mulf %549, %550 : vector<2x8x256xf32>
    %552 = arith.addf %544, %551 : vector<2x8x256xf32>
    %553 = arith.addf %521, %552 : vector<2x8x256xf32>
    %cst_153 = arith.constant dense<0.000000e+00> : vector<2x8xf32>
    %554 = vector.multi_reduction <add>, %553, %cst_153 [2] : vector<2x8x256xf32> to vector<2x8xf32>
    %555 = vector.shape_cast %554 : vector<2x8xf32> to vector<2x8x1xf32>
    %cst_154 = arith.constant dense<0.000000e+00> : vector<8x1xf32>
    %556 = vector.multi_reduction <add>, %555, %cst_154 [0] : vector<2x8x1xf32> to vector<8x1xf32>
    %557 = vector.shape_cast %556 : vector<8x1xf32> to vector<1x8x1xf32>
    %558 = arith.mulf %553, %553 : vector<2x8x256xf32>
    %cst_155 = arith.constant dense<0.000000e+00> : vector<2x8xf32>
    %559 = vector.multi_reduction <add>, %558, %cst_155 [2] : vector<2x8x256xf32> to vector<2x8xf32>
    %560 = vector.shape_cast %559 : vector<2x8xf32> to vector<2x8x1xf32>
    %cst_156 = arith.constant dense<0.000000e+00> : vector<8x1xf32>
    %561 = vector.multi_reduction <add>, %560, %cst_156 [0] : vector<2x8x1xf32> to vector<8x1xf32>
    %562 = vector.shape_cast %561 : vector<8x1xf32> to vector<1x8x1xf32>
    %cst_157 = arith.constant 0.001953125 : f32
    %563 = vector.broadcast %cst_157 : f32 to vector<1x8x1xf32>
    %564 = arith.mulf %557, %563 : vector<1x8x1xf32>
    %cst_158 = arith.constant 0.001953125 : f32
    %565 = vector.broadcast %cst_158 : f32 to vector<1x8x1xf32>
    %566 = arith.mulf %562, %565 : vector<1x8x1xf32>
    %567 = arith.mulf %564, %564 : vector<1x8x1xf32>
    %568 = arith.subf %566, %567 : vector<1x8x1xf32>
    %cst_159 = arith.constant 0.000000e+00 : f32
    %569 = vector.broadcast %cst_159 : f32 to vector<1x8x1xf32>
    %570 = arith.maximumf %568, %569 : vector<1x8x1xf32>
    %571 = math.sqrt %570 : vector<1x8x1xf32>
    %cst_160 = arith.constant 9.99999997E-7 : f32
    %572 = vector.broadcast %cst_160 : f32 to vector<1x8x1xf32>
    %573 = arith.addf %571, %572 : vector<1x8x1xf32>
    %574 = tpu.reciprocal %573 : vector<1x8x1xf32> -> vector<1x8x1xf32>
    %cst_161 = arith.constant 1.000000e+00 : f32
    %575 = vector.broadcast %cst_161 : f32 to vector<1x8x1xf32>
    %576 = arith.mulf %575, %574 : vector<1x8x1xf32>
    %577 = math.log %576 : vector<1x8x1xf32>
    %578 = arith.addf %486, %577 : vector<1x8x1xf32>
    %579 = vector.broadcast %564 : vector<1x8x1xf32> to vector<2x8x256xf32>
    %580 = arith.subf %553, %579 : vector<2x8x256xf32>
    %581 = vector.broadcast %576 : vector<1x8x1xf32> to vector<2x8x256xf32>
    %582 = arith.mulf %580, %581 : vector<2x8x256xf32>
    %c48 = arith.constant 48 : index
    %c0_162 = arith.constant 0 : index
    %c0_163 = arith.constant 0 : index
    %583 = vector.load %arg2[%c48, %c0_162, %c0_163] : memref<128x8x256xf32, #tpu.memory_space<vmem>>, vector<1x8x256xf32>
    %584 = vector.shape_cast %583 : vector<1x8x256xf32> to vector<8x256xf32>
    %585 = vector.shape_cast %584 : vector<8x256xf32> to vector<1x8x256xf32>
    %586 = vector.extract_strided_slice %582 {offsets = [0, 0, 0], sizes = [2, 1, 256], strides = [1, 1, 1]} : vector<2x8x256xf32> to vector<2x1x256xf32>
    %587 = vector.broadcast %585 : vector<1x8x256xf32> to vector<2x8x256xf32>
    %588 = vector.broadcast %586 : vector<2x1x256xf32> to vector<2x8x256xf32>
    %589 = arith.mulf %587, %588 : vector<2x8x256xf32>
    %c49 = arith.constant 49 : index
    %c0_164 = arith.constant 0 : index
    %c0_165 = arith.constant 0 : index
    %590 = vector.load %arg2[%c49, %c0_164, %c0_165] : memref<128x8x256xf32, #tpu.memory_space<vmem>>, vector<1x8x256xf32>
    %591 = vector.shape_cast %590 : vector<1x8x256xf32> to vector<8x256xf32>
    %592 = vector.shape_cast %591 : vector<8x256xf32> to vector<1x8x256xf32>
    %593 = vector.extract_strided_slice %582 {offsets = [0, 1, 0], sizes = [2, 1, 256], strides = [1, 1, 1]} : vector<2x8x256xf32> to vector<2x1x256xf32>
    %594 = vector.broadcast %592 : vector<1x8x256xf32> to vector<2x8x256xf32>
    %595 = vector.broadcast %593 : vector<2x1x256xf32> to vector<2x8x256xf32>
    %596 = arith.mulf %594, %595 : vector<2x8x256xf32>
    %597 = arith.addf %589, %596 : vector<2x8x256xf32>
    %c50 = arith.constant 50 : index
    %c0_166 = arith.constant 0 : index
    %c0_167 = arith.constant 0 : index
    %598 = vector.load %arg2[%c50, %c0_166, %c0_167] : memref<128x8x256xf32, #tpu.memory_space<vmem>>, vector<1x8x256xf32>
    %599 = vector.shape_cast %598 : vector<1x8x256xf32> to vector<8x256xf32>
    %600 = vector.shape_cast %599 : vector<8x256xf32> to vector<1x8x256xf32>
    %601 = vector.extract_strided_slice %582 {offsets = [0, 2, 0], sizes = [2, 1, 256], strides = [1, 1, 1]} : vector<2x8x256xf32> to vector<2x1x256xf32>
    %602 = vector.broadcast %600 : vector<1x8x256xf32> to vector<2x8x256xf32>
    %603 = vector.broadcast %601 : vector<2x1x256xf32> to vector<2x8x256xf32>
    %604 = arith.mulf %602, %603 : vector<2x8x256xf32>
    %605 = arith.addf %597, %604 : vector<2x8x256xf32>
    %c51 = arith.constant 51 : index
    %c0_168 = arith.constant 0 : index
    %c0_169 = arith.constant 0 : index
    %606 = vector.load %arg2[%c51, %c0_168, %c0_169] : memref<128x8x256xf32, #tpu.memory_space<vmem>>, vector<1x8x256xf32>
    %607 = vector.shape_cast %606 : vector<1x8x256xf32> to vector<8x256xf32>
    %608 = vector.shape_cast %607 : vector<8x256xf32> to vector<1x8x256xf32>
    %609 = vector.extract_strided_slice %582 {offsets = [0, 3, 0], sizes = [2, 1, 256], strides = [1, 1, 1]} : vector<2x8x256xf32> to vector<2x1x256xf32>
    %610 = vector.broadcast %608 : vector<1x8x256xf32> to vector<2x8x256xf32>
    %611 = vector.broadcast %609 : vector<2x1x256xf32> to vector<2x8x256xf32>
    %612 = arith.mulf %610, %611 : vector<2x8x256xf32>
    %613 = arith.addf %605, %612 : vector<2x8x256xf32>
    %c52 = arith.constant 52 : index
    %c0_170 = arith.constant 0 : index
    %c0_171 = arith.constant 0 : index
    %614 = vector.load %arg2[%c52, %c0_170, %c0_171] : memref<128x8x256xf32, #tpu.memory_space<vmem>>, vector<1x8x256xf32>
    %615 = vector.shape_cast %614 : vector<1x8x256xf32> to vector<8x256xf32>
    %616 = vector.shape_cast %615 : vector<8x256xf32> to vector<1x8x256xf32>
    %617 = vector.extract_strided_slice %582 {offsets = [0, 4, 0], sizes = [2, 1, 256], strides = [1, 1, 1]} : vector<2x8x256xf32> to vector<2x1x256xf32>
    %618 = vector.broadcast %616 : vector<1x8x256xf32> to vector<2x8x256xf32>
    %619 = vector.broadcast %617 : vector<2x1x256xf32> to vector<2x8x256xf32>
    %620 = arith.mulf %618, %619 : vector<2x8x256xf32>
    %c53 = arith.constant 53 : index
    %c0_172 = arith.constant 0 : index
    %c0_173 = arith.constant 0 : index
    %621 = vector.load %arg2[%c53, %c0_172, %c0_173] : memref<128x8x256xf32, #tpu.memory_space<vmem>>, vector<1x8x256xf32>
    %622 = vector.shape_cast %621 : vector<1x8x256xf32> to vector<8x256xf32>
    %623 = vector.shape_cast %622 : vector<8x256xf32> to vector<1x8x256xf32>
    %624 = vector.extract_strided_slice %582 {offsets = [0, 5, 0], sizes = [2, 1, 256], strides = [1, 1, 1]} : vector<2x8x256xf32> to vector<2x1x256xf32>
    %625 = vector.broadcast %623 : vector<1x8x256xf32> to vector<2x8x256xf32>
    %626 = vector.broadcast %624 : vector<2x1x256xf32> to vector<2x8x256xf32>
    %627 = arith.mulf %625, %626 : vector<2x8x256xf32>
    %628 = arith.addf %620, %627 : vector<2x8x256xf32>
    %c54 = arith.constant 54 : index
    %c0_174 = arith.constant 0 : index
    %c0_175 = arith.constant 0 : index
    %629 = vector.load %arg2[%c54, %c0_174, %c0_175] : memref<128x8x256xf32, #tpu.memory_space<vmem>>, vector<1x8x256xf32>
    %630 = vector.shape_cast %629 : vector<1x8x256xf32> to vector<8x256xf32>
    %631 = vector.shape_cast %630 : vector<8x256xf32> to vector<1x8x256xf32>
    %632 = vector.extract_strided_slice %582 {offsets = [0, 6, 0], sizes = [2, 1, 256], strides = [1, 1, 1]} : vector<2x8x256xf32> to vector<2x1x256xf32>
    %633 = vector.broadcast %631 : vector<1x8x256xf32> to vector<2x8x256xf32>
    %634 = vector.broadcast %632 : vector<2x1x256xf32> to vector<2x8x256xf32>
    %635 = arith.mulf %633, %634 : vector<2x8x256xf32>
    %636 = arith.addf %628, %635 : vector<2x8x256xf32>
    %c55 = arith.constant 55 : index
    %c0_176 = arith.constant 0 : index
    %c0_177 = arith.constant 0 : index
    %637 = vector.load %arg2[%c55, %c0_176, %c0_177] : memref<128x8x256xf32, #tpu.memory_space<vmem>>, vector<1x8x256xf32>
    %638 = vector.shape_cast %637 : vector<1x8x256xf32> to vector<8x256xf32>
    %639 = vector.shape_cast %638 : vector<8x256xf32> to vector<1x8x256xf32>
    %640 = vector.extract_strided_slice %582 {offsets = [0, 7, 0], sizes = [2, 1, 256], strides = [1, 1, 1]} : vector<2x8x256xf32> to vector<2x1x256xf32>
    %641 = vector.broadcast %639 : vector<1x8x256xf32> to vector<2x8x256xf32>
    %642 = vector.broadcast %640 : vector<2x1x256xf32> to vector<2x8x256xf32>
    %643 = arith.mulf %641, %642 : vector<2x8x256xf32>
    %644 = arith.addf %636, %643 : vector<2x8x256xf32>
    %645 = arith.addf %613, %644 : vector<2x8x256xf32>
    %cst_178 = arith.constant dense<0.000000e+00> : vector<2x8xf32>
    %646 = vector.multi_reduction <add>, %645, %cst_178 [2] : vector<2x8x256xf32> to vector<2x8xf32>
    %647 = vector.shape_cast %646 : vector<2x8xf32> to vector<2x8x1xf32>
    %cst_179 = arith.constant dense<0.000000e+00> : vector<8x1xf32>
    %648 = vector.multi_reduction <add>, %647, %cst_179 [0] : vector<2x8x1xf32> to vector<8x1xf32>
    %649 = vector.shape_cast %648 : vector<8x1xf32> to vector<1x8x1xf32>
    %650 = arith.mulf %645, %645 : vector<2x8x256xf32>
    %cst_180 = arith.constant dense<0.000000e+00> : vector<2x8xf32>
    %651 = vector.multi_reduction <add>, %650, %cst_180 [2] : vector<2x8x256xf32> to vector<2x8xf32>
    %652 = vector.shape_cast %651 : vector<2x8xf32> to vector<2x8x1xf32>
    %cst_181 = arith.constant dense<0.000000e+00> : vector<8x1xf32>
    %653 = vector.multi_reduction <add>, %652, %cst_181 [0] : vector<2x8x1xf32> to vector<8x1xf32>
    %654 = vector.shape_cast %653 : vector<8x1xf32> to vector<1x8x1xf32>
    %cst_182 = arith.constant 0.001953125 : f32
    %655 = vector.broadcast %cst_182 : f32 to vector<1x8x1xf32>
    %656 = arith.mulf %649, %655 : vector<1x8x1xf32>
    %cst_183 = arith.constant 0.001953125 : f32
    %657 = vector.broadcast %cst_183 : f32 to vector<1x8x1xf32>
    %658 = arith.mulf %654, %657 : vector<1x8x1xf32>
    %659 = arith.mulf %656, %656 : vector<1x8x1xf32>
    %660 = arith.subf %658, %659 : vector<1x8x1xf32>
    %cst_184 = arith.constant 0.000000e+00 : f32
    %661 = vector.broadcast %cst_184 : f32 to vector<1x8x1xf32>
    %662 = arith.maximumf %660, %661 : vector<1x8x1xf32>
    %663 = math.sqrt %662 : vector<1x8x1xf32>
    %cst_185 = arith.constant 9.99999997E-7 : f32
    %664 = vector.broadcast %cst_185 : f32 to vector<1x8x1xf32>
    %665 = arith.addf %663, %664 : vector<1x8x1xf32>
    %666 = tpu.reciprocal %665 : vector<1x8x1xf32> -> vector<1x8x1xf32>
    %cst_186 = arith.constant 1.000000e+00 : f32
    %667 = vector.broadcast %cst_186 : f32 to vector<1x8x1xf32>
    %668 = arith.mulf %667, %666 : vector<1x8x1xf32>
    %669 = math.log %668 : vector<1x8x1xf32>
    %670 = arith.addf %578, %669 : vector<1x8x1xf32>
    %671 = vector.broadcast %656 : vector<1x8x1xf32> to vector<2x8x256xf32>
    %672 = arith.subf %645, %671 : vector<2x8x256xf32>
    %673 = vector.broadcast %668 : vector<1x8x1xf32> to vector<2x8x256xf32>
    %674 = arith.mulf %672, %673 : vector<2x8x256xf32>
    %c56 = arith.constant 56 : index
    %c0_187 = arith.constant 0 : index
    %c0_188 = arith.constant 0 : index
    %675 = vector.load %arg2[%c56, %c0_187, %c0_188] : memref<128x8x256xf32, #tpu.memory_space<vmem>>, vector<1x8x256xf32>
    %676 = vector.shape_cast %675 : vector<1x8x256xf32> to vector<8x256xf32>
    %677 = vector.shape_cast %676 : vector<8x256xf32> to vector<1x8x256xf32>
    %678 = vector.extract_strided_slice %674 {offsets = [0, 0, 0], sizes = [2, 1, 256], strides = [1, 1, 1]} : vector<2x8x256xf32> to vector<2x1x256xf32>
    %679 = vector.broadcast %677 : vector<1x8x256xf32> to vector<2x8x256xf32>
    %680 = vector.broadcast %678 : vector<2x1x256xf32> to vector<2x8x256xf32>
    %681 = arith.mulf %679, %680 : vector<2x8x256xf32>
    %c57 = arith.constant 57 : index
    %c0_189 = arith.constant 0 : index
    %c0_190 = arith.constant 0 : index
    %682 = vector.load %arg2[%c57, %c0_189, %c0_190] : memref<128x8x256xf32, #tpu.memory_space<vmem>>, vector<1x8x256xf32>
    %683 = vector.shape_cast %682 : vector<1x8x256xf32> to vector<8x256xf32>
    %684 = vector.shape_cast %683 : vector<8x256xf32> to vector<1x8x256xf32>
    %685 = vector.extract_strided_slice %674 {offsets = [0, 1, 0], sizes = [2, 1, 256], strides = [1, 1, 1]} : vector<2x8x256xf32> to vector<2x1x256xf32>
    %686 = vector.broadcast %684 : vector<1x8x256xf32> to vector<2x8x256xf32>
    %687 = vector.broadcast %685 : vector<2x1x256xf32> to vector<2x8x256xf32>
    %688 = arith.mulf %686, %687 : vector<2x8x256xf32>
    %689 = arith.addf %681, %688 : vector<2x8x256xf32>
    %c58 = arith.constant 58 : index
    %c0_191 = arith.constant 0 : index
    %c0_192 = arith.constant 0 : index
    %690 = vector.load %arg2[%c58, %c0_191, %c0_192] : memref<128x8x256xf32, #tpu.memory_space<vmem>>, vector<1x8x256xf32>
    %691 = vector.shape_cast %690 : vector<1x8x256xf32> to vector<8x256xf32>
    %692 = vector.shape_cast %691 : vector<8x256xf32> to vector<1x8x256xf32>
    %693 = vector.extract_strided_slice %674 {offsets = [0, 2, 0], sizes = [2, 1, 256], strides = [1, 1, 1]} : vector<2x8x256xf32> to vector<2x1x256xf32>
    %694 = vector.broadcast %692 : vector<1x8x256xf32> to vector<2x8x256xf32>
    %695 = vector.broadcast %693 : vector<2x1x256xf32> to vector<2x8x256xf32>
    %696 = arith.mulf %694, %695 : vector<2x8x256xf32>
    %697 = arith.addf %689, %696 : vector<2x8x256xf32>
    %c59 = arith.constant 59 : index
    %c0_193 = arith.constant 0 : index
    %c0_194 = arith.constant 0 : index
    %698 = vector.load %arg2[%c59, %c0_193, %c0_194] : memref<128x8x256xf32, #tpu.memory_space<vmem>>, vector<1x8x256xf32>
    %699 = vector.shape_cast %698 : vector<1x8x256xf32> to vector<8x256xf32>
    %700 = vector.shape_cast %699 : vector<8x256xf32> to vector<1x8x256xf32>
    %701 = vector.extract_strided_slice %674 {offsets = [0, 3, 0], sizes = [2, 1, 256], strides = [1, 1, 1]} : vector<2x8x256xf32> to vector<2x1x256xf32>
    %702 = vector.broadcast %700 : vector<1x8x256xf32> to vector<2x8x256xf32>
    %703 = vector.broadcast %701 : vector<2x1x256xf32> to vector<2x8x256xf32>
    %704 = arith.mulf %702, %703 : vector<2x8x256xf32>
    %705 = arith.addf %697, %704 : vector<2x8x256xf32>
    %c60 = arith.constant 60 : index
    %c0_195 = arith.constant 0 : index
    %c0_196 = arith.constant 0 : index
    %706 = vector.load %arg2[%c60, %c0_195, %c0_196] : memref<128x8x256xf32, #tpu.memory_space<vmem>>, vector<1x8x256xf32>
    %707 = vector.shape_cast %706 : vector<1x8x256xf32> to vector<8x256xf32>
    %708 = vector.shape_cast %707 : vector<8x256xf32> to vector<1x8x256xf32>
    %709 = vector.extract_strided_slice %674 {offsets = [0, 4, 0], sizes = [2, 1, 256], strides = [1, 1, 1]} : vector<2x8x256xf32> to vector<2x1x256xf32>
    %710 = vector.broadcast %708 : vector<1x8x256xf32> to vector<2x8x256xf32>
    %711 = vector.broadcast %709 : vector<2x1x256xf32> to vector<2x8x256xf32>
    %712 = arith.mulf %710, %711 : vector<2x8x256xf32>
    %c61 = arith.constant 61 : index
    %c0_197 = arith.constant 0 : index
    %c0_198 = arith.constant 0 : index
    %713 = vector.load %arg2[%c61, %c0_197, %c0_198] : memref<128x8x256xf32, #tpu.memory_space<vmem>>, vector<1x8x256xf32>
    %714 = vector.shape_cast %713 : vector<1x8x256xf32> to vector<8x256xf32>
    %715 = vector.shape_cast %714 : vector<8x256xf32> to vector<1x8x256xf32>
    %716 = vector.extract_strided_slice %674 {offsets = [0, 5, 0], sizes = [2, 1, 256], strides = [1, 1, 1]} : vector<2x8x256xf32> to vector<2x1x256xf32>
    %717 = vector.broadcast %715 : vector<1x8x256xf32> to vector<2x8x256xf32>
    %718 = vector.broadcast %716 : vector<2x1x256xf32> to vector<2x8x256xf32>
    %719 = arith.mulf %717, %718 : vector<2x8x256xf32>
    %720 = arith.addf %712, %719 : vector<2x8x256xf32>
    %c62 = arith.constant 62 : index
    %c0_199 = arith.constant 0 : index
    %c0_200 = arith.constant 0 : index
    %721 = vector.load %arg2[%c62, %c0_199, %c0_200] : memref<128x8x256xf32, #tpu.memory_space<vmem>>, vector<1x8x256xf32>
    %722 = vector.shape_cast %721 : vector<1x8x256xf32> to vector<8x256xf32>
    %723 = vector.shape_cast %722 : vector<8x256xf32> to vector<1x8x256xf32>
    %724 = vector.extract_strided_slice %674 {offsets = [0, 6, 0], sizes = [2, 1, 256], strides = [1, 1, 1]} : vector<2x8x256xf32> to vector<2x1x256xf32>
    %725 = vector.broadcast %723 : vector<1x8x256xf32> to vector<2x8x256xf32>
    %726 = vector.broadcast %724 : vector<2x1x256xf32> to vector<2x8x256xf32>
    %727 = arith.mulf %725, %726 : vector<2x8x256xf32>
    %728 = arith.addf %720, %727 : vector<2x8x256xf32>
    %c63 = arith.constant 63 : index
    %c0_201 = arith.constant 0 : index
    %c0_202 = arith.constant 0 : index
    %729 = vector.load %arg2[%c63, %c0_201, %c0_202] : memref<128x8x256xf32, #tpu.memory_space<vmem>>, vector<1x8x256xf32>
    %730 = vector.shape_cast %729 : vector<1x8x256xf32> to vector<8x256xf32>
    %731 = vector.shape_cast %730 : vector<8x256xf32> to vector<1x8x256xf32>
    %732 = vector.extract_strided_slice %674 {offsets = [0, 7, 0], sizes = [2, 1, 256], strides = [1, 1, 1]} : vector<2x8x256xf32> to vector<2x1x256xf32>
    %733 = vector.broadcast %731 : vector<1x8x256xf32> to vector<2x8x256xf32>
    %734 = vector.broadcast %732 : vector<2x1x256xf32> to vector<2x8x256xf32>
    %735 = arith.mulf %733, %734 : vector<2x8x256xf32>
    %736 = arith.addf %728, %735 : vector<2x8x256xf32>
    %737 = arith.addf %705, %736 : vector<2x8x256xf32>
    %cst_203 = arith.constant dense<0.000000e+00> : vector<2x8xf32>
    %738 = vector.multi_reduction <add>, %737, %cst_203 [2] : vector<2x8x256xf32> to vector<2x8xf32>
    %739 = vector.shape_cast %738 : vector<2x8xf32> to vector<2x8x1xf32>
    %cst_204 = arith.constant dense<0.000000e+00> : vector<8x1xf32>
    %740 = vector.multi_reduction <add>, %739, %cst_204 [0] : vector<2x8x1xf32> to vector<8x1xf32>
    %741 = vector.shape_cast %740 : vector<8x1xf32> to vector<1x8x1xf32>
    %742 = arith.mulf %737, %737 : vector<2x8x256xf32>
    %cst_205 = arith.constant dense<0.000000e+00> : vector<2x8xf32>
    %743 = vector.multi_reduction <add>, %742, %cst_205 [2] : vector<2x8x256xf32> to vector<2x8xf32>
    %744 = vector.shape_cast %743 : vector<2x8xf32> to vector<2x8x1xf32>
    %cst_206 = arith.constant dense<0.000000e+00> : vector<8x1xf32>
    %745 = vector.multi_reduction <add>, %744, %cst_206 [0] : vector<2x8x1xf32> to vector<8x1xf32>
    %746 = vector.shape_cast %745 : vector<8x1xf32> to vector<1x8x1xf32>
    %cst_207 = arith.constant 0.001953125 : f32
    %747 = vector.broadcast %cst_207 : f32 to vector<1x8x1xf32>
    %748 = arith.mulf %741, %747 : vector<1x8x1xf32>
    %cst_208 = arith.constant 0.001953125 : f32
    %749 = vector.broadcast %cst_208 : f32 to vector<1x8x1xf32>
    %750 = arith.mulf %746, %749 : vector<1x8x1xf32>
    %751 = arith.mulf %748, %748 : vector<1x8x1xf32>
    %752 = arith.subf %750, %751 : vector<1x8x1xf32>
    %cst_209 = arith.constant 0.000000e+00 : f32
    %753 = vector.broadcast %cst_209 : f32 to vector<1x8x1xf32>
    %754 = arith.maximumf %752, %753 : vector<1x8x1xf32>
    %755 = math.sqrt %754 : vector<1x8x1xf32>
    %cst_210 = arith.constant 9.99999997E-7 : f32
    %756 = vector.broadcast %cst_210 : f32 to vector<1x8x1xf32>
    %757 = arith.addf %755, %756 : vector<1x8x1xf32>
    %758 = tpu.reciprocal %757 : vector<1x8x1xf32> -> vector<1x8x1xf32>
    %cst_211 = arith.constant 1.000000e+00 : f32
    %759 = vector.broadcast %cst_211 : f32 to vector<1x8x1xf32>
    %760 = arith.mulf %759, %758 : vector<1x8x1xf32>
    %761 = math.log %760 : vector<1x8x1xf32>
    %762 = arith.addf %670, %761 : vector<1x8x1xf32>
    %763 = vector.broadcast %748 : vector<1x8x1xf32> to vector<2x8x256xf32>
    %764 = arith.subf %737, %763 : vector<2x8x256xf32>
    %765 = vector.broadcast %760 : vector<1x8x1xf32> to vector<2x8x256xf32>
    %766 = arith.mulf %764, %765 : vector<2x8x256xf32>
    %c64 = arith.constant 64 : index
    %c0_212 = arith.constant 0 : index
    %c0_213 = arith.constant 0 : index
    %767 = vector.load %arg2[%c64, %c0_212, %c0_213] : memref<128x8x256xf32, #tpu.memory_space<vmem>>, vector<1x8x256xf32>
    %768 = vector.shape_cast %767 : vector<1x8x256xf32> to vector<8x256xf32>
    %769 = vector.shape_cast %768 : vector<8x256xf32> to vector<1x8x256xf32>
    %770 = vector.extract_strided_slice %766 {offsets = [0, 0, 0], sizes = [2, 1, 256], strides = [1, 1, 1]} : vector<2x8x256xf32> to vector<2x1x256xf32>
    %771 = vector.broadcast %769 : vector<1x8x256xf32> to vector<2x8x256xf32>
    %772 = vector.broadcast %770 : vector<2x1x256xf32> to vector<2x8x256xf32>
    %773 = arith.mulf %771, %772 : vector<2x8x256xf32>
    %c65 = arith.constant 65 : index
    %c0_214 = arith.constant 0 : index
    %c0_215 = arith.constant 0 : index
    %774 = vector.load %arg2[%c65, %c0_214, %c0_215] : memref<128x8x256xf32, #tpu.memory_space<vmem>>, vector<1x8x256xf32>
    %775 = vector.shape_cast %774 : vector<1x8x256xf32> to vector<8x256xf32>
    %776 = vector.shape_cast %775 : vector<8x256xf32> to vector<1x8x256xf32>
    %777 = vector.extract_strided_slice %766 {offsets = [0, 1, 0], sizes = [2, 1, 256], strides = [1, 1, 1]} : vector<2x8x256xf32> to vector<2x1x256xf32>
    %778 = vector.broadcast %776 : vector<1x8x256xf32> to vector<2x8x256xf32>
    %779 = vector.broadcast %777 : vector<2x1x256xf32> to vector<2x8x256xf32>
    %780 = arith.mulf %778, %779 : vector<2x8x256xf32>
    %781 = arith.addf %773, %780 : vector<2x8x256xf32>
    %c66 = arith.constant 66 : index
    %c0_216 = arith.constant 0 : index
    %c0_217 = arith.constant 0 : index
    %782 = vector.load %arg2[%c66, %c0_216, %c0_217] : memref<128x8x256xf32, #tpu.memory_space<vmem>>, vector<1x8x256xf32>
    %783 = vector.shape_cast %782 : vector<1x8x256xf32> to vector<8x256xf32>
    %784 = vector.shape_cast %783 : vector<8x256xf32> to vector<1x8x256xf32>
    %785 = vector.extract_strided_slice %766 {offsets = [0, 2, 0], sizes = [2, 1, 256], strides = [1, 1, 1]} : vector<2x8x256xf32> to vector<2x1x256xf32>
    %786 = vector.broadcast %784 : vector<1x8x256xf32> to vector<2x8x256xf32>
    %787 = vector.broadcast %785 : vector<2x1x256xf32> to vector<2x8x256xf32>
    %788 = arith.mulf %786, %787 : vector<2x8x256xf32>
    %789 = arith.addf %781, %788 : vector<2x8x256xf32>
    %c67 = arith.constant 67 : index
    %c0_218 = arith.constant 0 : index
    %c0_219 = arith.constant 0 : index
    %790 = vector.load %arg2[%c67, %c0_218, %c0_219] : memref<128x8x256xf32, #tpu.memory_space<vmem>>, vector<1x8x256xf32>
    %791 = vector.shape_cast %790 : vector<1x8x256xf32> to vector<8x256xf32>
    %792 = vector.shape_cast %791 : vector<8x256xf32> to vector<1x8x256xf32>
    %793 = vector.extract_strided_slice %766 {offsets = [0, 3, 0], sizes = [2, 1, 256], strides = [1, 1, 1]} : vector<2x8x256xf32> to vector<2x1x256xf32>
    %794 = vector.broadcast %792 : vector<1x8x256xf32> to vector<2x8x256xf32>
    %795 = vector.broadcast %793 : vector<2x1x256xf32> to vector<2x8x256xf32>
    %796 = arith.mulf %794, %795 : vector<2x8x256xf32>
    %797 = arith.addf %789, %796 : vector<2x8x256xf32>
    %c68 = arith.constant 68 : index
    %c0_220 = arith.constant 0 : index
    %c0_221 = arith.constant 0 : index
    %798 = vector.load %arg2[%c68, %c0_220, %c0_221] : memref<128x8x256xf32, #tpu.memory_space<vmem>>, vector<1x8x256xf32>
    %799 = vector.shape_cast %798 : vector<1x8x256xf32> to vector<8x256xf32>
    %800 = vector.shape_cast %799 : vector<8x256xf32> to vector<1x8x256xf32>
    %801 = vector.extract_strided_slice %766 {offsets = [0, 4, 0], sizes = [2, 1, 256], strides = [1, 1, 1]} : vector<2x8x256xf32> to vector<2x1x256xf32>
    %802 = vector.broadcast %800 : vector<1x8x256xf32> to vector<2x8x256xf32>
    %803 = vector.broadcast %801 : vector<2x1x256xf32> to vector<2x8x256xf32>
    %804 = arith.mulf %802, %803 : vector<2x8x256xf32>
    %c69 = arith.constant 69 : index
    %c0_222 = arith.constant 0 : index
    %c0_223 = arith.constant 0 : index
    %805 = vector.load %arg2[%c69, %c0_222, %c0_223] : memref<128x8x256xf32, #tpu.memory_space<vmem>>, vector<1x8x256xf32>
    %806 = vector.shape_cast %805 : vector<1x8x256xf32> to vector<8x256xf32>
    %807 = vector.shape_cast %806 : vector<8x256xf32> to vector<1x8x256xf32>
    %808 = vector.extract_strided_slice %766 {offsets = [0, 5, 0], sizes = [2, 1, 256], strides = [1, 1, 1]} : vector<2x8x256xf32> to vector<2x1x256xf32>
    %809 = vector.broadcast %807 : vector<1x8x256xf32> to vector<2x8x256xf32>
    %810 = vector.broadcast %808 : vector<2x1x256xf32> to vector<2x8x256xf32>
    %811 = arith.mulf %809, %810 : vector<2x8x256xf32>
    %812 = arith.addf %804, %811 : vector<2x8x256xf32>
    %c70 = arith.constant 70 : index
    %c0_224 = arith.constant 0 : index
    %c0_225 = arith.constant 0 : index
    %813 = vector.load %arg2[%c70, %c0_224, %c0_225] : memref<128x8x256xf32, #tpu.memory_space<vmem>>, vector<1x8x256xf32>
    %814 = vector.shape_cast %813 : vector<1x8x256xf32> to vector<8x256xf32>
    %815 = vector.shape_cast %814 : vector<8x256xf32> to vector<1x8x256xf32>
    %816 = vector.extract_strided_slice %766 {offsets = [0, 6, 0], sizes = [2, 1, 256], strides = [1, 1, 1]} : vector<2x8x256xf32> to vector<2x1x256xf32>
    %817 = vector.broadcast %815 : vector<1x8x256xf32> to vector<2x8x256xf32>
    %818 = vector.broadcast %816 : vector<2x1x256xf32> to vector<2x8x256xf32>
    %819 = arith.mulf %817, %818 : vector<2x8x256xf32>
    %820 = arith.addf %812, %819 : vector<2x8x256xf32>
    %c71 = arith.constant 71 : index
    %c0_226 = arith.constant 0 : index
    %c0_227 = arith.constant 0 : index
    %821 = vector.load %arg2[%c71, %c0_226, %c0_227] : memref<128x8x256xf32, #tpu.memory_space<vmem>>, vector<1x8x256xf32>
    %822 = vector.shape_cast %821 : vector<1x8x256xf32> to vector<8x256xf32>
    %823 = vector.shape_cast %822 : vector<8x256xf32> to vector<1x8x256xf32>
    %824 = vector.extract_strided_slice %766 {offsets = [0, 7, 0], sizes = [2, 1, 256], strides = [1, 1, 1]} : vector<2x8x256xf32> to vector<2x1x256xf32>
    %825 = vector.broadcast %823 : vector<1x8x256xf32> to vector<2x8x256xf32>
    %826 = vector.broadcast %824 : vector<2x1x256xf32> to vector<2x8x256xf32>
    %827 = arith.mulf %825, %826 : vector<2x8x256xf32>
    %828 = arith.addf %820, %827 : vector<2x8x256xf32>
    %829 = arith.addf %797, %828 : vector<2x8x256xf32>
    %cst_228 = arith.constant dense<0.000000e+00> : vector<2x8xf32>
    %830 = vector.multi_reduction <add>, %829, %cst_228 [2] : vector<2x8x256xf32> to vector<2x8xf32>
    %831 = vector.shape_cast %830 : vector<2x8xf32> to vector<2x8x1xf32>
    %cst_229 = arith.constant dense<0.000000e+00> : vector<8x1xf32>
    %832 = vector.multi_reduction <add>, %831, %cst_229 [0] : vector<2x8x1xf32> to vector<8x1xf32>
    %833 = vector.shape_cast %832 : vector<8x1xf32> to vector<1x8x1xf32>
    %834 = arith.mulf %829, %829 : vector<2x8x256xf32>
    %cst_230 = arith.constant dense<0.000000e+00> : vector<2x8xf32>
    %835 = vector.multi_reduction <add>, %834, %cst_230 [2] : vector<2x8x256xf32> to vector<2x8xf32>
    %836 = vector.shape_cast %835 : vector<2x8xf32> to vector<2x8x1xf32>
    %cst_231 = arith.constant dense<0.000000e+00> : vector<8x1xf32>
    %837 = vector.multi_reduction <add>, %836, %cst_231 [0] : vector<2x8x1xf32> to vector<8x1xf32>
    %838 = vector.shape_cast %837 : vector<8x1xf32> to vector<1x8x1xf32>
    %cst_232 = arith.constant 0.001953125 : f32
    %839 = vector.broadcast %cst_232 : f32 to vector<1x8x1xf32>
    %840 = arith.mulf %833, %839 : vector<1x8x1xf32>
    %cst_233 = arith.constant 0.001953125 : f32
    %841 = vector.broadcast %cst_233 : f32 to vector<1x8x1xf32>
    %842 = arith.mulf %838, %841 : vector<1x8x1xf32>
    %843 = arith.mulf %840, %840 : vector<1x8x1xf32>
    %844 = arith.subf %842, %843 : vector<1x8x1xf32>
    %cst_234 = arith.constant 0.000000e+00 : f32
    %845 = vector.broadcast %cst_234 : f32 to vector<1x8x1xf32>
    %846 = arith.maximumf %844, %845 : vector<1x8x1xf32>
    %847 = math.sqrt %846 : vector<1x8x1xf32>
    %cst_235 = arith.constant 9.99999997E-7 : f32
    %848 = vector.broadcast %cst_235 : f32 to vector<1x8x1xf32>
    %849 = arith.addf %847, %848 : vector<1x8x1xf32>
    %850 = tpu.reciprocal %849 : vector<1x8x1xf32> -> vector<1x8x1xf32>
    %cst_236 = arith.constant 1.000000e+00 : f32
    %851 = vector.broadcast %cst_236 : f32 to vector<1x8x1xf32>
    %852 = arith.mulf %851, %850 : vector<1x8x1xf32>
    %853 = math.log %852 : vector<1x8x1xf32>
    %854 = arith.addf %762, %853 : vector<1x8x1xf32>
    %855 = vector.broadcast %840 : vector<1x8x1xf32> to vector<2x8x256xf32>
    %856 = arith.subf %829, %855 : vector<2x8x256xf32>
    %857 = vector.broadcast %852 : vector<1x8x1xf32> to vector<2x8x256xf32>
    %858 = arith.mulf %856, %857 : vector<2x8x256xf32>
    %c72 = arith.constant 72 : index
    %c0_237 = arith.constant 0 : index
    %c0_238 = arith.constant 0 : index
    %859 = vector.load %arg2[%c72, %c0_237, %c0_238] : memref<128x8x256xf32, #tpu.memory_space<vmem>>, vector<1x8x256xf32>
    %860 = vector.shape_cast %859 : vector<1x8x256xf32> to vector<8x256xf32>
    %861 = vector.shape_cast %860 : vector<8x256xf32> to vector<1x8x256xf32>
    %862 = vector.extract_strided_slice %858 {offsets = [0, 0, 0], sizes = [2, 1, 256], strides = [1, 1, 1]} : vector<2x8x256xf32> to vector<2x1x256xf32>
    %863 = vector.broadcast %861 : vector<1x8x256xf32> to vector<2x8x256xf32>
    %864 = vector.broadcast %862 : vector<2x1x256xf32> to vector<2x8x256xf32>
    %865 = arith.mulf %863, %864 : vector<2x8x256xf32>
    %c73 = arith.constant 73 : index
    %c0_239 = arith.constant 0 : index
    %c0_240 = arith.constant 0 : index
    %866 = vector.load %arg2[%c73, %c0_239, %c0_240] : memref<128x8x256xf32, #tpu.memory_space<vmem>>, vector<1x8x256xf32>
    %867 = vector.shape_cast %866 : vector<1x8x256xf32> to vector<8x256xf32>
    %868 = vector.shape_cast %867 : vector<8x256xf32> to vector<1x8x256xf32>
    %869 = vector.extract_strided_slice %858 {offsets = [0, 1, 0], sizes = [2, 1, 256], strides = [1, 1, 1]} : vector<2x8x256xf32> to vector<2x1x256xf32>
    %870 = vector.broadcast %868 : vector<1x8x256xf32> to vector<2x8x256xf32>
    %871 = vector.broadcast %869 : vector<2x1x256xf32> to vector<2x8x256xf32>
    %872 = arith.mulf %870, %871 : vector<2x8x256xf32>
    %873 = arith.addf %865, %872 : vector<2x8x256xf32>
    %c74 = arith.constant 74 : index
    %c0_241 = arith.constant 0 : index
    %c0_242 = arith.constant 0 : index
    %874 = vector.load %arg2[%c74, %c0_241, %c0_242] : memref<128x8x256xf32, #tpu.memory_space<vmem>>, vector<1x8x256xf32>
    %875 = vector.shape_cast %874 : vector<1x8x256xf32> to vector<8x256xf32>
    %876 = vector.shape_cast %875 : vector<8x256xf32> to vector<1x8x256xf32>
    %877 = vector.extract_strided_slice %858 {offsets = [0, 2, 0], sizes = [2, 1, 256], strides = [1, 1, 1]} : vector<2x8x256xf32> to vector<2x1x256xf32>
    %878 = vector.broadcast %876 : vector<1x8x256xf32> to vector<2x8x256xf32>
    %879 = vector.broadcast %877 : vector<2x1x256xf32> to vector<2x8x256xf32>
    %880 = arith.mulf %878, %879 : vector<2x8x256xf32>
    %881 = arith.addf %873, %880 : vector<2x8x256xf32>
    %c75 = arith.constant 75 : index
    %c0_243 = arith.constant 0 : index
    %c0_244 = arith.constant 0 : index
    %882 = vector.load %arg2[%c75, %c0_243, %c0_244] : memref<128x8x256xf32, #tpu.memory_space<vmem>>, vector<1x8x256xf32>
    %883 = vector.shape_cast %882 : vector<1x8x256xf32> to vector<8x256xf32>
    %884 = vector.shape_cast %883 : vector<8x256xf32> to vector<1x8x256xf32>
    %885 = vector.extract_strided_slice %858 {offsets = [0, 3, 0], sizes = [2, 1, 256], strides = [1, 1, 1]} : vector<2x8x256xf32> to vector<2x1x256xf32>
    %886 = vector.broadcast %884 : vector<1x8x256xf32> to vector<2x8x256xf32>
    %887 = vector.broadcast %885 : vector<2x1x256xf32> to vector<2x8x256xf32>
    %888 = arith.mulf %886, %887 : vector<2x8x256xf32>
    %889 = arith.addf %881, %888 : vector<2x8x256xf32>
    %c76 = arith.constant 76 : index
    %c0_245 = arith.constant 0 : index
    %c0_246 = arith.constant 0 : index
    %890 = vector.load %arg2[%c76, %c0_245, %c0_246] : memref<128x8x256xf32, #tpu.memory_space<vmem>>, vector<1x8x256xf32>
    %891 = vector.shape_cast %890 : vector<1x8x256xf32> to vector<8x256xf32>
    %892 = vector.shape_cast %891 : vector<8x256xf32> to vector<1x8x256xf32>
    %893 = vector.extract_strided_slice %858 {offsets = [0, 4, 0], sizes = [2, 1, 256], strides = [1, 1, 1]} : vector<2x8x256xf32> to vector<2x1x256xf32>
    %894 = vector.broadcast %892 : vector<1x8x256xf32> to vector<2x8x256xf32>
    %895 = vector.broadcast %893 : vector<2x1x256xf32> to vector<2x8x256xf32>
    %896 = arith.mulf %894, %895 : vector<2x8x256xf32>
    %c77 = arith.constant 77 : index
    %c0_247 = arith.constant 0 : index
    %c0_248 = arith.constant 0 : index
    %897 = vector.load %arg2[%c77, %c0_247, %c0_248] : memref<128x8x256xf32, #tpu.memory_space<vmem>>, vector<1x8x256xf32>
    %898 = vector.shape_cast %897 : vector<1x8x256xf32> to vector<8x256xf32>
    %899 = vector.shape_cast %898 : vector<8x256xf32> to vector<1x8x256xf32>
    %900 = vector.extract_strided_slice %858 {offsets = [0, 5, 0], sizes = [2, 1, 256], strides = [1, 1, 1]} : vector<2x8x256xf32> to vector<2x1x256xf32>
    %901 = vector.broadcast %899 : vector<1x8x256xf32> to vector<2x8x256xf32>
    %902 = vector.broadcast %900 : vector<2x1x256xf32> to vector<2x8x256xf32>
    %903 = arith.mulf %901, %902 : vector<2x8x256xf32>
    %904 = arith.addf %896, %903 : vector<2x8x256xf32>
    %c78 = arith.constant 78 : index
    %c0_249 = arith.constant 0 : index
    %c0_250 = arith.constant 0 : index
    %905 = vector.load %arg2[%c78, %c0_249, %c0_250] : memref<128x8x256xf32, #tpu.memory_space<vmem>>, vector<1x8x256xf32>
    %906 = vector.shape_cast %905 : vector<1x8x256xf32> to vector<8x256xf32>
    %907 = vector.shape_cast %906 : vector<8x256xf32> to vector<1x8x256xf32>
    %908 = vector.extract_strided_slice %858 {offsets = [0, 6, 0], sizes = [2, 1, 256], strides = [1, 1, 1]} : vector<2x8x256xf32> to vector<2x1x256xf32>
    %909 = vector.broadcast %907 : vector<1x8x256xf32> to vector<2x8x256xf32>
    %910 = vector.broadcast %908 : vector<2x1x256xf32> to vector<2x8x256xf32>
    %911 = arith.mulf %909, %910 : vector<2x8x256xf32>
    %912 = arith.addf %904, %911 : vector<2x8x256xf32>
    %c79 = arith.constant 79 : index
    %c0_251 = arith.constant 0 : index
    %c0_252 = arith.constant 0 : index
    %913 = vector.load %arg2[%c79, %c0_251, %c0_252] : memref<128x8x256xf32, #tpu.memory_space<vmem>>, vector<1x8x256xf32>
    %914 = vector.shape_cast %913 : vector<1x8x256xf32> to vector<8x256xf32>
    %915 = vector.shape_cast %914 : vector<8x256xf32> to vector<1x8x256xf32>
    %916 = vector.extract_strided_slice %858 {offsets = [0, 7, 0], sizes = [2, 1, 256], strides = [1, 1, 1]} : vector<2x8x256xf32> to vector<2x1x256xf32>
    %917 = vector.broadcast %915 : vector<1x8x256xf32> to vector<2x8x256xf32>
    %918 = vector.broadcast %916 : vector<2x1x256xf32> to vector<2x8x256xf32>
    %919 = arith.mulf %917, %918 : vector<2x8x256xf32>
    %920 = arith.addf %912, %919 : vector<2x8x256xf32>
    %921 = arith.addf %889, %920 : vector<2x8x256xf32>
    %cst_253 = arith.constant dense<0.000000e+00> : vector<2x8xf32>
    %922 = vector.multi_reduction <add>, %921, %cst_253 [2] : vector<2x8x256xf32> to vector<2x8xf32>
    %923 = vector.shape_cast %922 : vector<2x8xf32> to vector<2x8x1xf32>
    %cst_254 = arith.constant dense<0.000000e+00> : vector<8x1xf32>
    %924 = vector.multi_reduction <add>, %923, %cst_254 [0] : vector<2x8x1xf32> to vector<8x1xf32>
    %925 = vector.shape_cast %924 : vector<8x1xf32> to vector<1x8x1xf32>
    %926 = arith.mulf %921, %921 : vector<2x8x256xf32>
    %cst_255 = arith.constant dense<0.000000e+00> : vector<2x8xf32>
    %927 = vector.multi_reduction <add>, %926, %cst_255 [2] : vector<2x8x256xf32> to vector<2x8xf32>
    %928 = vector.shape_cast %927 : vector<2x8xf32> to vector<2x8x1xf32>
    %cst_256 = arith.constant dense<0.000000e+00> : vector<8x1xf32>
    %929 = vector.multi_reduction <add>, %928, %cst_256 [0] : vector<2x8x1xf32> to vector<8x1xf32>
    %930 = vector.shape_cast %929 : vector<8x1xf32> to vector<1x8x1xf32>
    %cst_257 = arith.constant 0.001953125 : f32
    %931 = vector.broadcast %cst_257 : f32 to vector<1x8x1xf32>
    %932 = arith.mulf %925, %931 : vector<1x8x1xf32>
    %cst_258 = arith.constant 0.001953125 : f32
    %933 = vector.broadcast %cst_258 : f32 to vector<1x8x1xf32>
    %934 = arith.mulf %930, %933 : vector<1x8x1xf32>
    %935 = arith.mulf %932, %932 : vector<1x8x1xf32>
    %936 = arith.subf %934, %935 : vector<1x8x1xf32>
    %cst_259 = arith.constant 0.000000e+00 : f32
    %937 = vector.broadcast %cst_259 : f32 to vector<1x8x1xf32>
    %938 = arith.maximumf %936, %937 : vector<1x8x1xf32>
    %939 = math.sqrt %938 : vector<1x8x1xf32>
    %cst_260 = arith.constant 9.99999997E-7 : f32
    %940 = vector.broadcast %cst_260 : f32 to vector<1x8x1xf32>
    %941 = arith.addf %939, %940 : vector<1x8x1xf32>
    %942 = tpu.reciprocal %941 : vector<1x8x1xf32> -> vector<1x8x1xf32>
    %cst_261 = arith.constant 1.000000e+00 : f32
    %943 = vector.broadcast %cst_261 : f32 to vector<1x8x1xf32>
    %944 = arith.mulf %943, %942 : vector<1x8x1xf32>
    %945 = math.log %944 : vector<1x8x1xf32>
    %946 = arith.addf %854, %945 : vector<1x8x1xf32>
    %947 = vector.broadcast %932 : vector<1x8x1xf32> to vector<2x8x256xf32>
    %948 = arith.subf %921, %947 : vector<2x8x256xf32>
    %949 = vector.broadcast %944 : vector<1x8x1xf32> to vector<2x8x256xf32>
    %950 = arith.mulf %948, %949 : vector<2x8x256xf32>
    %c80 = arith.constant 80 : index
    %c0_262 = arith.constant 0 : index
    %c0_263 = arith.constant 0 : index
    %951 = vector.load %arg2[%c80, %c0_262, %c0_263] : memref<128x8x256xf32, #tpu.memory_space<vmem>>, vector<1x8x256xf32>
    %952 = vector.shape_cast %951 : vector<1x8x256xf32> to vector<8x256xf32>
    %953 = vector.shape_cast %952 : vector<8x256xf32> to vector<1x8x256xf32>
    %954 = vector.extract_strided_slice %950 {offsets = [0, 0, 0], sizes = [2, 1, 256], strides = [1, 1, 1]} : vector<2x8x256xf32> to vector<2x1x256xf32>
    %955 = vector.broadcast %953 : vector<1x8x256xf32> to vector<2x8x256xf32>
    %956 = vector.broadcast %954 : vector<2x1x256xf32> to vector<2x8x256xf32>
    %957 = arith.mulf %955, %956 : vector<2x8x256xf32>
    %c81 = arith.constant 81 : index
    %c0_264 = arith.constant 0 : index
    %c0_265 = arith.constant 0 : index
    %958 = vector.load %arg2[%c81, %c0_264, %c0_265] : memref<128x8x256xf32, #tpu.memory_space<vmem>>, vector<1x8x256xf32>
    %959 = vector.shape_cast %958 : vector<1x8x256xf32> to vector<8x256xf32>
    %960 = vector.shape_cast %959 : vector<8x256xf32> to vector<1x8x256xf32>
    %961 = vector.extract_strided_slice %950 {offsets = [0, 1, 0], sizes = [2, 1, 256], strides = [1, 1, 1]} : vector<2x8x256xf32> to vector<2x1x256xf32>
    %962 = vector.broadcast %960 : vector<1x8x256xf32> to vector<2x8x256xf32>
    %963 = vector.broadcast %961 : vector<2x1x256xf32> to vector<2x8x256xf32>
    %964 = arith.mulf %962, %963 : vector<2x8x256xf32>
    %965 = arith.addf %957, %964 : vector<2x8x256xf32>
    %c82 = arith.constant 82 : index
    %c0_266 = arith.constant 0 : index
    %c0_267 = arith.constant 0 : index
    %966 = vector.load %arg2[%c82, %c0_266, %c0_267] : memref<128x8x256xf32, #tpu.memory_space<vmem>>, vector<1x8x256xf32>
    %967 = vector.shape_cast %966 : vector<1x8x256xf32> to vector<8x256xf32>
    %968 = vector.shape_cast %967 : vector<8x256xf32> to vector<1x8x256xf32>
    %969 = vector.extract_strided_slice %950 {offsets = [0, 2, 0], sizes = [2, 1, 256], strides = [1, 1, 1]} : vector<2x8x256xf32> to vector<2x1x256xf32>
    %970 = vector.broadcast %968 : vector<1x8x256xf32> to vector<2x8x256xf32>
    %971 = vector.broadcast %969 : vector<2x1x256xf32> to vector<2x8x256xf32>
    %972 = arith.mulf %970, %971 : vector<2x8x256xf32>
    %973 = arith.addf %965, %972 : vector<2x8x256xf32>
    %c83 = arith.constant 83 : index
    %c0_268 = arith.constant 0 : index
    %c0_269 = arith.constant 0 : index
    %974 = vector.load %arg2[%c83, %c0_268, %c0_269] : memref<128x8x256xf32, #tpu.memory_space<vmem>>, vector<1x8x256xf32>
    %975 = vector.shape_cast %974 : vector<1x8x256xf32> to vector<8x256xf32>
    %976 = vector.shape_cast %975 : vector<8x256xf32> to vector<1x8x256xf32>
    %977 = vector.extract_strided_slice %950 {offsets = [0, 3, 0], sizes = [2, 1, 256], strides = [1, 1, 1]} : vector<2x8x256xf32> to vector<2x1x256xf32>
    %978 = vector.broadcast %976 : vector<1x8x256xf32> to vector<2x8x256xf32>
    %979 = vector.broadcast %977 : vector<2x1x256xf32> to vector<2x8x256xf32>
    %980 = arith.mulf %978, %979 : vector<2x8x256xf32>
    %981 = arith.addf %973, %980 : vector<2x8x256xf32>
    %c84 = arith.constant 84 : index
    %c0_270 = arith.constant 0 : index
    %c0_271 = arith.constant 0 : index
    %982 = vector.load %arg2[%c84, %c0_270, %c0_271] : memref<128x8x256xf32, #tpu.memory_space<vmem>>, vector<1x8x256xf32>
    %983 = vector.shape_cast %982 : vector<1x8x256xf32> to vector<8x256xf32>
    %984 = vector.shape_cast %983 : vector<8x256xf32> to vector<1x8x256xf32>
    %985 = vector.extract_strided_slice %950 {offsets = [0, 4, 0], sizes = [2, 1, 256], strides = [1, 1, 1]} : vector<2x8x256xf32> to vector<2x1x256xf32>
    %986 = vector.broadcast %984 : vector<1x8x256xf32> to vector<2x8x256xf32>
    %987 = vector.broadcast %985 : vector<2x1x256xf32> to vector<2x8x256xf32>
    %988 = arith.mulf %986, %987 : vector<2x8x256xf32>
    %c85 = arith.constant 85 : index
    %c0_272 = arith.constant 0 : index
    %c0_273 = arith.constant 0 : index
    %989 = vector.load %arg2[%c85, %c0_272, %c0_273] : memref<128x8x256xf32, #tpu.memory_space<vmem>>, vector<1x8x256xf32>
    %990 = vector.shape_cast %989 : vector<1x8x256xf32> to vector<8x256xf32>
    %991 = vector.shape_cast %990 : vector<8x256xf32> to vector<1x8x256xf32>
    %992 = vector.extract_strided_slice %950 {offsets = [0, 5, 0], sizes = [2, 1, 256], strides = [1, 1, 1]} : vector<2x8x256xf32> to vector<2x1x256xf32>
    %993 = vector.broadcast %991 : vector<1x8x256xf32> to vector<2x8x256xf32>
    %994 = vector.broadcast %992 : vector<2x1x256xf32> to vector<2x8x256xf32>
    %995 = arith.mulf %993, %994 : vector<2x8x256xf32>
    %996 = arith.addf %988, %995 : vector<2x8x256xf32>
    %c86 = arith.constant 86 : index
    %c0_274 = arith.constant 0 : index
    %c0_275 = arith.constant 0 : index
    %997 = vector.load %arg2[%c86, %c0_274, %c0_275] : memref<128x8x256xf32, #tpu.memory_space<vmem>>, vector<1x8x256xf32>
    %998 = vector.shape_cast %997 : vector<1x8x256xf32> to vector<8x256xf32>
    %999 = vector.shape_cast %998 : vector<8x256xf32> to vector<1x8x256xf32>
    %1000 = vector.extract_strided_slice %950 {offsets = [0, 6, 0], sizes = [2, 1, 256], strides = [1, 1, 1]} : vector<2x8x256xf32> to vector<2x1x256xf32>
    %1001 = vector.broadcast %999 : vector<1x8x256xf32> to vector<2x8x256xf32>
    %1002 = vector.broadcast %1000 : vector<2x1x256xf32> to vector<2x8x256xf32>
    %1003 = arith.mulf %1001, %1002 : vector<2x8x256xf32>
    %1004 = arith.addf %996, %1003 : vector<2x8x256xf32>
    %c87 = arith.constant 87 : index
    %c0_276 = arith.constant 0 : index
    %c0_277 = arith.constant 0 : index
    %1005 = vector.load %arg2[%c87, %c0_276, %c0_277] : memref<128x8x256xf32, #tpu.memory_space<vmem>>, vector<1x8x256xf32>
    %1006 = vector.shape_cast %1005 : vector<1x8x256xf32> to vector<8x256xf32>
    %1007 = vector.shape_cast %1006 : vector<8x256xf32> to vector<1x8x256xf32>
    %1008 = vector.extract_strided_slice %950 {offsets = [0, 7, 0], sizes = [2, 1, 256], strides = [1, 1, 1]} : vector<2x8x256xf32> to vector<2x1x256xf32>
    %1009 = vector.broadcast %1007 : vector<1x8x256xf32> to vector<2x8x256xf32>
    %1010 = vector.broadcast %1008 : vector<2x1x256xf32> to vector<2x8x256xf32>
    %1011 = arith.mulf %1009, %1010 : vector<2x8x256xf32>
    %1012 = arith.addf %1004, %1011 : vector<2x8x256xf32>
    %1013 = arith.addf %981, %1012 : vector<2x8x256xf32>
    %cst_278 = arith.constant dense<0.000000e+00> : vector<2x8xf32>
    %1014 = vector.multi_reduction <add>, %1013, %cst_278 [2] : vector<2x8x256xf32> to vector<2x8xf32>
    %1015 = vector.shape_cast %1014 : vector<2x8xf32> to vector<2x8x1xf32>
    %cst_279 = arith.constant dense<0.000000e+00> : vector<8x1xf32>
    %1016 = vector.multi_reduction <add>, %1015, %cst_279 [0] : vector<2x8x1xf32> to vector<8x1xf32>
    %1017 = vector.shape_cast %1016 : vector<8x1xf32> to vector<1x8x1xf32>
    %1018 = arith.mulf %1013, %1013 : vector<2x8x256xf32>
    %cst_280 = arith.constant dense<0.000000e+00> : vector<2x8xf32>
    %1019 = vector.multi_reduction <add>, %1018, %cst_280 [2] : vector<2x8x256xf32> to vector<2x8xf32>
    %1020 = vector.shape_cast %1019 : vector<2x8xf32> to vector<2x8x1xf32>
    %cst_281 = arith.constant dense<0.000000e+00> : vector<8x1xf32>
    %1021 = vector.multi_reduction <add>, %1020, %cst_281 [0] : vector<2x8x1xf32> to vector<8x1xf32>
    %1022 = vector.shape_cast %1021 : vector<8x1xf32> to vector<1x8x1xf32>
    %cst_282 = arith.constant 0.001953125 : f32
    %1023 = vector.broadcast %cst_282 : f32 to vector<1x8x1xf32>
    %1024 = arith.mulf %1017, %1023 : vector<1x8x1xf32>
    %cst_283 = arith.constant 0.001953125 : f32
    %1025 = vector.broadcast %cst_283 : f32 to vector<1x8x1xf32>
    %1026 = arith.mulf %1022, %1025 : vector<1x8x1xf32>
    %1027 = arith.mulf %1024, %1024 : vector<1x8x1xf32>
    %1028 = arith.subf %1026, %1027 : vector<1x8x1xf32>
    %cst_284 = arith.constant 0.000000e+00 : f32
    %1029 = vector.broadcast %cst_284 : f32 to vector<1x8x1xf32>
    %1030 = arith.maximumf %1028, %1029 : vector<1x8x1xf32>
    %1031 = math.sqrt %1030 : vector<1x8x1xf32>
    %cst_285 = arith.constant 9.99999997E-7 : f32
    %1032 = vector.broadcast %cst_285 : f32 to vector<1x8x1xf32>
    %1033 = arith.addf %1031, %1032 : vector<1x8x1xf32>
    %1034 = tpu.reciprocal %1033 : vector<1x8x1xf32> -> vector<1x8x1xf32>
    %cst_286 = arith.constant 1.000000e+00 : f32
    %1035 = vector.broadcast %cst_286 : f32 to vector<1x8x1xf32>
    %1036 = arith.mulf %1035, %1034 : vector<1x8x1xf32>
    %1037 = math.log %1036 : vector<1x8x1xf32>
    %1038 = arith.addf %946, %1037 : vector<1x8x1xf32>
    %1039 = vector.broadcast %1024 : vector<1x8x1xf32> to vector<2x8x256xf32>
    %1040 = arith.subf %1013, %1039 : vector<2x8x256xf32>
    %1041 = vector.broadcast %1036 : vector<1x8x1xf32> to vector<2x8x256xf32>
    %1042 = arith.mulf %1040, %1041 : vector<2x8x256xf32>
    %c88 = arith.constant 88 : index
    %c0_287 = arith.constant 0 : index
    %c0_288 = arith.constant 0 : index
    %1043 = vector.load %arg2[%c88, %c0_287, %c0_288] : memref<128x8x256xf32, #tpu.memory_space<vmem>>, vector<1x8x256xf32>
    %1044 = vector.shape_cast %1043 : vector<1x8x256xf32> to vector<8x256xf32>
    %1045 = vector.shape_cast %1044 : vector<8x256xf32> to vector<1x8x256xf32>
    %1046 = vector.extract_strided_slice %1042 {offsets = [0, 0, 0], sizes = [2, 1, 256], strides = [1, 1, 1]} : vector<2x8x256xf32> to vector<2x1x256xf32>
    %1047 = vector.broadcast %1045 : vector<1x8x256xf32> to vector<2x8x256xf32>
    %1048 = vector.broadcast %1046 : vector<2x1x256xf32> to vector<2x8x256xf32>
    %1049 = arith.mulf %1047, %1048 : vector<2x8x256xf32>
    %c89 = arith.constant 89 : index
    %c0_289 = arith.constant 0 : index
    %c0_290 = arith.constant 0 : index
    %1050 = vector.load %arg2[%c89, %c0_289, %c0_290] : memref<128x8x256xf32, #tpu.memory_space<vmem>>, vector<1x8x256xf32>
    %1051 = vector.shape_cast %1050 : vector<1x8x256xf32> to vector<8x256xf32>
    %1052 = vector.shape_cast %1051 : vector<8x256xf32> to vector<1x8x256xf32>
    %1053 = vector.extract_strided_slice %1042 {offsets = [0, 1, 0], sizes = [2, 1, 256], strides = [1, 1, 1]} : vector<2x8x256xf32> to vector<2x1x256xf32>
    %1054 = vector.broadcast %1052 : vector<1x8x256xf32> to vector<2x8x256xf32>
    %1055 = vector.broadcast %1053 : vector<2x1x256xf32> to vector<2x8x256xf32>
    %1056 = arith.mulf %1054, %1055 : vector<2x8x256xf32>
    %1057 = arith.addf %1049, %1056 : vector<2x8x256xf32>
    %c90 = arith.constant 90 : index
    %c0_291 = arith.constant 0 : index
    %c0_292 = arith.constant 0 : index
    %1058 = vector.load %arg2[%c90, %c0_291, %c0_292] : memref<128x8x256xf32, #tpu.memory_space<vmem>>, vector<1x8x256xf32>
    %1059 = vector.shape_cast %1058 : vector<1x8x256xf32> to vector<8x256xf32>
    %1060 = vector.shape_cast %1059 : vector<8x256xf32> to vector<1x8x256xf32>
    %1061 = vector.extract_strided_slice %1042 {offsets = [0, 2, 0], sizes = [2, 1, 256], strides = [1, 1, 1]} : vector<2x8x256xf32> to vector<2x1x256xf32>
    %1062 = vector.broadcast %1060 : vector<1x8x256xf32> to vector<2x8x256xf32>
    %1063 = vector.broadcast %1061 : vector<2x1x256xf32> to vector<2x8x256xf32>
    %1064 = arith.mulf %1062, %1063 : vector<2x8x256xf32>
    %1065 = arith.addf %1057, %1064 : vector<2x8x256xf32>
    %c91 = arith.constant 91 : index
    %c0_293 = arith.constant 0 : index
    %c0_294 = arith.constant 0 : index
    %1066 = vector.load %arg2[%c91, %c0_293, %c0_294] : memref<128x8x256xf32, #tpu.memory_space<vmem>>, vector<1x8x256xf32>
    %1067 = vector.shape_cast %1066 : vector<1x8x256xf32> to vector<8x256xf32>
    %1068 = vector.shape_cast %1067 : vector<8x256xf32> to vector<1x8x256xf32>
    %1069 = vector.extract_strided_slice %1042 {offsets = [0, 3, 0], sizes = [2, 1, 256], strides = [1, 1, 1]} : vector<2x8x256xf32> to vector<2x1x256xf32>
    %1070 = vector.broadcast %1068 : vector<1x8x256xf32> to vector<2x8x256xf32>
    %1071 = vector.broadcast %1069 : vector<2x1x256xf32> to vector<2x8x256xf32>
    %1072 = arith.mulf %1070, %1071 : vector<2x8x256xf32>
    %1073 = arith.addf %1065, %1072 : vector<2x8x256xf32>
    %c92 = arith.constant 92 : index
    %c0_295 = arith.constant 0 : index
    %c0_296 = arith.constant 0 : index
    %1074 = vector.load %arg2[%c92, %c0_295, %c0_296] : memref<128x8x256xf32, #tpu.memory_space<vmem>>, vector<1x8x256xf32>
    %1075 = vector.shape_cast %1074 : vector<1x8x256xf32> to vector<8x256xf32>
    %1076 = vector.shape_cast %1075 : vector<8x256xf32> to vector<1x8x256xf32>
    %1077 = vector.extract_strided_slice %1042 {offsets = [0, 4, 0], sizes = [2, 1, 256], strides = [1, 1, 1]} : vector<2x8x256xf32> to vector<2x1x256xf32>
    %1078 = vector.broadcast %1076 : vector<1x8x256xf32> to vector<2x8x256xf32>
    %1079 = vector.broadcast %1077 : vector<2x1x256xf32> to vector<2x8x256xf32>
    %1080 = arith.mulf %1078, %1079 : vector<2x8x256xf32>
    %c93 = arith.constant 93 : index
    %c0_297 = arith.constant 0 : index
    %c0_298 = arith.constant 0 : index
    %1081 = vector.load %arg2[%c93, %c0_297, %c0_298] : memref<128x8x256xf32, #tpu.memory_space<vmem>>, vector<1x8x256xf32>
    %1082 = vector.shape_cast %1081 : vector<1x8x256xf32> to vector<8x256xf32>
    %1083 = vector.shape_cast %1082 : vector<8x256xf32> to vector<1x8x256xf32>
    %1084 = vector.extract_strided_slice %1042 {offsets = [0, 5, 0], sizes = [2, 1, 256], strides = [1, 1, 1]} : vector<2x8x256xf32> to vector<2x1x256xf32>
    %1085 = vector.broadcast %1083 : vector<1x8x256xf32> to vector<2x8x256xf32>
    %1086 = vector.broadcast %1084 : vector<2x1x256xf32> to vector<2x8x256xf32>
    %1087 = arith.mulf %1085, %1086 : vector<2x8x256xf32>
    %1088 = arith.addf %1080, %1087 : vector<2x8x256xf32>
    %c94 = arith.constant 94 : index
    %c0_299 = arith.constant 0 : index
    %c0_300 = arith.constant 0 : index
    %1089 = vector.load %arg2[%c94, %c0_299, %c0_300] : memref<128x8x256xf32, #tpu.memory_space<vmem>>, vector<1x8x256xf32>
    %1090 = vector.shape_cast %1089 : vector<1x8x256xf32> to vector<8x256xf32>
    %1091 = vector.shape_cast %1090 : vector<8x256xf32> to vector<1x8x256xf32>
    %1092 = vector.extract_strided_slice %1042 {offsets = [0, 6, 0], sizes = [2, 1, 256], strides = [1, 1, 1]} : vector<2x8x256xf32> to vector<2x1x256xf32>
    %1093 = vector.broadcast %1091 : vector<1x8x256xf32> to vector<2x8x256xf32>
    %1094 = vector.broadcast %1092 : vector<2x1x256xf32> to vector<2x8x256xf32>
    %1095 = arith.mulf %1093, %1094 : vector<2x8x256xf32>
    %1096 = arith.addf %1088, %1095 : vector<2x8x256xf32>
    %c95 = arith.constant 95 : index
    %c0_301 = arith.constant 0 : index
    %c0_302 = arith.constant 0 : index
    %1097 = vector.load %arg2[%c95, %c0_301, %c0_302] : memref<128x8x256xf32, #tpu.memory_space<vmem>>, vector<1x8x256xf32>
    %1098 = vector.shape_cast %1097 : vector<1x8x256xf32> to vector<8x256xf32>
    %1099 = vector.shape_cast %1098 : vector<8x256xf32> to vector<1x8x256xf32>
    %1100 = vector.extract_strided_slice %1042 {offsets = [0, 7, 0], sizes = [2, 1, 256], strides = [1, 1, 1]} : vector<2x8x256xf32> to vector<2x1x256xf32>
    %1101 = vector.broadcast %1099 : vector<1x8x256xf32> to vector<2x8x256xf32>
    %1102 = vector.broadcast %1100 : vector<2x1x256xf32> to vector<2x8x256xf32>
    %1103 = arith.mulf %1101, %1102 : vector<2x8x256xf32>
    %1104 = arith.addf %1096, %1103 : vector<2x8x256xf32>
    %1105 = arith.addf %1073, %1104 : vector<2x8x256xf32>
    %cst_303 = arith.constant dense<0.000000e+00> : vector<2x8xf32>
    %1106 = vector.multi_reduction <add>, %1105, %cst_303 [2] : vector<2x8x256xf32> to vector<2x8xf32>
    %1107 = vector.shape_cast %1106 : vector<2x8xf32> to vector<2x8x1xf32>
    %cst_304 = arith.constant dense<0.000000e+00> : vector<8x1xf32>
    %1108 = vector.multi_reduction <add>, %1107, %cst_304 [0] : vector<2x8x1xf32> to vector<8x1xf32>
    %1109 = vector.shape_cast %1108 : vector<8x1xf32> to vector<1x8x1xf32>
    %1110 = arith.mulf %1105, %1105 : vector<2x8x256xf32>
    %cst_305 = arith.constant dense<0.000000e+00> : vector<2x8xf32>
    %1111 = vector.multi_reduction <add>, %1110, %cst_305 [2] : vector<2x8x256xf32> to vector<2x8xf32>
    %1112 = vector.shape_cast %1111 : vector<2x8xf32> to vector<2x8x1xf32>
    %cst_306 = arith.constant dense<0.000000e+00> : vector<8x1xf32>
    %1113 = vector.multi_reduction <add>, %1112, %cst_306 [0] : vector<2x8x1xf32> to vector<8x1xf32>
    %1114 = vector.shape_cast %1113 : vector<8x1xf32> to vector<1x8x1xf32>
    %cst_307 = arith.constant 0.001953125 : f32
    %1115 = vector.broadcast %cst_307 : f32 to vector<1x8x1xf32>
    %1116 = arith.mulf %1109, %1115 : vector<1x8x1xf32>
    %cst_308 = arith.constant 0.001953125 : f32
    %1117 = vector.broadcast %cst_308 : f32 to vector<1x8x1xf32>
    %1118 = arith.mulf %1114, %1117 : vector<1x8x1xf32>
    %1119 = arith.mulf %1116, %1116 : vector<1x8x1xf32>
    %1120 = arith.subf %1118, %1119 : vector<1x8x1xf32>
    %cst_309 = arith.constant 0.000000e+00 : f32
    %1121 = vector.broadcast %cst_309 : f32 to vector<1x8x1xf32>
    %1122 = arith.maximumf %1120, %1121 : vector<1x8x1xf32>
    %1123 = math.sqrt %1122 : vector<1x8x1xf32>
    %cst_310 = arith.constant 9.99999997E-7 : f32
    %1124 = vector.broadcast %cst_310 : f32 to vector<1x8x1xf32>
    %1125 = arith.addf %1123, %1124 : vector<1x8x1xf32>
    %1126 = tpu.reciprocal %1125 : vector<1x8x1xf32> -> vector<1x8x1xf32>
    %cst_311 = arith.constant 1.000000e+00 : f32
    %1127 = vector.broadcast %cst_311 : f32 to vector<1x8x1xf32>
    %1128 = arith.mulf %1127, %1126 : vector<1x8x1xf32>
    %1129 = math.log %1128 : vector<1x8x1xf32>
    %1130 = arith.addf %1038, %1129 : vector<1x8x1xf32>
    %1131 = vector.broadcast %1116 : vector<1x8x1xf32> to vector<2x8x256xf32>
    %1132 = arith.subf %1105, %1131 : vector<2x8x256xf32>
    %1133 = vector.broadcast %1128 : vector<1x8x1xf32> to vector<2x8x256xf32>
    %1134 = arith.mulf %1132, %1133 : vector<2x8x256xf32>
    %c96 = arith.constant 96 : index
    %c0_312 = arith.constant 0 : index
    %c0_313 = arith.constant 0 : index
    %1135 = vector.load %arg2[%c96, %c0_312, %c0_313] : memref<128x8x256xf32, #tpu.memory_space<vmem>>, vector<1x8x256xf32>
    %1136 = vector.shape_cast %1135 : vector<1x8x256xf32> to vector<8x256xf32>
    %1137 = vector.shape_cast %1136 : vector<8x256xf32> to vector<1x8x256xf32>
    %1138 = vector.extract_strided_slice %1134 {offsets = [0, 0, 0], sizes = [2, 1, 256], strides = [1, 1, 1]} : vector<2x8x256xf32> to vector<2x1x256xf32>
    %1139 = vector.broadcast %1137 : vector<1x8x256xf32> to vector<2x8x256xf32>
    %1140 = vector.broadcast %1138 : vector<2x1x256xf32> to vector<2x8x256xf32>
    %1141 = arith.mulf %1139, %1140 : vector<2x8x256xf32>
    %c97 = arith.constant 97 : index
    %c0_314 = arith.constant 0 : index
    %c0_315 = arith.constant 0 : index
    %1142 = vector.load %arg2[%c97, %c0_314, %c0_315] : memref<128x8x256xf32, #tpu.memory_space<vmem>>, vector<1x8x256xf32>
    %1143 = vector.shape_cast %1142 : vector<1x8x256xf32> to vector<8x256xf32>
    %1144 = vector.shape_cast %1143 : vector<8x256xf32> to vector<1x8x256xf32>
    %1145 = vector.extract_strided_slice %1134 {offsets = [0, 1, 0], sizes = [2, 1, 256], strides = [1, 1, 1]} : vector<2x8x256xf32> to vector<2x1x256xf32>
    %1146 = vector.broadcast %1144 : vector<1x8x256xf32> to vector<2x8x256xf32>
    %1147 = vector.broadcast %1145 : vector<2x1x256xf32> to vector<2x8x256xf32>
    %1148 = arith.mulf %1146, %1147 : vector<2x8x256xf32>
    %1149 = arith.addf %1141, %1148 : vector<2x8x256xf32>
    %c98 = arith.constant 98 : index
    %c0_316 = arith.constant 0 : index
    %c0_317 = arith.constant 0 : index
    %1150 = vector.load %arg2[%c98, %c0_316, %c0_317] : memref<128x8x256xf32, #tpu.memory_space<vmem>>, vector<1x8x256xf32>
    %1151 = vector.shape_cast %1150 : vector<1x8x256xf32> to vector<8x256xf32>
    %1152 = vector.shape_cast %1151 : vector<8x256xf32> to vector<1x8x256xf32>
    %1153 = vector.extract_strided_slice %1134 {offsets = [0, 2, 0], sizes = [2, 1, 256], strides = [1, 1, 1]} : vector<2x8x256xf32> to vector<2x1x256xf32>
    %1154 = vector.broadcast %1152 : vector<1x8x256xf32> to vector<2x8x256xf32>
    %1155 = vector.broadcast %1153 : vector<2x1x256xf32> to vector<2x8x256xf32>
    %1156 = arith.mulf %1154, %1155 : vector<2x8x256xf32>
    %1157 = arith.addf %1149, %1156 : vector<2x8x256xf32>
    %c99 = arith.constant 99 : index
    %c0_318 = arith.constant 0 : index
    %c0_319 = arith.constant 0 : index
    %1158 = vector.load %arg2[%c99, %c0_318, %c0_319] : memref<128x8x256xf32, #tpu.memory_space<vmem>>, vector<1x8x256xf32>
    %1159 = vector.shape_cast %1158 : vector<1x8x256xf32> to vector<8x256xf32>
    %1160 = vector.shape_cast %1159 : vector<8x256xf32> to vector<1x8x256xf32>
    %1161 = vector.extract_strided_slice %1134 {offsets = [0, 3, 0], sizes = [2, 1, 256], strides = [1, 1, 1]} : vector<2x8x256xf32> to vector<2x1x256xf32>
    %1162 = vector.broadcast %1160 : vector<1x8x256xf32> to vector<2x8x256xf32>
    %1163 = vector.broadcast %1161 : vector<2x1x256xf32> to vector<2x8x256xf32>
    %1164 = arith.mulf %1162, %1163 : vector<2x8x256xf32>
    %1165 = arith.addf %1157, %1164 : vector<2x8x256xf32>
    %c100 = arith.constant 100 : index
    %c0_320 = arith.constant 0 : index
    %c0_321 = arith.constant 0 : index
    %1166 = vector.load %arg2[%c100, %c0_320, %c0_321] : memref<128x8x256xf32, #tpu.memory_space<vmem>>, vector<1x8x256xf32>
    %1167 = vector.shape_cast %1166 : vector<1x8x256xf32> to vector<8x256xf32>
    %1168 = vector.shape_cast %1167 : vector<8x256xf32> to vector<1x8x256xf32>
    %1169 = vector.extract_strided_slice %1134 {offsets = [0, 4, 0], sizes = [2, 1, 256], strides = [1, 1, 1]} : vector<2x8x256xf32> to vector<2x1x256xf32>
    %1170 = vector.broadcast %1168 : vector<1x8x256xf32> to vector<2x8x256xf32>
    %1171 = vector.broadcast %1169 : vector<2x1x256xf32> to vector<2x8x256xf32>
    %1172 = arith.mulf %1170, %1171 : vector<2x8x256xf32>
    %c101 = arith.constant 101 : index
    %c0_322 = arith.constant 0 : index
    %c0_323 = arith.constant 0 : index
    %1173 = vector.load %arg2[%c101, %c0_322, %c0_323] : memref<128x8x256xf32, #tpu.memory_space<vmem>>, vector<1x8x256xf32>
    %1174 = vector.shape_cast %1173 : vector<1x8x256xf32> to vector<8x256xf32>
    %1175 = vector.shape_cast %1174 : vector<8x256xf32> to vector<1x8x256xf32>
    %1176 = vector.extract_strided_slice %1134 {offsets = [0, 5, 0], sizes = [2, 1, 256], strides = [1, 1, 1]} : vector<2x8x256xf32> to vector<2x1x256xf32>
    %1177 = vector.broadcast %1175 : vector<1x8x256xf32> to vector<2x8x256xf32>
    %1178 = vector.broadcast %1176 : vector<2x1x256xf32> to vector<2x8x256xf32>
    %1179 = arith.mulf %1177, %1178 : vector<2x8x256xf32>
    %1180 = arith.addf %1172, %1179 : vector<2x8x256xf32>
    %c102 = arith.constant 102 : index
    %c0_324 = arith.constant 0 : index
    %c0_325 = arith.constant 0 : index
    %1181 = vector.load %arg2[%c102, %c0_324, %c0_325] : memref<128x8x256xf32, #tpu.memory_space<vmem>>, vector<1x8x256xf32>
    %1182 = vector.shape_cast %1181 : vector<1x8x256xf32> to vector<8x256xf32>
    %1183 = vector.shape_cast %1182 : vector<8x256xf32> to vector<1x8x256xf32>
    %1184 = vector.extract_strided_slice %1134 {offsets = [0, 6, 0], sizes = [2, 1, 256], strides = [1, 1, 1]} : vector<2x8x256xf32> to vector<2x1x256xf32>
    %1185 = vector.broadcast %1183 : vector<1x8x256xf32> to vector<2x8x256xf32>
    %1186 = vector.broadcast %1184 : vector<2x1x256xf32> to vector<2x8x256xf32>
    %1187 = arith.mulf %1185, %1186 : vector<2x8x256xf32>
    %1188 = arith.addf %1180, %1187 : vector<2x8x256xf32>
    %c103 = arith.constant 103 : index
    %c0_326 = arith.constant 0 : index
    %c0_327 = arith.constant 0 : index
    %1189 = vector.load %arg2[%c103, %c0_326, %c0_327] : memref<128x8x256xf32, #tpu.memory_space<vmem>>, vector<1x8x256xf32>
    %1190 = vector.shape_cast %1189 : vector<1x8x256xf32> to vector<8x256xf32>
    %1191 = vector.shape_cast %1190 : vector<8x256xf32> to vector<1x8x256xf32>
    %1192 = vector.extract_strided_slice %1134 {offsets = [0, 7, 0], sizes = [2, 1, 256], strides = [1, 1, 1]} : vector<2x8x256xf32> to vector<2x1x256xf32>
    %1193 = vector.broadcast %1191 : vector<1x8x256xf32> to vector<2x8x256xf32>
    %1194 = vector.broadcast %1192 : vector<2x1x256xf32> to vector<2x8x256xf32>
    %1195 = arith.mulf %1193, %1194 : vector<2x8x256xf32>
    %1196 = arith.addf %1188, %1195 : vector<2x8x256xf32>
    %1197 = arith.addf %1165, %1196 : vector<2x8x256xf32>
    %cst_328 = arith.constant dense<0.000000e+00> : vector<2x8xf32>
    %1198 = vector.multi_reduction <add>, %1197, %cst_328 [2] : vector<2x8x256xf32> to vector<2x8xf32>
    %1199 = vector.shape_cast %1198 : vector<2x8xf32> to vector<2x8x1xf32>
    %cst_329 = arith.constant dense<0.000000e+00> : vector<8x1xf32>
    %1200 = vector.multi_reduction <add>, %1199, %cst_329 [0] : vector<2x8x1xf32> to vector<8x1xf32>
    %1201 = vector.shape_cast %1200 : vector<8x1xf32> to vector<1x8x1xf32>
    %1202 = arith.mulf %1197, %1197 : vector<2x8x256xf32>
    %cst_330 = arith.constant dense<0.000000e+00> : vector<2x8xf32>
    %1203 = vector.multi_reduction <add>, %1202, %cst_330 [2] : vector<2x8x256xf32> to vector<2x8xf32>
    %1204 = vector.shape_cast %1203 : vector<2x8xf32> to vector<2x8x1xf32>
    %cst_331 = arith.constant dense<0.000000e+00> : vector<8x1xf32>
    %1205 = vector.multi_reduction <add>, %1204, %cst_331 [0] : vector<2x8x1xf32> to vector<8x1xf32>
    %1206 = vector.shape_cast %1205 : vector<8x1xf32> to vector<1x8x1xf32>
    %cst_332 = arith.constant 0.001953125 : f32
    %1207 = vector.broadcast %cst_332 : f32 to vector<1x8x1xf32>
    %1208 = arith.mulf %1201, %1207 : vector<1x8x1xf32>
    %cst_333 = arith.constant 0.001953125 : f32
    %1209 = vector.broadcast %cst_333 : f32 to vector<1x8x1xf32>
    %1210 = arith.mulf %1206, %1209 : vector<1x8x1xf32>
    %1211 = arith.mulf %1208, %1208 : vector<1x8x1xf32>
    %1212 = arith.subf %1210, %1211 : vector<1x8x1xf32>
    %cst_334 = arith.constant 0.000000e+00 : f32
    %1213 = vector.broadcast %cst_334 : f32 to vector<1x8x1xf32>
    %1214 = arith.maximumf %1212, %1213 : vector<1x8x1xf32>
    %1215 = math.sqrt %1214 : vector<1x8x1xf32>
    %cst_335 = arith.constant 9.99999997E-7 : f32
    %1216 = vector.broadcast %cst_335 : f32 to vector<1x8x1xf32>
    %1217 = arith.addf %1215, %1216 : vector<1x8x1xf32>
    %1218 = tpu.reciprocal %1217 : vector<1x8x1xf32> -> vector<1x8x1xf32>
    %cst_336 = arith.constant 1.000000e+00 : f32
    %1219 = vector.broadcast %cst_336 : f32 to vector<1x8x1xf32>
    %1220 = arith.mulf %1219, %1218 : vector<1x8x1xf32>
    %1221 = math.log %1220 : vector<1x8x1xf32>
    %1222 = arith.addf %1130, %1221 : vector<1x8x1xf32>
    %1223 = vector.broadcast %1208 : vector<1x8x1xf32> to vector<2x8x256xf32>
    %1224 = arith.subf %1197, %1223 : vector<2x8x256xf32>
    %1225 = vector.broadcast %1220 : vector<1x8x1xf32> to vector<2x8x256xf32>
    %1226 = arith.mulf %1224, %1225 : vector<2x8x256xf32>
    %c104 = arith.constant 104 : index
    %c0_337 = arith.constant 0 : index
    %c0_338 = arith.constant 0 : index
    %1227 = vector.load %arg2[%c104, %c0_337, %c0_338] : memref<128x8x256xf32, #tpu.memory_space<vmem>>, vector<1x8x256xf32>
    %1228 = vector.shape_cast %1227 : vector<1x8x256xf32> to vector<8x256xf32>
    %1229 = vector.shape_cast %1228 : vector<8x256xf32> to vector<1x8x256xf32>
    %1230 = vector.extract_strided_slice %1226 {offsets = [0, 0, 0], sizes = [2, 1, 256], strides = [1, 1, 1]} : vector<2x8x256xf32> to vector<2x1x256xf32>
    %1231 = vector.broadcast %1229 : vector<1x8x256xf32> to vector<2x8x256xf32>
    %1232 = vector.broadcast %1230 : vector<2x1x256xf32> to vector<2x8x256xf32>
    %1233 = arith.mulf %1231, %1232 : vector<2x8x256xf32>
    %c105 = arith.constant 105 : index
    %c0_339 = arith.constant 0 : index
    %c0_340 = arith.constant 0 : index
    %1234 = vector.load %arg2[%c105, %c0_339, %c0_340] : memref<128x8x256xf32, #tpu.memory_space<vmem>>, vector<1x8x256xf32>
    %1235 = vector.shape_cast %1234 : vector<1x8x256xf32> to vector<8x256xf32>
    %1236 = vector.shape_cast %1235 : vector<8x256xf32> to vector<1x8x256xf32>
    %1237 = vector.extract_strided_slice %1226 {offsets = [0, 1, 0], sizes = [2, 1, 256], strides = [1, 1, 1]} : vector<2x8x256xf32> to vector<2x1x256xf32>
    %1238 = vector.broadcast %1236 : vector<1x8x256xf32> to vector<2x8x256xf32>
    %1239 = vector.broadcast %1237 : vector<2x1x256xf32> to vector<2x8x256xf32>
    %1240 = arith.mulf %1238, %1239 : vector<2x8x256xf32>
    %1241 = arith.addf %1233, %1240 : vector<2x8x256xf32>
    %c106 = arith.constant 106 : index
    %c0_341 = arith.constant 0 : index
    %c0_342 = arith.constant 0 : index
    %1242 = vector.load %arg2[%c106, %c0_341, %c0_342] : memref<128x8x256xf32, #tpu.memory_space<vmem>>, vector<1x8x256xf32>
    %1243 = vector.shape_cast %1242 : vector<1x8x256xf32> to vector<8x256xf32>
    %1244 = vector.shape_cast %1243 : vector<8x256xf32> to vector<1x8x256xf32>
    %1245 = vector.extract_strided_slice %1226 {offsets = [0, 2, 0], sizes = [2, 1, 256], strides = [1, 1, 1]} : vector<2x8x256xf32> to vector<2x1x256xf32>
    %1246 = vector.broadcast %1244 : vector<1x8x256xf32> to vector<2x8x256xf32>
    %1247 = vector.broadcast %1245 : vector<2x1x256xf32> to vector<2x8x256xf32>
    %1248 = arith.mulf %1246, %1247 : vector<2x8x256xf32>
    %1249 = arith.addf %1241, %1248 : vector<2x8x256xf32>
    %c107 = arith.constant 107 : index
    %c0_343 = arith.constant 0 : index
    %c0_344 = arith.constant 0 : index
    %1250 = vector.load %arg2[%c107, %c0_343, %c0_344] : memref<128x8x256xf32, #tpu.memory_space<vmem>>, vector<1x8x256xf32>
    %1251 = vector.shape_cast %1250 : vector<1x8x256xf32> to vector<8x256xf32>
    %1252 = vector.shape_cast %1251 : vector<8x256xf32> to vector<1x8x256xf32>
    %1253 = vector.extract_strided_slice %1226 {offsets = [0, 3, 0], sizes = [2, 1, 256], strides = [1, 1, 1]} : vector<2x8x256xf32> to vector<2x1x256xf32>
    %1254 = vector.broadcast %1252 : vector<1x8x256xf32> to vector<2x8x256xf32>
    %1255 = vector.broadcast %1253 : vector<2x1x256xf32> to vector<2x8x256xf32>
    %1256 = arith.mulf %1254, %1255 : vector<2x8x256xf32>
    %1257 = arith.addf %1249, %1256 : vector<2x8x256xf32>
    %c108 = arith.constant 108 : index
    %c0_345 = arith.constant 0 : index
    %c0_346 = arith.constant 0 : index
    %1258 = vector.load %arg2[%c108, %c0_345, %c0_346] : memref<128x8x256xf32, #tpu.memory_space<vmem>>, vector<1x8x256xf32>
    %1259 = vector.shape_cast %1258 : vector<1x8x256xf32> to vector<8x256xf32>
    %1260 = vector.shape_cast %1259 : vector<8x256xf32> to vector<1x8x256xf32>
    %1261 = vector.extract_strided_slice %1226 {offsets = [0, 4, 0], sizes = [2, 1, 256], strides = [1, 1, 1]} : vector<2x8x256xf32> to vector<2x1x256xf32>
    %1262 = vector.broadcast %1260 : vector<1x8x256xf32> to vector<2x8x256xf32>
    %1263 = vector.broadcast %1261 : vector<2x1x256xf32> to vector<2x8x256xf32>
    %1264 = arith.mulf %1262, %1263 : vector<2x8x256xf32>
    %c109 = arith.constant 109 : index
    %c0_347 = arith.constant 0 : index
    %c0_348 = arith.constant 0 : index
    %1265 = vector.load %arg2[%c109, %c0_347, %c0_348] : memref<128x8x256xf32, #tpu.memory_space<vmem>>, vector<1x8x256xf32>
    %1266 = vector.shape_cast %1265 : vector<1x8x256xf32> to vector<8x256xf32>
    %1267 = vector.shape_cast %1266 : vector<8x256xf32> to vector<1x8x256xf32>
    %1268 = vector.extract_strided_slice %1226 {offsets = [0, 5, 0], sizes = [2, 1, 256], strides = [1, 1, 1]} : vector<2x8x256xf32> to vector<2x1x256xf32>
    %1269 = vector.broadcast %1267 : vector<1x8x256xf32> to vector<2x8x256xf32>
    %1270 = vector.broadcast %1268 : vector<2x1x256xf32> to vector<2x8x256xf32>
    %1271 = arith.mulf %1269, %1270 : vector<2x8x256xf32>
    %1272 = arith.addf %1264, %1271 : vector<2x8x256xf32>
    %c110 = arith.constant 110 : index
    %c0_349 = arith.constant 0 : index
    %c0_350 = arith.constant 0 : index
    %1273 = vector.load %arg2[%c110, %c0_349, %c0_350] : memref<128x8x256xf32, #tpu.memory_space<vmem>>, vector<1x8x256xf32>
    %1274 = vector.shape_cast %1273 : vector<1x8x256xf32> to vector<8x256xf32>
    %1275 = vector.shape_cast %1274 : vector<8x256xf32> to vector<1x8x256xf32>
    %1276 = vector.extract_strided_slice %1226 {offsets = [0, 6, 0], sizes = [2, 1, 256], strides = [1, 1, 1]} : vector<2x8x256xf32> to vector<2x1x256xf32>
    %1277 = vector.broadcast %1275 : vector<1x8x256xf32> to vector<2x8x256xf32>
    %1278 = vector.broadcast %1276 : vector<2x1x256xf32> to vector<2x8x256xf32>
    %1279 = arith.mulf %1277, %1278 : vector<2x8x256xf32>
    %1280 = arith.addf %1272, %1279 : vector<2x8x256xf32>
    %c111 = arith.constant 111 : index
    %c0_351 = arith.constant 0 : index
    %c0_352 = arith.constant 0 : index
    %1281 = vector.load %arg2[%c111, %c0_351, %c0_352] : memref<128x8x256xf32, #tpu.memory_space<vmem>>, vector<1x8x256xf32>
    %1282 = vector.shape_cast %1281 : vector<1x8x256xf32> to vector<8x256xf32>
    %1283 = vector.shape_cast %1282 : vector<8x256xf32> to vector<1x8x256xf32>
    %1284 = vector.extract_strided_slice %1226 {offsets = [0, 7, 0], sizes = [2, 1, 256], strides = [1, 1, 1]} : vector<2x8x256xf32> to vector<2x1x256xf32>
    %1285 = vector.broadcast %1283 : vector<1x8x256xf32> to vector<2x8x256xf32>
    %1286 = vector.broadcast %1284 : vector<2x1x256xf32> to vector<2x8x256xf32>
    %1287 = arith.mulf %1285, %1286 : vector<2x8x256xf32>
    %1288 = arith.addf %1280, %1287 : vector<2x8x256xf32>
    %1289 = arith.addf %1257, %1288 : vector<2x8x256xf32>
    %cst_353 = arith.constant dense<0.000000e+00> : vector<2x8xf32>
    %1290 = vector.multi_reduction <add>, %1289, %cst_353 [2] : vector<2x8x256xf32> to vector<2x8xf32>
    %1291 = vector.shape_cast %1290 : vector<2x8xf32> to vector<2x8x1xf32>
    %cst_354 = arith.constant dense<0.000000e+00> : vector<8x1xf32>
    %1292 = vector.multi_reduction <add>, %1291, %cst_354 [0] : vector<2x8x1xf32> to vector<8x1xf32>
    %1293 = vector.shape_cast %1292 : vector<8x1xf32> to vector<1x8x1xf32>
    %1294 = arith.mulf %1289, %1289 : vector<2x8x256xf32>
    %cst_355 = arith.constant dense<0.000000e+00> : vector<2x8xf32>
    %1295 = vector.multi_reduction <add>, %1294, %cst_355 [2] : vector<2x8x256xf32> to vector<2x8xf32>
    %1296 = vector.shape_cast %1295 : vector<2x8xf32> to vector<2x8x1xf32>
    %cst_356 = arith.constant dense<0.000000e+00> : vector<8x1xf32>
    %1297 = vector.multi_reduction <add>, %1296, %cst_356 [0] : vector<2x8x1xf32> to vector<8x1xf32>
    %1298 = vector.shape_cast %1297 : vector<8x1xf32> to vector<1x8x1xf32>
    %cst_357 = arith.constant 0.001953125 : f32
    %1299 = vector.broadcast %cst_357 : f32 to vector<1x8x1xf32>
    %1300 = arith.mulf %1293, %1299 : vector<1x8x1xf32>
    %cst_358 = arith.constant 0.001953125 : f32
    %1301 = vector.broadcast %cst_358 : f32 to vector<1x8x1xf32>
    %1302 = arith.mulf %1298, %1301 : vector<1x8x1xf32>
    %1303 = arith.mulf %1300, %1300 : vector<1x8x1xf32>
    %1304 = arith.subf %1302, %1303 : vector<1x8x1xf32>
    %cst_359 = arith.constant 0.000000e+00 : f32
    %1305 = vector.broadcast %cst_359 : f32 to vector<1x8x1xf32>
    %1306 = arith.maximumf %1304, %1305 : vector<1x8x1xf32>
    %1307 = math.sqrt %1306 : vector<1x8x1xf32>
    %cst_360 = arith.constant 9.99999997E-7 : f32
    %1308 = vector.broadcast %cst_360 : f32 to vector<1x8x1xf32>
    %1309 = arith.addf %1307, %1308 : vector<1x8x1xf32>
    %1310 = tpu.reciprocal %1309 : vector<1x8x1xf32> -> vector<1x8x1xf32>
    %cst_361 = arith.constant 1.000000e+00 : f32
    %1311 = vector.broadcast %cst_361 : f32 to vector<1x8x1xf32>
    %1312 = arith.mulf %1311, %1310 : vector<1x8x1xf32>
    %1313 = math.log %1312 : vector<1x8x1xf32>
    %1314 = arith.addf %1222, %1313 : vector<1x8x1xf32>
    %1315 = vector.broadcast %1300 : vector<1x8x1xf32> to vector<2x8x256xf32>
    %1316 = arith.subf %1289, %1315 : vector<2x8x256xf32>
    %1317 = vector.broadcast %1312 : vector<1x8x1xf32> to vector<2x8x256xf32>
    %1318 = arith.mulf %1316, %1317 : vector<2x8x256xf32>
    %c112 = arith.constant 112 : index
    %c0_362 = arith.constant 0 : index
    %c0_363 = arith.constant 0 : index
    %1319 = vector.load %arg2[%c112, %c0_362, %c0_363] : memref<128x8x256xf32, #tpu.memory_space<vmem>>, vector<1x8x256xf32>
    %1320 = vector.shape_cast %1319 : vector<1x8x256xf32> to vector<8x256xf32>
    %1321 = vector.shape_cast %1320 : vector<8x256xf32> to vector<1x8x256xf32>
    %1322 = vector.extract_strided_slice %1318 {offsets = [0, 0, 0], sizes = [2, 1, 256], strides = [1, 1, 1]} : vector<2x8x256xf32> to vector<2x1x256xf32>
    %1323 = vector.broadcast %1321 : vector<1x8x256xf32> to vector<2x8x256xf32>
    %1324 = vector.broadcast %1322 : vector<2x1x256xf32> to vector<2x8x256xf32>
    %1325 = arith.mulf %1323, %1324 : vector<2x8x256xf32>
    %c113 = arith.constant 113 : index
    %c0_364 = arith.constant 0 : index
    %c0_365 = arith.constant 0 : index
    %1326 = vector.load %arg2[%c113, %c0_364, %c0_365] : memref<128x8x256xf32, #tpu.memory_space<vmem>>, vector<1x8x256xf32>
    %1327 = vector.shape_cast %1326 : vector<1x8x256xf32> to vector<8x256xf32>
    %1328 = vector.shape_cast %1327 : vector<8x256xf32> to vector<1x8x256xf32>
    %1329 = vector.extract_strided_slice %1318 {offsets = [0, 1, 0], sizes = [2, 1, 256], strides = [1, 1, 1]} : vector<2x8x256xf32> to vector<2x1x256xf32>
    %1330 = vector.broadcast %1328 : vector<1x8x256xf32> to vector<2x8x256xf32>
    %1331 = vector.broadcast %1329 : vector<2x1x256xf32> to vector<2x8x256xf32>
    %1332 = arith.mulf %1330, %1331 : vector<2x8x256xf32>
    %1333 = arith.addf %1325, %1332 : vector<2x8x256xf32>
    %c114 = arith.constant 114 : index
    %c0_366 = arith.constant 0 : index
    %c0_367 = arith.constant 0 : index
    %1334 = vector.load %arg2[%c114, %c0_366, %c0_367] : memref<128x8x256xf32, #tpu.memory_space<vmem>>, vector<1x8x256xf32>
    %1335 = vector.shape_cast %1334 : vector<1x8x256xf32> to vector<8x256xf32>
    %1336 = vector.shape_cast %1335 : vector<8x256xf32> to vector<1x8x256xf32>
    %1337 = vector.extract_strided_slice %1318 {offsets = [0, 2, 0], sizes = [2, 1, 256], strides = [1, 1, 1]} : vector<2x8x256xf32> to vector<2x1x256xf32>
    %1338 = vector.broadcast %1336 : vector<1x8x256xf32> to vector<2x8x256xf32>
    %1339 = vector.broadcast %1337 : vector<2x1x256xf32> to vector<2x8x256xf32>
    %1340 = arith.mulf %1338, %1339 : vector<2x8x256xf32>
    %1341 = arith.addf %1333, %1340 : vector<2x8x256xf32>
    %c115 = arith.constant 115 : index
    %c0_368 = arith.constant 0 : index
    %c0_369 = arith.constant 0 : index
    %1342 = vector.load %arg2[%c115, %c0_368, %c0_369] : memref<128x8x256xf32, #tpu.memory_space<vmem>>, vector<1x8x256xf32>
    %1343 = vector.shape_cast %1342 : vector<1x8x256xf32> to vector<8x256xf32>
    %1344 = vector.shape_cast %1343 : vector<8x256xf32> to vector<1x8x256xf32>
    %1345 = vector.extract_strided_slice %1318 {offsets = [0, 3, 0], sizes = [2, 1, 256], strides = [1, 1, 1]} : vector<2x8x256xf32> to vector<2x1x256xf32>
    %1346 = vector.broadcast %1344 : vector<1x8x256xf32> to vector<2x8x256xf32>
    %1347 = vector.broadcast %1345 : vector<2x1x256xf32> to vector<2x8x256xf32>
    %1348 = arith.mulf %1346, %1347 : vector<2x8x256xf32>
    %1349 = arith.addf %1341, %1348 : vector<2x8x256xf32>
    %c116 = arith.constant 116 : index
    %c0_370 = arith.constant 0 : index
    %c0_371 = arith.constant 0 : index
    %1350 = vector.load %arg2[%c116, %c0_370, %c0_371] : memref<128x8x256xf32, #tpu.memory_space<vmem>>, vector<1x8x256xf32>
    %1351 = vector.shape_cast %1350 : vector<1x8x256xf32> to vector<8x256xf32>
    %1352 = vector.shape_cast %1351 : vector<8x256xf32> to vector<1x8x256xf32>
    %1353 = vector.extract_strided_slice %1318 {offsets = [0, 4, 0], sizes = [2, 1, 256], strides = [1, 1, 1]} : vector<2x8x256xf32> to vector<2x1x256xf32>
    %1354 = vector.broadcast %1352 : vector<1x8x256xf32> to vector<2x8x256xf32>
    %1355 = vector.broadcast %1353 : vector<2x1x256xf32> to vector<2x8x256xf32>
    %1356 = arith.mulf %1354, %1355 : vector<2x8x256xf32>
    %c117 = arith.constant 117 : index
    %c0_372 = arith.constant 0 : index
    %c0_373 = arith.constant 0 : index
    %1357 = vector.load %arg2[%c117, %c0_372, %c0_373] : memref<128x8x256xf32, #tpu.memory_space<vmem>>, vector<1x8x256xf32>
    %1358 = vector.shape_cast %1357 : vector<1x8x256xf32> to vector<8x256xf32>
    %1359 = vector.shape_cast %1358 : vector<8x256xf32> to vector<1x8x256xf32>
    %1360 = vector.extract_strided_slice %1318 {offsets = [0, 5, 0], sizes = [2, 1, 256], strides = [1, 1, 1]} : vector<2x8x256xf32> to vector<2x1x256xf32>
    %1361 = vector.broadcast %1359 : vector<1x8x256xf32> to vector<2x8x256xf32>
    %1362 = vector.broadcast %1360 : vector<2x1x256xf32> to vector<2x8x256xf32>
    %1363 = arith.mulf %1361, %1362 : vector<2x8x256xf32>
    %1364 = arith.addf %1356, %1363 : vector<2x8x256xf32>
    %c118 = arith.constant 118 : index
    %c0_374 = arith.constant 0 : index
    %c0_375 = arith.constant 0 : index
    %1365 = vector.load %arg2[%c118, %c0_374, %c0_375] : memref<128x8x256xf32, #tpu.memory_space<vmem>>, vector<1x8x256xf32>
    %1366 = vector.shape_cast %1365 : vector<1x8x256xf32> to vector<8x256xf32>
    %1367 = vector.shape_cast %1366 : vector<8x256xf32> to vector<1x8x256xf32>
    %1368 = vector.extract_strided_slice %1318 {offsets = [0, 6, 0], sizes = [2, 1, 256], strides = [1, 1, 1]} : vector<2x8x256xf32> to vector<2x1x256xf32>
    %1369 = vector.broadcast %1367 : vector<1x8x256xf32> to vector<2x8x256xf32>
    %1370 = vector.broadcast %1368 : vector<2x1x256xf32> to vector<2x8x256xf32>
    %1371 = arith.mulf %1369, %1370 : vector<2x8x256xf32>
    %1372 = arith.addf %1364, %1371 : vector<2x8x256xf32>
    %c119 = arith.constant 119 : index
    %c0_376 = arith.constant 0 : index
    %c0_377 = arith.constant 0 : index
    %1373 = vector.load %arg2[%c119, %c0_376, %c0_377] : memref<128x8x256xf32, #tpu.memory_space<vmem>>, vector<1x8x256xf32>
    %1374 = vector.shape_cast %1373 : vector<1x8x256xf32> to vector<8x256xf32>
    %1375 = vector.shape_cast %1374 : vector<8x256xf32> to vector<1x8x256xf32>
    %1376 = vector.extract_strided_slice %1318 {offsets = [0, 7, 0], sizes = [2, 1, 256], strides = [1, 1, 1]} : vector<2x8x256xf32> to vector<2x1x256xf32>
    %1377 = vector.broadcast %1375 : vector<1x8x256xf32> to vector<2x8x256xf32>
    %1378 = vector.broadcast %1376 : vector<2x1x256xf32> to vector<2x8x256xf32>
    %1379 = arith.mulf %1377, %1378 : vector<2x8x256xf32>
    %1380 = arith.addf %1372, %1379 : vector<2x8x256xf32>
    %1381 = arith.addf %1349, %1380 : vector<2x8x256xf32>
    %cst_378 = arith.constant dense<0.000000e+00> : vector<2x8xf32>
    %1382 = vector.multi_reduction <add>, %1381, %cst_378 [2] : vector<2x8x256xf32> to vector<2x8xf32>
    %1383 = vector.shape_cast %1382 : vector<2x8xf32> to vector<2x8x1xf32>
    %cst_379 = arith.constant dense<0.000000e+00> : vector<8x1xf32>
    %1384 = vector.multi_reduction <add>, %1383, %cst_379 [0] : vector<2x8x1xf32> to vector<8x1xf32>
    %1385 = vector.shape_cast %1384 : vector<8x1xf32> to vector<1x8x1xf32>
    %1386 = arith.mulf %1381, %1381 : vector<2x8x256xf32>
    %cst_380 = arith.constant dense<0.000000e+00> : vector<2x8xf32>
    %1387 = vector.multi_reduction <add>, %1386, %cst_380 [2] : vector<2x8x256xf32> to vector<2x8xf32>
    %1388 = vector.shape_cast %1387 : vector<2x8xf32> to vector<2x8x1xf32>
    %cst_381 = arith.constant dense<0.000000e+00> : vector<8x1xf32>
    %1389 = vector.multi_reduction <add>, %1388, %cst_381 [0] : vector<2x8x1xf32> to vector<8x1xf32>
    %1390 = vector.shape_cast %1389 : vector<8x1xf32> to vector<1x8x1xf32>
    %cst_382 = arith.constant 0.001953125 : f32
    %1391 = vector.broadcast %cst_382 : f32 to vector<1x8x1xf32>
    %1392 = arith.mulf %1385, %1391 : vector<1x8x1xf32>
    %cst_383 = arith.constant 0.001953125 : f32
    %1393 = vector.broadcast %cst_383 : f32 to vector<1x8x1xf32>
    %1394 = arith.mulf %1390, %1393 : vector<1x8x1xf32>
    %1395 = arith.mulf %1392, %1392 : vector<1x8x1xf32>
    %1396 = arith.subf %1394, %1395 : vector<1x8x1xf32>
    %cst_384 = arith.constant 0.000000e+00 : f32
    %1397 = vector.broadcast %cst_384 : f32 to vector<1x8x1xf32>
    %1398 = arith.maximumf %1396, %1397 : vector<1x8x1xf32>
    %1399 = math.sqrt %1398 : vector<1x8x1xf32>
    %cst_385 = arith.constant 9.99999997E-7 : f32
    %1400 = vector.broadcast %cst_385 : f32 to vector<1x8x1xf32>
    %1401 = arith.addf %1399, %1400 : vector<1x8x1xf32>
    %1402 = tpu.reciprocal %1401 : vector<1x8x1xf32> -> vector<1x8x1xf32>
    %cst_386 = arith.constant 1.000000e+00 : f32
    %1403 = vector.broadcast %cst_386 : f32 to vector<1x8x1xf32>
    %1404 = arith.mulf %1403, %1402 : vector<1x8x1xf32>
    %1405 = math.log %1404 : vector<1x8x1xf32>
    %1406 = arith.addf %1314, %1405 : vector<1x8x1xf32>
    %1407 = vector.broadcast %1392 : vector<1x8x1xf32> to vector<2x8x256xf32>
    %1408 = arith.subf %1381, %1407 : vector<2x8x256xf32>
    %1409 = vector.broadcast %1404 : vector<1x8x1xf32> to vector<2x8x256xf32>
    %1410 = arith.mulf %1408, %1409 : vector<2x8x256xf32>
    %c120 = arith.constant 120 : index
    %c0_387 = arith.constant 0 : index
    %c0_388 = arith.constant 0 : index
    %1411 = vector.load %arg2[%c120, %c0_387, %c0_388] : memref<128x8x256xf32, #tpu.memory_space<vmem>>, vector<1x8x256xf32>
    %1412 = vector.shape_cast %1411 : vector<1x8x256xf32> to vector<8x256xf32>
    %1413 = vector.shape_cast %1412 : vector<8x256xf32> to vector<1x8x256xf32>
    %1414 = vector.extract_strided_slice %1410 {offsets = [0, 0, 0], sizes = [2, 1, 256], strides = [1, 1, 1]} : vector<2x8x256xf32> to vector<2x1x256xf32>
    %1415 = vector.broadcast %1413 : vector<1x8x256xf32> to vector<2x8x256xf32>
    %1416 = vector.broadcast %1414 : vector<2x1x256xf32> to vector<2x8x256xf32>
    %1417 = arith.mulf %1415, %1416 : vector<2x8x256xf32>
    %c121 = arith.constant 121 : index
    %c0_389 = arith.constant 0 : index
    %c0_390 = arith.constant 0 : index
    %1418 = vector.load %arg2[%c121, %c0_389, %c0_390] : memref<128x8x256xf32, #tpu.memory_space<vmem>>, vector<1x8x256xf32>
    %1419 = vector.shape_cast %1418 : vector<1x8x256xf32> to vector<8x256xf32>
    %1420 = vector.shape_cast %1419 : vector<8x256xf32> to vector<1x8x256xf32>
    %1421 = vector.extract_strided_slice %1410 {offsets = [0, 1, 0], sizes = [2, 1, 256], strides = [1, 1, 1]} : vector<2x8x256xf32> to vector<2x1x256xf32>
    %1422 = vector.broadcast %1420 : vector<1x8x256xf32> to vector<2x8x256xf32>
    %1423 = vector.broadcast %1421 : vector<2x1x256xf32> to vector<2x8x256xf32>
    %1424 = arith.mulf %1422, %1423 : vector<2x8x256xf32>
    %1425 = arith.addf %1417, %1424 : vector<2x8x256xf32>
    %c122 = arith.constant 122 : index
    %c0_391 = arith.constant 0 : index
    %c0_392 = arith.constant 0 : index
    %1426 = vector.load %arg2[%c122, %c0_391, %c0_392] : memref<128x8x256xf32, #tpu.memory_space<vmem>>, vector<1x8x256xf32>
    %1427 = vector.shape_cast %1426 : vector<1x8x256xf32> to vector<8x256xf32>
    %1428 = vector.shape_cast %1427 : vector<8x256xf32> to vector<1x8x256xf32>
    %1429 = vector.extract_strided_slice %1410 {offsets = [0, 2, 0], sizes = [2, 1, 256], strides = [1, 1, 1]} : vector<2x8x256xf32> to vector<2x1x256xf32>
    %1430 = vector.broadcast %1428 : vector<1x8x256xf32> to vector<2x8x256xf32>
    %1431 = vector.broadcast %1429 : vector<2x1x256xf32> to vector<2x8x256xf32>
    %1432 = arith.mulf %1430, %1431 : vector<2x8x256xf32>
    %1433 = arith.addf %1425, %1432 : vector<2x8x256xf32>
    %c123 = arith.constant 123 : index
    %c0_393 = arith.constant 0 : index
    %c0_394 = arith.constant 0 : index
    %1434 = vector.load %arg2[%c123, %c0_393, %c0_394] : memref<128x8x256xf32, #tpu.memory_space<vmem>>, vector<1x8x256xf32>
    %1435 = vector.shape_cast %1434 : vector<1x8x256xf32> to vector<8x256xf32>
    %1436 = vector.shape_cast %1435 : vector<8x256xf32> to vector<1x8x256xf32>
    %1437 = vector.extract_strided_slice %1410 {offsets = [0, 3, 0], sizes = [2, 1, 256], strides = [1, 1, 1]} : vector<2x8x256xf32> to vector<2x1x256xf32>
    %1438 = vector.broadcast %1436 : vector<1x8x256xf32> to vector<2x8x256xf32>
    %1439 = vector.broadcast %1437 : vector<2x1x256xf32> to vector<2x8x256xf32>
    %1440 = arith.mulf %1438, %1439 : vector<2x8x256xf32>
    %1441 = arith.addf %1433, %1440 : vector<2x8x256xf32>
    %c124 = arith.constant 124 : index
    %c0_395 = arith.constant 0 : index
    %c0_396 = arith.constant 0 : index
    %1442 = vector.load %arg2[%c124, %c0_395, %c0_396] : memref<128x8x256xf32, #tpu.memory_space<vmem>>, vector<1x8x256xf32>
    %1443 = vector.shape_cast %1442 : vector<1x8x256xf32> to vector<8x256xf32>
    %1444 = vector.shape_cast %1443 : vector<8x256xf32> to vector<1x8x256xf32>
    %1445 = vector.extract_strided_slice %1410 {offsets = [0, 4, 0], sizes = [2, 1, 256], strides = [1, 1, 1]} : vector<2x8x256xf32> to vector<2x1x256xf32>
    %1446 = vector.broadcast %1444 : vector<1x8x256xf32> to vector<2x8x256xf32>
    %1447 = vector.broadcast %1445 : vector<2x1x256xf32> to vector<2x8x256xf32>
    %1448 = arith.mulf %1446, %1447 : vector<2x8x256xf32>
    %c125 = arith.constant 125 : index
    %c0_397 = arith.constant 0 : index
    %c0_398 = arith.constant 0 : index
    %1449 = vector.load %arg2[%c125, %c0_397, %c0_398] : memref<128x8x256xf32, #tpu.memory_space<vmem>>, vector<1x8x256xf32>
    %1450 = vector.shape_cast %1449 : vector<1x8x256xf32> to vector<8x256xf32>
    %1451 = vector.shape_cast %1450 : vector<8x256xf32> to vector<1x8x256xf32>
    %1452 = vector.extract_strided_slice %1410 {offsets = [0, 5, 0], sizes = [2, 1, 256], strides = [1, 1, 1]} : vector<2x8x256xf32> to vector<2x1x256xf32>
    %1453 = vector.broadcast %1451 : vector<1x8x256xf32> to vector<2x8x256xf32>
    %1454 = vector.broadcast %1452 : vector<2x1x256xf32> to vector<2x8x256xf32>
    %1455 = arith.mulf %1453, %1454 : vector<2x8x256xf32>
    %1456 = arith.addf %1448, %1455 : vector<2x8x256xf32>
    %c126 = arith.constant 126 : index
    %c0_399 = arith.constant 0 : index
    %c0_400 = arith.constant 0 : index
    %1457 = vector.load %arg2[%c126, %c0_399, %c0_400] : memref<128x8x256xf32, #tpu.memory_space<vmem>>, vector<1x8x256xf32>
    %1458 = vector.shape_cast %1457 : vector<1x8x256xf32> to vector<8x256xf32>
    %1459 = vector.shape_cast %1458 : vector<8x256xf32> to vector<1x8x256xf32>
    %1460 = vector.extract_strided_slice %1410 {offsets = [0, 6, 0], sizes = [2, 1, 256], strides = [1, 1, 1]} : vector<2x8x256xf32> to vector<2x1x256xf32>
    %1461 = vector.broadcast %1459 : vector<1x8x256xf32> to vector<2x8x256xf32>
    %1462 = vector.broadcast %1460 : vector<2x1x256xf32> to vector<2x8x256xf32>
    %1463 = arith.mulf %1461, %1462 : vector<2x8x256xf32>
    %1464 = arith.addf %1456, %1463 : vector<2x8x256xf32>
    %c127 = arith.constant 127 : index
    %c0_401 = arith.constant 0 : index
    %c0_402 = arith.constant 0 : index
    %1465 = vector.load %arg2[%c127, %c0_401, %c0_402] : memref<128x8x256xf32, #tpu.memory_space<vmem>>, vector<1x8x256xf32>
    %1466 = vector.shape_cast %1465 : vector<1x8x256xf32> to vector<8x256xf32>
    %1467 = vector.shape_cast %1466 : vector<8x256xf32> to vector<1x8x256xf32>
    %1468 = vector.extract_strided_slice %1410 {offsets = [0, 7, 0], sizes = [2, 1, 256], strides = [1, 1, 1]} : vector<2x8x256xf32> to vector<2x1x256xf32>
    %1469 = vector.broadcast %1467 : vector<1x8x256xf32> to vector<2x8x256xf32>
    %1470 = vector.broadcast %1468 : vector<2x1x256xf32> to vector<2x8x256xf32>
    %1471 = arith.mulf %1469, %1470 : vector<2x8x256xf32>
    %1472 = arith.addf %1464, %1471 : vector<2x8x256xf32>
    %1473 = arith.addf %1441, %1472 : vector<2x8x256xf32>
    %c0_403 = arith.constant 0 : index
    %c0_404 = arith.constant 0 : index
    %c0_405 = arith.constant 0 : index
    %1474 = vector.load %arg3[%c0_403, %c0_404, %c0_405] : memref<2x8x256xf32, #tpu.memory_space<vmem>>, vector<2x8x256xf32>
    tpu.vector_store %arg3[%c0_403, %c0_404, %c0_405], %1473 {strides = array<i32>} : memref<2x8x256xf32, #tpu.memory_space<vmem>>, vector<2x8x256xf32>,
    %1475 = vector.shape_cast %1406 : vector<1x8x1xf32> to vector<1x1x8x1xf32>
    %cst_406 = arith.constant dense<0.000000e+00> : vector<1xf32>
    %1476 = vector.multi_reduction <add>, %1475, %cst_406 [1, 2, 3] : vector<1x1x8x1xf32> to vector<1xf32>
    %1477 = vector.shape_cast %1476 : vector<1xf32> to vector<1x1x1x1xf32>
    %1478 = vector.extract %1477[0, 0, 0, 0] : f32 from vector<1x1x1x1xf32>
    %cst_407 = arith.constant 2.560000e+02 : f32
    %1479 = arith.mulf %1478, %cst_407 : f32
    %1480 = vector.broadcast %1479 : f32 to vector<1x1xf32>
    %c0_408 = arith.constant 0 : index
    %c0_409 = arith.constant 0 : index
    %1481 = vector.load %arg4[%c0_408, %c0_409] : memref<1x1xf32, #tpu.memory_space<vmem>>, vector<1x1xf32>
    tpu.vector_store %arg4[%c0_408, %c0_409], %1480 {strides = array<i32>} : memref<1x1xf32, #tpu.memory_space<vmem>>, vector<1x1xf32>,
    return
  }
  func.func @transform_0(%arg0: i32) -> (i32, i32, i32) {
    %c0_i32 = arith.constant 0 : i32
    %c0_i32_0 = arith.constant 0 : i32
    %c0_i32_1 = arith.constant 0 : i32
    %c0_i32_2 = arith.constant 0 : i32
    return %c0_i32, %c0_i32_0, %c0_i32_1 : i32, i32, i32
  }
  func.func @transform_1(%arg0: i32) -> (i32, i32, i32) {
    %c0_i32 = arith.constant 0 : i32
    %c0_i32_0 = arith.constant 0 : i32
    %c0_i32_1 = arith.constant 0 : i32
    %c0_i32_2 = arith.constant 0 : i32
    return %c0_i32, %c0_i32_0, %c0_i32_1 : i32, i32, i32
  }
  func.func @transform_2(%arg0: i32) -> (i32, i32, i32) {
    %c0_i32 = arith.constant 0 : i32
    %c0_i32_0 = arith.constant 0 : i32
    %c0_i32_1 = arith.constant 0 : i32
    %c0_i32_2 = arith.constant 0 : i32
    return %c0_i32, %c0_i32_0, %c0_i32_1 : i32, i32, i32
  }
  func.func @transform_3(%arg0: i32) -> (i32, i32) {
    %c0_i32 = arith.constant 0 : i32
    %c0_i32_0 = arith.constant 0 : i32
    %c0_i32_1 = arith.constant 0 : i32
    return %c0_i32, %c0_i32_0 : i32, i32
  }
}

</mosaic_0001>

<bundles_post_ra>
// kernel: tpu_custom_call.1
= control target key start
LH: loop header
LB: loop body
LE: loop exit
PB: predicated region body
PF: predicated region fallthrough
CT: control target
= control target key end

     0   :  { %9 = vsyncpa [#allocation3], 0  ;;  %s6568_s0 = inlined_call_operand.hbm [shape: f32[2,8,256], index: 0, kind: input, shape index: {}, may-alias: {0,2}]   ;;  %s6569_s1 = inlined_call_operand.hbm [shape: f32[128,8,256], index: 1, kind: input, shape index: {}]   ;;  %s6570_s2 = inlined_call_operand.hbm [shape: f32[2,8,256], index: 2, kind: output, shape index: {0}, may-alias: {0,2}]   ;;  %s6571_s3 = inlined_call_operand.hbm [shape: f32[1,1], index: 3, kind: output, shape index: {1}]  }
   0x1   :  { %10 = vsyncpa [#allocation6], 0 }
   0x2   :  { %11 = vsyncpa [#allocation4], 0 }
   0x3   :  { %12 = vsyncpa [#allocation9], 0  ;;  %s4377_s12 = smov [#allocation2]   ;;  %s4281_s16 = scalar_lea.hbm %s6568_s0, 512 }
   0x4   :  { %s18_s13 = sshll.u32 %s4377_s12, 4  ;;  %p4282_p0 = scmp.ne.s32.totalorder %s6568_s0, %s4281_s16  ;;  %s19_s13 = int_to_ptr.vmem [resolvable:$true] %s18_s13 }
   0x5   :  { %p4285_p1 = scmp.lt.u32.totalorder %s4281_s16, %s6568_s0 }
   0x7   :  { %p4287_p2 = pnand %p4285_p1, %p4282_p0 }
   0x9   :  { %4290 = shalt.err (!%p4287_p2)
}
   0xa   :  { %s4291_s21 = scalar_lea.vmem %s19_s13, 512  ;;  %p4296_p4 = scmp.lt.s32.totalorder %s19_s13, %s19_s13 }
   0xb   :  { %p4292_p3 = scmp.ne.s32.totalorder %s19_s13, %s4291_s21  ;;  %p4297_p5 = scmp.lt.s32.totalorder %s4291_s21, %s4291_s21 }
   0xd   :  { %p4298_p6 = por %p4297_p5, %p4296_p4 }
   0xf   :  { %p4299_p7 = pnand %p4298_p6, %p4292_p3 }
  0x11   :  { %4302 = shalt.err (!%p4299_p7)
}
  0x12   :  { %s4378_s22 = smov 256   ;;  %s4379_s23 = smov 16  }
  0x13   :  { %24 = dma.hbm_to_vmem [thread:$0]  %s6568_s0, 512, %s19_s13, [#allocation3], %s4378_s22, %s4378_s22, %s4379_s23  }
  0x14   :  { %s4380_s26 = smov [#allocation5]   ;;  %s4303_s30 = scalar_lea.hbm %s6569_s1, 32768 }
  0x15   :  { %s30_s27 = sshll.u32 %s4380_s26, 4  ;;  %p4304_p8 = scmp.ne.s32.totalorder %s6569_s1, %s4303_s30  ;;  %s31_s27 = int_to_ptr.vmem [resolvable:$true] %s30_s27 }
  0x16   :  { %p4307_p9 = scmp.lt.u32.totalorder %s4303_s30, %s6569_s1 }
  0x18   :  { %p4309_p10 = pnand %p4307_p9, %p4304_p8 }
  0x1a   :  { %4312 = shalt.err (!%p4309_p10)
}
  0x1b   :  { %s4313_s8 = scalar_lea.vmem %s31_s27, 32768  ;;  %p4318_p12 = scmp.lt.s32.totalorder %s31_s27, %s31_s27 }
  0x1c   :  { %p4314_p11 = scmp.ne.s32.totalorder %s31_s27, %s4313_s8  ;;  %p4319_p13 = scmp.lt.s32.totalorder %s4313_s8, %s4313_s8 }
  0x1e   :  { %p4320_p0 = por %p4319_p13, %p4318_p12 }
  0x20   :  { %p4321_p1 = pnand %p4320_p0, %p4314_p11 }
  0x22   :  { %4324 = shalt.err (!%p4321_p1)
}
  0x23   :  { %36 = dma.hbm_to_vmem [thread:$0]  %s6569_s1, 32768, %s31_s27, [#allocation6], %s4378_s22, %s4378_s22, %s4379_s23  }
  0x24   :  { %4369 = dma.done.wait [#allocation3], 512  }
  0x25   :  { %4370 = vsyncadd [#allocation3], 4294966784 }
  0x26   :  { %4371 = dma.done.wait [#allocation6], 32768  }
  0x27   :  { %4372 = vsyncadd [#allocation6], 4294934528  ;;  %v43_v0 = vld [vmem:[#allocation2] sm:$0xff]  ;;  %v44_v1 = vld [vmem:[#allocation2 + $0x8] sm:$0xff]  ;;  %v92_v29 = vlaneseq  ;;  %s4381_s1 = smov [#allocation7]  }
  0x28   :  { %v45_v2 = vld [vmem:[#allocation2 + $0x10] sm:$0xff]  ;;  %v47_v3 = vadd.f32 %v44_v1, %v43_v0  ;;  %v54_v4 = vmul.f32 %v43_v0, %v43_v0  ;;  %v55_v5 = vmul.f32 %v44_v1, %v44_v1  ;;  %v46_v6 = vld [vmem:[#allocation2 + $0x18] sm:$0xff]  ;;  %v4449_v42 = vld [vmem:[#allocation5] sm:$0xff]  ;;  %s4150_s10 = sshll.u32 %s4381_s1, 4  ;;  %s4151_s10 = int_to_ptr.vmem [resolvable:$true] %s4150_s10 }
  0x29   :  { %v56_v7 = vmul.f32 %v45_v2, %v45_v2  ;;  %v57_v8 = vmul.f32 %v46_v6, %v46_v6  ;;  %v50_v10 = vadd.f32 %v46_v6, %v45_v2  ;;  %v93_v30 = vshrl.u32 %v92_v29, 7  ;;  %v4451_v43 = vld [vmem:[#allocation5 + $0x8] sm:$0xff]  ;;  %v4457_v46 = vld [vmem:[#allocation5 + $0x10] sm:$0xff]  ;;  %v4459_v47 = vld [vmem:[#allocation5 + $0x18] sm:$0xff]  ;;  %s4325_s11 = scalar_lea.vmem %s4151_s10, 512  ;;  %p4330_p3 = scmp.lt.s32.totalorder %s4151_s10, %s4151_s10 }
  0x2a   :  { %48 = vadd.xlane.f32.xlu0 %v47_v3  ;;  %v58_v9 = vadd.f32 %v55_v5, %v54_v4  ;;  %v4461_v48 = vld [vmem:[#allocation5 + $0x20] sm:$0xff]  ;;  %v4481_v57 = vld [vmem:[#allocation5 + $0x28] sm:$0xff]  ;;  %v4483_v58 = vld [vmem:[#allocation5 + $0x30] sm:$0xff]  ;;  %p4326_p2 = scmp.ne.s32.totalorder %s4151_s10, %s4325_s11  ;;  %p4331_p4 = scmp.lt.s32.totalorder %s4325_s11, %s4325_s11 }
  0x2b   :  { %v61_v11 = vadd.f32 %v57_v8, %v56_v7  ;;  %v4433_v33 = vsub.s32 0, %v93_v30  ;;  %v4435_v34 = vsub.s32 1, %v93_v30  ;;  %v4439_v38 = vsub.s32 2, %v93_v30  ;;  %v4485_v59 = vld [vmem:[#allocation5 + $0x38] sm:$0xff]  ;;  %v4503_v8 = vld [vmem:[#allocation5 + $0x40] sm:$0xff] }
  0x2c   :  { %59 = vadd.xlane.f32.xlu1 %v58_v9  ;;  %v4441_v39 = vsub.s32 3, %v93_v30  ;;  %v4453_v44 = vsub.s32 4, %v93_v30  ;;  %v4455_v45 = vsub.s32 5, %v93_v30  ;;  %v4463_v49 = vsub.s32 6, %v93_v30  ;;  %v4505_v9 = vld [vmem:[#allocation5 + $0x48] sm:$0xff]  ;;  %p4332_p5 = por %p4331_p4, %p4330_p3 }
  0x2d   :  { %v4465_v50 = vsub.s32 7, %v93_v30  ;;  %v271_v30 = vld [vmem:[#allocation5 + $0x70] sm:$0xff] }
  0x2e   :  { %51 = vadd.xlane.f32.xlu0 %v50_v10  ;;  %v4507_v10 = vld [vmem:[#allocation5 + $0x50] sm:$0xff]  ;;  %p4333_p6 = pnand %p4332_p5, %p4326_p2 }
  0x30   :  { %62 = vadd.xlane.f32.xlu1 %v61_v11 }
  0xb7   :  { %v49_v12 = vpop.xlane.xlu0 %48 }
  0xb9   :  { %v60_v13 = vpop.xlane.xlu1 %59 }
  0xbb   :  { %v52_v14 = vpop.xlane.xlu0 %51 }
  0xbc   :  { %v53_v15 = vadd.f32 %v52_v14, %v49_v12 }
  0xbd   :  { %v63_v16 = vpop.xlane.xlu1 %62 }
  0xbe   :  { %v65_v17 = vmul.f32 0.001953125, %v53_v15  ;;  %v64_v18 = vadd.f32 %v63_v16, %v60_v13  ;;  %v218_v15 = vld [vmem:[#allocation5 + $0x58] sm:$0xff]  ;;  %v4513_v16 = vld [vmem:[#allocation5 + $0x60] sm:$0xff] }
  0xc0   :  { %v66_v19 = vmul.f32 0.001953125, %v64_v18  ;;  %v67_v20 = vmul.f32 %v65_v17, %v65_v17  ;;  %v84_v31 = vsub.f32 %v45_v2, %v65_v17  ;;  %v85_v32 = vsub.f32 %v46_v6, %v65_v17 }
  0xc1   :  { %v82_v36 = vsub.f32 %v43_v0, %v65_v17  ;;  %v83_v37 = vsub.f32 %v44_v1, %v65_v17  ;;  %v4515_v17 = vld [vmem:[#allocation5 + $0x68] sm:$0xff] }
  0xc2   :  { %v68_v21 = vsub.f32 %v66_v19, %v67_v20 }
  0xc4   :  { %v69_v22 = vmax.f32 %v68_v21, 0.0 }
  0xc6   :  { %4185 = vrsqrt.f32 %v69_v22  ;;  %vm72_vm0 = vcmp.eq.f32.partialorder %v69_v22, inf  ;;  %v75_v25 = vand.u32 2147483648, %v69_v22  ;;  %vm74_vm1 = vcmp.eq.f32.partialorder %v69_v22, 0.0 }
  0xd0   :  { %v4186_v23 = vpop.eup %4185 }
  0xd1   :  { %v71_v24 = vmul.f32 %v4186_v23, %v69_v22 }
  0xd3   :  { %v73_v26 = vsel %vm72_vm0, %v69_v22, %v71_v24 }
  0xd4   :  { %v76_v27 = vsel %vm74_vm1, %v75_v25, %v73_v26 }
  0xd5   :  { %v77_v28 = vadd.f32 1e-06, %v76_v27 }
  0xd7   :  { %4187 = vrcp.f32 %v77_v28 }
  0xe1   :  { %v4437_v35 = vpop.eup %4187 }
  0xe2   :  { %v4444_v40 = vmul.f32 %v4437_v35, %v84_v31  ;;  %v4447_v41 = vmul.f32 %v4437_v35, %v85_v32  ;;  %v4468_v51 = vmul.f32 %v4437_v35, %v82_v36  ;;  %v4471_v52 = vmul.f32 %v4437_v35, %v83_v37  ;;  %v272_v31 = vld [vmem:[#allocation5 + $0x78] sm:$0xff] }
  0xe4   :  { %v103_v53 = vrot.slane %v4444_v40, %v4433_v33  ;;  %v107_v54 = vrot.slane %v4447_v41, %v4433_v33  ;;  %v126_v55 = vrot.slane %v4444_v40, %v4435_v34  ;;  %v130_v56 = vrot.slane %v4447_v41, %v4435_v34 }
  0xe5   :  { %v153_v60 = vrot.slane %v4444_v40, %v4439_v38  ;;  %v157_v61 = vrot.slane %v4447_v41, %v4439_v38  ;;  %v180_v62 = vrot.slane %v4444_v40, %v4441_v39  ;;  %v184_v63 = vrot.slane %v4447_v41, %v4441_v39 }
  0xe6   :  { %v110_v0 = vmul.f32 %v103_v53, %v4449_v42  ;;  %v111_v1 = vmul.f32 %v107_v54, %v4451_v43  ;;  %v133_v2 = vmul.f32 %v126_v55, %v4457_v46  ;;  %v134_v3 = vmul.f32 %v130_v56, %v4459_v47 }
  0xe7   :  { %v160_v4 = vmul.f32 %v153_v60, %v4461_v48  ;;  %v161_v5 = vmul.f32 %v157_v61, %v4481_v57  ;;  %v187_v6 = vmul.f32 %v180_v62, %v4483_v58  ;;  %v188_v7 = vmul.f32 %v184_v63, %v4485_v59 }
  0xe8   :  { %v137_v11 = vadd.f32 %v133_v2, %v110_v0  ;;  %v138_v12 = vadd.f32 %v134_v3, %v111_v1  ;;  %v207_v13 = vrot.slane %v4444_v40, %v4453_v44  ;;  %v211_v14 = vrot.slane %v4447_v41, %v4453_v44 }
  0xe9   :  { %v230_v18 = vrot.slane %v4444_v40, %v4455_v45  ;;  %v234_v19 = vrot.slane %v4447_v41, %v4455_v45  ;;  %v257_v20 = vrot.slane %v4444_v40, %v4463_v49  ;;  %v261_v21 = vrot.slane %v4447_v41, %v4463_v49 }
  0xea   :  { %v164_v22 = vadd.f32 %v160_v4, %v137_v11  ;;  %v165_v23 = vadd.f32 %v161_v5, %v138_v12  ;;  %v214_v24 = vmul.f32 %v207_v13, %v4503_v8  ;;  %v215_v25 = vmul.f32 %v211_v14, %v4505_v9 }
  0xeb   :  { %v237_v26 = vmul.f32 %v230_v18, %v4507_v10  ;;  %v238_v27 = vmul.f32 %v234_v19, %v218_v15  ;;  %v264_v28 = vmul.f32 %v257_v20, %v4513_v16  ;;  %v265_v29 = vmul.f32 %v261_v21, %v4515_v17 }
  0xec   :  { %v191_v32 = vadd.f32 %v187_v6, %v164_v22  ;;  %v192_v36 = vadd.f32 %v188_v7, %v165_v23  ;;  %v284_v37 = vrot.slane %v4444_v40, %v4465_v50  ;;  %v288_v53 = vrot.slane %v4447_v41, %v4465_v50 }
  0xed   :  { %v241_v54 = vadd.f32 %v237_v26, %v214_v24  ;;  %v242_v55 = vadd.f32 %v238_v27, %v215_v25  ;;  %v95_v56 = vrot.slane %v4468_v51, %v4433_v33  ;;  %v99_v60 = vrot.slane %v4471_v52, %v4433_v33 }
  0xee   :  { %v291_v61 = vmul.f32 %v284_v37, %v271_v30  ;;  %v292_v62 = vmul.f32 %v288_v53, %v272_v31  ;;  %v118_v63 = vrot.slane %v4468_v51, %v4435_v34  ;;  %v122_v0 = vrot.slane %v4471_v52, %v4435_v34 }
  0xef   :  { %v268_v40 = vadd.f32 %v264_v28, %v241_v54  ;;  %v269_v1 = vadd.f32 %v265_v29, %v242_v55  ;;  %v108_v41 = vmul.f32 %v95_v56, %v4449_v42  ;;  %v109_v2 = vmul.f32 %v99_v60, %v4451_v43 }
  0xf0   :  { %v131_v3 = vmul.f32 %v118_v63, %v4457_v46  ;;  %v132_v4 = vmul.f32 %v122_v0, %v4459_v47  ;;  %v145_v5 = vrot.slane %v4468_v51, %v4439_v38  ;;  %v149_v6 = vrot.slane %v4471_v52, %v4439_v38 }
  0xf1   :  { %v295_v7 = vadd.f32 %v291_v61, %v268_v40  ;;  %v296_v11 = vadd.f32 %v292_v62, %v269_v1  ;;  %v172_v12 = vrot.slane %v4468_v51, %v4441_v39  ;;  %v176_v47 = vrot.slane %v4471_v52, %v4441_v39 }
  0xf2   :  { %v135_v13 = vadd.f32 %v131_v3, %v108_v41  ;;  %v136_v14 = vadd.f32 %v132_v4, %v109_v2  ;;  %v158_v46 = vmul.f32 %v145_v5, %v4461_v48  ;;  %v159_v18 = vmul.f32 %v149_v6, %v4481_v57 }
  0xf3   :  { %v4552_v42 = vadd.f32 %v295_v7, %v191_v32  ;;  %v4554_v43 = vadd.f32 %v296_v11, %v192_v36  ;;  %v185_v19 = vmul.f32 %v172_v12, %v4483_v58  ;;  %v199_v20 = vrot.slane %v4468_v51, %v4453_v44 }
  0xf4   :  { %v203_v21 = vrot.slane %v4471_v52, %v4453_v44  ;;  %v222_v23 = vrot.slane %v4468_v51, %v4455_v45  ;;  %v226_v48 = vrot.slane %v4471_v52, %v4455_v45  ;;  %v249_v57 = vrot.slane %v4468_v51, %v4463_v49 }
  0xf5   :  { %v304_v22 = vadd.f32 %v4554_v43, %v4552_v42  ;;  %v162_v24 = vadd.f32 %v158_v46, %v135_v13  ;;  %v163_v58 = vadd.f32 %v159_v18, %v136_v14  ;;  %v212_v25 = vmul.f32 %v199_v20, %v4503_v8 }
  0xf6   :  { %v213_v26 = vmul.f32 %v203_v21, %v4505_v9  ;;  %v186_v27 = vmul.f32 %v176_v47, %v4485_v59  ;;  %v235_v28 = vmul.f32 %v222_v23, %v4507_v10  ;;  %v236_v29 = vmul.f32 %v226_v48, %v218_v15 }
  0xf7   :  { %305 = vadd.xlane.f32.xlu1 %v304_v22  ;;  %v253_v32 = vrot.slane %v4471_v52, %v4463_v49  ;;  %v276_v36 = vrot.slane %v4468_v51, %v4465_v50  ;;  %v280_v37 = vrot.slane %v4471_v52, %v4465_v50  ;;  %v310_v8 = vmul.f32 %v4552_v42, %v4552_v42 }
  0xf8   :  { %v311_v9 = vmul.f32 %v4554_v43, %v4554_v43  ;;  %v239_v53 = vadd.f32 %v235_v28, %v212_v25  ;;  %v240_v59 = vadd.f32 %v236_v29, %v213_v26  ;;  %v262_v10 = vmul.f32 %v249_v57, %v4513_v16  ;;  %v4595_v25 = vld [vmem:[#allocation5 + $0x80] sm:$0xff]  ;;  %v4597_v26 = vld [vmem:[#allocation5 + $0x88] sm:$0xff]  ;;  %v4601_v28 = vld [vmem:[#allocation5 + $0x98] sm:$0xff] }
  0xf9   :  { %v263_v15 = vmul.f32 %v253_v32, %v4515_v17  ;;  %v189_v54 = vadd.f32 %v185_v19, %v162_v24  ;;  %v190_v55 = vadd.f32 %v186_v27, %v163_v58  ;;  %v289_v61 = vmul.f32 %v276_v36, %v271_v30  ;;  %v4599_v27 = vld [vmem:[#allocation5 + $0x90] sm:$0xff]  ;;  %v4603_v29 = vld [vmem:[#allocation5 + $0xa0] sm:$0xff] }
  0xfa   :  { %v315_v56 = vadd.f32 %v311_v9, %v310_v8  ;;  %v266_v60 = vadd.f32 %v262_v10, %v239_v53  ;;  %v290_v62 = vmul.f32 %v280_v37, %v272_v31  ;;  %v4615_v9 = vld [vmem:[#allocation5 + $0xa8] sm:$0xff]  ;;  %v4617_v53 = vld [vmem:[#allocation5 + $0xb0] sm:$0xff] }
  0xfb   :  { %v267_v51 = vadd.f32 %v263_v15, %v240_v59  ;;  %v4619_v59 = vld [vmem:[#allocation5 + $0xb8] sm:$0xff] }
  0xfc   :  { %316 = vadd.xlane.f32.xlu1 %v315_v56  ;;  %v293_v52 = vadd.f32 %v289_v61, %v266_v60 }
  0xfd   :  { %v294_v63 = vadd.f32 %v290_v62, %v267_v51 }
  0xfe   :  { %v297_v0 = vadd.f32 %v293_v52, %v189_v54 }
  0xff   :  { %v298_v40 = vadd.f32 %v294_v63, %v190_v55 }
 0x100   :  { %v308_v41 = vmul.f32 %v297_v0, %v297_v0 }
 0x101   :  { %v301_v1 = vadd.f32 %v298_v40, %v297_v0  ;;  %v309_v2 = vmul.f32 %v298_v40, %v298_v40 }
 0x103   :  { %302 = vadd.xlane.f32.xlu0 %v301_v1  ;;  %v312_v3 = vadd.f32 %v309_v2, %v308_v41  ;;  %v4635_v1 = vld [vmem:[#allocation5 + $0xc8] sm:$0xff]  ;;  %v4637_v41 = vld [vmem:[#allocation5 + $0xd0] sm:$0xff] }
 0x107   :  { %313 = vadd.xlane.f32.xlu0 %v312_v3 }
 0x184   :  { %v306_v16 = vpop.xlane.xlu1 %305 }
 0x189   :  { %v317_v5 = vpop.xlane.xlu1 %316 }
 0x190   :  { %v303_v17 = vpop.xlane.xlu0 %302 }
 0x191   :  { %v307_v4 = vadd.f32 %v306_v16, %v303_v17 }
 0x193   :  { %v319_v6 = vmul.f32 0.001953125, %v307_v4  ;;  %v473_v4 = vld [vmem:[#allocation5 + $0xd8] sm:$0xff] }
 0x194   :  { %v314_v7 = vpop.xlane.xlu0 %313 }
 0x195   :  { %v318_v11 = vadd.f32 %v317_v5, %v314_v7  ;;  %v321_v30 = vmul.f32 %v319_v6, %v319_v6  ;;  %v338_v21 = vsub.f32 %v4552_v42, %v319_v6  ;;  %v339_v22 = vsub.f32 %v4554_v43, %v319_v6  ;;  %v4641_v5 = vld [vmem:[#allocation5 + $0xe0] sm:$0xff] }
 0x196   :  { %v336_v48 = vsub.f32 %v297_v0, %v319_v6  ;;  %v337_v57 = vsub.f32 %v298_v40, %v319_v6  ;;  %v4633_v40 = vld [vmem:[#allocation5 + $0xc0] sm:$0xff]  ;;  %v4643_v6 = vld [vmem:[#allocation5 + $0xe8] sm:$0xff] }
 0x197   :  { %v320_v31 = vmul.f32 0.001953125, %v318_v11 }
 0x199   :  { %v322_v12 = vsub.f32 %v320_v31, %v321_v30 }
 0x19b   :  { %v323_v13 = vmax.f32 %v322_v12, 0.0 }
 0x19d   :  { %4189 = vrsqrt.f32 %v323_v13  ;;  %vm326_vm2 = vcmp.eq.f32.partialorder %v323_v13, inf  ;;  %v329_v47 = vand.u32 2147483648, %v323_v13  ;;  %vm328_vm3 = vcmp.eq.f32.partialorder %v323_v13, 0.0 }
 0x1a7   :  { %v4190_v14 = vpop.eup %4189 }
 0x1a8   :  { %v325_v46 = vmul.f32 %v4190_v14, %v323_v13 }
 0x1aa   :  { %v327_v18 = vsel %vm326_vm2, %v323_v13, %v325_v46 }
 0x1ab   :  { %v330_v19 = vsel %vm328_vm3, %v329_v47, %v327_v18 }
 0x1ac   :  { %v331_v20 = vadd.f32 1e-06, %v330_v19 }
 0x1ae   :  { %4191 = vrcp.f32 %v331_v20 }
 0x1b8   :  { %v4591_v23 = vpop.eup %4191 }
 0x1b9   :  { %v342_v24 = vmul.f32 %v4591_v23, %v338_v21  ;;  %v343_v58 = vmul.f32 %v4591_v23, %v339_v22  ;;  %v4606_v42 = vmul.f32 %v4591_v23, %v336_v48  ;;  %v4609_v43 = vmul.f32 %v4591_v23, %v337_v57  ;;  %v526_v21 = vld [vmem:[#allocation5 + $0xf0] sm:$0xff]  ;;  %v527_v22 = vld [vmem:[#allocation5 + $0xf8] sm:$0xff] }
 0x1bb   :  { %v358_v32 = vrot.slane %v342_v24, %v4433_v33  ;;  %v362_v36 = vrot.slane %v343_v58, %v4433_v33  ;;  %v381_v37 = vrot.slane %v342_v24, %v4435_v34  ;;  %v385_v8 = vrot.slane %v343_v58, %v4435_v34 }
 0x1bc   :  { %v408_v10 = vrot.slane %v342_v24, %v4439_v38  ;;  %v412_v15 = vrot.slane %v343_v58, %v4439_v38  ;;  %v435_v54 = vrot.slane %v342_v24, %v4441_v39  ;;  %v439_v55 = vrot.slane %v343_v58, %v4441_v39 }
 0x1bd   :  { %v365_v56 = vmul.f32 %v358_v32, %v4595_v25  ;;  %v366_v60 = vmul.f32 %v362_v36, %v4597_v26  ;;  %v388_v51 = vmul.f32 %v381_v37, %v4599_v27  ;;  %v389_v61 = vmul.f32 %v385_v8, %v4601_v28 }
 0x1be   :  { %v415_v62 = vmul.f32 %v408_v10, %v4603_v29  ;;  %v416_v52 = vmul.f32 %v412_v15, %v4615_v9  ;;  %v442_v63 = vmul.f32 %v435_v54, %v4617_v53  ;;  %v443_v0 = vmul.f32 %v439_v55, %v4619_v59 }
 0x1bf   :  { %v392_v2 = vadd.f32 %v388_v51, %v365_v56  ;;  %v393_v3 = vadd.f32 %v389_v61, %v366_v60  ;;  %v462_v16 = vrot.slane %v342_v24, %v4453_v44  ;;  %v466_v17 = vrot.slane %v343_v58, %v4453_v44 }
 0x1c0   :  { %v485_v7 = vrot.slane %v342_v24, %v4455_v45  ;;  %v489_v11 = vrot.slane %v343_v58, %v4455_v45  ;;  %v512_v30 = vrot.slane %v342_v24, %v4463_v49  ;;  %v516_v31 = vrot.slane %v343_v58, %v4463_v49 }
 0x1c1   :  { %v419_v12 = vadd.f32 %v415_v62, %v392_v2  ;;  %v420_v13 = vadd.f32 %v416_v52, %v393_v3  ;;  %v469_v14 = vmul.f32 %v462_v16, %v4633_v40  ;;  %v470_v46 = vmul.f32 %v466_v17, %v4635_v1 }
 0x1c2   :  { %v492_v47 = vmul.f32 %v485_v7, %v4637_v41  ;;  %v493_v18 = vmul.f32 %v489_v11, %v473_v4  ;;  %v519_v19 = vmul.f32 %v512_v30, %v4641_v5  ;;  %v520_v20 = vmul.f32 %v516_v31, %v4643_v6 }
 0x1c3   :  { %v446_v48 = vadd.f32 %v442_v63, %v419_v12  ;;  %v447_v57 = vadd.f32 %v443_v0, %v420_v13  ;;  %v539_v32 = vrot.slane %v342_v24, %v4465_v50  ;;  %v543_v36 = vrot.slane %v343_v58, %v4465_v50 }
 0x1c4   :  { %v496_v37 = vadd.f32 %v492_v47, %v469_v14  ;;  %v497_v8 = vadd.f32 %v493_v18, %v470_v46  ;;  %v350_v10 = vrot.slane %v4606_v42, %v4433_v33  ;;  %v354_v15 = vrot.slane %v4609_v43, %v4433_v33 }
 0x1c5   :  { %v546_v54 = vmul.f32 %v539_v32, %v526_v21  ;;  %v547_v55 = vmul.f32 %v543_v36, %v527_v22  ;;  %v373_v56 = vrot.slane %v4606_v42, %v4435_v34  ;;  %v377_v60 = vrot.slane %v4609_v43, %v4435_v34 }
 0x1c6   :  { %v523_v51 = vadd.f32 %v519_v19, %v496_v37  ;;  %v524_v24 = vadd.f32 %v520_v20, %v497_v8  ;;  %v363_v58 = vmul.f32 %v350_v10, %v4595_v25  ;;  %v364_v61 = vmul.f32 %v354_v15, %v4597_v26 }
 0x1c7   :  { %v386_v62 = vmul.f32 %v373_v56, %v4599_v27  ;;  %v387_v52 = vmul.f32 %v377_v60, %v4601_v28  ;;  %v400_v63 = vrot.slane %v4606_v42, %v4439_v38  ;;  %v404_v0 = vrot.slane %v4609_v43, %v4439_v38 }
 0x1c8   :  { %v550_v2 = vadd.f32 %v546_v54, %v523_v51  ;;  %v551_v3 = vadd.f32 %v547_v55, %v524_v24  ;;  %v427_v16 = vrot.slane %v4606_v42, %v4441_v39  ;;  %v431_v28 = vrot.slane %v4609_v43, %v4441_v39 }
 0x1c9   :  { %v390_v17 = vadd.f32 %v386_v62, %v363_v58  ;;  %v391_v7 = vadd.f32 %v387_v52, %v364_v61  ;;  %v413_v27 = vmul.f32 %v400_v63, %v4603_v29  ;;  %v414_v11 = vmul.f32 %v404_v0, %v4615_v9 }
 0x1ca   :  { %v4674_v25 = vadd.f32 %v550_v2, %v446_v48  ;;  %v4676_v26 = vadd.f32 %v551_v3, %v447_v57  ;;  %v440_v30 = vmul.f32 %v427_v16, %v4617_v53  ;;  %v454_v31 = vrot.slane %v4606_v42, %v4453_v44 }
 0x1cb   :  { %v458_v12 = vrot.slane %v4609_v43, %v4453_v44  ;;  %v477_v14 = vrot.slane %v4606_v42, %v4455_v45  ;;  %v481_v29 = vrot.slane %v4609_v43, %v4455_v45  ;;  %v504_v9 = vrot.slane %v4606_v42, %v4463_v49 }
 0x1cc   :  { %v559_v13 = vadd.f32 %v4676_v26, %v4674_v25  ;;  %v417_v46 = vadd.f32 %v413_v27, %v390_v17  ;;  %v418_v53 = vadd.f32 %v414_v11, %v391_v7  ;;  %v467_v47 = vmul.f32 %v454_v31, %v4633_v40 }
 0x1cd   :  { %v468_v18 = vmul.f32 %v458_v12, %v4635_v1  ;;  %v441_v19 = vmul.f32 %v431_v28, %v4619_v59  ;;  %v490_v20 = vmul.f32 %v477_v14, %v4637_v41  ;;  %v491_v48 = vmul.f32 %v481_v29, %v473_v4 }
 0x1ce   :  { %560 = vadd.xlane.f32.xlu1 %v559_v13  ;;  %v508_v57 = vrot.slane %v4609_v43, %v4463_v49  ;;  %v531_v32 = vrot.slane %v4606_v42, %v4465_v50  ;;  %v535_v36 = vrot.slane %v4609_v43, %v4465_v50  ;;  %v565_v40 = vmul.f32 %v4674_v25, %v4674_v25 }
 0x1cf   :  { %v566_v1 = vmul.f32 %v4676_v26, %v4676_v26  ;;  %v494_v37 = vadd.f32 %v490_v20, %v467_v47  ;;  %v495_v59 = vadd.f32 %v491_v48, %v468_v18  ;;  %v517_v41 = vmul.f32 %v504_v9, %v4641_v5  ;;  %v4717_v18 = vld [vmem:[#allocation5 + $0x100] sm:$0xff]  ;;  %v4721_v20 = vld [vmem:[#allocation5 + $0x110] sm:$0xff]  ;;  %v4723_v48 = vld [vmem:[#allocation5 + $0x118] sm:$0xff] }
 0x1d0   :  { %v518_v4 = vmul.f32 %v508_v57, %v4643_v6  ;;  %v444_v8 = vadd.f32 %v440_v30, %v417_v46  ;;  %v445_v10 = vadd.f32 %v441_v19, %v418_v53  ;;  %v544_v55 = vmul.f32 %v531_v32, %v526_v21  ;;  %v4719_v19 = vld [vmem:[#allocation5 + $0x108] sm:$0xff]  ;;  %v4725_v57 = vld [vmem:[#allocation5 + $0x120] sm:$0xff] }
 0x1d1   :  { %v570_v15 = vadd.f32 %v566_v1, %v565_v40  ;;  %v521_v54 = vadd.f32 %v517_v41, %v494_v37  ;;  %v545_v56 = vmul.f32 %v535_v36, %v527_v22  ;;  %v4737_v37 = vld [vmem:[#allocation5 + $0x128] sm:$0xff]  ;;  %v4741_v41 = vld [vmem:[#allocation5 + $0x138] sm:$0xff] }
 0x1d2   :  { %v522_v42 = vadd.f32 %v518_v4, %v495_v59  ;;  %v4739_v59 = vld [vmem:[#allocation5 + $0x130] sm:$0xff] }
 0x1d3   :  { %571 = vadd.xlane.f32.xlu1 %v570_v15  ;;  %v548_v43 = vadd.f32 %v544_v55, %v521_v54 }
 0x1d4   :  { %v549_v60 = vadd.f32 %v545_v56, %v522_v42 }
 0x1d5   :  { %v552_v51 = vadd.f32 %v548_v43, %v444_v8 }
 0x1d6   :  { %v553_v24 = vadd.f32 %v549_v60, %v445_v10 }
 0x1d7   :  { %v563_v61 = vmul.f32 %v552_v51, %v552_v51 }
 0x1d8   :  { %v556_v58 = vadd.f32 %v553_v24, %v552_v51  ;;  %v564_v62 = vmul.f32 %v553_v24, %v553_v24 }
 0x1da   :  { %557 = vadd.xlane.f32.xlu0 %v556_v58  ;;  %v567_v52 = vadd.f32 %v564_v62, %v563_v61  ;;  %v4755_v58 = vld [vmem:[#allocation5 + $0x140] sm:$0xff]  ;;  %v4757_v61 = vld [vmem:[#allocation5 + $0x148] sm:$0xff]  ;;  %v4759_v62 = vld [vmem:[#allocation5 + $0x150] sm:$0xff] }
 0x1de   :  { %568 = vadd.xlane.f32.xlu0 %v567_v52 }
 0x25b   :  { %v561_v5 = vpop.xlane.xlu1 %560 }
 0x260   :  { %v572_v0 = vpop.xlane.xlu1 %571 }
 0x267   :  { %v558_v6 = vpop.xlane.xlu0 %557 }
 0x268   :  { %v562_v63 = vadd.f32 %v561_v5, %v558_v6 }
 0x26a   :  { %v574_v2 = vmul.f32 0.001953125, %v562_v63 }
 0x26b   :  { %v569_v3 = vpop.xlane.xlu0 %568 }
 0x26c   :  { %v573_v16 = vadd.f32 %v572_v0, %v569_v3  ;;  %v576_v21 = vmul.f32 %v574_v2, %v574_v2  ;;  %v593_v13 = vsub.f32 %v4674_v25, %v574_v2  ;;  %v594_v14 = vsub.f32 %v4676_v26, %v574_v2  ;;  %v728_v0 = vld [vmem:[#allocation5 + $0x158] sm:$0xff]  ;;  %v4765_v3 = vld [vmem:[#allocation5 + $0x168] sm:$0xff] }
 0x26d   :  { %v591_v9 = vsub.f32 %v552_v51, %v574_v2  ;;  %v592_v46 = vsub.f32 %v553_v24, %v574_v2  ;;  %v4763_v2 = vld [vmem:[#allocation5 + $0x160] sm:$0xff] }
 0x26e   :  { %v575_v22 = vmul.f32 0.001953125, %v573_v16 }
 0x270   :  { %v577_v17 = vsub.f32 %v575_v22, %v576_v21 }
 0x272   :  { %v578_v7 = vmax.f32 %v577_v17, 0.0 }
 0x274   :  { %4193 = vrsqrt.f32 %v578_v7  ;;  %vm581_vm4 = vcmp.eq.f32.partialorder %v578_v7, inf  ;;  %v584_v11 = vand.u32 2147483648, %v578_v7  ;;  %vm583_vm5 = vcmp.eq.f32.partialorder %v578_v7, 0.0 }
 0x27e   :  { %v4194_v27 = vpop.eup %4193 }
 0x27f   :  { %v580_v28 = vmul.f32 %v4194_v27, %v578_v7 }
 0x281   :  { %v582_v30 = vsel %vm581_vm4, %v578_v7, %v580_v28 }
 0x282   :  { %v585_v31 = vsel %vm583_vm5, %v584_v11, %v582_v30 }
 0x283   :  { %v586_v12 = vadd.f32 1e-06, %v585_v31 }
 0x285   :  { %4195 = vrcp.f32 %v586_v12 }
 0x28f   :  { %v4713_v29 = vpop.eup %4195 }
 0x290   :  { %v597_v53 = vmul.f32 %v4713_v29, %v593_v13  ;;  %v598_v47 = vmul.f32 %v4713_v29, %v594_v14  ;;  %v4728_v25 = vmul.f32 %v4713_v29, %v591_v9  ;;  %v4731_v26 = vmul.f32 %v4713_v29, %v592_v46  ;;  %v781_v14 = vld [vmem:[#allocation5 + $0x170] sm:$0xff]  ;;  %v782_v9 = vld [vmem:[#allocation5 + $0x178] sm:$0xff] }
 0x292   :  { %v613_v32 = vrot.slane %v597_v53, %v4433_v33  ;;  %v617_v36 = vrot.slane %v598_v47, %v4433_v33  ;;  %v636_v40 = vrot.slane %v597_v53, %v4435_v34  ;;  %v640_v1 = vrot.slane %v598_v47, %v4435_v34 }
 0x293   :  { %v663_v4 = vrot.slane %v597_v53, %v4439_v38  ;;  %v667_v8 = vrot.slane %v598_v47, %v4439_v38  ;;  %v690_v10 = vrot.slane %v597_v53, %v4441_v39  ;;  %v694_v15 = vrot.slane %v598_v47, %v4441_v39 }
 0x294   :  { %v620_v54 = vmul.f32 %v613_v32, %v4717_v18  ;;  %v621_v42 = vmul.f32 %v617_v36, %v4719_v19  ;;  %v643_v55 = vmul.f32 %v636_v40, %v4721_v20  ;;  %v644_v56 = vmul.f32 %v640_v1, %v4723_v48 }
 0x295   :  { %v670_v43 = vmul.f32 %v663_v4, %v4725_v57  ;;  %v671_v60 = vmul.f32 %v667_v8, %v4737_v37  ;;  %v697_v51 = vmul.f32 %v690_v10, %v4739_v59  ;;  %v698_v24 = vmul.f32 %v694_v15, %v4741_v41 }
 0x296   :  { %v647_v52 = vadd.f32 %v643_v55, %v620_v54  ;;  %v648_v5 = vadd.f32 %v644_v56, %v621_v42  ;;  %v717_v6 = vrot.slane %v597_v53, %v4453_v44  ;;  %v721_v63 = vrot.slane %v598_v47, %v4453_v44 }
 0x297   :  { %v740_v16 = vrot.slane %v597_v53, %v4455_v45  ;;  %v744_v21 = vrot.slane %v598_v47, %v4455_v45  ;;  %v767_v22 = vrot.slane %v597_v53, %v4463_v49  ;;  %v771_v17 = vrot.slane %v598_v47, %v4463_v49 }
 0x298   :  { %v674_v7 = vadd.f32 %v670_v43, %v647_v52  ;;  %v675_v27 = vadd.f32 %v671_v60, %v648_v5  ;;  %v724_v28 = vmul.f32 %v717_v6, %v4755_v58  ;;  %v725_v11 = vmul.f32 %v721_v63, %v4757_v61 }
 0x299   :  { %v747_v30 = vmul.f32 %v740_v16, %v4759_v62  ;;  %v748_v31 = vmul.f32 %v744_v21, %v728_v0  ;;  %v774_v12 = vmul.f32 %v767_v22, %v4763_v2  ;;  %v775_v13 = vmul.f32 %v771_v17, %v4765_v3 }
 0x29a   :  { %v701_v46 = vadd.f32 %v697_v51, %v674_v7  ;;  %v702_v32 = vadd.f32 %v698_v24, %v675_v27  ;;  %v794_v36 = vrot.slane %v597_v53, %v4465_v50  ;;  %v798_v40 = vrot.slane %v598_v47, %v4465_v50 }
 0x29b   :  { %v751_v1 = vadd.f32 %v747_v30, %v724_v28  ;;  %v752_v4 = vadd.f32 %v748_v31, %v725_v11  ;;  %v605_v8 = vrot.slane %v4728_v25, %v4433_v33  ;;  %v609_v10 = vrot.slane %v4731_v26, %v4433_v33 }
 0x29c   :  { %v801_v15 = vmul.f32 %v794_v36, %v781_v14  ;;  %v802_v54 = vmul.f32 %v798_v40, %v782_v9  ;;  %v628_v42 = vrot.slane %v4728_v25, %v4435_v34  ;;  %v632_v55 = vrot.slane %v4731_v26, %v4435_v34 }
 0x29d   :  { %v778_v56 = vadd.f32 %v774_v12, %v751_v1  ;;  %v779_v53 = vadd.f32 %v775_v13, %v752_v4  ;;  %v618_v47 = vmul.f32 %v605_v8, %v4717_v18  ;;  %v619_v43 = vmul.f32 %v609_v10, %v4719_v19 }
 0x29e   :  { %v641_v60 = vmul.f32 %v628_v42, %v4721_v20  ;;  %v642_v51 = vmul.f32 %v632_v55, %v4723_v48  ;;  %v655_v24 = vrot.slane %v4728_v25, %v4439_v38  ;;  %v659_v52 = vrot.slane %v4731_v26, %v4439_v38 }
 0x29f   :  { %v805_v5 = vadd.f32 %v801_v15, %v778_v56  ;;  %v806_v6 = vadd.f32 %v802_v54, %v779_v53  ;;  %v682_v63 = vrot.slane %v4728_v25, %v4441_v39  ;;  %v686_v48 = vrot.slane %v4731_v26, %v4441_v39 }
 0x2a0   :  { %v645_v16 = vadd.f32 %v641_v60, %v618_v47  ;;  %v646_v21 = vadd.f32 %v642_v51, %v619_v43  ;;  %v668_v20 = vmul.f32 %v655_v24, %v4725_v57  ;;  %v669_v22 = vmul.f32 %v659_v52, %v4737_v37 }
 0x2a1   :  { %v4796_v18 = vadd.f32 %v805_v5, %v701_v46  ;;  %v4798_v19 = vadd.f32 %v806_v6, %v702_v32  ;;  %v695_v17 = vmul.f32 %v682_v63, %v4739_v59  ;;  %v709_v7 = vrot.slane %v4728_v25, %v4453_v44 }
 0x2a2   :  { %v713_v27 = vrot.slane %v4731_v26, %v4453_v44  ;;  %v732_v11 = vrot.slane %v4728_v25, %v4455_v45  ;;  %v736_v57 = vrot.slane %v4731_v26, %v4455_v45  ;;  %v759_v37 = vrot.slane %v4728_v25, %v4463_v49 }
 0x2a3   :  { %v814_v28 = vadd.f32 %v4798_v19, %v4796_v18  ;;  %v672_v30 = vadd.f32 %v668_v20, %v645_v16  ;;  %v673_v59 = vadd.f32 %v669_v22, %v646_v21  ;;  %v722_v31 = vmul.f32 %v709_v7, %v4755_v58 }
 0x2a4   :  { %v723_v12 = vmul.f32 %v713_v27, %v4757_v61  ;;  %v696_v13 = vmul.f32 %v686_v48, %v4741_v41  ;;  %v745_v46 = vmul.f32 %v732_v11, %v4759_v62  ;;  %v746_v32 = vmul.f32 %v736_v57, %v728_v0 }
 0x2a5   :  { %815 = vadd.xlane.f32.xlu1 %v814_v28  ;;  %v763_v36 = vrot.slane %v4731_v26, %v4463_v49  ;;  %v786_v40 = vrot.slane %v4728_v25, %v4465_v50  ;;  %v790_v1 = vrot.slane %v4731_v26, %v4465_v50  ;;  %v820_v58 = vmul.f32 %v4796_v18, %v4796_v18 }
 0x2a6   :  { %v821_v61 = vmul.f32 %v4798_v19, %v4798_v19  ;;  %v749_v4 = vadd.f32 %v745_v46, %v722_v31  ;;  %v750_v41 = vadd.f32 %v746_v32, %v723_v12  ;;  %v772_v62 = vmul.f32 %v759_v37, %v4763_v2  ;;  %v4841_v46 = vld [vmem:[#allocation5 + $0x188] sm:$0xff]  ;;  %v4843_v32 = vld [vmem:[#allocation5 + $0x190] sm:$0xff] }
 0x2a7   :  { %v773_v0 = vmul.f32 %v763_v36, %v4765_v3  ;;  %v699_v8 = vadd.f32 %v695_v17, %v672_v30  ;;  %v700_v10 = vadd.f32 %v696_v13, %v673_v59  ;;  %v799_v42 = vmul.f32 %v786_v40, %v781_v14  ;;  %v4839_v13 = vld [vmem:[#allocation5 + $0x180] sm:$0xff]  ;;  %v4845_v36 = vld [vmem:[#allocation5 + $0x198] sm:$0xff] }
 0x2a8   :  { %v825_v15 = vadd.f32 %v821_v61, %v820_v58  ;;  %v776_v54 = vadd.f32 %v772_v62, %v749_v4  ;;  %v800_v55 = vmul.f32 %v790_v1, %v782_v9  ;;  %v4847_v40 = vld [vmem:[#allocation5 + $0x1a0] sm:$0xff]  ;;  %v4861_v62 = vld [vmem:[#allocation5 + $0x1b0] sm:$0xff] }
 0x2a9   :  { %v777_v25 = vadd.f32 %v773_v0, %v750_v41  ;;  %v4859_v41 = vld [vmem:[#allocation5 + $0x1a8] sm:$0xff]  ;;  %v4863_v0 = vld [vmem:[#allocation5 + $0x1b8] sm:$0xff] }
 0x2aa   :  { %826 = vadd.xlane.f32.xlu1 %v825_v15  ;;  %v803_v26 = vadd.f32 %v799_v42, %v776_v54 }
 0x2ab   :  { %v804_v56 = vadd.f32 %v800_v55, %v777_v25 }
 0x2ac   :  { %v807_v53 = vadd.f32 %v803_v26, %v699_v8 }
 0x2ad   :  { %v808_v47 = vadd.f32 %v804_v56, %v700_v10 }
 0x2ae   :  { %v818_v60 = vmul.f32 %v807_v53, %v807_v53 }
 0x2af   :  { %v811_v43 = vadd.f32 %v808_v47, %v807_v53  ;;  %v819_v51 = vmul.f32 %v808_v47, %v808_v47 }
 0x2b1   :  { %812 = vadd.xlane.f32.xlu0 %v811_v43  ;;  %v822_v24 = vadd.f32 %v819_v51, %v818_v60  ;;  %v4877_v60 = vld [vmem:[#allocation5 + $0x1c0] sm:$0xff]  ;;  %v4879_v51 = vld [vmem:[#allocation5 + $0x1c8] sm:$0xff] }
 0x2b5   :  { %823 = vadd.xlane.f32.xlu0 %v822_v24  ;;  %v4881_v24 = vld [vmem:[#allocation5 + $0x1d0] sm:$0xff] }
 0x332   :  { %v816_v2 = vpop.xlane.xlu1 %815 }
 0x337   :  { %v827_v5 = vpop.xlane.xlu1 %826 }
 0x33e   :  { %v813_v3 = vpop.xlane.xlu0 %812 }
 0x33f   :  { %v817_v52 = vadd.f32 %v816_v2, %v813_v3 }
 0x341   :  { %v829_v6 = vmul.f32 0.001953125, %v817_v52 }
 0x342   :  { %v824_v63 = vpop.xlane.xlu0 %823 }
 0x343   :  { %v828_v16 = vadd.f32 %v827_v5, %v824_v63  ;;  %v831_v14 = vmul.f32 %v829_v6, %v829_v6  ;;  %v848_v11 = vsub.f32 %v4796_v18, %v829_v6  ;;  %v849_v57 = vsub.f32 %v4798_v19, %v829_v6  ;;  %v4885_v63 = vld [vmem:[#allocation5 + $0x1e0] sm:$0xff] }
 0x344   :  { %v846_v30 = vsub.f32 %v807_v53, %v829_v6  ;;  %v847_v59 = vsub.f32 %v808_v47, %v829_v6  ;;  %v983_v6 = vld [vmem:[#allocation5 + $0x1d8] sm:$0xff] }
 0x345   :  { %v830_v9 = vmul.f32 0.001953125, %v828_v16  ;;  %v4887_v16 = vld [vmem:[#allocation5 + $0x1e8] sm:$0xff] }
 0x347   :  { %v832_v21 = vsub.f32 %v830_v9, %v831_v14 }
 0x349   :  { %v833_v20 = vmax.f32 %v832_v21, 0.0 }
 0x34b   :  { %4197 = vrsqrt.f32 %v833_v20  ;;  %vm836_vm6 = vcmp.eq.f32.partialorder %v833_v20, inf  ;;  %v839_v17 = vand.u32 2147483648, %v833_v20  ;;  %vm838_vm7 = vcmp.eq.f32.partialorder %v833_v20, 0.0 }
 0x355   :  { %v4198_v48 = vpop.eup %4197 }
 0x356   :  { %v835_v22 = vmul.f32 %v4198_v48, %v833_v20 }
 0x358   :  { %v837_v7 = vsel %vm836_vm6, %v833_v20, %v835_v22 }
 0x359   :  { %v840_v27 = vsel %vm838_vm7, %v839_v17, %v837_v7 }
 0x35a   :  { %v841_v28 = vadd.f32 1e-06, %v840_v27 }
 0x35c   :  { %4199 = vrcp.f32 %v841_v28 }
 0x366   :  { %v4835_v37 = vpop.eup %4199 }
 0x367   :  { %v852_v31 = vmul.f32 %v4835_v37, %v848_v11  ;;  %v853_v12 = vmul.f32 %v4835_v37, %v849_v57  ;;  %v4850_v18 = vmul.f32 %v4835_v37, %v846_v30  ;;  %v4853_v19 = vmul.f32 %v4835_v37, %v847_v59  ;;  %v1036_v30 = vld [vmem:[#allocation5 + $0x1f0] sm:$0xff]  ;;  %v1037_v59 = vld [vmem:[#allocation5 + $0x1f8] sm:$0xff] }
 0x369   :  { %v868_v1 = vrot.slane %v852_v31, %v4433_v33  ;;  %v872_v58 = vrot.slane %v853_v12, %v4433_v33  ;;  %v891_v61 = vrot.slane %v852_v31, %v4435_v34  ;;  %v895_v4 = vrot.slane %v853_v12, %v4435_v34 }
 0x36a   :  { %v918_v8 = vrot.slane %v852_v31, %v4439_v38  ;;  %v922_v10 = vrot.slane %v853_v12, %v4439_v38  ;;  %v945_v15 = vrot.slane %v852_v31, %v4441_v39  ;;  %v949_v54 = vrot.slane %v853_v12, %v4441_v39 }
 0x36b   :  { %v875_v25 = vmul.f32 %v868_v1, %v4839_v13  ;;  %v876_v42 = vmul.f32 %v872_v58, %v4841_v46  ;;  %v898_v55 = vmul.f32 %v891_v61, %v4843_v32  ;;  %v899_v26 = vmul.f32 %v895_v4, %v4845_v36 }
 0x36c   :  { %v925_v56 = vmul.f32 %v918_v8, %v4847_v40  ;;  %v926_v53 = vmul.f32 %v922_v10, %v4859_v41  ;;  %v952_v47 = vmul.f32 %v945_v15, %v4861_v62  ;;  %v953_v43 = vmul.f32 %v949_v54, %v4863_v0 }
 0x36d   :  { %v902_v2 = vadd.f32 %v898_v55, %v875_v25  ;;  %v903_v3 = vadd.f32 %v899_v26, %v876_v42  ;;  %v972_v52 = vrot.slane %v852_v31, %v4453_v44  ;;  %v976_v5 = vrot.slane %v853_v12, %v4453_v44 }
 0x36e   :  { %v995_v14 = vrot.slane %v852_v31, %v4455_v45  ;;  %v999_v9 = vrot.slane %v853_v12, %v4455_v45  ;;  %v1022_v21 = vrot.slane %v852_v31, %v4463_v49  ;;  %v1026_v20 = vrot.slane %v853_v12, %v4463_v49 }
 0x36f   :  { %v929_v48 = vadd.f32 %v925_v56, %v902_v2  ;;  %v930_v22 = vadd.f32 %v926_v53, %v903_v3  ;;  %v979_v17 = vmul.f32 %v972_v52, %v4877_v60  ;;  %v980_v7 = vmul.f32 %v976_v5, %v4879_v51 }
 0x370   :  { %v1002_v27 = vmul.f32 %v995_v14, %v4881_v24  ;;  %v1003_v28 = vmul.f32 %v999_v9, %v983_v6  ;;  %v1029_v11 = vmul.f32 %v1022_v21, %v4885_v63  ;;  %v1030_v57 = vmul.f32 %v1026_v20, %v4887_v16 }
 0x371   :  { %v956_v1 = vadd.f32 %v952_v47, %v929_v48  ;;  %v957_v58 = vadd.f32 %v953_v43, %v930_v22  ;;  %v1049_v61 = vrot.slane %v852_v31, %v4465_v50  ;;  %v1053_v4 = vrot.slane %v853_v12, %v4465_v50 }
 0x372   :  { %v1006_v8 = vadd.f32 %v1002_v27, %v979_v17  ;;  %v1007_v10 = vadd.f32 %v1003_v28, %v980_v7  ;;  %v860_v15 = vrot.slane %v4850_v18, %v4433_v33  ;;  %v864_v54 = vrot.slane %v4853_v19, %v4433_v33 }
 0x373   :  { %v1056_v25 = vmul.f32 %v1049_v61, %v1036_v30  ;;  %v1057_v42 = vmul.f32 %v1053_v4, %v1037_v59  ;;  %v883_v55 = vrot.slane %v4850_v18, %v4435_v34  ;;  %v887_v26 = vrot.slane %v4853_v19, %v4435_v34 }
 0x374   :  { %v1033_v56 = vadd.f32 %v1029_v11, %v1006_v8  ;;  %v1034_v31 = vadd.f32 %v1030_v57, %v1007_v10  ;;  %v873_v12 = vmul.f32 %v860_v15, %v4839_v13  ;;  %v874_v53 = vmul.f32 %v864_v54, %v4841_v46 }
 0x375   :  { %v896_v47 = vmul.f32 %v883_v55, %v4843_v32  ;;  %v897_v43 = vmul.f32 %v887_v26, %v4845_v36  ;;  %v910_v2 = vrot.slane %v4850_v18, %v4439_v38  ;;  %v914_v3 = vrot.slane %v4853_v19, %v4439_v38 }
 0x376   :  { %v1060_v52 = vadd.f32 %v1056_v25, %v1033_v56  ;;  %v1061_v5 = vadd.f32 %v1057_v42, %v1034_v31  ;;  %v937_v14 = vrot.slane %v4850_v18, %v4441_v39  ;;  %v941_v36 = vrot.slane %v4853_v19, %v4441_v39 }
 0x377   :  { %v900_v9 = vadd.f32 %v896_v47, %v873_v12  ;;  %v901_v21 = vadd.f32 %v897_v43, %v874_v53  ;;  %v923_v32 = vmul.f32 %v910_v2, %v4847_v40  ;;  %v924_v20 = vmul.f32 %v914_v3, %v4859_v41 }
 0x378   :  { %v4918_v13 = vadd.f32 %v1060_v52, %v956_v1  ;;  %v4920_v46 = vadd.f32 %v1061_v5, %v957_v58  ;;  %v950_v48 = vmul.f32 %v937_v14, %v4861_v62  ;;  %v964_v22 = vrot.slane %v4850_v18, %v4453_v44 }
 0x379   :  { %v968_v17 = vrot.slane %v4853_v19, %v4453_v44  ;;  %v987_v27 = vrot.slane %v4850_v18, %v4455_v45  ;;  %v991_v40 = vrot.slane %v4853_v19, %v4455_v45  ;;  %v1014_v41 = vrot.slane %v4850_v18, %v4463_v49 }
 0x37a   :  { %v1069_v7 = vadd.f32 %v4920_v46, %v4918_v13  ;;  %v927_v28 = vadd.f32 %v923_v32, %v900_v9  ;;  %v928_v62 = vadd.f32 %v924_v20, %v901_v21  ;;  %v977_v11 = vmul.f32 %v964_v22, %v4877_v60 }
 0x37b   :  { %v978_v57 = vmul.f32 %v968_v17, %v4879_v51  ;;  %v951_v1 = vmul.f32 %v941_v36, %v4863_v0  ;;  %v1000_v58 = vmul.f32 %v987_v27, %v4881_v24  ;;  %v1001_v61 = vmul.f32 %v991_v40, %v983_v6 }
 0x37c   :  { %1070 = vadd.xlane.f32.xlu1 %v1069_v7  ;;  %v1018_v4 = vrot.slane %v4853_v19, %v4463_v49  ;;  %v1041_v8 = vrot.slane %v4850_v18, %v4465_v50  ;;  %v1045_v10 = vrot.slane %v4853_v19, %v4465_v50  ;;  %v1075_v60 = vmul.f32 %v4918_v13, %v4918_v13 }
 0x37d   :  { %v1076_v51 = vmul.f32 %v4920_v46, %v4920_v46  ;;  %v1004_v15 = vadd.f32 %v1000_v58, %v977_v11  ;;  %v1005_v0 = vadd.f32 %v1001_v61, %v978_v57  ;;  %v1027_v24 = vmul.f32 %v1014_v41, %v4885_v63  ;;  %v4961_v58 = vld [vmem:[#allocation5 + $0x200] sm:$0xff]  ;;  %v4963_v61 = vld [vmem:[#allocation5 + $0x208] sm:$0xff] }
 0x37e   :  { %v1028_v6 = vmul.f32 %v1018_v4, %v4887_v16  ;;  %v954_v54 = vadd.f32 %v950_v48, %v927_v28  ;;  %v955_v25 = vadd.f32 %v951_v1, %v928_v62  ;;  %v1054_v26 = vmul.f32 %v1041_v8, %v1036_v30  ;;  %v4965_v4 = vld [vmem:[#allocation5 + $0x210] sm:$0xff]  ;;  %v4967_v8 = vld [vmem:[#allocation5 + $0x218] sm:$0xff] }
 0x37f   :  { %v1080_v42 = vadd.f32 %v1076_v51, %v1075_v60  ;;  %v1031_v55 = vadd.f32 %v1027_v24, %v1004_v15  ;;  %v1055_v56 = vmul.f32 %v1045_v10, %v1037_v59  ;;  %v4969_v10 = vld [vmem:[#allocation5 + $0x220] sm:$0xff]  ;;  %v4981_v24 = vld [vmem:[#allocation5 + $0x228] sm:$0xff] }
 0x380   :  { %v1032_v18 = vadd.f32 %v1028_v6, %v1005_v0  ;;  %v4983_v6 = vld [vmem:[#allocation5 + $0x230] sm:$0xff] }
 0x381   :  { %1081 = vadd.xlane.f32.xlu1 %v1080_v42  ;;  %v1058_v19 = vadd.f32 %v1054_v26, %v1031_v55 }
 0x382   :  { %v1059_v31 = vadd.f32 %v1055_v56, %v1032_v18 }
 0x383   :  { %v1062_v12 = vadd.f32 %v1058_v19, %v954_v54  ;;  %v4985_v54 = vld [vmem:[#allocation5 + $0x238] sm:$0xff] }
 0x384   :  { %v1063_v53 = vadd.f32 %v1059_v31, %v955_v25 }
 0x385   :  { %v1073_v43 = vmul.f32 %v1062_v12, %v1062_v12 }
 0x386   :  { %v1066_v47 = vadd.f32 %v1063_v53, %v1062_v12  ;;  %v1074_v2 = vmul.f32 %v1063_v53, %v1063_v53 }
 0x388   :  { %1067 = vadd.xlane.f32.xlu0 %v1066_v47  ;;  %v1077_v3 = vadd.f32 %v1074_v2, %v1073_v43  ;;  %v4999_v2 = vld [vmem:[#allocation5 + $0x240] sm:$0xff] }
 0x38c   :  { %1078 = vadd.xlane.f32.xlu0 %v1077_v3  ;;  %v5001_v3 = vld [vmem:[#allocation5 + $0x248] sm:$0xff] }
 0x409   :  { %v1071_v63 = vpop.xlane.xlu1 %1070 }
 0x40e   :  { %v1082_v5 = vpop.xlane.xlu1 %1081 }
 0x415   :  { %v1068_v16 = vpop.xlane.xlu0 %1067 }
 0x416   :  { %v1072_v52 = vadd.f32 %v1071_v63, %v1068_v16  ;;  %v5003_v63 = vld [vmem:[#allocation5 + $0x250] sm:$0xff] }
 0x418   :  { %v1084_v14 = vmul.f32 0.001953125, %v1072_v52 }
 0x419   :  { %v1079_v9 = vpop.xlane.xlu0 %1078 }
 0x41a   :  { %v1083_v21 = vadd.f32 %v1082_v5, %v1079_v9  ;;  %v1086_v30 = vmul.f32 %v1084_v14, %v1084_v14  ;;  %v1103_v40 = vsub.f32 %v4918_v13, %v1084_v14  ;;  %v1104_v41 = vsub.f32 %v4920_v46, %v1084_v14  ;;  %v1238_v9 = vld [vmem:[#allocation5 + $0x258] sm:$0xff] }
 0x41b   :  { %v1101_v62 = vsub.f32 %v1062_v12, %v1084_v14  ;;  %v1102_v11 = vsub.f32 %v1063_v53, %v1084_v14 }
 0x41c   :  { %v1085_v59 = vmul.f32 0.001953125, %v1083_v21  ;;  %v5007_v21 = vld [vmem:[#allocation5 + $0x260] sm:$0xff] }
 0x41e   :  { %v1087_v32 = vsub.f32 %v1085_v59, %v1086_v30  ;;  %v5009_v30 = vld [vmem:[#allocation5 + $0x268] sm:$0xff] }
 0x420   :  { %v1088_v36 = vmax.f32 %v1087_v32, 0.0 }
 0x422   :  { %4201 = vrsqrt.f32 %v1088_v36  ;;  %vm1091_vm8 = vcmp.eq.f32.partialorder %v1088_v36, inf  ;;  %v1094_v22 = vand.u32 2147483648, %v1088_v36  ;;  %vm1093_vm9 = vcmp.eq.f32.partialorder %v1088_v36, 0.0 }
 0x42c   :  { %v4202_v20 = vpop.eup %4201 }
 0x42d   :  { %v1090_v48 = vmul.f32 %v4202_v20, %v1088_v36 }
 0x42f   :  { %v1092_v17 = vsel %vm1091_vm8, %v1088_v36, %v1090_v48 }
 0x430   :  { %v1095_v7 = vsel %vm1093_vm9, %v1094_v22, %v1092_v17 }
 0x431   :  { %v1096_v27 = vadd.f32 1e-06, %v1095_v7 }
 0x433   :  { %4203 = vrcp.f32 %v1096_v27 }
 0x43d   :  { %v4957_v28 = vpop.eup %4203 }
 0x43e   :  { %v1107_v57 = vmul.f32 %v4957_v28, %v1103_v40  ;;  %v1108_v1 = vmul.f32 %v4957_v28, %v1104_v41  ;;  %v4972_v13 = vmul.f32 %v4957_v28, %v1101_v62  ;;  %v4975_v46 = vmul.f32 %v4957_v28, %v1102_v11  ;;  %v1291_v11 = vld [vmem:[#allocation5 + $0x270] sm:$0xff] }
 0x440   :  { %v1123_v60 = vrot.slane %v1107_v57, %v4433_v33  ;;  %v1127_v51 = vrot.slane %v1108_v1, %v4433_v33  ;;  %v1146_v15 = vrot.slane %v1107_v57, %v4435_v34  ;;  %v1150_v0 = vrot.slane %v1108_v1, %v4435_v34 }
 0x441   :  { %v1173_v25 = vrot.slane %v1107_v57, %v4439_v38  ;;  %v1177_v42 = vrot.slane %v1108_v1, %v4439_v38  ;;  %v1200_v55 = vrot.slane %v1107_v57, %v4441_v39  ;;  %v1204_v18 = vrot.slane %v1108_v1, %v4441_v39 }
 0x442   :  { %v1130_v26 = vmul.f32 %v1123_v60, %v4961_v58  ;;  %v1131_v56 = vmul.f32 %v1127_v51, %v4963_v61  ;;  %v1153_v19 = vmul.f32 %v1146_v15, %v4965_v4  ;;  %v1154_v31 = vmul.f32 %v1150_v0, %v4967_v8  ;;  %v1292_v60 = vld [vmem:[#allocation5 + $0x278] sm:$0xff] }
 0x443   :  { %v1180_v12 = vmul.f32 %v1173_v25, %v4969_v10  ;;  %v1181_v53 = vmul.f32 %v1177_v42, %v4981_v24  ;;  %v1207_v47 = vmul.f32 %v1200_v55, %v4983_v6  ;;  %v1208_v43 = vmul.f32 %v1204_v18, %v4985_v54 }
 0x444   :  { %v1157_v16 = vadd.f32 %v1153_v19, %v1130_v26  ;;  %v1158_v52 = vadd.f32 %v1154_v31, %v1131_v56  ;;  %v1227_v5 = vrot.slane %v1107_v57, %v4453_v44  ;;  %v1231_v14 = vrot.slane %v1108_v1, %v4453_v44 }
 0x445   :  { %v1250_v59 = vrot.slane %v1107_v57, %v4455_v45  ;;  %v1254_v32 = vrot.slane %v1108_v1, %v4455_v45  ;;  %v1277_v36 = vrot.slane %v1107_v57, %v4463_v49  ;;  %v1281_v20 = vrot.slane %v1108_v1, %v4463_v49 }
 0x446   :  { %v1184_v48 = vadd.f32 %v1180_v12, %v1157_v16  ;;  %v1185_v22 = vadd.f32 %v1181_v53, %v1158_v52  ;;  %v1234_v17 = vmul.f32 %v1227_v5, %v4999_v2  ;;  %v1235_v7 = vmul.f32 %v1231_v14, %v5001_v3 }
 0x447   :  { %v1257_v27 = vmul.f32 %v1250_v59, %v5003_v63  ;;  %v1258_v40 = vmul.f32 %v1254_v32, %v1238_v9  ;;  %v1284_v41 = vmul.f32 %v1277_v36, %v5007_v21  ;;  %v1285_v62 = vmul.f32 %v1281_v20, %v5009_v30 }
 0x448   :  { %v1211_v51 = vadd.f32 %v1207_v47, %v1184_v48  ;;  %v1212_v15 = vadd.f32 %v1208_v43, %v1185_v22  ;;  %v1304_v0 = vrot.slane %v1107_v57, %v4465_v50  ;;  %v1308_v25 = vrot.slane %v1108_v1, %v4465_v50 }
 0x449   :  { %v1261_v42 = vadd.f32 %v1257_v27, %v1234_v17  ;;  %v1262_v55 = vadd.f32 %v1258_v40, %v1235_v7  ;;  %v1115_v18 = vrot.slane %v4972_v13, %v4433_v33  ;;  %v1119_v26 = vrot.slane %v4975_v46, %v4433_v33 }
 0x44a   :  { %v1311_v56 = vmul.f32 %v1304_v0, %v1291_v11  ;;  %v1312_v19 = vmul.f32 %v1308_v25, %v1292_v60  ;;  %v1138_v31 = vrot.slane %v4972_v13, %v4435_v34  ;;  %v1142_v12 = vrot.slane %v4975_v46, %v4435_v34 }
 0x44b   :  { %v1288_v53 = vadd.f32 %v1284_v41, %v1261_v42  ;;  %v1289_v57 = vadd.f32 %v1285_v62, %v1262_v55  ;;  %v1128_v1 = vmul.f32 %v1115_v18, %v4961_v58  ;;  %v1129_v47 = vmul.f32 %v1119_v26, %v4963_v61 }
 0x44c   :  { %v1151_v43 = vmul.f32 %v1138_v31, %v4965_v4  ;;  %v1152_v16 = vmul.f32 %v1142_v12, %v4967_v8  ;;  %v1165_v52 = vrot.slane %v4972_v13, %v4439_v38  ;;  %v1169_v5 = vrot.slane %v4975_v46, %v4439_v38 }
 0x44d   :  { %v1315_v14 = vadd.f32 %v1311_v56, %v1288_v53  ;;  %v1316_v59 = vadd.f32 %v1312_v19, %v1289_v57  ;;  %v1192_v32 = vrot.slane %v4972_v13, %v4441_v39  ;;  %v1196_v8 = vrot.slane %v4975_v46, %v4441_v39 }
 0x44e   :  { %v1155_v36 = vadd.f32 %v1151_v43, %v1128_v1  ;;  %v1156_v20 = vadd.f32 %v1152_v16, %v1129_v47  ;;  %v1178_v4 = vmul.f32 %v1165_v52, %v4969_v10  ;;  %v1179_v48 = vmul.f32 %v1169_v5, %v4981_v24 }
 0x44f   :  { %v5040_v58 = vadd.f32 %v1315_v14, %v1211_v51  ;;  %v5042_v61 = vadd.f32 %v1316_v59, %v1212_v15  ;;  %v1205_v22 = vmul.f32 %v1192_v32, %v4983_v6  ;;  %v1219_v17 = vrot.slane %v4972_v13, %v4453_v44 }
 0x450   :  { %v1223_v7 = vrot.slane %v4975_v46, %v4453_v44  ;;  %v1242_v40 = vrot.slane %v4972_v13, %v4455_v45  ;;  %v1246_v10 = vrot.slane %v4975_v46, %v4455_v45  ;;  %v1269_v24 = vrot.slane %v4972_v13, %v4463_v49 }
 0x451   :  { %v1324_v27 = vadd.f32 %v5042_v61, %v5040_v58  ;;  %v1182_v41 = vadd.f32 %v1178_v4, %v1155_v36  ;;  %v1183_v6 = vadd.f32 %v1179_v48, %v1156_v20  ;;  %v1232_v62 = vmul.f32 %v1219_v17, %v4999_v2 }
 0x452   :  { %v1233_v51 = vmul.f32 %v1223_v7, %v5001_v3  ;;  %v1206_v15 = vmul.f32 %v1196_v8, %v4985_v54  ;;  %v1255_v0 = vmul.f32 %v1242_v40, %v5003_v63  ;;  %v1256_v25 = vmul.f32 %v1246_v10, %v1238_v9 }
 0x453   :  { %1325 = vadd.xlane.f32.xlu1 %v1324_v27  ;;  %v1273_v42 = vrot.slane %v4975_v46, %v4463_v49  ;;  %v1296_v55 = vrot.slane %v4972_v13, %v4465_v50  ;;  %v1300_v18 = vrot.slane %v4975_v46, %v4465_v50  ;;  %v1330_v2 = vmul.f32 %v5040_v58, %v5040_v58 }
 0x454   :  { %v1331_v3 = vmul.f32 %v5042_v61, %v5042_v61  ;;  %v1259_v26 = vadd.f32 %v1255_v0, %v1232_v62  ;;  %v1260_v54 = vadd.f32 %v1256_v25, %v1233_v51  ;;  %v1282_v63 = vmul.f32 %v1269_v24, %v5007_v21  ;;  %v5083_v25 = vld [vmem:[#allocation5 + $0x280] sm:$0xff] }
 0x455   :  { %v1283_v9 = vmul.f32 %v1273_v42, %v5009_v30  ;;  %v1209_v56 = vadd.f32 %v1205_v22, %v1182_v41  ;;  %v1210_v19 = vadd.f32 %v1206_v15, %v1183_v6  ;;  %v1309_v53 = vmul.f32 %v1296_v55, %v1291_v11  ;;  %v5085_v42 = vld [vmem:[#allocation5 + $0x288] sm:$0xff]  ;;  %v5087_v55 = vld [vmem:[#allocation5 + $0x290] sm:$0xff] }
 0x456   :  { %v1335_v31 = vadd.f32 %v1331_v3, %v1330_v2  ;;  %v1286_v12 = vadd.f32 %v1282_v63, %v1259_v26  ;;  %v1310_v57 = vmul.f32 %v1300_v18, %v1292_v60  ;;  %v5089_v18 = vld [vmem:[#allocation5 + $0x298] sm:$0xff]  ;;  %v5091_v2 = vld [vmem:[#allocation5 + $0x2a0] sm:$0xff] }
 0x457   :  { %v1287_v13 = vadd.f32 %v1283_v9, %v1260_v54  ;;  %v5103_v9 = vld [vmem:[#allocation5 + $0x2a8] sm:$0xff] }
 0x458   :  { %1336 = vadd.xlane.f32.xlu1 %v1335_v31  ;;  %v1313_v46 = vadd.f32 %v1309_v53, %v1286_v12 }
 0x459   :  { %v1314_v1 = vadd.f32 %v1310_v57, %v1287_v13 }
 0x45a   :  { %v1317_v47 = vadd.f32 %v1313_v46, %v1209_v56  ;;  %v5105_v56 = vld [vmem:[#allocation5 + $0x2b0] sm:$0xff] }
 0x45b   :  { %v1318_v43 = vadd.f32 %v1314_v1, %v1210_v19  ;;  %v5107_v19 = vld [vmem:[#allocation5 + $0x2b8] sm:$0xff] }
 0x45c   :  { %v1328_v52 = vmul.f32 %v1317_v47, %v1317_v47 }
 0x45d   :  { %v1321_v16 = vadd.f32 %v1318_v43, %v1317_v47  ;;  %v1329_v5 = vmul.f32 %v1318_v43, %v1318_v43 }
 0x45f   :  { %1322 = vadd.xlane.f32.xlu0 %v1321_v16  ;;  %v1332_v14 = vadd.f32 %v1329_v5, %v1328_v52 }
 0x463   :  { %1333 = vadd.xlane.f32.xlu0 %v1332_v14  ;;  %v5121_v14 = vld [vmem:[#allocation5 + $0x2c0] sm:$0xff] }
 0x4e0   :  { %v1326_v21 = vpop.xlane.xlu1 %1325 }
 0x4e5   :  { %v1337_v32 = vpop.xlane.xlu1 %1336 }
 0x4ec   :  { %v1323_v30 = vpop.xlane.xlu0 %1322 }
 0x4ed   :  { %v1327_v59 = vadd.f32 %v1326_v21, %v1323_v30  ;;  %v5123_v21 = vld [vmem:[#allocation5 + $0x2c8] sm:$0xff]  ;;  %v5125_v30 = vld [vmem:[#allocation5 + $0x2d0] sm:$0xff] }
 0x4ef   :  { %v1339_v36 = vmul.f32 0.001953125, %v1327_v59 }
 0x4f0   :  { %v1334_v20 = vpop.xlane.xlu0 %1333 }
 0x4f1   :  { %v1338_v4 = vadd.f32 %v1337_v32, %v1334_v20  ;;  %v1341_v11 = vmul.f32 %v1339_v36, %v1339_v36  ;;  %v1358_v24 = vsub.f32 %v5040_v58, %v1339_v36  ;;  %v1359_v41 = vsub.f32 %v5042_v61, %v1339_v36 }
 0x4f2   :  { %v1356_v62 = vsub.f32 %v1317_v47, %v1339_v36  ;;  %v1357_v51 = vsub.f32 %v1318_v43, %v1339_v36 }
 0x4f3   :  { %v1340_v60 = vmul.f32 0.001953125, %v1338_v4  ;;  %v1493_v4 = vld [vmem:[#allocation5 + $0x2d8] sm:$0xff] }
 0x4f5   :  { %v1342_v8 = vsub.f32 %v1340_v60, %v1341_v11  ;;  %v5129_v11 = vld [vmem:[#allocation5 + $0x2e0] sm:$0xff]  ;;  %v5131_v60 = vld [vmem:[#allocation5 + $0x2e8] sm:$0xff] }
 0x4f7   :  { %v1343_v48 = vmax.f32 %v1342_v8, 0.0 }
 0x4f9   :  { %4205 = vrsqrt.f32 %v1343_v48  ;;  %vm1346_vm10 = vcmp.eq.f32.partialorder %v1343_v48, inf  ;;  %v1349_v7 = vand.u32 2147483648, %v1343_v48  ;;  %vm1348_vm11 = vcmp.eq.f32.partialorder %v1343_v48, 0.0 }
 0x503   :  { %v4206_v22 = vpop.eup %4205 }
 0x504   :  { %v1345_v17 = vmul.f32 %v4206_v22, %v1343_v48 }
 0x506   :  { %v1347_v27 = vsel %vm1346_vm10, %v1343_v48, %v1345_v17 }
 0x507   :  { %v1350_v40 = vsel %vm1348_vm11, %v1349_v7, %v1347_v27 }
 0x508   :  { %v1351_v10 = vadd.f32 1e-06, %v1350_v40 }
 0x50a   :  { %4207 = vrcp.f32 %v1351_v10 }
 0x514   :  { %v5079_v6 = vpop.eup %4207 }
 0x515   :  { %v1362_v15 = vmul.f32 %v5079_v6, %v1358_v24  ;;  %v1363_v0 = vmul.f32 %v5079_v6, %v1359_v41  ;;  %v5094_v58 = vmul.f32 %v5079_v6, %v1356_v62  ;;  %v5097_v61 = vmul.f32 %v5079_v6, %v1357_v51 }
 0x517   :  { %v1378_v3 = vrot.slane %v1362_v15, %v4433_v33  ;;  %v1382_v26 = vrot.slane %v1363_v0, %v4433_v33  ;;  %v1401_v54 = vrot.slane %v1362_v15, %v4435_v34  ;;  %v1405_v63 = vrot.slane %v1363_v0, %v4435_v34 }
 0x518   :  { %v1428_v31 = vrot.slane %v1362_v15, %v4439_v38  ;;  %v1432_v12 = vrot.slane %v1363_v0, %v4439_v38  ;;  %v1455_v13 = vrot.slane %v1362_v15, %v4441_v39  ;;  %v1459_v53 = vrot.slane %v1363_v0, %v4441_v39 }
 0x519   :  { %v1385_v57 = vmul.f32 %v1378_v3, %v5083_v25  ;;  %v1386_v46 = vmul.f32 %v1382_v26, %v5085_v42  ;;  %v1408_v1 = vmul.f32 %v1401_v54, %v5087_v55  ;;  %v1409_v47 = vmul.f32 %v1405_v63, %v5089_v18  ;;  %v1546_v3 = vld [vmem:[#allocation5 + $0x2f0] sm:$0xff]  ;;  %v1547_v26 = vld [vmem:[#allocation5 + $0x2f8] sm:$0xff] }
 0x51a   :  { %v1435_v43 = vmul.f32 %v1428_v31, %v5091_v2  ;;  %v1436_v16 = vmul.f32 %v1432_v12, %v5103_v9  ;;  %v1462_v52 = vmul.f32 %v1455_v13, %v5105_v56  ;;  %v1463_v5 = vmul.f32 %v1459_v53, %v5107_v19 }
 0x51b   :  { %v1412_v59 = vadd.f32 %v1408_v1, %v1385_v57  ;;  %v1413_v32 = vadd.f32 %v1409_v47, %v1386_v46  ;;  %v1482_v36 = vrot.slane %v1362_v15, %v4453_v44  ;;  %v1486_v20 = vrot.slane %v1363_v0, %v4453_v44 }
 0x51c   :  { %v1505_v8 = vrot.slane %v1362_v15, %v4455_v45  ;;  %v1509_v48 = vrot.slane %v1363_v0, %v4455_v45  ;;  %v1532_v22 = vrot.slane %v1362_v15, %v4463_v49  ;;  %v1536_v17 = vrot.slane %v1363_v0, %v4463_v49 }
 0x51d   :  { %v1439_v7 = vadd.f32 %v1435_v43, %v1412_v59  ;;  %v1440_v27 = vadd.f32 %v1436_v16, %v1413_v32  ;;  %v1489_v40 = vmul.f32 %v1482_v36, %v5121_v14  ;;  %v1490_v10 = vmul.f32 %v1486_v20, %v5123_v21 }
 0x51e   :  { %v1512_v24 = vmul.f32 %v1505_v8, %v5125_v30  ;;  %v1513_v41 = vmul.f32 %v1509_v48, %v1493_v4  ;;  %v1539_v62 = vmul.f32 %v1532_v22, %v5129_v11  ;;  %v1540_v51 = vmul.f32 %v1536_v17, %v5131_v60 }
 0x51f   :  { %v1466_v54 = vadd.f32 %v1462_v52, %v1439_v7  ;;  %v1467_v63 = vadd.f32 %v1463_v5, %v1440_v27  ;;  %v1559_v31 = vrot.slane %v1362_v15, %v4465_v50  ;;  %v1563_v12 = vrot.slane %v1363_v0, %v4465_v50 }
 0x520   :  { %v1516_v13 = vadd.f32 %v1512_v24, %v1489_v40  ;;  %v1517_v53 = vadd.f32 %v1513_v41, %v1490_v10  ;;  %v1370_v57 = vrot.slane %v5094_v58, %v4433_v33  ;;  %v1374_v46 = vrot.slane %v5097_v61, %v4433_v33 }
 0x521   :  { %v1566_v1 = vmul.f32 %v1559_v31, %v1546_v3  ;;  %v1567_v47 = vmul.f32 %v1563_v12, %v1547_v26  ;;  %v1393_v43 = vrot.slane %v5094_v58, %v4435_v34  ;;  %v1397_v16 = vrot.slane %v5097_v61, %v4435_v34 }
 0x522   :  { %v1543_v52 = vadd.f32 %v1539_v62, %v1516_v13  ;;  %v1544_v15 = vadd.f32 %v1540_v51, %v1517_v53  ;;  %v1383_v0 = vmul.f32 %v1370_v57, %v5083_v25  ;;  %v1384_v5 = vmul.f32 %v1374_v46, %v5085_v42 }
 0x523   :  { %v1406_v59 = vmul.f32 %v1393_v43, %v5087_v55  ;;  %v1407_v32 = vmul.f32 %v1397_v16, %v5089_v18  ;;  %v1420_v36 = vrot.slane %v5094_v58, %v4439_v38  ;;  %v1424_v20 = vrot.slane %v5097_v61, %v4439_v38 }
 0x524   :  { %v1570_v8 = vadd.f32 %v1566_v1, %v1543_v52  ;;  %v1571_v48 = vadd.f32 %v1567_v47, %v1544_v15  ;;  %v1447_v22 = vrot.slane %v5094_v58, %v4441_v39  ;;  %v1451_v18 = vrot.slane %v5097_v61, %v4441_v39 }
 0x525   :  { %v1410_v17 = vadd.f32 %v1406_v59, %v1383_v0  ;;  %v1411_v7 = vadd.f32 %v1407_v32, %v1384_v5  ;;  %v1433_v55 = vmul.f32 %v1420_v36, %v5091_v2  ;;  %v1434_v27 = vmul.f32 %v1424_v20, %v5103_v9 }
 0x526   :  { %v5162_v25 = vadd.f32 %v1570_v8, %v1466_v54  ;;  %v5164_v42 = vadd.f32 %v1571_v48, %v1467_v63  ;;  %v1460_v40 = vmul.f32 %v1447_v22, %v5105_v56  ;;  %v1474_v10 = vrot.slane %v5094_v58, %v4453_v44 }
 0x527   :  { %v1478_v24 = vrot.slane %v5097_v61, %v4453_v44  ;;  %v1497_v62 = vrot.slane %v5094_v58, %v4455_v45  ;;  %v1501_v2 = vrot.slane %v5097_v61, %v4455_v45  ;;  %v1524_v9 = vrot.slane %v5094_v58, %v4463_v49 }
 0x528   :  { %v1579_v41 = vadd.f32 %v5164_v42, %v5162_v25  ;;  %v1437_v51 = vadd.f32 %v1433_v55, %v1410_v17  ;;  %v1438_v56 = vadd.f32 %v1434_v27, %v1411_v7  ;;  %v1487_v54 = vmul.f32 %v1474_v10, %v5121_v14 }
 0x529   :  { %v1488_v63 = vmul.f32 %v1478_v24, %v5123_v21  ;;  %v1461_v31 = vmul.f32 %v1451_v18, %v5107_v19  ;;  %v1510_v12 = vmul.f32 %v1497_v62, %v5125_v30  ;;  %v1511_v13 = vmul.f32 %v1501_v2, %v1493_v4 }
 0x52a   :  { %1580 = vadd.xlane.f32.xlu1 %v1579_v41  ;;  %v1528_v53 = vrot.slane %v5097_v61, %v4463_v49  ;;  %v1551_v57 = vrot.slane %v5094_v58, %v4465_v50  ;;  %v1555_v46 = vrot.slane %v5097_v61, %v4465_v50  ;;  %v1585_v14 = vmul.f32 %v5162_v25, %v5162_v25 }
 0x52b   :  { %v1586_v21 = vmul.f32 %v5164_v42, %v5164_v42  ;;  %v1514_v1 = vadd.f32 %v1510_v12, %v1487_v54  ;;  %v1515_v19 = vadd.f32 %v1511_v13, %v1488_v63  ;;  %v1537_v30 = vmul.f32 %v1524_v9, %v5129_v11 }
 0x52c   :  { %v1538_v4 = vmul.f32 %v1528_v53, %v5131_v60  ;;  %v1464_v47 = vadd.f32 %v1460_v40, %v1437_v51  ;;  %v1465_v43 = vadd.f32 %v1461_v31, %v1438_v56  ;;  %v1564_v15 = vmul.f32 %v1551_v57, %v1546_v3  ;;  %v5205_v53 = vld [vmem:[#allocation5 + $0x300] sm:$0xff]  ;;  %v5207_v57 = vld [vmem:[#allocation5 + $0x308] sm:$0xff] }
 0x52d   :  { %v1590_v16 = vadd.f32 %v1586_v21, %v1585_v14  ;;  %v1541_v52 = vadd.f32 %v1537_v30, %v1514_v1  ;;  %v1565_v0 = vmul.f32 %v1555_v46, %v1547_v26  ;;  %v5209_v46 = vld [vmem:[#allocation5 + $0x310] sm:$0xff]  ;;  %v5211_v14 = vld [vmem:[#allocation5 + $0x318] sm:$0xff]  ;;  %v5213_v21 = vld [vmem:[#allocation5 + $0x320] sm:$0xff] }
 0x52e   :  { %v1542_v58 = vadd.f32 %v1538_v4, %v1515_v19 }
 0x52f   :  { %1591 = vadd.xlane.f32.xlu1 %v1590_v16  ;;  %v1568_v61 = vadd.f32 %v1564_v15, %v1541_v52  ;;  %v5229_v16 = vld [vmem:[#allocation5 + $0x338] sm:$0xff] }
 0x530   :  { %v1569_v5 = vadd.f32 %v1565_v0, %v1542_v58 }
 0x531   :  { %v1572_v59 = vadd.f32 %v1568_v61, %v1464_v47  ;;  %v5225_v47 = vld [vmem:[#allocation5 + $0x328] sm:$0xff] }
 0x532   :  { %v1573_v32 = vadd.f32 %v1569_v5, %v1465_v43  ;;  %v5227_v43 = vld [vmem:[#allocation5 + $0x330] sm:$0xff] }
 0x533   :  { %v1583_v20 = vmul.f32 %v1572_v59, %v1572_v59 }
 0x534   :  { %v1576_v36 = vadd.f32 %v1573_v32, %v1572_v59  ;;  %v1584_v8 = vmul.f32 %v1573_v32, %v1573_v32 }
 0x536   :  { %1577 = vadd.xlane.f32.xlu0 %v1576_v36  ;;  %v1587_v48 = vadd.f32 %v1584_v8, %v1583_v20 }
 0x53a   :  { %1588 = vadd.xlane.f32.xlu0 %v1587_v48 }
 0x5b7   :  { %v1581_v11 = vpop.xlane.xlu1 %1580 }
 0x5bc   :  { %v1592_v17 = vpop.xlane.xlu1 %1591 }
 0x5c3   :  { %v1578_v60 = vpop.xlane.xlu0 %1577 }
 0x5c4   :  { %v1582_v22 = vadd.f32 %v1581_v11, %v1578_v60  ;;  %v5243_v11 = vld [vmem:[#allocation5 + $0x340] sm:$0xff]  ;;  %v5245_v60 = vld [vmem:[#allocation5 + $0x348] sm:$0xff] }
 0x5c6   :  { %v1594_v7 = vmul.f32 0.001953125, %v1582_v22  ;;  %v5247_v22 = vld [vmem:[#allocation5 + $0x350] sm:$0xff] }
 0x5c7   :  { %v1589_v55 = vpop.xlane.xlu0 %1588 }
 0x5c8   :  { %v1593_v18 = vadd.f32 %v1592_v17, %v1589_v55  ;;  %v1596_v3 = vmul.f32 %v1594_v7, %v1594_v7  ;;  %v1613_v51 = vsub.f32 %v5162_v25, %v1594_v7  ;;  %v1614_v56 = vsub.f32 %v5164_v42, %v1594_v7 }
 0x5c9   :  { %v1611_v63 = vsub.f32 %v1572_v59, %v1594_v7  ;;  %v1612_v31 = vsub.f32 %v1573_v32, %v1594_v7 }
 0x5ca   :  { %v1595_v26 = vmul.f32 0.001953125, %v1593_v18 }
 0x5cc   :  { %v1597_v27 = vsub.f32 %v1595_v26, %v1596_v3  ;;  %v5251_v3 = vld [vmem:[#allocation5 + $0x358] sm:$0xff]  ;;  %v5253_v26 = vld [vmem:[#allocation5 + $0x360] sm:$0xff] }
 0x5ce   :  { %v1598_v40 = vmax.f32 %v1597_v27, 0.0  ;;  %v5255_v27 = vld [vmem:[#allocation5 + $0x368] sm:$0xff] }
 0x5d0   :  { %4209 = vrsqrt.f32 %v1598_v40  ;;  %vm1601_vm12 = vcmp.eq.f32.partialorder %v1598_v40, inf  ;;  %v1604_v41 = vand.u32 2147483648, %v1598_v40  ;;  %vm1603_vm13 = vcmp.eq.f32.partialorder %v1598_v40, 0.0 }
 0x5da   :  { %v4210_v10 = vpop.eup %4209 }
 0x5db   :  { %v1600_v24 = vmul.f32 %v4210_v10, %v1598_v40 }
 0x5dd   :  { %v1602_v62 = vsel %vm1601_vm12, %v1598_v40, %v1600_v24 }
 0x5de   :  { %v1605_v2 = vsel %vm1603_vm13, %v1604_v41, %v1602_v62 }
 0x5df   :  { %v1606_v9 = vadd.f32 1e-06, %v1605_v2 }
 0x5e1   :  { %4211 = vrcp.f32 %v1606_v9 }
 0x5e2   :  { %4213 = vlog2.f32 %v4437_v35 }
 0x5e3   :  { %4215 = vlog2.f32 %v4591_v23 }
 0x5e4   :  { %4217 = vlog2.f32 %v4713_v29 }
 0x5e5   :  { %4219 = vlog2.f32 %v4835_v37 }
 0x5e6   :  { %4221 = vlog2.f32 %v4957_v28 }
 0x5e7   :  { %4223 = vlog2.f32 %v5079_v6 }
 0x5eb   :  { %v5201_v54 = vpop.eup %4211 }
 0x5ec   :  { %v1617_v12 = vmul.f32 %v5201_v54, %v1613_v51  ;;  %v1618_v13 = vmul.f32 %v5201_v54, %v1614_v56  ;;  %v5216_v25 = vmul.f32 %v5201_v54, %v1611_v63  ;;  %v5219_v42 = vmul.f32 %v5201_v54, %v1612_v31 }
 0x5ed   :  { %4225 = vlog2.f32 %v5201_v54 }
 0x5ee   :  { %v1633_v1 = vrot.slane %v1617_v12, %v4433_v33  ;;  %v1637_v19 = vrot.slane %v1618_v13, %v4433_v33  ;;  %v1656_v30 = vrot.slane %v1617_v12, %v4435_v34  ;;  %v1660_v4 = vrot.slane %v1618_v13, %v4435_v34 }
 0x5ef   :  { %v1683_v52 = vrot.slane %v1617_v12, %v4439_v38  ;;  %v1687_v58 = vrot.slane %v1618_v13, %v4439_v38  ;;  %v1710_v15 = vrot.slane %v1617_v12, %v4441_v39  ;;  %v1714_v0 = vrot.slane %v1618_v13, %v4441_v39 }
 0x5f0   :  { %v1640_v61 = vmul.f32 %v1633_v1, %v5205_v53  ;;  %v1641_v5 = vmul.f32 %v1637_v19, %v5207_v57  ;;  %v1663_v59 = vmul.f32 %v1656_v30, %v5209_v46  ;;  %v1664_v32 = vmul.f32 %v1660_v4, %v5211_v14  ;;  %v5267_v19 = vld [vmem:[#allocation5 + $0x370] sm:$0xff]  ;;  %v5269_v30 = vld [vmem:[#allocation5 + $0x378] sm:$0xff] }
 0x5f1   :  { %v1690_v36 = vmul.f32 %v1683_v52, %v5213_v21  ;;  %v1691_v20 = vmul.f32 %v1687_v58, %v5225_v47  ;;  %v1717_v8 = vmul.f32 %v1710_v15, %v5227_v43  ;;  %v1718_v48 = vmul.f32 %v1714_v0, %v5229_v16 }
 0x5f2   :  { %v1667_v17 = vadd.f32 %v1663_v59, %v1640_v61  ;;  %v1668_v7 = vadd.f32 %v1664_v32, %v1641_v5  ;;  %v1737_v55 = vrot.slane %v1617_v12, %v4453_v44  ;;  %v1741_v18 = vrot.slane %v1618_v13, %v4453_v44 }
 0x5f3   :  { %v1760_v40 = vrot.slane %v1617_v12, %v4455_v45  ;;  %v1764_v10 = vrot.slane %v1618_v13, %v4455_v45  ;;  %v1787_v24 = vrot.slane %v1617_v12, %v4463_v49  ;;  %v1791_v41 = vrot.slane %v1618_v13, %v4463_v49 }
 0x5f4   :  { %v1694_v62 = vadd.f32 %v1690_v36, %v1667_v17  ;;  %v1695_v2 = vadd.f32 %v1691_v20, %v1668_v7  ;;  %v1744_v9 = vmul.f32 %v1737_v55, %v5243_v11  ;;  %v1745_v51 = vmul.f32 %v1741_v18, %v5245_v60 }
 0x5f5   :  { %v1767_v56 = vmul.f32 %v1760_v40, %v5247_v22  ;;  %v1768_v63 = vmul.f32 %v1764_v10, %v5251_v3  ;;  %v1794_v31 = vmul.f32 %v1787_v24, %v5253_v26  ;;  %v1795_v1 = vmul.f32 %v1791_v41, %v5255_v27 }
 0x5f6   :  { %v1721_v4 = vadd.f32 %v1717_v8, %v1694_v62  ;;  %v1722_v52 = vadd.f32 %v1718_v48, %v1695_v2  ;;  %v1814_v58 = vrot.slane %v1617_v12, %v4465_v50  ;;  %v1818_v15 = vrot.slane %v1618_v13, %v4465_v50 }
 0x5f7   :  { %v1771_v0 = vadd.f32 %v1767_v56, %v1744_v9  ;;  %v1772_v61 = vadd.f32 %v1768_v63, %v1745_v51  ;;  %v1625_v5 = vrot.slane %v5216_v25, %v4433_v33  ;;  %v1629_v59 = vrot.slane %v5219_v42, %v4433_v33 }
 0x5f8   :  { %v1821_v32 = vmul.f32 %v1814_v58, %v5267_v19  ;;  %v1822_v36 = vmul.f32 %v1818_v15, %v5269_v30  ;;  %v1648_v20 = vrot.slane %v5216_v25, %v4435_v34  ;;  %v1652_v12 = vrot.slane %v5219_v42, %v4435_v34 }
 0x5f9   :  { %v1798_v8 = vadd.f32 %v1794_v31, %v1771_v0  ;;  %v1799_v13 = vadd.f32 %v1795_v1, %v1772_v61  ;;  %v1638_v48 = vmul.f32 %v1625_v5, %v5205_v53  ;;  %v1639_v17 = vmul.f32 %v1629_v59, %v5207_v57 }
 0x5fa   :  { %v1661_v7 = vmul.f32 %v1648_v20, %v5209_v46  ;;  %v1662_v55 = vmul.f32 %v1652_v12, %v5211_v14  ;;  %v1675_v18 = vrot.slane %v5216_v25, %v4439_v38  ;;  %v1679_v40 = vrot.slane %v5219_v42, %v4439_v38 }
 0x5fb   :  { %v1825_v10 = vadd.f32 %v1821_v32, %v1798_v8  ;;  %v1826_v24 = vadd.f32 %v1822_v36, %v1799_v13  ;;  %v1702_v41 = vrot.slane %v5216_v25, %v4441_v39  ;;  %v1706_v2 = vrot.slane %v5219_v42, %v4441_v39 }
 0x5fc   :  { %v1665_v53 = vadd.f32 %v1661_v7, %v1638_v48  ;;  %v1666_v62 = vadd.f32 %v1662_v55, %v1639_v17  ;;  %v1688_v14 = vmul.f32 %v1675_v18, %v5213_v21  ;;  %v1689_v9 = vmul.f32 %v1679_v40, %v5225_v47 }
 0x5fd   :  { %v5295_v57 = vadd.f32 %v1825_v10, %v1721_v4  ;;  %v5297_v46 = vadd.f32 %v1826_v24, %v1722_v52  ;;  %v1715_v51 = vmul.f32 %v1702_v41, %v5227_v43  ;;  %v1729_v35 = vrot.slane %v5216_v25, %v4453_v44 }
 0x5fe   :  { %v1733_v56 = vrot.slane %v5219_v42, %v4453_v44  ;;  %v1752_v63 = vrot.slane %v5216_v25, %v4455_v45  ;;  %v1756_v21 = vrot.slane %v5219_v42, %v4455_v45  ;;  %v1779_v47 = vrot.slane %v5216_v25, %v4463_v49 }
 0x5ff   :  { %v1834_v23 = vadd.f32 %v5297_v46, %v5295_v57  ;;  %v1692_v31 = vadd.f32 %v1688_v14, %v1665_v53  ;;  %v1693_v43 = vadd.f32 %v1689_v9, %v1666_v62  ;;  %v1742_v1 = vmul.f32 %v1729_v35, %v5243_v11 }
 0x600   :  { %v1743_v4 = vmul.f32 %v1733_v56, %v5245_v60  ;;  %v1716_v52 = vmul.f32 %v1706_v2, %v5229_v16  ;;  %v1765_v58 = vmul.f32 %v1752_v63, %v5247_v22  ;;  %v1766_v15 = vmul.f32 %v1756_v21, %v5251_v3 }
 0x601   :  { %1835 = vadd.xlane.f32.xlu1 %v1834_v23  ;;  %v1783_v0 = vrot.slane %v5219_v42, %v4463_v49  ;;  %v1806_v61 = vrot.slane %v5216_v25, %v4465_v50  ;;  %v1810_v5 = vrot.slane %v5219_v42, %v4465_v50  ;;  %v1840_v11 = vmul.f32 %v5295_v57, %v5295_v57  ;;  %v4214_v25 = vpop.eup %4213 }
 0x602   :  { %v1841_v60 = vmul.f32 %v5297_v46, %v5297_v46  ;;  %v1769_v16 = vadd.f32 %v1765_v58, %v1742_v1  ;;  %v1770_v59 = vadd.f32 %v1766_v15, %v1743_v4  ;;  %v1792_v22 = vmul.f32 %v1779_v47, %v5253_v26  ;;  %v4216_v48 = vpop.eup %4215 }
 0x603   :  { %v1793_v3 = vmul.f32 %v1783_v0, %v5255_v27  ;;  %v1719_v32 = vadd.f32 %v1715_v51, %v1692_v31  ;;  %v1720_v36 = vadd.f32 %v1716_v52, %v1693_v43  ;;  %v1819_v8 = vmul.f32 %v1806_v61, %v5267_v19  ;;  %v4218_v40 = vpop.eup %4217 }
 0x604   :  { %v1845_v20 = vadd.f32 %v1841_v60, %v1840_v11  ;;  %v1796_v12 = vadd.f32 %v1792_v22, %v1769_v16  ;;  %v1820_v13 = vmul.f32 %v1810_v5, %v5269_v30  ;;  %v334_v10 = vmul.f32 0.6931472, %v4216_v48  ;;  %v4220_v30 = vpop.eup %4219  ;;  %v5354_v48 = vld [vmem:[#allocation5 + $0x398] sm:$0xff] }
 0x605   :  { %v1797_v42 = vadd.f32 %v1793_v3, %v1770_v59  ;;  %v80_v37 = vmul.f32 0.6931472, %v4214_v25  ;;  %v589_v24 = vmul.f32 0.6931472, %v4218_v40  ;;  %v4222_v41 = vpop.eup %4221  ;;  %v844_v28 = vmul.f32 0.6931472, %v4220_v30 }
 0x606   :  { %1846 = vadd.xlane.f32.xlu1 %v1845_v20  ;;  %v1823_v17 = vadd.f32 %v1819_v8, %v1796_v12  ;;  %v4224_v62 = vpop.eup %4223  ;;  %v1099_v2 = vmul.f32 0.6931472, %v4222_v41  ;;  %v5350_v8 = vld [vmem:[#allocation5 + $0x388] sm:$0xff]  ;;  %v5372_v40 = vld [vmem:[#allocation5 + $0x3b8] sm:$0xff] }
 0x607   :  { %v1824_v26 = vadd.f32 %v1820_v13, %v1797_v42  ;;  %v335_v53 = vadd.f32 %v334_v10, %v80_v37  ;;  %v1354_v9 = vmul.f32 0.6931472, %v4224_v62  ;;  %v4226_v35 = vpop.eup %4225  ;;  %v5348_v42 = vld [vmem:[#allocation5 + $0x380] sm:$0xff]  ;;  %v5352_v13 = vld [vmem:[#allocation5 + $0x390] sm:$0xff] }
 0x608   :  { %v1827_v27 = vadd.f32 %v1823_v17, %v1719_v32  ;;  %v1609_v23 = vmul.f32 0.6931472, %v4226_v35  ;;  %v5356_v17 = vld [vmem:[#allocation5 + $0x3a0] sm:$0xff]  ;;  %v5390_v35 = vld [vmem:[#allocation5 + $0x3d0] sm:$0xff] }
 0x609   :  { %v1828_v7 = vadd.f32 %v1824_v26, %v1720_v36  ;;  %v590_v14 = vadd.f32 %v589_v24, %v335_v53 }
 0x60a   :  { %v1838_v55 = vmul.f32 %v1827_v27, %v1827_v27 }
 0x60b   :  { %v1831_v29 = vadd.f32 %v1828_v7, %v1827_v27  ;;  %v1839_v18 = vmul.f32 %v1828_v7, %v1828_v7  ;;  %v845_v6 = vadd.f32 %v844_v28, %v590_v14 }
 0x60d   :  { %1832 = vadd.xlane.f32.xlu0 %v1831_v29  ;;  %v1842_v19 = vadd.f32 %v1839_v18, %v1838_v55  ;;  %v1100_v51 = vadd.f32 %v1099_v2, %v845_v6  ;;  %v5368_v55 = vld [vmem:[#allocation5 + $0x3a8] sm:$0xff]  ;;  %v5370_v18 = vld [vmem:[#allocation5 + $0x3b0] sm:$0xff] }
 0x60f   :  { %v1355_v56 = vadd.f32 %v1354_v9, %v1100_v51  ;;  %v5386_v9 = vld [vmem:[#allocation5 + $0x3c0] sm:$0xff]  ;;  %v5388_v51 = vld [vmem:[#allocation5 + $0x3c8] sm:$0xff] }
 0x611   :  { %1843 = vadd.xlane.f32.xlu0 %v1842_v19  ;;  %v5340_v63 = vadd.f32 %v1609_v23, %v1355_v56 }
 0x68e   :  { %v1836_v21 = vpop.xlane.xlu1 %1835 }
 0x693   :  { %v1847_v31 = vpop.xlane.xlu1 %1846 }
 0x69a   :  { %v1833_v47 = vpop.xlane.xlu0 %1832 }
 0x69b   :  { %v1837_v54 = vadd.f32 %v1836_v21, %v1833_v47 }
 0x69d   :  { %v1849_v43 = vmul.f32 0.001953125, %v1837_v54  ;;  %v2003_v54 = vld [vmem:[#allocation5 + $0x3d8] sm:$0xff] }
 0x69e   :  { %v1844_v1 = vpop.xlane.xlu0 %1843 }
 0x69f   :  { %v1848_v4 = vadd.f32 %v1847_v31, %v1844_v1  ;;  %v1851_v52 = vmul.f32 %v1849_v43, %v1849_v43  ;;  %v1868_v22 = vsub.f32 %v5295_v57, %v1849_v43  ;;  %v1869_v3 = vsub.f32 %v5297_v46, %v1849_v43  ;;  %v2029_v31 = vld [vmem:[#allocation5 + $0x3e0] sm:$0xff] }
 0x6a0   :  { %v1866_v36 = vsub.f32 %v1827_v27, %v1849_v43  ;;  %v1867_v20 = vsub.f32 %v1828_v7, %v1849_v43  ;;  %v5394_v43 = vld [vmem:[#allocation5 + $0x3e8] sm:$0xff] }
 0x6a1   :  { %v1850_v58 = vmul.f32 0.001953125, %v1848_v4 }
 0x6a3   :  { %v1852_v15 = vsub.f32 %v1850_v58, %v1851_v52 }
 0x6a5   :  { %v1853_v0 = vmax.f32 %v1852_v15, 0.0 }
 0x6a7   :  { %4227 = vrsqrt.f32 %v1853_v0  ;;  %vm1856_vm14 = vcmp.eq.f32.partialorder %v1853_v0, inf  ;;  %v1859_v11 = vand.u32 2147483648, %v1853_v0  ;;  %vm1858_vm15 = vcmp.eq.f32.partialorder %v1853_v0, 0.0 }
 0x6b1   :  { %v4228_v61 = vpop.eup %4227 }
 0x6b2   :  { %v1855_v5 = vmul.f32 %v4228_v61, %v1853_v0 }
 0x6b4   :  { %v1857_v60 = vsel %vm1856_vm14, %v1853_v0, %v1855_v5 }
 0x6b5   :  { %v1860_v16 = vsel %vm1858_vm15, %v1859_v11, %v1857_v60 }
 0x6b6   :  { %v1861_v59 = vadd.f32 1e-06, %v1860_v16 }
 0x6b8   :  { %4229 = vrcp.f32 %v1861_v59 }
 0x6c2   :  { %v5344_v32 = vpop.eup %4229 }
 0x6c3   :  { %v1872_v25 = vmul.f32 %v5344_v32, %v1868_v22  ;;  %v1873_v12 = vmul.f32 %v5344_v32, %v1869_v3  ;;  %v5359_v57 = vmul.f32 %v5344_v32, %v1866_v36  ;;  %v5362_v46 = vmul.f32 %v5344_v32, %v1867_v20  ;;  %v2056_v22 = vld [vmem:[#allocation5 + $0x3f0] sm:$0xff]  ;;  %v2057_v3 = vld [vmem:[#allocation5 + $0x3f8] sm:$0xff] }
 0x6c4   :  { %4231 = vlog2.f32 %v5344_v32 }
 0x6c5   :  { %v1888_v26 = vrot.slane %v1872_v25, %v4433_v33  ;;  %v1892_v27 = vrot.slane %v1873_v12, %v4433_v33  ;;  %v1911_v7 = vrot.slane %v1872_v25, %v4435_v34  ;;  %v1915_v29 = vrot.slane %v1873_v12, %v4435_v34 }
 0x6c6   :  { %v1938_v19 = vrot.slane %v1872_v25, %v4439_v38  ;;  %v1942_v10 = vrot.slane %v1873_v12, %v4439_v38  ;;  %v1965_v30 = vrot.slane %v1872_v25, %v4441_v39  ;;  %v1969_v37 = vrot.slane %v1873_v12, %v4441_v39 }
 0x6c7   :  { %v1895_v24 = vmul.f32 %v1888_v26, %v5348_v42  ;;  %v1896_v41 = vmul.f32 %v1892_v27, %v5350_v8  ;;  %v1918_v53 = vmul.f32 %v1911_v7, %v5352_v13  ;;  %v1919_v28 = vmul.f32 %v1915_v29, %v5354_v48 }
 0x6c8   :  { %v1945_v62 = vmul.f32 %v1938_v19, %v5356_v17  ;;  %v1946_v14 = vmul.f32 %v1942_v10, %v5368_v55  ;;  %v1972_v2 = vmul.f32 %v1965_v30, %v5370_v18  ;;  %v1973_v6 = vmul.f32 %v1969_v37, %v5372_v40 }
 0x6c9   :  { %v1922_v56 = vadd.f32 %v1918_v53, %v1895_v24  ;;  %v1923_v23 = vadd.f32 %v1919_v28, %v1896_v41  ;;  %v1992_v21 = vrot.slane %v1872_v25, %v4453_v44  ;;  %v1996_v47 = vrot.slane %v1873_v12, %v4453_v44 }
 0x6ca   :  { %v2015_v1 = vrot.slane %v1872_v25, %v4455_v45  ;;  %v2019_v4 = vrot.slane %v1873_v12, %v4455_v45  ;;  %v2042_v52 = vrot.slane %v1872_v25, %v4463_v49  ;;  %v2046_v58 = vrot.slane %v1873_v12, %v4463_v49 }
 0x6cb   :  { %v1949_v15 = vadd.f32 %v1945_v62, %v1922_v56  ;;  %v1950_v0 = vadd.f32 %v1946_v14, %v1923_v23  ;;  %v1999_v61 = vmul.f32 %v1992_v21, %v5386_v9  ;;  %v2000_v5 = vmul.f32 %v1996_v47, %v5388_v51 }
 0x6cc   :  { %v2022_v11 = vmul.f32 %v2015_v1, %v5390_v35  ;;  %v2023_v60 = vmul.f32 %v2019_v4, %v2003_v54  ;;  %v2049_v16 = vmul.f32 %v2042_v52, %v2029_v31  ;;  %v2050_v59 = vmul.f32 %v2046_v58, %v5394_v43 }
 0x6cd   :  { %v1976_v36 = vadd.f32 %v1972_v2, %v1949_v15  ;;  %v1977_v20 = vadd.f32 %v1973_v6, %v1950_v0  ;;  %v2069_v26 = vrot.slane %v1872_v25, %v4465_v50  ;;  %v2073_v27 = vrot.slane %v1873_v12, %v4465_v50 }
 0x6ce   :  { %v2026_v7 = vadd.f32 %v2022_v11, %v1999_v61  ;;  %v2027_v29 = vadd.f32 %v2023_v60, %v2000_v5  ;;  %v1880_v19 = vrot.slane %v5359_v57, %v4433_v33  ;;  %v1884_v10 = vrot.slane %v5362_v46, %v4433_v33 }
 0x6cf   :  { %v2076_v30 = vmul.f32 %v2069_v26, %v2056_v22  ;;  %v2077_v37 = vmul.f32 %v2073_v27, %v2057_v3  ;;  %v1903_v24 = vrot.slane %v5359_v57, %v4435_v34  ;;  %v1907_v41 = vrot.slane %v5362_v46, %v4435_v34 }
 0x6d0   :  { %v2053_v53 = vadd.f32 %v2049_v16, %v2026_v7  ;;  %v2054_v25 = vadd.f32 %v2050_v59, %v2027_v29  ;;  %v1893_v12 = vmul.f32 %v1880_v19, %v5348_v42  ;;  %v1894_v28 = vmul.f32 %v1884_v10, %v5350_v8 }
 0x6d1   :  { %v1916_v62 = vmul.f32 %v1903_v24, %v5352_v13  ;;  %v1917_v14 = vmul.f32 %v1907_v41, %v5354_v48  ;;  %v1930_v2 = vrot.slane %v5359_v57, %v4439_v38  ;;  %v1934_v6 = vrot.slane %v5362_v46, %v4439_v38 }
 0x6d2   :  { %v2080_v56 = vadd.f32 %v2076_v30, %v2053_v53  ;;  %v2081_v23 = vadd.f32 %v2077_v37, %v2054_v25  ;;  %v1957_v21 = vrot.slane %v5359_v57, %v4441_v39  ;;  %v1961_v42 = vrot.slane %v5362_v46, %v4441_v39 }
 0x6d3   :  { %v1920_v47 = vadd.f32 %v1916_v62, %v1893_v12  ;;  %v1921_v8 = vadd.f32 %v1917_v14, %v1894_v28  ;;  %v1943_v48 = vmul.f32 %v1930_v2, %v5356_v17  ;;  %v1944_v4 = vmul.f32 %v1934_v6, %v5368_v55  ;;  %v4232_v62 = vpop.eup %4231 }
 0x6d4   :  { %v5426_v1 = vadd.f32 %v2080_v56, %v1976_v36  ;;  %v5428_v13 = vadd.f32 %v2081_v23, %v1977_v20  ;;  %v1970_v52 = vmul.f32 %v1957_v21, %v5370_v18  ;;  %v1971_v58 = vmul.f32 %v1961_v42, %v5372_v40 }
 0x6d5   :  { %v1984_v15 = vrot.slane %v5359_v57, %v4453_v44  ;;  %v1988_v0 = vrot.slane %v5362_v46, %v4453_v44  ;;  %v2007_v5 = vrot.slane %v5359_v57, %v4455_v45  ;;  %v2011_v17 = vrot.slane %v5362_v46, %v4455_v45 }
 0x6d6   :  { %v2089_v61 = vadd.f32 %v5428_v13, %v5426_v1  ;;  %v2034_v55 = vrot.slane %v5359_v57, %v4463_v49  ;;  %v1947_v18 = vadd.f32 %v1943_v48, %v1920_v47  ;;  %v1948_v40 = vadd.f32 %v1944_v4, %v1921_v8 }
 0x6d7   :  { %v1997_v11 = vmul.f32 %v1984_v15, %v5386_v9  ;;  %v1998_v60 = vmul.f32 %v1988_v0, %v5388_v51  ;;  %v2020_v16 = vmul.f32 %v2007_v5, %v5390_v35  ;;  %v2021_v59 = vmul.f32 %v2011_v17, %v2003_v54 }
 0x6d8   :  { %2090 = vadd.xlane.f32.xlu1 %v2089_v61  ;;  %v2038_v36 = vrot.slane %v5362_v46, %v4463_v49  ;;  %v2047_v20 = vmul.f32 %v2034_v55, %v2029_v31  ;;  %v2061_v26 = vrot.slane %v5359_v57, %v4465_v50  ;;  %v2065_v27 = vrot.slane %v5362_v46, %v4465_v50 }
 0x6d9   :  { %v2095_v7 = vmul.f32 %v5426_v1, %v5426_v1  ;;  %v2096_v9 = vmul.f32 %v5428_v13, %v5428_v13  ;;  %v2024_v51 = vadd.f32 %v2020_v16, %v1997_v11  ;;  %v2025_v29 = vadd.f32 %v2021_v59, %v1998_v60  ;;  %v5470_v60 = vld [vmem:[#allocation5 + $0x400] sm:$0xff]  ;;  %v5472_v16 = vld [vmem:[#allocation5 + $0x408] sm:$0xff]  ;;  %v5474_v59 = vld [vmem:[#allocation5 + $0x410] sm:$0xff] }
 0x6da   :  { %v2048_v35 = vmul.f32 %v2038_v36, %v5394_v43  ;;  %v1974_v54 = vadd.f32 %v1970_v52, %v1947_v18  ;;  %v1975_v31 = vadd.f32 %v1971_v58, %v1948_v40  ;;  %v2074_v30 = vmul.f32 %v2061_v26, %v2056_v22  ;;  %v5476_v36 = vld [vmem:[#allocation5 + $0x418] sm:$0xff] }
 0x6db   :  { %v2100_v19 = vadd.f32 %v2096_v9, %v2095_v7  ;;  %v2051_v10 = vadd.f32 %v2047_v20, %v2024_v51  ;;  %v2075_v37 = vmul.f32 %v2065_v27, %v2057_v3  ;;  %v1864_v43 = vmul.f32 0.6931472, %v4232_v62  ;;  %v5478_v20 = vld [vmem:[#allocation5 + $0x420] sm:$0xff]  ;;  %v5492_v51 = vld [vmem:[#allocation5 + $0x428] sm:$0xff]  ;;  %v5518_v62 = vld [vmem:[#allocation5 + $0x450] sm:$0xff] }
 0x6dc   :  { %v2052_v57 = vadd.f32 %v2048_v35, %v2025_v29  ;;  %v5494_v29 = vld [vmem:[#allocation5 + $0x430] sm:$0xff]  ;;  %v5496_v35 = vld [vmem:[#allocation5 + $0x438] sm:$0xff] }
 0x6dd   :  { %2101 = vadd.xlane.f32.xlu1 %v2100_v19  ;;  %v2078_v46 = vadd.f32 %v2074_v30, %v2051_v10  ;;  %v5462_v32 = vadd.f32 %v1864_v43, %v5340_v63 }
 0x6de   :  { %v2079_v24 = vadd.f32 %v2075_v37, %v2052_v57 }
 0x6df   :  { %v2082_v41 = vadd.f32 %v2078_v46, %v1974_v54 }
 0x6e0   :  { %v2083_v53 = vadd.f32 %v2079_v24, %v1975_v31 }
 0x6e1   :  { %v2093_v12 = vmul.f32 %v2082_v41, %v2082_v41 }
 0x6e2   :  { %v2086_v25 = vadd.f32 %v2083_v53, %v2082_v41  ;;  %v2094_v28 = vmul.f32 %v2083_v53, %v2083_v53 }
 0x6e4   :  { %2087 = vadd.xlane.f32.xlu0 %v2086_v25  ;;  %v2097_v14 = vadd.f32 %v2094_v28, %v2093_v12  ;;  %v5514_v12 = vld [vmem:[#allocation5 + $0x440] sm:$0xff]  ;;  %v5516_v28 = vld [vmem:[#allocation5 + $0x448] sm:$0xff] }
 0x6e8   :  { %2098 = vadd.xlane.f32.xlu0 %v2097_v14 }
 0x765   :  { %v2091_v2 = vpop.xlane.xlu1 %2090 }
 0x76a   :  { %v2102_v3 = vpop.xlane.xlu1 %2101 }
 0x771   :  { %v2088_v6 = vpop.xlane.xlu0 %2087 }
 0x772   :  { %v2092_v22 = vadd.f32 %v2091_v2, %v2088_v6 }
 0x774   :  { %v2104_v56 = vmul.f32 0.001953125, %v2092_v22  ;;  %v2258_v22 = vld [vmem:[#allocation5 + $0x458] sm:$0xff] }
 0x775   :  { %v2099_v23 = vpop.xlane.xlu0 %2098 }
 0x776   :  { %v2103_v21 = vadd.f32 %v2102_v3, %v2099_v23  ;;  %v2106_v42 = vmul.f32 %v2104_v56, %v2104_v56  ;;  %v2123_v61 = vsub.f32 %v5426_v1, %v2104_v56  ;;  %v2124_v5 = vsub.f32 %v5428_v13, %v2104_v56  ;;  %v5524_v3 = vld [vmem:[#allocation5 + $0x460] sm:$0xff] }
 0x777   :  { %v2121_v55 = vsub.f32 %v2082_v41, %v2104_v56  ;;  %v2122_v18 = vsub.f32 %v2083_v53, %v2104_v56  ;;  %v5526_v56 = vld [vmem:[#allocation5 + $0x468] sm:$0xff] }
 0x778   :  { %v2105_v47 = vmul.f32 0.001953125, %v2103_v21 }
 0x77a   :  { %v2107_v8 = vsub.f32 %v2105_v47, %v2106_v42 }
 0x77c   :  { %v2108_v48 = vmax.f32 %v2107_v8, 0.0 }
 0x77e   :  { %4233 = vrsqrt.f32 %v2108_v48  ;;  %vm2111_vm0 = vcmp.eq.f32.partialorder %v2108_v48, inf  ;;  %v2114_v58 = vand.u32 2147483648, %v2108_v48  ;;  %vm2113_vm1 = vcmp.eq.f32.partialorder %v2108_v48, 0.0 }
 0x788   :  { %v4234_v4 = vpop.eup %4233 }
 0x789   :  { %v2110_v52 = vmul.f32 %v4234_v4, %v2108_v48 }
 0x78b   :  { %v2112_v15 = vsel %vm2111_vm0, %v2108_v48, %v2110_v52  ;;  %vm4130_vm0 = vcmask 7168  }
 0x78c   :  { %v2115_v63 = vsel %vm2113_vm1, %v2114_v58, %v2112_v15 }
 0x78d   :  { %v2116_v0 = vadd.f32 1e-06, %v2115_v63 }
 0x78f   :  { %4235 = vrcp.f32 %v2116_v0 }
 0x799   :  { %v4236_v17 = vpop.eup %4235 }
 0x79a   :  { %v5466_v40 = vmul.f32 %v4236_v17, %v2123_v61  ;;  %v5468_v11 = vmul.f32 %v4236_v17, %v2124_v5  ;;  %v5480_v1 = vmul.f32 %v4236_v17, %v2121_v55  ;;  %v5482_v13 = vmul.f32 %v4236_v17, %v2122_v18  ;;  %v2311_v61 = vld [vmem:[#allocation5 + $0x470] sm:$0xff]  ;;  %v5541_v5 = vld [vmem:[#allocation5 + $0x478] sm:$0xff] }
 0x79b   :  { %4237 = vlog2.f32 %v4236_v17 }
 0x79c   :  { %v2143_v26 = vrot.slane %v5466_v40, %v4433_v33  ;;  %v2147_v27 = vrot.slane %v5468_v11, %v4433_v33  ;;  %v2166_v7 = vrot.slane %v5466_v40, %v4435_v34  ;;  %v2170_v9 = vrot.slane %v5468_v11, %v4435_v34 }
 0x79d   :  { %v2193_v54 = vrot.slane %v5466_v40, %v4439_v38  ;;  %v2197_v31 = vrot.slane %v5468_v11, %v4439_v38  ;;  %v2220_v19 = vrot.slane %v5466_v40, %v4441_v39  ;;  %v2224_v10 = vrot.slane %v5468_v11, %v4441_v39 }
 0x79e   :  { %v2150_v57 = vmul.f32 %v2143_v26, %v5470_v60  ;;  %v2151_v30 = vmul.f32 %v2147_v27, %v5472_v16  ;;  %v2173_v37 = vmul.f32 %v2166_v7, %v5474_v59  ;;  %v2174_v46 = vmul.f32 %v2170_v9, %v5476_v36 }
 0x79f   :  { %v2200_v24 = vmul.f32 %v2193_v54, %v5478_v20  ;;  %v2201_v41 = vmul.f32 %v2197_v31, %v5492_v51  ;;  %v2227_v53 = vmul.f32 %v2220_v19, %v5494_v29  ;;  %v2228_v25 = vmul.f32 %v2224_v10, %v5496_v35 }
 0x7a0   :  { %v2177_v43 = vadd.f32 %v2173_v37, %v2150_v57  ;;  %v2178_v14 = vadd.f32 %v2174_v46, %v2151_v30  ;;  %v2247_v2 = vrot.slane %v5466_v40, %v4453_v44  ;;  %v2251_v6 = vrot.slane %v5468_v11, %v4453_v44 }
 0x7a1   :  { %v2270_v23 = vrot.slane %v5466_v40, %v4455_v45  ;;  %v2274_v21 = vrot.slane %v5468_v11, %v4455_v45  ;;  %v2297_v42 = vrot.slane %v5466_v40, %v4463_v49  ;;  %v2301_v47 = vrot.slane %v5468_v11, %v4463_v49 }
 0x7a2   :  { %v2204_v8 = vadd.f32 %v2200_v24, %v2177_v43  ;;  %v2205_v48 = vadd.f32 %v2201_v41, %v2178_v14  ;;  %v2254_v4 = vmul.f32 %v2247_v2, %v5514_v12  ;;  %v2255_v52 = vmul.f32 %v2251_v6, %v5516_v28 }
 0x7a3   :  { %v2277_v58 = vmul.f32 %v2270_v23, %v5518_v62  ;;  %v2278_v15 = vmul.f32 %v2274_v21, %v2258_v22  ;;  %v2304_v63 = vmul.f32 %v2297_v42, %v5524_v3  ;;  %v2305_v0 = vmul.f32 %v2301_v47, %v5526_v56 }
 0x7a4   :  { %v2231_v17 = vadd.f32 %v2227_v53, %v2204_v8  ;;  %v2232_v55 = vadd.f32 %v2228_v25, %v2205_v48  ;;  %v2324_v18 = vrot.slane %v5466_v40, %v4465_v50  ;;  %v2328_v26 = vrot.slane %v5468_v11, %v4465_v50 }
 0x7a5   :  { %v4238_v27 = vpop.eup %4237  ;;  %v2281_v7 = vadd.f32 %v2277_v58, %v2254_v4  ;;  %v2282_v9 = vadd.f32 %v2278_v15, %v2255_v52  ;;  %v2135_v54 = vrot.slane %v5480_v1, %v4433_v33  ;;  %v2139_v31 = vrot.slane %v5482_v13, %v4433_v33 }
 0x7a6   :  { %v2331_v19 = vmul.f32 %v2324_v18, %v2311_v61  ;;  %v2332_v10 = vmul.f32 %v2328_v26, %v5541_v5  ;;  %v2158_v57 = vrot.slane %v5480_v1, %v4435_v34  ;;  %v2162_v40 = vrot.slane %v5482_v13, %v4435_v34 }
 0x7a7   :  { %v2308_v30 = vadd.f32 %v2304_v63, %v2281_v7  ;;  %v2309_v11 = vadd.f32 %v2305_v0, %v2282_v9  ;;  %v2148_v37 = vmul.f32 %v2135_v54, %v5470_v60  ;;  %v2149_v46 = vmul.f32 %v2139_v31, %v5472_v16 }
 0x7a8   :  { %v2171_v24 = vmul.f32 %v2158_v57, %v5474_v59  ;;  %v2172_v41 = vmul.f32 %v2162_v40, %v5476_v36  ;;  %v2185_v53 = vrot.slane %v5480_v1, %v4439_v38  ;;  %v2189_v25 = vrot.slane %v5482_v13, %v4439_v38 }
 0x7a9   :  { %v2335_v43 = vadd.f32 %v2331_v19, %v2308_v30  ;;  %v2336_v14 = vadd.f32 %v2332_v10, %v2309_v11  ;;  %v2212_v2 = vrot.slane %v5480_v1, %v4441_v39  ;;  %v2216_v60 = vrot.slane %v5482_v13, %v4441_v39 }
 0x7aa   :  { %v2175_v6 = vadd.f32 %v2171_v24, %v2148_v37  ;;  %v2176_v16 = vadd.f32 %v2172_v41, %v2149_v46  ;;  %v2198_v36 = vmul.f32 %v2185_v53, %v5478_v20  ;;  %v2199_v21 = vmul.f32 %v2189_v25, %v5492_v51 }
 0x7ab   :  { %v5568_v23 = vadd.f32 %v2335_v43, %v2231_v17  ;;  %v5570_v59 = vadd.f32 %v2336_v14, %v2232_v55  ;;  %v2225_v42 = vmul.f32 %v2212_v2, %v5494_v29  ;;  %v2226_v47 = vmul.f32 %v2216_v60, %v5496_v35 }
 0x7ac   :  { %v2239_v8 = vrot.slane %v5480_v1, %v4453_v44  ;;  %v2243_v48 = vrot.slane %v5482_v13, %v4453_v44  ;;  %v2262_v52 = vrot.slane %v5480_v1, %v4455_v45  ;;  %v2266_v20 = vrot.slane %v5482_v13, %v4455_v45 }
 0x7ad   :  { %v2344_v4 = vadd.f32 %v5570_v59, %v5568_v23  ;;  %v2289_v51 = vrot.slane %v5480_v1, %v4463_v49  ;;  %v2202_v29 = vadd.f32 %v2198_v36, %v2175_v6  ;;  %v2203_v35 = vadd.f32 %v2199_v21, %v2176_v16 }
 0x7ae   :  { %v2252_v58 = vmul.f32 %v2239_v8, %v5514_v12  ;;  %v2253_v15 = vmul.f32 %v2243_v48, %v5516_v28  ;;  %v2275_v63 = vmul.f32 %v2262_v52, %v5518_v62  ;;  %v2276_v0 = vmul.f32 %v2266_v20, %v2258_v22 }
 0x7af   :  { %2345 = vadd.xlane.f32.xlu1 %v2344_v4  ;;  %v2293_v17 = vrot.slane %v5482_v13, %v4463_v49  ;;  %v2302_v55 = vmul.f32 %v2289_v51, %v5524_v3  ;;  %v2316_v18 = vrot.slane %v5480_v1, %v4465_v50  ;;  %v2320_v26 = vrot.slane %v5482_v13, %v4465_v50 }
 0x7b0   :  { %v2350_v12 = vmul.f32 %v5568_v23, %v5568_v23  ;;  %v2351_v28 = vmul.f32 %v5570_v59, %v5570_v59  ;;  %v2279_v7 = vadd.f32 %v2275_v63, %v2252_v58  ;;  %v2280_v62 = vadd.f32 %v2276_v0, %v2253_v15  ;;  %v5613_v58 = vld [vmem:[#allocation5 + $0x480] sm:$0xff]  ;;  %v5615_v15 = vld [vmem:[#allocation5 + $0x488] sm:$0xff]  ;;  %v5617_v63 = vld [vmem:[#allocation5 + $0x490] sm:$0xff] }
 0x7b1   :  { %v2303_v22 = vmul.f32 %v2293_v17, %v5526_v56  ;;  %v2119_v9 = vmul.f32 0.6931472, %v4238_v27  ;;  %v2229_v54 = vadd.f32 %v2225_v42, %v2202_v29  ;;  %v2230_v31 = vadd.f32 %v2226_v47, %v2203_v35  ;;  %v5619_v0 = vld [vmem:[#allocation5 + $0x498] sm:$0xff]  ;;  %v5621_v17 = vld [vmem:[#allocation5 + $0x4a0] sm:$0xff] }
 0x7b2   :  { %v2329_v3 = vmul.f32 %v2316_v18, %v2311_v61  ;;  %v2355_v19 = vadd.f32 %v2351_v28, %v2350_v12  ;;  %v2306_v10 = vadd.f32 %v2302_v55, %v2279_v7  ;;  %v2330_v57 = vmul.f32 %v2320_v26, %v5541_v5  ;;  %v5635_v28 = vld [vmem:[#allocation5 + $0x4a8] sm:$0xff]  ;;  %v5637_v7 = vld [vmem:[#allocation5 + $0x4b0] sm:$0xff] }
 0x7b3   :  { %v2307_v1 = vadd.f32 %v2303_v22, %v2280_v62  ;;  %v5605_v13 = vadd.f32 %v2119_v9, %v5462_v32  ;;  %v5639_v62 = vld [vmem:[#allocation5 + $0x4b8] sm:$0xff] }
 0x7b4   :  { %2356 = vadd.xlane.f32.xlu1 %v2355_v19  ;;  %v2333_v40 = vadd.f32 %v2329_v3, %v2306_v10 }
 0x7b5   :  { %v2334_v30 = vadd.f32 %v2330_v57, %v2307_v1 }
 0x7b6   :  { %v2337_v11 = vadd.f32 %v2333_v40, %v2229_v54 }
 0x7b7   :  { %v2338_v37 = vadd.f32 %v2334_v30, %v2230_v31 }
 0x7b8   :  { %v2348_v24 = vmul.f32 %v2337_v11, %v2337_v11 }
 0x7b9   :  { %v2341_v46 = vadd.f32 %v2338_v37, %v2337_v11  ;;  %v2349_v56 = vmul.f32 %v2338_v37, %v2338_v37 }
 0x7bb   :  { %2342 = vadd.xlane.f32.xlu0 %v2341_v46  ;;  %v2352_v27 = vadd.f32 %v2349_v56, %v2348_v24  ;;  %v5659_v46 = vld [vmem:[#allocation5 + $0x4c8] sm:$0xff]  ;;  %v5661_v24 = vld [vmem:[#allocation5 + $0x4d0] sm:$0xff] }
 0x7bf   :  { %2353 = vadd.xlane.f32.xlu0 %v2352_v27 }
 0x83c   :  { %v2346_v61 = vpop.xlane.xlu1 %2345 }
 0x841   :  { %v2357_v25 = vpop.xlane.xlu1 %2356 }
 0x848   :  { %v2343_v41 = vpop.xlane.xlu0 %2342 }
 0x849   :  { %v2347_v53 = vadd.f32 %v2346_v61, %v2343_v41 }
 0x84b   :  { %v2359_v43 = vmul.f32 0.001953125, %v2347_v53  ;;  %v2513_v53 = vld [vmem:[#allocation5 + $0x4d8] sm:$0xff] }
 0x84c   :  { %v2354_v5 = vpop.xlane.xlu0 %2353 }
 0x84d   :  { %v2358_v14 = vadd.f32 %v2357_v25, %v2354_v5  ;;  %v2361_v32 = vmul.f32 %v2359_v43, %v2359_v43  ;;  %v2378_v48 = vsub.f32 %v5568_v23, %v2359_v43  ;;  %v2379_v4 = vsub.f32 %v5570_v59, %v2359_v43  ;;  %v5667_v25 = vld [vmem:[#allocation5 + $0x4e0] sm:$0xff] }
 0x84e   :  { %v2376_v20 = vsub.f32 %v2337_v11, %v2359_v43  ;;  %v2377_v51 = vsub.f32 %v2338_v37, %v2359_v43  ;;  %v5657_v37 = vld [vmem:[#allocation5 + $0x4c0] sm:$0xff]  ;;  %v5669_v43 = vld [vmem:[#allocation5 + $0x4e8] sm:$0xff] }
 0x84f   :  { %v2360_v2 = vmul.f32 0.001953125, %v2358_v14 }
 0x851   :  { %v2362_v60 = vsub.f32 %v2360_v2, %v2361_v32 }
 0x853   :  { %v2363_v6 = vmax.f32 %v2362_v60, 0.0 }
 0x855   :  { %4239 = vrsqrt.f32 %v2363_v6  ;;  %vm2366_vm2 = vcmp.eq.f32.partialorder %v2363_v6, inf  ;;  %v2369_v21 = vand.u32 2147483648, %v2363_v6  ;;  %vm2368_vm3 = vcmp.eq.f32.partialorder %v2363_v6, 0.0 }
 0x85f   :  { %v4240_v16 = vpop.eup %4239 }
 0x860   :  { %v2365_v36 = vmul.f32 %v4240_v16, %v2363_v6 }
 0x862   :  { %v2367_v42 = vsel %vm2366_vm2, %v2363_v6, %v2365_v36 }
 0x863   :  { %v2370_v47 = vsel %vm2368_vm3, %v2369_v21, %v2367_v42 }
 0x864   :  { %v2371_v8 = vadd.f32 1e-06, %v2370_v47 }
 0x866   :  { %4241 = vrcp.f32 %v2371_v8 }
 0x870   :  { %v4242_v52 = vpop.eup %4241 }
 0x871   :  { %v5609_v29 = vmul.f32 %v4242_v52, %v2378_v48  ;;  %v5611_v35 = vmul.f32 %v4242_v52, %v2379_v4  ;;  %v5623_v23 = vmul.f32 %v4242_v52, %v2376_v20  ;;  %v5625_v59 = vmul.f32 %v4242_v52, %v2377_v51  ;;  %v2566_v48 = vld [vmem:[#allocation5 + $0x4f0] sm:$0xff]  ;;  %v5684_v4 = vld [vmem:[#allocation5 + $0x4f8] sm:$0xff] }
 0x872   :  { %4243 = vlog2.f32 %v4242_v52 }
 0x873   :  { %v2398_v55 = vrot.slane %v5609_v29, %v4433_v33  ;;  %v2402_v18 = vrot.slane %v5611_v35, %v4433_v33  ;;  %v2421_v26 = vrot.slane %v5609_v29, %v4435_v34  ;;  %v2425_v12 = vrot.slane %v5611_v35, %v4435_v34 }
 0x874   :  { %v2448_v22 = vrot.slane %v5609_v29, %v4439_v38  ;;  %v2452_v9 = vrot.slane %v5611_v35, %v4439_v38  ;;  %v2475_v54 = vrot.slane %v5609_v29, %v4441_v39  ;;  %v2479_v31 = vrot.slane %v5611_v35, %v4441_v39 }
 0x875   :  { %v2405_v3 = vmul.f32 %v2398_v55, %v5613_v58  ;;  %v2406_v19 = vmul.f32 %v2402_v18, %v5615_v15  ;;  %v2428_v10 = vmul.f32 %v2421_v26, %v5617_v63  ;;  %v2429_v1 = vmul.f32 %v2425_v12, %v5619_v0 }
 0x876   :  { %v2455_v57 = vmul.f32 %v2448_v22, %v5621_v17  ;;  %v2456_v40 = vmul.f32 %v2452_v9, %v5635_v28  ;;  %v2482_v30 = vmul.f32 %v2475_v54, %v5637_v7  ;;  %v2483_v11 = vmul.f32 %v2479_v31, %v5639_v62 }
 0x877   :  { %v2432_v56 = vadd.f32 %v2428_v10, %v2405_v3  ;;  %v2433_v27 = vadd.f32 %v2429_v1, %v2406_v19  ;;  %v2502_v61 = vrot.slane %v5609_v29, %v4453_v44  ;;  %v2506_v41 = vrot.slane %v5611_v35, %v4453_v44 }
 0x878   :  { %v2525_v5 = vrot.slane %v5609_v29, %v4455_v45  ;;  %v2529_v14 = vrot.slane %v5611_v35, %v4455_v45  ;;  %v2552_v32 = vrot.slane %v5609_v29, %v4463_v49  ;;  %v2556_v2 = vrot.slane %v5611_v35, %v4463_v49 }
 0x879   :  { %v2459_v60 = vadd.f32 %v2455_v57, %v2432_v56  ;;  %v2460_v6 = vadd.f32 %v2456_v40, %v2433_v27  ;;  %v2509_v16 = vmul.f32 %v2502_v61, %v5657_v37  ;;  %v2510_v36 = vmul.f32 %v2506_v41, %v5659_v46 }
 0x87a   :  { %v2532_v21 = vmul.f32 %v2525_v5, %v5661_v24  ;;  %v2533_v42 = vmul.f32 %v2529_v14, %v2513_v53  ;;  %v2559_v47 = vmul.f32 %v2552_v32, %v5667_v25  ;;  %v2560_v8 = vmul.f32 %v2556_v2, %v5669_v43 }
 0x87b   :  { %v2486_v52 = vadd.f32 %v2482_v30, %v2459_v60  ;;  %v2487_v20 = vadd.f32 %v2483_v11, %v2460_v6  ;;  %v2579_v51 = vrot.slane %v5609_v29, %v4465_v50  ;;  %v2583_v55 = vrot.slane %v5611_v35, %v4465_v50 }
 0x87c   :  { %v4244_v18 = vpop.eup %4243  ;;  %v2536_v26 = vadd.f32 %v2532_v21, %v2509_v16  ;;  %v2537_v12 = vadd.f32 %v2533_v42, %v2510_v36  ;;  %v2390_v22 = vrot.slane %v5623_v23, %v4433_v33  ;;  %v2394_v9 = vrot.slane %v5625_v59, %v4433_v33 }
 0x87d   :  { %v2586_v54 = vmul.f32 %v2579_v51, %v2566_v48  ;;  %v2587_v31 = vmul.f32 %v2583_v55, %v5684_v4  ;;  %v2413_v3 = vrot.slane %v5623_v23, %v4435_v34  ;;  %v2417_v29 = vrot.slane %v5625_v59, %v4435_v34 }
 0x87e   :  { %v2563_v19 = vadd.f32 %v2559_v47, %v2536_v26  ;;  %v2564_v35 = vadd.f32 %v2560_v8, %v2537_v12  ;;  %v2403_v10 = vmul.f32 %v2390_v22, %v5613_v58  ;;  %v2404_v1 = vmul.f32 %v2394_v9, %v5615_v15 }
 0x87f   :  { %v2426_v57 = vmul.f32 %v2413_v3, %v5617_v63  ;;  %v2427_v40 = vmul.f32 %v2417_v29, %v5619_v0  ;;  %v2440_v30 = vrot.slane %v5623_v23, %v4439_v38  ;;  %v2444_v11 = vrot.slane %v5625_v59, %v4439_v38 }
 0x880   :  { %v2590_v56 = vadd.f32 %v2586_v54, %v2563_v19  ;;  %v2591_v27 = vadd.f32 %v2587_v31, %v2564_v35  ;;  %v2467_v61 = vrot.slane %v5623_v23, %v4441_v39  ;;  %v2471_v58 = vrot.slane %v5625_v59, %v4441_v39 }
 0x881   :  { %v2430_v41 = vadd.f32 %v2426_v57, %v2403_v10  ;;  %v2431_v15 = vadd.f32 %v2427_v40, %v2404_v1  ;;  %v2453_v0 = vmul.f32 %v2440_v30, %v5621_v17  ;;  %v2454_v14 = vmul.f32 %v2444_v11, %v5635_v28 }
 0x882   :  { %v5711_v5 = vadd.f32 %v2590_v56, %v2486_v52  ;;  %v5713_v63 = vadd.f32 %v2591_v27, %v2487_v20  ;;  %v2480_v32 = vmul.f32 %v2467_v61, %v5637_v7  ;;  %v2481_v2 = vmul.f32 %v2471_v58, %v5639_v62 }
 0x883   :  { %v2494_v60 = vrot.slane %v5623_v23, %v4453_v44  ;;  %v2498_v6 = vrot.slane %v5625_v59, %v4453_v44  ;;  %v2517_v36 = vrot.slane %v5623_v23, %v4455_v45  ;;  %v2521_v17 = vrot.slane %v5625_v59, %v4455_v45 }
 0x884   :  { %v2599_v16 = vadd.f32 %v5713_v63, %v5711_v5  ;;  %v2544_v28 = vrot.slane %v5623_v23, %v4463_v49  ;;  %v2457_v7 = vadd.f32 %v2453_v0, %v2430_v41  ;;  %v2458_v62 = vadd.f32 %v2454_v14, %v2431_v15 }
 0x885   :  { %v2507_v21 = vmul.f32 %v2494_v60, %v5657_v37  ;;  %v2508_v42 = vmul.f32 %v2498_v6, %v5659_v46  ;;  %v2530_v47 = vmul.f32 %v2517_v36, %v5661_v24  ;;  %v2531_v8 = vmul.f32 %v2521_v17, %v2513_v53 }
 0x886   :  { %2600 = vadd.xlane.f32.xlu1 %v2599_v16  ;;  %v2548_v52 = vrot.slane %v5625_v59, %v4463_v49  ;;  %v2557_v20 = vmul.f32 %v2544_v28, %v5667_v25  ;;  %v2571_v51 = vrot.slane %v5623_v23, %v4465_v50  ;;  %v2575_v55 = vrot.slane %v5625_v59, %v4465_v50 }
 0x887   :  { %v2605_v37 = vmul.f32 %v5711_v5, %v5711_v5  ;;  %v2606_v46 = vmul.f32 %v5713_v63, %v5713_v63  ;;  %v2534_v26 = vadd.f32 %v2530_v47, %v2507_v21  ;;  %v2535_v24 = vadd.f32 %v2531_v8, %v2508_v42  ;;  %v5756_v21 = vld [vmem:[#allocation5 + $0x500] sm:$0xff]  ;;  %v5758_v42 = vld [vmem:[#allocation5 + $0x508] sm:$0xff]  ;;  %v5760_v47 = vld [vmem:[#allocation5 + $0x510] sm:$0xff] }
 0x888   :  { %v2558_v53 = vmul.f32 %v2548_v52, %v5669_v43  ;;  %v2374_v12 = vmul.f32 0.6931472, %v4244_v18  ;;  %v2484_v22 = vadd.f32 %v2480_v32, %v2457_v7  ;;  %v2485_v9 = vadd.f32 %v2481_v2, %v2458_v62  ;;  %v5762_v8 = vld [vmem:[#allocation5 + $0x518] sm:$0xff]  ;;  %v5764_v52 = vld [vmem:[#allocation5 + $0x520] sm:$0xff] }
 0x889   :  { %v2584_v25 = vmul.f32 %v2571_v51, %v2566_v48  ;;  %v2610_v54 = vadd.f32 %v2606_v46, %v2605_v37  ;;  %v2561_v31 = vadd.f32 %v2557_v20, %v2534_v26  ;;  %v2585_v3 = vmul.f32 %v2575_v55, %v5684_v4  ;;  %v5778_v46 = vld [vmem:[#allocation5 + $0x528] sm:$0xff]  ;;  %v5780_v26 = vld [vmem:[#allocation5 + $0x530] sm:$0xff] }
 0x88a   :  { %v2562_v23 = vadd.f32 %v2558_v53, %v2535_v24  ;;  %v5748_v59 = vadd.f32 %v2374_v12, %v5605_v13  ;;  %v5782_v24 = vld [vmem:[#allocation5 + $0x538] sm:$0xff] }
 0x88b   :  { %2611 = vadd.xlane.f32.xlu1 %v2610_v54  ;;  %v2588_v29 = vadd.f32 %v2584_v25, %v2561_v31 }
 0x88c   :  { %v2589_v19 = vadd.f32 %v2585_v3, %v2562_v23 }
 0x88d   :  { %v2592_v35 = vadd.f32 %v2588_v29, %v2484_v22 }
 0x88e   :  { %v2593_v10 = vadd.f32 %v2589_v19, %v2485_v9 }
 0x88f   :  { %v2603_v57 = vmul.f32 %v2592_v35, %v2592_v35 }
 0x890   :  { %v2596_v1 = vadd.f32 %v2593_v10, %v2592_v35  ;;  %v2604_v43 = vmul.f32 %v2593_v10, %v2593_v10 }
 0x892   :  { %2597 = vadd.xlane.f32.xlu0 %v2596_v1  ;;  %v2607_v18 = vadd.f32 %v2604_v43, %v2603_v57  ;;  %v5802_v1 = vld [vmem:[#allocation5 + $0x548] sm:$0xff]  ;;  %v5804_v57 = vld [vmem:[#allocation5 + $0x550] sm:$0xff] }
 0x896   :  { %2608 = vadd.xlane.f32.xlu0 %v2607_v18 }
 0x913   :  { %v2601_v48 = vpop.xlane.xlu1 %2600 }
 0x918   :  { %v2612_v11 = vpop.xlane.xlu1 %2611 }
 0x91f   :  { %v2598_v40 = vpop.xlane.xlu0 %2597 }
 0x920   :  { %v2602_v30 = vadd.f32 %v2601_v48, %v2598_v40 }
 0x922   :  { %v2614_v56 = vmul.f32 0.001953125, %v2602_v30  ;;  %v2768_v30 = vld [vmem:[#allocation5 + $0x558] sm:$0xff] }
 0x923   :  { %v2609_v4 = vpop.xlane.xlu0 %2608 }
 0x924   :  { %v2613_v27 = vadd.f32 %v2612_v11, %v2609_v4  ;;  %v2616_v13 = vmul.f32 %v2614_v56, %v2614_v56  ;;  %v2633_v6 = vsub.f32 %v5711_v5, %v2614_v56  ;;  %v2634_v16 = vsub.f32 %v5713_v63, %v2614_v56  ;;  %v5810_v11 = vld [vmem:[#allocation5 + $0x560] sm:$0xff] }
 0x925   :  { %v2631_v17 = vsub.f32 %v2592_v35, %v2614_v56  ;;  %v2632_v28 = vsub.f32 %v2593_v10, %v2614_v56  ;;  %v5800_v10 = vld [vmem:[#allocation5 + $0x540] sm:$0xff]  ;;  %v5812_v56 = vld [vmem:[#allocation5 + $0x568] sm:$0xff] }
 0x926   :  { %v2615_v61 = vmul.f32 0.001953125, %v2613_v27 }
 0x928   :  { %v2617_v58 = vsub.f32 %v2615_v61, %v2616_v13 }
 0x92a   :  { %v2618_v41 = vmax.f32 %v2617_v58, 0.0 }
 0x92c   :  { %4245 = vrsqrt.f32 %v2618_v41  ;;  %vm2621_vm4 = vcmp.eq.f32.partialorder %v2618_v41, inf  ;;  %v2624_v14 = vand.u32 2147483648, %v2618_v41  ;;  %vm2623_vm5 = vcmp.eq.f32.partialorder %v2618_v41, 0.0 }
 0x936   :  { %v4246_v15 = vpop.eup %4245 }
 0x937   :  { %v2620_v0 = vmul.f32 %v4246_v15, %v2618_v41 }
 0x939   :  { %v2622_v32 = vsel %vm2621_vm4, %v2618_v41, %v2620_v0 }
 0x93a   :  { %v2625_v2 = vsel %vm2623_vm5, %v2624_v14, %v2622_v32 }
 0x93b   :  { %v2626_v60 = vadd.f32 1e-06, %v2625_v2 }
 0x93d   :  { %4247 = vrcp.f32 %v2626_v60 }
 0x947   :  { %v4248_v36 = vpop.eup %4247 }
 0x948   :  { %v5752_v7 = vmul.f32 %v4248_v36, %v2633_v6  ;;  %v5754_v62 = vmul.f32 %v4248_v36, %v2634_v16  ;;  %v5766_v5 = vmul.f32 %v4248_v36, %v2631_v17  ;;  %v5768_v63 = vmul.f32 %v4248_v36, %v2632_v28  ;;  %v2821_v6 = vld [vmem:[#allocation5 + $0x570] sm:$0xff]  ;;  %v5827_v16 = vld [vmem:[#allocation5 + $0x578] sm:$0xff] }
 0x949   :  { %4249 = vlog2.f32 %v4248_v36 }
 0x94a   :  { %v2653_v20 = vrot.slane %v5752_v7, %v4433_v33  ;;  %v2657_v51 = vrot.slane %v5754_v62, %v4433_v33  ;;  %v2676_v55 = vrot.slane %v5752_v7, %v4435_v34  ;;  %v2680_v37 = vrot.slane %v5754_v62, %v4435_v34 }
 0x94b   :  { %v2703_v53 = vrot.slane %v5752_v7, %v4439_v38  ;;  %v2707_v12 = vrot.slane %v5754_v62, %v4439_v38  ;;  %v2730_v22 = vrot.slane %v5752_v7, %v4441_v39  ;;  %v2734_v9 = vrot.slane %v5754_v62, %v4441_v39 }
 0x94c   :  { %v2660_v25 = vmul.f32 %v2653_v20, %v5756_v21  ;;  %v2661_v54 = vmul.f32 %v2657_v51, %v5758_v42  ;;  %v2683_v31 = vmul.f32 %v2676_v55, %v5760_v47  ;;  %v2684_v23 = vmul.f32 %v2680_v37, %v5762_v8 }
 0x94d   :  { %v2710_v3 = vmul.f32 %v2703_v53, %v5764_v52  ;;  %v2711_v29 = vmul.f32 %v2707_v12, %v5778_v46  ;;  %v2737_v19 = vmul.f32 %v2730_v22, %v5780_v26  ;;  %v2738_v35 = vmul.f32 %v2734_v9, %v5782_v24 }
 0x94e   :  { %v2687_v43 = vadd.f32 %v2683_v31, %v2660_v25  ;;  %v2688_v18 = vadd.f32 %v2684_v23, %v2661_v54  ;;  %v2757_v48 = vrot.slane %v5752_v7, %v4453_v44  ;;  %v2761_v40 = vrot.slane %v5754_v62, %v4453_v44 }
 0x94f   :  { %v2780_v4 = vrot.slane %v5752_v7, %v4455_v45  ;;  %v2784_v27 = vrot.slane %v5754_v62, %v4455_v45  ;;  %v2807_v13 = vrot.slane %v5752_v7, %v4463_v49  ;;  %v2811_v61 = vrot.slane %v5754_v62, %v4463_v49 }
 0x950   :  { %v2714_v58 = vadd.f32 %v2710_v3, %v2687_v43  ;;  %v2715_v41 = vadd.f32 %v2711_v29, %v2688_v18  ;;  %v2764_v15 = vmul.f32 %v2757_v48, %v5800_v10  ;;  %v2765_v0 = vmul.f32 %v2761_v40, %v5802_v1 }
 0x951   :  { %v2787_v14 = vmul.f32 %v2780_v4, %v5804_v57  ;;  %v2788_v32 = vmul.f32 %v2784_v27, %v2768_v30  ;;  %v2814_v2 = vmul.f32 %v2807_v13, %v5810_v11  ;;  %v2815_v60 = vmul.f32 %v2811_v61, %v5812_v56 }
 0x952   :  { %v2741_v36 = vadd.f32 %v2737_v19, %v2714_v58  ;;  %v2742_v17 = vadd.f32 %v2738_v35, %v2715_v41  ;;  %v2834_v28 = vrot.slane %v5752_v7, %v4465_v50  ;;  %v2838_v20 = vrot.slane %v5754_v62, %v4465_v50 }
 0x953   :  { %v4250_v51 = vpop.eup %4249  ;;  %v2791_v55 = vadd.f32 %v2787_v14, %v2764_v15  ;;  %v2792_v37 = vadd.f32 %v2788_v32, %v2765_v0  ;;  %v2645_v53 = vrot.slane %v5766_v5, %v4433_v33  ;;  %v2649_v12 = vrot.slane %v5768_v63, %v4433_v33 }
 0x954   :  { %v2841_v22 = vmul.f32 %v2834_v28, %v2821_v6  ;;  %v2842_v9 = vmul.f32 %v2838_v20, %v5827_v16  ;;  %v2668_v25 = vrot.slane %v5766_v5, %v4435_v34  ;;  %v2672_v7 = vrot.slane %v5768_v63, %v4435_v34 }
 0x955   :  { %v2818_v54 = vadd.f32 %v2814_v2, %v2791_v55  ;;  %v2819_v62 = vadd.f32 %v2815_v60, %v2792_v37  ;;  %v2658_v31 = vmul.f32 %v2645_v53, %v5756_v21  ;;  %v2659_v23 = vmul.f32 %v2649_v12, %v5758_v42 }
 0x956   :  { %v2681_v3 = vmul.f32 %v2668_v25, %v5760_v47  ;;  %v2682_v29 = vmul.f32 %v2672_v7, %v5762_v8  ;;  %v2695_v19 = vrot.slane %v5766_v5, %v4439_v38  ;;  %v2699_v35 = vrot.slane %v5768_v63, %v4439_v38 }
 0x957   :  { %v2845_v43 = vadd.f32 %v2841_v22, %v2818_v54  ;;  %v2846_v18 = vadd.f32 %v2842_v9, %v2819_v62  ;;  %v2722_v48 = vrot.slane %v5766_v5, %v4441_v39  ;;  %v2726_v21 = vrot.slane %v5768_v63, %v4441_v39 }
 0x958   :  { %v2685_v40 = vadd.f32 %v2681_v3, %v2658_v31  ;;  %v2686_v42 = vadd.f32 %v2682_v29, %v2659_v23  ;;  %v2708_v8 = vmul.f32 %v2695_v19, %v5764_v52  ;;  %v2709_v27 = vmul.f32 %v2699_v35, %v5778_v46 }
 0x959   :  { %v5854_v4 = vadd.f32 %v2845_v43, %v2741_v36  ;;  %v5856_v47 = vadd.f32 %v2846_v18, %v2742_v17  ;;  %v2735_v13 = vmul.f32 %v2722_v48, %v5780_v26  ;;  %v2736_v61 = vmul.f32 %v2726_v21, %v5782_v24 }
 0x95a   :  { %v2749_v58 = vrot.slane %v5766_v5, %v4453_v44  ;;  %v2753_v41 = vrot.slane %v5768_v63, %v4453_v44  ;;  %v2772_v0 = vrot.slane %v5766_v5, %v4455_v45  ;;  %v2776_v52 = vrot.slane %v5768_v63, %v4455_v45 }
 0x95b   :  { %v2854_v15 = vadd.f32 %v5856_v47, %v5854_v4  ;;  %v2799_v46 = vrot.slane %v5766_v5, %v4463_v49  ;;  %v2712_v26 = vadd.f32 %v2708_v8, %v2685_v40  ;;  %v2713_v24 = vadd.f32 %v2709_v27, %v2686_v42 }
 0x95c   :  { %v2762_v14 = vmul.f32 %v2749_v58, %v5800_v10  ;;  %v2763_v32 = vmul.f32 %v2753_v41, %v5802_v1  ;;  %v2785_v2 = vmul.f32 %v2772_v0, %v5804_v57  ;;  %v2786_v60 = vmul.f32 %v2776_v52, %v2768_v30 }
 0x95d   :  { %2855 = vadd.xlane.f32.xlu1 %v2854_v15  ;;  %v2803_v36 = vrot.slane %v5768_v63, %v4463_v49  ;;  %v2812_v17 = vmul.f32 %v2799_v46, %v5810_v11  ;;  %v2826_v28 = vrot.slane %v5766_v5, %v4465_v50  ;;  %v2830_v20 = vrot.slane %v5768_v63, %v4465_v50 }
 0x95e   :  { %v2860_v10 = vmul.f32 %v5854_v4, %v5854_v4  ;;  %v2861_v1 = vmul.f32 %v5856_v47, %v5856_v47  ;;  %v2789_v55 = vadd.f32 %v2785_v2, %v2762_v14  ;;  %v2790_v57 = vadd.f32 %v2786_v60, %v2763_v32  ;;  %v5899_v14 = vld [vmem:[#allocation5 + $0x580] sm:$0xff]  ;;  %v5901_v32 = vld [vmem:[#allocation5 + $0x588] sm:$0xff]  ;;  %v5903_v2 = vld [vmem:[#allocation5 + $0x590] sm:$0xff] }
 0x95f   :  { %v2813_v30 = vmul.f32 %v2803_v36, %v5812_v56  ;;  %v2629_v37 = vmul.f32 0.6931472, %v4250_v51  ;;  %v2739_v53 = vadd.f32 %v2735_v13, %v2712_v26  ;;  %v2740_v12 = vadd.f32 %v2736_v61, %v2713_v24  ;;  %v5905_v60 = vld [vmem:[#allocation5 + $0x598] sm:$0xff]  ;;  %v5907_v36 = vld [vmem:[#allocation5 + $0x5a0] sm:$0xff] }
 0x960   :  { %v2839_v11 = vmul.f32 %v2826_v28, %v2821_v6  ;;  %v2865_v22 = vadd.f32 %v2861_v1, %v2860_v10  ;;  %v2816_v9 = vadd.f32 %v2812_v17, %v2789_v55  ;;  %v2840_v25 = vmul.f32 %v2830_v20, %v5827_v16  ;;  %v5921_v1 = vld [vmem:[#allocation5 + $0x5a8] sm:$0xff]  ;;  %v5923_v55 = vld [vmem:[#allocation5 + $0x5b0] sm:$0xff] }
 0x961   :  { %v2817_v5 = vadd.f32 %v2813_v30, %v2790_v57  ;;  %v5891_v63 = vadd.f32 %v2629_v37, %v5748_v59  ;;  %v5925_v57 = vld [vmem:[#allocation5 + $0x5b8] sm:$0xff] }
 0x962   :  { %2866 = vadd.xlane.f32.xlu1 %v2865_v22  ;;  %v2843_v7 = vadd.f32 %v2839_v11, %v2816_v9 }
 0x963   :  { %v2844_v54 = vadd.f32 %v2840_v25, %v2817_v5 }
 0x964   :  { %v2847_v62 = vadd.f32 %v2843_v7, %v2739_v53 }
 0x965   :  { %v2848_v31 = vadd.f32 %v2844_v54, %v2740_v12 }
 0x966   :  { %v2858_v3 = vmul.f32 %v2847_v62, %v2847_v62 }
 0x967   :  { %v2851_v23 = vadd.f32 %v2848_v31, %v2847_v62  ;;  %v2859_v56 = vmul.f32 %v2848_v31, %v2848_v31 }
 0x969   :  { %2852 = vadd.xlane.f32.xlu0 %v2851_v23  ;;  %v2862_v51 = vadd.f32 %v2859_v56, %v2858_v3  ;;  %v5945_v23 = vld [vmem:[#allocation5 + $0x5c8] sm:$0xff]  ;;  %v5947_v3 = vld [vmem:[#allocation5 + $0x5d0] sm:$0xff] }
 0x96d   :  { %2863 = vadd.xlane.f32.xlu0 %v2862_v51 }
 0x9ea   :  { %v2856_v6 = vpop.xlane.xlu1 %2855 }
 0x9ef   :  { %v2867_v35 = vpop.xlane.xlu1 %2866 }
 0x9f6   :  { %v2853_v29 = vpop.xlane.xlu0 %2852 }
 0x9f7   :  { %v2857_v19 = vadd.f32 %v2856_v6, %v2853_v29 }
 0x9f9   :  { %v2869_v43 = vmul.f32 0.001953125, %v2857_v19  ;;  %v3023_v19 = vld [vmem:[#allocation5 + $0x5d8] sm:$0xff] }
 0x9fa   :  { %v2864_v16 = vpop.xlane.xlu0 %2863 }
 0x9fb   :  { %v2868_v18 = vadd.f32 %v2867_v35, %v2864_v16  ;;  %v2871_v59 = vmul.f32 %v2869_v43, %v2869_v43  ;;  %v2888_v41 = vsub.f32 %v5854_v4, %v2869_v43  ;;  %v2889_v15 = vsub.f32 %v5856_v47, %v2869_v43  ;;  %v5953_v35 = vld [vmem:[#allocation5 + $0x5e0] sm:$0xff] }
 0x9fc   :  { %v2886_v52 = vsub.f32 %v2847_v62, %v2869_v43  ;;  %v2887_v46 = vsub.f32 %v2848_v31, %v2869_v43  ;;  %v5943_v31 = vld [vmem:[#allocation5 + $0x5c0] sm:$0xff]  ;;  %v5955_v43 = vld [vmem:[#allocation5 + $0x5e8] sm:$0xff] }
 0x9fd   :  { %v2870_v48 = vmul.f32 0.001953125, %v2868_v18 }
 0x9ff   :  { %v2872_v21 = vsub.f32 %v2870_v48, %v2871_v59 }
 0xa01   :  { %v2873_v40 = vmax.f32 %v2872_v21, 0.0 }
 0xa03   :  { %4251 = vrsqrt.f32 %v2873_v40  ;;  %vm2876_vm6 = vcmp.eq.f32.partialorder %v2873_v40, inf  ;;  %v2879_v27 = vand.u32 2147483648, %v2873_v40  ;;  %vm2878_vm7 = vcmp.eq.f32.partialorder %v2873_v40, 0.0 }
 0xa0d   :  { %v4252_v42 = vpop.eup %4251 }
 0xa0e   :  { %v2875_v8 = vmul.f32 %v4252_v42, %v2873_v40 }
 0xa10   :  { %v2877_v13 = vsel %vm2876_vm6, %v2873_v40, %v2875_v8 }
 0xa11   :  { %v2880_v61 = vsel %vm2878_vm7, %v2879_v27, %v2877_v13 }
 0xa12   :  { %v2881_v58 = vadd.f32 1e-06, %v2880_v61 }
 0xa14   :  { %4253 = vrcp.f32 %v2881_v58 }
 0xa1e   :  { %v4254_v0 = vpop.eup %4253 }
 0xa1f   :  { %v5895_v26 = vmul.f32 %v4254_v0, %v2888_v41  ;;  %v5897_v24 = vmul.f32 %v4254_v0, %v2889_v15  ;;  %v5909_v4 = vmul.f32 %v4254_v0, %v2886_v52  ;;  %v5911_v47 = vmul.f32 %v4254_v0, %v2887_v46  ;;  %v3076_v41 = vld [vmem:[#allocation5 + $0x5f0] sm:$0xff]  ;;  %v5970_v15 = vld [vmem:[#allocation5 + $0x5f8] sm:$0xff] }
 0xa20   :  { %4255 = vlog2.f32 %v4254_v0 }
 0xa21   :  { %v2908_v17 = vrot.slane %v5895_v26, %v4433_v33  ;;  %v2912_v28 = vrot.slane %v5897_v24, %v4433_v33  ;;  %v2931_v20 = vrot.slane %v5895_v26, %v4435_v34  ;;  %v2935_v10 = vrot.slane %v5897_v24, %v4435_v34 }
 0xa22   :  { %v2958_v30 = vrot.slane %v5895_v26, %v4439_v38  ;;  %v2962_v37 = vrot.slane %v5897_v24, %v4439_v38  ;;  %v2985_v53 = vrot.slane %v5895_v26, %v4441_v39  ;;  %v2989_v12 = vrot.slane %v5897_v24, %v4441_v39 }
 0xa23   :  { %v2915_v11 = vmul.f32 %v2908_v17, %v5899_v14  ;;  %v2916_v22 = vmul.f32 %v2912_v28, %v5901_v32  ;;  %v2938_v9 = vmul.f32 %v2931_v20, %v5903_v2  ;;  %v2939_v5 = vmul.f32 %v2935_v10, %v5905_v60 }
 0xa24   :  { %v2965_v25 = vmul.f32 %v2958_v30, %v5907_v36  ;;  %v2966_v7 = vmul.f32 %v2962_v37, %v5921_v1  ;;  %v2992_v54 = vmul.f32 %v2985_v53, %v5923_v55  ;;  %v2993_v62 = vmul.f32 %v2989_v12, %v5925_v57 }
 0xa25   :  { %v2942_v56 = vadd.f32 %v2938_v9, %v2915_v11  ;;  %v2943_v51 = vadd.f32 %v2939_v5, %v2916_v22  ;;  %v3012_v6 = vrot.slane %v5895_v26, %v4453_v44  ;;  %v3016_v29 = vrot.slane %v5897_v24, %v4453_v44 }
 0xa26   :  { %v3035_v16 = vrot.slane %v5895_v26, %v4455_v45  ;;  %v3039_v18 = vrot.slane %v5897_v24, %v4455_v45  ;;  %v3062_v59 = vrot.slane %v5895_v26, %v4463_v49  ;;  %v3066_v48 = vrot.slane %v5897_v24, %v4463_v49 }
 0xa27   :  { %v2969_v21 = vadd.f32 %v2965_v25, %v2942_v56  ;;  %v2970_v40 = vadd.f32 %v2966_v7, %v2943_v51  ;;  %v3019_v42 = vmul.f32 %v3012_v6, %v5943_v31  ;;  %v3020_v8 = vmul.f32 %v3016_v29, %v5945_v23 }
 0xa28   :  { %v3042_v27 = vmul.f32 %v3035_v16, %v5947_v3  ;;  %v3043_v13 = vmul.f32 %v3039_v18, %v3023_v19  ;;  %v3069_v61 = vmul.f32 %v3062_v59, %v5953_v35  ;;  %v3070_v58 = vmul.f32 %v3066_v48, %v5955_v43 }
 0xa29   :  { %v2996_v0 = vadd.f32 %v2992_v54, %v2969_v21  ;;  %v2997_v52 = vadd.f32 %v2993_v62, %v2970_v40  ;;  %v3089_v46 = vrot.slane %v5895_v26, %v4465_v50  ;;  %v3093_v17 = vrot.slane %v5897_v24, %v4465_v50 }
 0xa2a   :  { %v4256_v28 = vpop.eup %4255  ;;  %v3046_v20 = vadd.f32 %v3042_v27, %v3019_v42  ;;  %v3047_v10 = vadd.f32 %v3043_v13, %v3020_v8  ;;  %v2900_v30 = vrot.slane %v5909_v4, %v4433_v33  ;;  %v2904_v37 = vrot.slane %v5911_v47, %v4433_v33 }
 0xa2b   :  { %v3096_v53 = vmul.f32 %v3089_v46, %v3076_v41  ;;  %v3097_v12 = vmul.f32 %v3093_v17, %v5970_v15  ;;  %v2923_v11 = vrot.slane %v5909_v4, %v4435_v34  ;;  %v2927_v26 = vrot.slane %v5911_v47, %v4435_v34 }
 0xa2c   :  { %v3073_v22 = vadd.f32 %v3069_v61, %v3046_v20  ;;  %v3074_v24 = vadd.f32 %v3070_v58, %v3047_v10  ;;  %v2913_v9 = vmul.f32 %v2900_v30, %v5899_v14  ;;  %v2914_v5 = vmul.f32 %v2904_v37, %v5901_v32 }
 0xa2d   :  { %v2936_v25 = vmul.f32 %v2923_v11, %v5903_v2  ;;  %v2937_v7 = vmul.f32 %v2927_v26, %v5905_v60  ;;  %v2950_v54 = vrot.slane %v5909_v4, %v4439_v38  ;;  %v2954_v62 = vrot.slane %v5911_v47, %v4439_v38 }
 0xa2e   :  { %v3100_v56 = vadd.f32 %v3096_v53, %v3073_v22  ;;  %v3101_v51 = vadd.f32 %v3097_v12, %v3074_v24  ;;  %v2977_v6 = vrot.slane %v5909_v4, %v4441_v39  ;;  %v2981_v14 = vrot.slane %v5911_v47, %v4441_v39 }
 0xa2f   :  { %v2940_v29 = vadd.f32 %v2936_v25, %v2913_v9  ;;  %v2941_v32 = vadd.f32 %v2937_v7, %v2914_v5  ;;  %v2963_v60 = vmul.f32 %v2950_v54, %v5907_v36  ;;  %v2964_v18 = vmul.f32 %v2954_v62, %v5921_v1 }
 0xa30   :  { %v5997_v16 = vadd.f32 %v3100_v56, %v2996_v0  ;;  %v5999_v2 = vadd.f32 %v3101_v51, %v2997_v52  ;;  %v2990_v59 = vmul.f32 %v2977_v6, %v5923_v55  ;;  %v2991_v48 = vmul.f32 %v2981_v14, %v5925_v57 }
 0xa31   :  { %v3004_v21 = vrot.slane %v5909_v4, %v4453_v44  ;;  %v3008_v40 = vrot.slane %v5911_v47, %v4453_v44  ;;  %v3027_v8 = vrot.slane %v5909_v4, %v4455_v45  ;;  %v3031_v36 = vrot.slane %v5911_v47, %v4455_v45 }
 0xa32   :  { %v3109_v42 = vadd.f32 %v5999_v2, %v5997_v16  ;;  %v3054_v1 = vrot.slane %v5909_v4, %v4463_v49  ;;  %v2967_v55 = vadd.f32 %v2963_v60, %v2940_v29  ;;  %v2968_v57 = vadd.f32 %v2964_v18, %v2941_v32 }
 0xa33   :  { %v3017_v27 = vmul.f32 %v3004_v21, %v5943_v31  ;;  %v3018_v13 = vmul.f32 %v3008_v40, %v5945_v23  ;;  %v3040_v61 = vmul.f32 %v3027_v8, %v5947_v3  ;;  %v3041_v58 = vmul.f32 %v3031_v36, %v3023_v19 }
 0xa34   :  { %3110 = vadd.xlane.f32.xlu1 %v3109_v42  ;;  %v3058_v0 = vrot.slane %v5911_v47, %v4463_v49  ;;  %v3067_v52 = vmul.f32 %v3054_v1, %v5953_v35  ;;  %v3081_v46 = vrot.slane %v5909_v4, %v4465_v50  ;;  %v3085_v17 = vrot.slane %v5911_v47, %v4465_v50 }
 0xa35   :  { %v3115_v31 = vmul.f32 %v5997_v16, %v5997_v16  ;;  %v3116_v23 = vmul.f32 %v5999_v2, %v5999_v2  ;;  %v3044_v20 = vadd.f32 %v3040_v61, %v3017_v27  ;;  %v3045_v3 = vadd.f32 %v3041_v58, %v3018_v13  ;;  %v6042_v27 = vld [vmem:[#allocation5 + $0x600] sm:$0xff]  ;;  %v6044_v13 = vld [vmem:[#allocation5 + $0x608] sm:$0xff]  ;;  %v6046_v61 = vld [vmem:[#allocation5 + $0x610] sm:$0xff] }
 0xa36   :  { %v3068_v19 = vmul.f32 %v3058_v0, %v5955_v43  ;;  %v2884_v10 = vmul.f32 0.6931472, %v4256_v28  ;;  %v2994_v30 = vadd.f32 %v2990_v59, %v2967_v55  ;;  %v2995_v37 = vadd.f32 %v2991_v48, %v2968_v57  ;;  %v6048_v58 = vld [vmem:[#allocation5 + $0x618] sm:$0xff]  ;;  %v6050_v0 = vld [vmem:[#allocation5 + $0x620] sm:$0xff] }
 0xa37   :  { %v3094_v35 = vmul.f32 %v3081_v46, %v3076_v41  ;;  %v3120_v53 = vadd.f32 %v3116_v23, %v3115_v31  ;;  %v3071_v12 = vadd.f32 %v3067_v52, %v3044_v20  ;;  %v3095_v11 = vmul.f32 %v3085_v17, %v5970_v15  ;;  %v6064_v23 = vld [vmem:[#allocation5 + $0x628] sm:$0xff]  ;;  %v6066_v20 = vld [vmem:[#allocation5 + $0x630] sm:$0xff] }
 0xa38   :  { %v3072_v4 = vadd.f32 %v3068_v19, %v3045_v3  ;;  %v6034_v47 = vadd.f32 %v2884_v10, %v5891_v63  ;;  %v6068_v3 = vld [vmem:[#allocation5 + $0x638] sm:$0xff] }
 0xa39   :  { %3121 = vadd.xlane.f32.xlu1 %v3120_v53  ;;  %v3098_v26 = vadd.f32 %v3094_v35, %v3071_v12 }
 0xa3a   :  { %v3099_v22 = vadd.f32 %v3095_v11, %v3072_v4 }
 0xa3b   :  { %v3102_v24 = vadd.f32 %v3098_v26, %v2994_v30 }
 0xa3c   :  { %v3103_v9 = vadd.f32 %v3099_v22, %v2995_v37 }
 0xa3d   :  { %v3113_v25 = vmul.f32 %v3102_v24, %v3102_v24 }
 0xa3e   :  { %v3106_v5 = vadd.f32 %v3103_v9, %v3102_v24  ;;  %v3114_v43 = vmul.f32 %v3103_v9, %v3103_v9 }
 0xa40   :  { %3107 = vadd.xlane.f32.xlu0 %v3106_v5  ;;  %v3117_v28 = vadd.f32 %v3114_v43, %v3113_v25  ;;  %v6088_v5 = vld [vmem:[#allocation5 + $0x648] sm:$0xff]  ;;  %v6090_v25 = vld [vmem:[#allocation5 + $0x650] sm:$0xff] }
 0xa44   :  { %3118 = vadd.xlane.f32.xlu0 %v3117_v28 }
 0xac1   :  { %v3111_v41 = vpop.xlane.xlu1 %3110 }
 0xac6   :  { %v3122_v62 = vpop.xlane.xlu1 %3121 }
 0xacd   :  { %v3108_v7 = vpop.xlane.xlu0 %3107 }
 0xace   :  { %v3112_v54 = vadd.f32 %v3111_v41, %v3108_v7 }
 0xad0   :  { %v3124_v56 = vmul.f32 0.001953125, %v3112_v54  ;;  %v3278_v54 = vld [vmem:[#allocation5 + $0x658] sm:$0xff] }
 0xad1   :  { %v3119_v15 = vpop.xlane.xlu0 %3118 }
 0xad2   :  { %v3123_v51 = vadd.f32 %v3122_v62, %v3119_v15  ;;  %v3126_v63 = vmul.f32 %v3124_v56, %v3124_v56  ;;  %v3143_v40 = vsub.f32 %v5997_v16, %v3124_v56  ;;  %v3144_v42 = vsub.f32 %v5999_v2, %v3124_v56  ;;  %v6096_v62 = vld [vmem:[#allocation5 + $0x660] sm:$0xff] }
 0xad3   :  { %v3141_v36 = vsub.f32 %v3102_v24, %v3124_v56  ;;  %v3142_v1 = vsub.f32 %v3103_v9, %v3124_v56  ;;  %v6086_v9 = vld [vmem:[#allocation5 + $0x640] sm:$0xff]  ;;  %v6098_v56 = vld [vmem:[#allocation5 + $0x668] sm:$0xff] }
 0xad4   :  { %v3125_v6 = vmul.f32 0.001953125, %v3123_v51 }
 0xad6   :  { %v3127_v14 = vsub.f32 %v3125_v6, %v3126_v63 }
 0xad8   :  { %v3128_v29 = vmax.f32 %v3127_v14, 0.0 }
 0xada   :  { %4257 = vrsqrt.f32 %v3128_v29  ;;  %vm3131_vm8 = vcmp.eq.f32.partialorder %v3128_v29, inf  ;;  %v3134_v18 = vand.u32 2147483648, %v3128_v29  ;;  %vm3133_vm9 = vcmp.eq.f32.partialorder %v3128_v29, 0.0 }
 0xae4   :  { %v4258_v32 = vpop.eup %4257 }
 0xae5   :  { %v3130_v60 = vmul.f32 %v4258_v32, %v3128_v29 }
 0xae7   :  { %v3132_v59 = vsel %vm3131_vm8, %v3128_v29, %v3130_v60 }
 0xae8   :  { %v3135_v48 = vsel %vm3133_vm9, %v3134_v18, %v3132_v59 }
 0xae9   :  { %v3136_v21 = vadd.f32 1e-06, %v3135_v48 }
 0xaeb   :  { %4259 = vrcp.f32 %v3136_v21 }
 0xaf5   :  { %v4260_v8 = vpop.eup %4259 }
 0xaf6   :  { %v6038_v55 = vmul.f32 %v4260_v8, %v3143_v40  ;;  %v6040_v57 = vmul.f32 %v4260_v8, %v3144_v42  ;;  %v6052_v16 = vmul.f32 %v4260_v8, %v3141_v36  ;;  %v6054_v2 = vmul.f32 %v4260_v8, %v3142_v1  ;;  %v3331_v40 = vld [vmem:[#allocation5 + $0x670] sm:$0xff]  ;;  %v6113_v42 = vld [vmem:[#allocation5 + $0x678] sm:$0xff] }
 0xaf7   :  { %4261 = vlog2.f32 %v4260_v8 }
 0xaf8   :  { %v3163_v52 = vrot.slane %v6038_v55, %v4433_v33  ;;  %v3167_v46 = vrot.slane %v6040_v57, %v4433_v33  ;;  %v3186_v17 = vrot.slane %v6038_v55, %v4435_v34  ;;  %v3190_v31 = vrot.slane %v6040_v57, %v4435_v34 }
 0xaf9   :  { %v3213_v19 = vrot.slane %v6038_v55, %v4439_v38  ;;  %v3217_v10 = vrot.slane %v6040_v57, %v4439_v38  ;;  %v3240_v30 = vrot.slane %v6038_v55, %v4441_v39  ;;  %v3244_v37 = vrot.slane %v6040_v57, %v4441_v39 }
 0xafa   :  { %v3170_v35 = vmul.f32 %v3163_v52, %v6042_v27  ;;  %v3171_v53 = vmul.f32 %v3167_v46, %v6044_v13  ;;  %v3193_v12 = vmul.f32 %v3186_v17, %v6046_v61  ;;  %v3194_v4 = vmul.f32 %v3190_v31, %v6048_v58 }
 0xafb   :  { %v3220_v11 = vmul.f32 %v3213_v19, %v6050_v0  ;;  %v3221_v26 = vmul.f32 %v3217_v10, %v6064_v23  ;;  %v3247_v22 = vmul.f32 %v3240_v30, %v6066_v20  ;;  %v3248_v24 = vmul.f32 %v3244_v37, %v6068_v3 }
 0xafc   :  { %v3197_v43 = vadd.f32 %v3193_v12, %v3170_v35  ;;  %v3198_v28 = vadd.f32 %v3194_v4, %v3171_v53  ;;  %v3267_v41 = vrot.slane %v6038_v55, %v4453_v44  ;;  %v3271_v7 = vrot.slane %v6040_v57, %v4453_v44 }
 0xafd   :  { %v3290_v15 = vrot.slane %v6038_v55, %v4455_v45  ;;  %v3294_v51 = vrot.slane %v6040_v57, %v4455_v45  ;;  %v3317_v63 = vrot.slane %v6038_v55, %v4463_v49  ;;  %v3321_v6 = vrot.slane %v6040_v57, %v4463_v49 }
 0xafe   :  { %v3224_v14 = vadd.f32 %v3220_v11, %v3197_v43  ;;  %v3225_v29 = vadd.f32 %v3221_v26, %v3198_v28  ;;  %v3274_v32 = vmul.f32 %v3267_v41, %v6086_v9  ;;  %v3275_v60 = vmul.f32 %v3271_v7, %v6088_v5 }
 0xaff   :  { %v3297_v18 = vmul.f32 %v3290_v15, %v6090_v25  ;;  %v3298_v59 = vmul.f32 %v3294_v51, %v3278_v54  ;;  %v3324_v48 = vmul.f32 %v3317_v63, %v6096_v62  ;;  %v3325_v21 = vmul.f32 %v3321_v6, %v6098_v56 }
 0xb00   :  { %v3251_v8 = vadd.f32 %v3247_v22, %v3224_v14  ;;  %v3252_v36 = vadd.f32 %v3248_v24, %v3225_v29  ;;  %v3344_v1 = vrot.slane %v6038_v55, %v4465_v50  ;;  %v3348_v52 = vrot.slane %v6040_v57, %v4465_v50 }
 0xb01   :  { %v4262_v46 = vpop.eup %4261  ;;  %v3301_v17 = vadd.f32 %v3297_v18, %v3274_v32  ;;  %v3302_v31 = vadd.f32 %v3298_v59, %v3275_v60  ;;  %v3155_v19 = vrot.slane %v6052_v16, %v4433_v33  ;;  %v3159_v10 = vrot.slane %v6054_v2, %v4433_v33 }
 0xb02   :  { %v3351_v30 = vmul.f32 %v3344_v1, %v3331_v40  ;;  %v3352_v37 = vmul.f32 %v3348_v52, %v6113_v42  ;;  %v3178_v35 = vrot.slane %v6052_v16, %v4435_v34  ;;  %v3182_v55 = vrot.slane %v6054_v2, %v4435_v34 }
 0xb03   :  { %v3328_v53 = vadd.f32 %v3324_v48, %v3301_v17  ;;  %v3329_v57 = vadd.f32 %v3325_v21, %v3302_v31  ;;  %v3168_v12 = vmul.f32 %v3155_v19, %v6042_v27  ;;  %v3169_v4 = vmul.f32 %v3159_v10, %v6044_v13 }
 0xb04   :  { %v3191_v11 = vmul.f32 %v3178_v35, %v6046_v61  ;;  %v3192_v26 = vmul.f32 %v3182_v55, %v6048_v58  ;;  %v3205_v22 = vrot.slane %v6052_v16, %v4439_v38  ;;  %v3209_v24 = vrot.slane %v6054_v2, %v4439_v38 }
 0xb05   :  { %v3355_v43 = vadd.f32 %v3351_v30, %v3328_v53  ;;  %v3356_v28 = vadd.f32 %v3352_v37, %v3329_v57  ;;  %v3232_v41 = vrot.slane %v6052_v16, %v4441_v39  ;;  %v3236_v27 = vrot.slane %v6054_v2, %v4441_v39 }
 0xb06   :  { %v3195_v7 = vadd.f32 %v3191_v11, %v3168_v12  ;;  %v3196_v13 = vadd.f32 %v3192_v26, %v3169_v4  ;;  %v3218_v58 = vmul.f32 %v3205_v22, %v6050_v0  ;;  %v3219_v51 = vmul.f32 %v3209_v24, %v6064_v23 }
 0xb07   :  { %v6140_v15 = vadd.f32 %v3355_v43, %v3251_v8  ;;  %v6142_v61 = vadd.f32 %v3356_v28, %v3252_v36  ;;  %v3245_v63 = vmul.f32 %v3232_v41, %v6066_v20  ;;  %v3246_v6 = vmul.f32 %v3236_v27, %v6068_v3 }
 0xb08   :  { %v3259_v14 = vrot.slane %v6052_v16, %v4453_v44  ;;  %v3263_v29 = vrot.slane %v6054_v2, %v4453_v44  ;;  %v3282_v60 = vrot.slane %v6052_v16, %v4455_v45  ;;  %v3286_v0 = vrot.slane %v6054_v2, %v4455_v45 }
 0xb09   :  { %v3364_v32 = vadd.f32 %v6142_v61, %v6140_v15  ;;  %v3309_v23 = vrot.slane %v6052_v16, %v4463_v49  ;;  %v3222_v20 = vadd.f32 %v3218_v58, %v3195_v7  ;;  %v3223_v3 = vadd.f32 %v3219_v51, %v3196_v13 }
 0xb0a   :  { %v3272_v18 = vmul.f32 %v3259_v14, %v6086_v9  ;;  %v3273_v59 = vmul.f32 %v3263_v29, %v6088_v5  ;;  %v3295_v48 = vmul.f32 %v3282_v60, %v6090_v25  ;;  %v3296_v21 = vmul.f32 %v3286_v0, %v3278_v54 }
 0xb0b   :  { %3365 = vadd.xlane.f32.xlu1 %v3364_v32  ;;  %v3313_v8 = vrot.slane %v6054_v2, %v4463_v49  ;;  %v3322_v36 = vmul.f32 %v3309_v23, %v6096_v62  ;;  %v3336_v1 = vrot.slane %v6052_v16, %v4465_v50  ;;  %v3340_v52 = vrot.slane %v6054_v2, %v4465_v50 }
 0xb0c   :  { %v3370_v9 = vmul.f32 %v6140_v15, %v6140_v15  ;;  %v3371_v5 = vmul.f32 %v6142_v61, %v6142_v61  ;;  %v3299_v17 = vadd.f32 %v3295_v48, %v3272_v18  ;;  %v3300_v25 = vadd.f32 %v3296_v21, %v3273_v59  ;;  %v6185_v18 = vld [vmem:[#allocation5 + $0x680] sm:$0xff]  ;;  %v6187_v59 = vld [vmem:[#allocation5 + $0x688] sm:$0xff]  ;;  %v6189_v48 = vld [vmem:[#allocation5 + $0x690] sm:$0xff] }
 0xb0d   :  { %v3323_v54 = vmul.f32 %v3313_v8, %v6098_v56  ;;  %v3139_v31 = vmul.f32 0.6931472, %v4262_v46  ;;  %v3249_v19 = vadd.f32 %v3245_v63, %v3222_v20  ;;  %v3250_v10 = vadd.f32 %v3246_v6, %v3223_v3  ;;  %v6191_v21 = vld [vmem:[#allocation5 + $0x698] sm:$0xff]  ;;  %v6193_v8 = vld [vmem:[#allocation5 + $0x6a0] sm:$0xff] }
 0xb0e   :  { %v3349_v62 = vmul.f32 %v3336_v1, %v3331_v40  ;;  %v3375_v30 = vadd.f32 %v3371_v5, %v3370_v9  ;;  %v3326_v37 = vadd.f32 %v3322_v36, %v3299_v17  ;;  %v3350_v35 = vmul.f32 %v3340_v52, %v6113_v42  ;;  %v6207_v5 = vld [vmem:[#allocation5 + $0x6a8] sm:$0xff]  ;;  %v6209_v17 = vld [vmem:[#allocation5 + $0x6b0] sm:$0xff] }
 0xb0f   :  { %v3327_v16 = vadd.f32 %v3323_v54, %v3300_v25  ;;  %v6177_v2 = vadd.f32 %v3139_v31, %v6034_v47  ;;  %v6211_v25 = vld [vmem:[#allocation5 + $0x6b8] sm:$0xff] }
 0xb10   :  { %3376 = vadd.xlane.f32.xlu1 %v3375_v30  ;;  %v3353_v55 = vadd.f32 %v3349_v62, %v3326_v37 }
 0xb11   :  { %v3354_v53 = vadd.f32 %v3350_v35, %v3327_v16 }
 0xb12   :  { %v3357_v57 = vadd.f32 %v3353_v55, %v3249_v19 }
 0xb13   :  { %v3358_v12 = vadd.f32 %v3354_v53, %v3250_v10 }
 0xb14   :  { %v3368_v11 = vmul.f32 %v3357_v57, %v3357_v57 }
 0xb15   :  { %v3361_v4 = vadd.f32 %v3358_v12, %v3357_v57  ;;  %v3369_v56 = vmul.f32 %v3358_v12, %v3358_v12 }
 0xb17   :  { %3362 = vadd.xlane.f32.xlu0 %v3361_v4  ;;  %v3372_v46 = vadd.f32 %v3369_v56, %v3368_v11  ;;  %v6231_v4 = vld [vmem:[#allocation5 + $0x6c8] sm:$0xff]  ;;  %v6233_v11 = vld [vmem:[#allocation5 + $0x6d0] sm:$0xff] }
 0xb1b   :  { %3373 = vadd.xlane.f32.xlu0 %v3372_v46 }
 0xb98   :  { %v3366_v40 = vpop.xlane.xlu1 %3365 }
 0xb9d   :  { %v3377_v24 = vpop.xlane.xlu1 %3376 }
 0xba4   :  { %v3363_v26 = vpop.xlane.xlu0 %3362 }
 0xba5   :  { %v3367_v22 = vadd.f32 %v3366_v40, %v3363_v26 }
 0xba7   :  { %v3379_v43 = vmul.f32 0.001953125, %v3367_v22  ;;  %v3533_v22 = vld [vmem:[#allocation5 + $0x6d8] sm:$0xff] }
 0xba8   :  { %v3374_v42 = vpop.xlane.xlu0 %3373 }
 0xba9   :  { %v3378_v28 = vadd.f32 %v3377_v24, %v3374_v42  ;;  %v3381_v47 = vmul.f32 %v3379_v43, %v3379_v43  ;;  %v3398_v29 = vsub.f32 %v6140_v15, %v3379_v43  ;;  %v3399_v32 = vsub.f32 %v6142_v61, %v3379_v43  ;;  %v6239_v24 = vld [vmem:[#allocation5 + $0x6e0] sm:$0xff] }
 0xbaa   :  { %v3396_v0 = vsub.f32 %v3357_v57, %v3379_v43  ;;  %v3397_v23 = vsub.f32 %v3358_v12, %v3379_v43  ;;  %v6229_v12 = vld [vmem:[#allocation5 + $0x6c0] sm:$0xff]  ;;  %v6241_v43 = vld [vmem:[#allocation5 + $0x6e8] sm:$0xff] }
 0xbab   :  { %v3380_v41 = vmul.f32 0.001953125, %v3378_v28 }
 0xbad   :  { %v3382_v27 = vsub.f32 %v3380_v41, %v3381_v47 }
 0xbaf   :  { %v3383_v7 = vmax.f32 %v3382_v27, 0.0 }
 0xbb1   :  { %4263 = vrsqrt.f32 %v3383_v7  ;;  %vm3386_vm10 = vcmp.eq.f32.partialorder %v3383_v7, inf  ;;  %v3389_v51 = vand.u32 2147483648, %v3383_v7  ;;  %vm3388_vm11 = vcmp.eq.f32.partialorder %v3383_v7, 0.0 }
 0xbbb   :  { %v4264_v13 = vpop.eup %4263 }
 0xbbc   :  { %v3385_v58 = vmul.f32 %v4264_v13, %v3383_v7 }
 0xbbe   :  { %v3387_v63 = vsel %vm3386_vm10, %v3383_v7, %v3385_v58 }
 0xbbf   :  { %v3390_v6 = vsel %vm3388_vm11, %v3389_v51, %v3387_v63 }
 0xbc0   :  { %v3391_v14 = vadd.f32 1e-06, %v3390_v6 }
 0xbc2   :  { %4265 = vrcp.f32 %v3391_v14 }
 0xbcc   :  { %v4266_v60 = vpop.eup %4265 }
 0xbcd   :  { %v6181_v20 = vmul.f32 %v4266_v60, %v3398_v29  ;;  %v6183_v3 = vmul.f32 %v4266_v60, %v3399_v32  ;;  %v6195_v15 = vmul.f32 %v4266_v60, %v3396_v0  ;;  %v6197_v61 = vmul.f32 %v4266_v60, %v3397_v23  ;;  %v3586_v29 = vld [vmem:[#allocation5 + $0x6f0] sm:$0xff]  ;;  %v6256_v32 = vld [vmem:[#allocation5 + $0x6f8] sm:$0xff] }
 0xbce   :  { %4267 = vlog2.f32 %v4266_v60 }
 0xbcf   :  { %v3418_v36 = vrot.slane %v6181_v20, %v4433_v33  ;;  %v3422_v1 = vrot.slane %v6183_v3, %v4433_v33  ;;  %v3441_v52 = vrot.slane %v6181_v20, %v4435_v34  ;;  %v3445_v9 = vrot.slane %v6183_v3, %v4435_v34 }
 0xbd0   :  { %v3468_v54 = vrot.slane %v6181_v20, %v4439_v38  ;;  %v3472_v31 = vrot.slane %v6183_v3, %v4439_v38  ;;  %v3495_v19 = vrot.slane %v6181_v20, %v4441_v39  ;;  %v3499_v10 = vrot.slane %v6183_v3, %v4441_v39 }
 0xbd1   :  { %v3425_v62 = vmul.f32 %v3418_v36, %v6185_v18  ;;  %v3426_v30 = vmul.f32 %v3422_v1, %v6187_v59  ;;  %v3448_v37 = vmul.f32 %v3441_v52, %v6189_v48  ;;  %v3449_v16 = vmul.f32 %v3445_v9, %v6191_v21 }
 0xbd2   :  { %v3475_v35 = vmul.f32 %v3468_v54, %v6193_v8  ;;  %v3476_v55 = vmul.f32 %v3472_v31, %v6207_v5  ;;  %v3502_v53 = vmul.f32 %v3495_v19, %v6209_v17  ;;  %v3503_v57 = vmul.f32 %v3499_v10, %v6211_v25 }
 0xbd3   :  { %v3452_v56 = vadd.f32 %v3448_v37, %v3425_v62  ;;  %v3453_v46 = vadd.f32 %v3449_v16, %v3426_v30  ;;  %v3522_v40 = vrot.slane %v6181_v20, %v4453_v44  ;;  %v3526_v26 = vrot.slane %v6183_v3, %v4453_v44 }
 0xbd4   :  { %v3545_v42 = vrot.slane %v6181_v20, %v4455_v45  ;;  %v3549_v28 = vrot.slane %v6183_v3, %v4455_v45  ;;  %v3572_v47 = vrot.slane %v6181_v20, %v4463_v49  ;;  %v3576_v41 = vrot.slane %v6183_v3, %v4463_v49 }
 0xbd5   :  { %v3479_v27 = vadd.f32 %v3475_v35, %v3452_v56  ;;  %v3480_v7 = vadd.f32 %v3476_v55, %v3453_v46  ;;  %v3529_v13 = vmul.f32 %v3522_v40, %v6229_v12  ;;  %v3530_v58 = vmul.f32 %v3526_v26, %v6231_v4 }
 0xbd6   :  { %v3552_v51 = vmul.f32 %v3545_v42, %v6233_v11  ;;  %v3553_v63 = vmul.f32 %v3549_v28, %v3533_v22  ;;  %v3579_v6 = vmul.f32 %v3572_v47, %v6239_v24  ;;  %v3580_v14 = vmul.f32 %v3576_v41, %v6241_v43 }
 0xbd7   :  { %v3506_v60 = vadd.f32 %v3502_v53, %v3479_v27  ;;  %v3507_v0 = vadd.f32 %v3503_v57, %v3480_v7  ;;  %v3599_v23 = vrot.slane %v6181_v20, %v4465_v50  ;;  %v3603_v36 = vrot.slane %v6183_v3, %v4465_v50 }
 0xbd8   :  { %v4268_v1 = vpop.eup %4267  ;;  %v3556_v52 = vadd.f32 %v3552_v51, %v3529_v13  ;;  %v3557_v9 = vadd.f32 %v3553_v63, %v3530_v58  ;;  %v3410_v54 = vrot.slane %v6195_v15, %v4433_v33  ;;  %v3414_v31 = vrot.slane %v6197_v61, %v4433_v33 }
 0xbd9   :  { %v3606_v19 = vmul.f32 %v3599_v23, %v3586_v29  ;;  %v3607_v10 = vmul.f32 %v3603_v36, %v6256_v32  ;;  %v3433_v62 = vrot.slane %v6195_v15, %v4435_v34  ;;  %v3437_v20 = vrot.slane %v6197_v61, %v4435_v34 }
 0xbda   :  { %v3583_v30 = vadd.f32 %v3579_v6, %v3556_v52  ;;  %v3584_v3 = vadd.f32 %v3580_v14, %v3557_v9  ;;  %v3423_v37 = vmul.f32 %v3410_v54, %v6185_v18  ;;  %v3424_v16 = vmul.f32 %v3414_v31, %v6187_v59 }
 0xbdb   :  { %v3446_v35 = vmul.f32 %v3433_v62, %v6189_v48  ;;  %v3447_v55 = vmul.f32 %v3437_v20, %v6191_v21  ;;  %v3460_v53 = vrot.slane %v6195_v15, %v4439_v38  ;;  %v3464_v57 = vrot.slane %v6197_v61, %v4439_v38 }
 0xbdc   :  { %v3610_v56 = vadd.f32 %v3606_v19, %v3583_v30  ;;  %v3611_v46 = vadd.f32 %v3607_v10, %v3584_v3  ;;  %v3487_v40 = vrot.slane %v6195_v15, %v4441_v39  ;;  %v3491_v18 = vrot.slane %v6197_v61, %v4441_v39 }
 0xbdd   :  { %v3450_v26 = vadd.f32 %v3446_v35, %v3423_v37  ;;  %v3451_v59 = vadd.f32 %v3447_v55, %v3424_v16  ;;  %v3473_v21 = vmul.f32 %v3460_v53, %v6193_v8  ;;  %v3474_v28 = vmul.f32 %v3464_v57, %v6207_v5 }
 0xbde   :  { %v6283_v42 = vadd.f32 %v3610_v56, %v3506_v60  ;;  %v6285_v48 = vadd.f32 %v3611_v46, %v3507_v0  ;;  %v3500_v47 = vmul.f32 %v3487_v40, %v6209_v17  ;;  %v3501_v41 = vmul.f32 %v3491_v18, %v6211_v25 }
 0xbdf   :  { %v3514_v27 = vrot.slane %v6195_v15, %v4453_v44  ;;  %v3518_v7 = vrot.slane %v6197_v61, %v4453_v44  ;;  %v3537_v58 = vrot.slane %v6195_v15, %v4455_v45  ;;  %v3541_v8 = vrot.slane %v6197_v61, %v4455_v45 }
 0xbe0   :  { %v3619_v13 = vadd.f32 %v6285_v48, %v6283_v42  ;;  %v3564_v5 = vrot.slane %v6195_v15, %v4463_v49  ;;  %v3477_v17 = vadd.f32 %v3473_v21, %v3450_v26  ;;  %v3478_v25 = vadd.f32 %v3474_v28, %v3451_v59 }
 0xbe1   :  { %v3527_v51 = vmul.f32 %v3514_v27, %v6229_v12  ;;  %v3528_v63 = vmul.f32 %v3518_v7, %v6231_v4  ;;  %v3550_v6 = vmul.f32 %v3537_v58, %v6233_v11  ;;  %v3551_v14 = vmul.f32 %v3541_v8, %v3533_v22 }
 0xbe2   :  { %3620 = vadd.xlane.f32.xlu1 %v3619_v13  ;;  %v3568_v60 = vrot.slane %v6197_v61, %v4463_v49  ;;  %v3577_v0 = vmul.f32 %v3564_v5, %v6239_v24  ;;  %v3591_v23 = vrot.slane %v6195_v15, %v4465_v50  ;;  %v3595_v36 = vrot.slane %v6197_v61, %v4465_v50 }
 0xbe3   :  { %v3625_v12 = vmul.f32 %v6283_v42, %v6283_v42  ;;  %v3626_v4 = vmul.f32 %v6285_v48, %v6285_v48  ;;  %v3554_v52 = vadd.f32 %v3550_v6, %v3527_v51  ;;  %v3555_v11 = vadd.f32 %v3551_v14, %v3528_v63  ;;  %v6328_v51 = vld [vmem:[#allocation5 + $0x700] sm:$0xff]  ;;  %v6330_v63 = vld [vmem:[#allocation5 + $0x708] sm:$0xff]  ;;  %v6332_v6 = vld [vmem:[#allocation5 + $0x710] sm:$0xff] }
 0xbe4   :  { %v3578_v22 = vmul.f32 %v3568_v60, %v6241_v43  ;;  %v3394_v9 = vmul.f32 0.6931472, %v4268_v1  ;;  %v3504_v54 = vadd.f32 %v3500_v47, %v3477_v17  ;;  %v3505_v31 = vadd.f32 %v3501_v41, %v3478_v25  ;;  %v6334_v14 = vld [vmem:[#allocation5 + $0x718] sm:$0xff]  ;;  %v6336_v60 = vld [vmem:[#allocation5 + $0x720] sm:$0xff] }
 0xbe5   :  { %v3604_v24 = vmul.f32 %v3591_v23, %v3586_v29  ;;  %v3630_v19 = vadd.f32 %v3626_v4, %v3625_v12  ;;  %v3581_v10 = vadd.f32 %v3577_v0, %v3554_v52  ;;  %v3605_v62 = vmul.f32 %v3595_v36, %v6256_v32  ;;  %v6350_v4 = vld [vmem:[#allocation5 + $0x728] sm:$0xff]  ;;  %v6352_v52 = vld [vmem:[#allocation5 + $0x730] sm:$0xff] }
 0xbe6   :  { %v3582_v15 = vadd.f32 %v3578_v22, %v3555_v11  ;;  %v6320_v61 = vadd.f32 %v3394_v9, %v6177_v2  ;;  %v6354_v11 = vld [vmem:[#allocation5 + $0x738] sm:$0xff] }
 0xbe7   :  { %3631 = vadd.xlane.f32.xlu1 %v3630_v19  ;;  %v3608_v20 = vadd.f32 %v3604_v24, %v3581_v10 }
 0xbe8   :  { %v3609_v30 = vadd.f32 %v3605_v62, %v3582_v15 }
 0xbe9   :  { %v3612_v3 = vadd.f32 %v3608_v20, %v3504_v54 }
 0xbea   :  { %v3613_v37 = vadd.f32 %v3609_v30, %v3505_v31 }
 0xbeb   :  { %v3623_v35 = vmul.f32 %v3612_v3, %v3612_v3 }
 0xbec   :  { %v3616_v16 = vadd.f32 %v3613_v37, %v3612_v3  ;;  %v3624_v43 = vmul.f32 %v3613_v37, %v3613_v37 }
 0xbee   :  { %3617 = vadd.xlane.f32.xlu0 %v3616_v16  ;;  %v3627_v1 = vadd.f32 %v3624_v43, %v3623_v35  ;;  %v6374_v16 = vld [vmem:[#allocation5 + $0x748] sm:$0xff]  ;;  %v6376_v35 = vld [vmem:[#allocation5 + $0x750] sm:$0xff] }
 0xbf2   :  { %3628 = vadd.xlane.f32.xlu0 %v3627_v1 }
 0xc6f   :  { %v3621_v29 = vpop.xlane.xlu1 %3620 }
 0xc74   :  { %v3632_v57 = vpop.xlane.xlu1 %3631 }
 0xc7b   :  { %v3618_v55 = vpop.xlane.xlu0 %3617 }
 0xc7c   :  { %v3622_v53 = vadd.f32 %v3621_v29, %v3618_v55 }
 0xc7e   :  { %v3634_v56 = vmul.f32 0.001953125, %v3622_v53  ;;  %v3788_v53 = vld [vmem:[#allocation5 + $0x758] sm:$0xff] }
 0xc7f   :  { %v3629_v32 = vpop.xlane.xlu0 %3628 }
 0xc80   :  { %v3633_v46 = vadd.f32 %v3632_v57, %v3629_v32  ;;  %v3636_v2 = vmul.f32 %v3634_v56, %v3634_v56  ;;  %v3653_v7 = vsub.f32 %v6283_v42, %v3634_v56  ;;  %v3654_v13 = vsub.f32 %v6285_v48, %v3634_v56  ;;  %v6382_v57 = vld [vmem:[#allocation5 + $0x760] sm:$0xff] }
 0xc81   :  { %v3651_v8 = vsub.f32 %v3612_v3, %v3634_v56  ;;  %v3652_v5 = vsub.f32 %v3613_v37, %v3634_v56  ;;  %v6372_v37 = vld [vmem:[#allocation5 + $0x740] sm:$0xff]  ;;  %v6384_v56 = vld [vmem:[#allocation5 + $0x768] sm:$0xff] }
 0xc82   :  { %v3635_v40 = vmul.f32 0.001953125, %v3633_v46 }
 0xc84   :  { %v3637_v18 = vsub.f32 %v3635_v40, %v3636_v2 }
 0xc86   :  { %v3638_v26 = vmax.f32 %v3637_v18, 0.0 }
 0xc88   :  { %4269 = vrsqrt.f32 %v3638_v26  ;;  %vm3641_vm12 = vcmp.eq.f32.partialorder %v3638_v26, inf  ;;  %v3644_v28 = vand.u32 2147483648, %v3638_v26  ;;  %vm3643_vm13 = vcmp.eq.f32.partialorder %v3638_v26, 0.0 }
 0xc92   :  { %v4270_v59 = vpop.eup %4269 }
 0xc93   :  { %v3640_v21 = vmul.f32 %v4270_v59, %v3638_v26 }
 0xc95   :  { %v3642_v47 = vsel %vm3641_vm12, %v3638_v26, %v3640_v21 }
 0xc96   :  { %v3645_v41 = vsel %vm3643_vm13, %v3644_v28, %v3642_v47 }
 0xc97   :  { %v3646_v27 = vadd.f32 1e-06, %v3645_v41 }
 0xc99   :  { %4271 = vrcp.f32 %v3646_v27 }
 0xca3   :  { %v4272_v58 = vpop.eup %4271 }
 0xca4   :  { %v6324_v17 = vmul.f32 %v4272_v58, %v3653_v7  ;;  %v6326_v25 = vmul.f32 %v4272_v58, %v3654_v13  ;;  %v6338_v42 = vmul.f32 %v4272_v58, %v3651_v8  ;;  %v6340_v48 = vmul.f32 %v4272_v58, %v3652_v5  ;;  %v3841_v7 = vld [vmem:[#allocation5 + $0x770] sm:$0xff]  ;;  %v6399_v13 = vld [vmem:[#allocation5 + $0x778] sm:$0xff] }
 0xca5   :  { %4273 = vlog2.f32 %v4272_v58 }
 0xca6   :  { %v3673_v0 = vrot.slane %v6324_v17, %v4433_v33  ;;  %v3677_v23 = vrot.slane %v6326_v25, %v4433_v33  ;;  %v3696_v36 = vrot.slane %v6324_v17, %v4435_v34  ;;  %v3700_v12 = vrot.slane %v6326_v25, %v4435_v34 }
 0xca7   :  { %v3723_v22 = vrot.slane %v6324_v17, %v4439_v38  ;;  %v3727_v9 = vrot.slane %v6326_v25, %v4439_v38  ;;  %v3750_v54 = vrot.slane %v6324_v17, %v4441_v39  ;;  %v3754_v31 = vrot.slane %v6326_v25, %v4441_v39 }
 0xca8   :  { %v3680_v24 = vmul.f32 %v3673_v0, %v6328_v51  ;;  %v3681_v19 = vmul.f32 %v3677_v23, %v6330_v63  ;;  %v3703_v10 = vmul.f32 %v3696_v36, %v6332_v6  ;;  %v3704_v15 = vmul.f32 %v3700_v12, %v6334_v14 }
 0xca9   :  { %v3730_v62 = vmul.f32 %v3723_v22, %v6336_v60  ;;  %v3731_v20 = vmul.f32 %v3727_v9, %v6350_v4  ;;  %v3757_v30 = vmul.f32 %v3750_v54, %v6352_v52  ;;  %v3758_v3 = vmul.f32 %v3754_v31, %v6354_v11 }
 0xcaa   :  { %v3707_v43 = vadd.f32 %v3703_v10, %v3680_v24  ;;  %v3708_v1 = vadd.f32 %v3704_v15, %v3681_v19  ;;  %v3777_v29 = vrot.slane %v6324_v17, %v4453_v44  ;;  %v3781_v55 = vrot.slane %v6326_v25, %v4453_v44 }
 0xcab   :  { %v3800_v32 = vrot.slane %v6324_v17, %v4455_v45  ;;  %v3804_v46 = vrot.slane %v6326_v25, %v4455_v45  ;;  %v3827_v2 = vrot.slane %v6324_v17, %v4463_v49  ;;  %v3831_v40 = vrot.slane %v6326_v25, %v4463_v49 }
 0xcac   :  { %v3734_v18 = vadd.f32 %v3730_v62, %v3707_v43  ;;  %v3735_v26 = vadd.f32 %v3731_v20, %v3708_v1  ;;  %v3784_v59 = vmul.f32 %v3777_v29, %v6372_v37  ;;  %v3785_v21 = vmul.f32 %v3781_v55, %v6374_v16 }
 0xcad   :  { %v3807_v28 = vmul.f32 %v3800_v32, %v6376_v35  ;;  %v3808_v47 = vmul.f32 %v3804_v46, %v3788_v53  ;;  %v3834_v41 = vmul.f32 %v3827_v2, %v6382_v57  ;;  %v3835_v27 = vmul.f32 %v3831_v40, %v6384_v56 }
 0xcae   :  { %v3761_v58 = vadd.f32 %v3757_v30, %v3734_v18  ;;  %v3762_v8 = vadd.f32 %v3758_v3, %v3735_v26  ;;  %v3854_v5 = vrot.slane %v6324_v17, %v4465_v50  ;;  %v3858_v0 = vrot.slane %v6326_v25, %v4465_v50 }
 0xcaf   :  { %v4274_v23 = vpop.eup %4273  ;;  %v3811_v36 = vadd.f32 %v3807_v28, %v3784_v59  ;;  %v3812_v12 = vadd.f32 %v3808_v47, %v3785_v21  ;;  %v3665_v22 = vrot.slane %v6338_v42, %v4433_v33  ;;  %v3669_v9 = vrot.slane %v6340_v48, %v4433_v33 }
 0xcb0   :  { %v3861_v54 = vmul.f32 %v3854_v5, %v3841_v7  ;;  %v3862_v31 = vmul.f32 %v3858_v0, %v6399_v13  ;;  %v3688_v24 = vrot.slane %v6338_v42, %v4435_v34  ;;  %v3692_v17 = vrot.slane %v6340_v48, %v4435_v34 }
 0xcb1   :  { %v3838_v19 = vadd.f32 %v3834_v41, %v3811_v36  ;;  %v3839_v25 = vadd.f32 %v3835_v27, %v3812_v12  ;;  %v3678_v10 = vmul.f32 %v3665_v22, %v6328_v51  ;;  %v3679_v15 = vmul.f32 %v3669_v9, %v6330_v63 }
 0xcb2   :  { %v3701_v62 = vmul.f32 %v3688_v24, %v6332_v6  ;;  %v3702_v20 = vmul.f32 %v3692_v17, %v6334_v14  ;;  %v3715_v30 = vrot.slane %v6338_v42, %v4439_v38  ;;  %v3719_v3 = vrot.slane %v6340_v48, %v4439_v38 }
 0xcb3   :  { %v3865_v43 = vadd.f32 %v3861_v54, %v3838_v19  ;;  %v3866_v1 = vadd.f32 %v3862_v31, %v3839_v25  ;;  %v3742_v29 = vrot.slane %v6338_v42, %v4441_v39  ;;  %v3746_v51 = vrot.slane %v6340_v48, %v4441_v39 }
 0xcb4   :  { %v3705_v55 = vadd.f32 %v3701_v62, %v3678_v10  ;;  %v3706_v63 = vadd.f32 %v3702_v20, %v3679_v15  ;;  %v3728_v14 = vmul.f32 %v3715_v30, %v6336_v60  ;;  %v3729_v46 = vmul.f32 %v3719_v3, %v6350_v4 }
 0xcb5   :  { %v6426_v32 = vadd.f32 %v3865_v43, %v3761_v58  ;;  %v6428_v6 = vadd.f32 %v3866_v1, %v3762_v8  ;;  %v3755_v2 = vmul.f32 %v3742_v29, %v6352_v52  ;;  %v3756_v40 = vmul.f32 %v3746_v51, %v6354_v11 }
 0xcb6   :  { %v3769_v18 = vrot.slane %v6338_v42, %v4453_v44  ;;  %v3773_v26 = vrot.slane %v6340_v48, %v4453_v44  ;;  %v3792_v21 = vrot.slane %v6338_v42, %v4455_v45  ;;  %v3796_v60 = vrot.slane %v6340_v48, %v4455_v45 }
 0xcb7   :  { %v3874_v59 = vadd.f32 %v6428_v6, %v6426_v32  ;;  %v3819_v4 = vrot.slane %v6338_v42, %v4463_v49  ;;  %v3732_v52 = vadd.f32 %v3728_v14, %v3705_v55  ;;  %v3733_v11 = vadd.f32 %v3729_v46, %v3706_v63 }
 0xcb8   :  { %v3782_v28 = vmul.f32 %v3769_v18, %v6372_v37  ;;  %v3783_v47 = vmul.f32 %v3773_v26, %v6374_v16  ;;  %v3805_v41 = vmul.f32 %v3792_v21, %v6376_v35  ;;  %v3806_v27 = vmul.f32 %v3796_v60, %v3788_v53 }
 0xcb9   :  { %3875 = vadd.xlane.f32.xlu1 %v3874_v59  ;;  %v3823_v58 = vrot.slane %v6340_v48, %v4463_v49  ;;  %v3832_v8 = vmul.f32 %v3819_v4, %v6382_v57  ;;  %v3846_v5 = vrot.slane %v6338_v42, %v4465_v50  ;;  %v3850_v0 = vrot.slane %v6340_v48, %v4465_v50 }
 0xcba   :  { %v3880_v37 = vmul.f32 %v6426_v32, %v6426_v32  ;;  %v3881_v16 = vmul.f32 %v6428_v6, %v6428_v6  ;;  %v3809_v36 = vadd.f32 %v3805_v41, %v3782_v28  ;;  %v3810_v35 = vadd.f32 %v3806_v27, %v3783_v47  ;;  %v3915_v41 = vld [vmem:[#allocation5 + $0x780] sm:$0xff]  ;;  %v3916_v27 = vld [vmem:[#allocation5 + $0x788] sm:$0xff] }
 0xcbb   :  { %v3833_v53 = vmul.f32 %v3823_v58, %v6384_v56  ;;  %v3649_v12 = vmul.f32 0.6931472, %v4274_v23  ;;  %v3759_v22 = vadd.f32 %v3755_v2, %v3732_v52  ;;  %v3760_v9 = vadd.f32 %v3756_v40, %v3733_v11  ;;  %v3938_v58 = vld [vmem:[#allocation5 + $0x790] sm:$0xff] }
 0xcbc   :  { %v3859_v57 = vmul.f32 %v3846_v5, %v3841_v7  ;;  %v3885_v54 = vadd.f32 %v3881_v16, %v3880_v37  ;;  %v3836_v31 = vadd.f32 %v3832_v8, %v3809_v36  ;;  %v3860_v24 = vmul.f32 %v3850_v0, %v6399_v13  ;;  %v3939_v5 = vld [vmem:[#allocation5 + $0x798] sm:$0xff] }
 0xcbd   :  { %v3837_v42 = vadd.f32 %v3833_v53, %v3810_v35  ;;  %v6463_v48 = vadd.f32 %v3649_v12, %v6320_v61 }
 0xcbe   :  { %3886 = vadd.xlane.f32.xlu1 %v3885_v54  ;;  %v3863_v17 = vadd.f32 %v3859_v57, %v3836_v31 }
 0xcbf   :  { %v3864_v19 = vadd.f32 %v3860_v24, %v3837_v42  ;;  %v3965_v24 = vld [vmem:[#allocation5 + $0x7a0] sm:$0xff] }
 0xcc0   :  { %v3867_v25 = vadd.f32 %v3863_v17, %v3759_v22  ;;  %v3966_v17 = vld [vmem:[#allocation5 + $0x7a8] sm:$0xff] }
 0xcc1   :  { %v3868_v10 = vadd.f32 %v3864_v19, %v3760_v9 }
 0xcc2   :  { %v3878_v62 = vmul.f32 %v3867_v25, %v3867_v25 }
 0xcc3   :  { %v3871_v15 = vadd.f32 %v3868_v10, %v3867_v25  ;;  %v3879_v56 = vmul.f32 %v3868_v10, %v3868_v10 }
 0xcc5   :  { %3872 = vadd.xlane.f32.xlu0 %v3871_v15  ;;  %v3882_v23 = vadd.f32 %v3879_v56, %v3878_v62 }
 0xcc9   :  { %3883 = vadd.xlane.f32.xlu0 %v3882_v23 }
 0xd46   :  { %v3876_v7 = vpop.xlane.xlu1 %3875 }
 0xd4b   :  { %v3887_v3 = vpop.xlane.xlu1 %3886 }
 0xd52   :  { %v3873_v20 = vpop.xlane.xlu0 %3872 }
 0xd53   :  { %v3877_v30 = vadd.f32 %v3876_v7, %v3873_v20  ;;  %v3992_v20 = vld [vmem:[#allocation5 + $0x7b0] sm:$0xff] }
 0xd55   :  { %v3889_v43 = vmul.f32 0.001953125, %v3877_v30 }
 0xd56   :  { %v3884_v13 = vpop.xlane.xlu0 %3883 }
 0xd57   :  { %v3888_v1 = vadd.f32 %v3887_v3, %v3884_v13  ;;  %v3891_v61 = vmul.f32 %v3889_v43, %v3889_v43  ;;  %v3906_v26 = vsub.f32 %v3867_v25, %v3889_v43  ;;  %v3907_v59 = vsub.f32 %v3868_v10, %v3889_v43 }
 0xd58   :  { %v3908_v21 = vsub.f32 %v6426_v32, %v3889_v43  ;;  %v3909_v4 = vsub.f32 %v6428_v6, %v3889_v43  ;;  %v3993_v43 = vld [vmem:[#allocation5 + $0x7b8] sm:$0xff] }
 0xd59   :  { %v3890_v29 = vmul.f32 0.001953125, %v3888_v1 }
 0xd5b   :  { %v3892_v51 = vsub.f32 %v3890_v29, %v3891_v61 }
 0xd5d   :  { %v3893_v55 = vmax.f32 %v3892_v51, 0.0 }
 0xd5f   :  { %4275 = vrsqrt.f32 %v3893_v55  ;;  %vm3896_vm14 = vcmp.eq.f32.partialorder %v3893_v55, inf  ;;  %v3899_v46 = vand.u32 2147483648, %v3893_v55  ;;  %vm3898_vm15 = vcmp.eq.f32.partialorder %v3893_v55, 0.0 }
 0xd69   :  { %v4276_v63 = vpop.eup %4275 }
 0xd6a   :  { %v3895_v14 = vmul.f32 %v4276_v63, %v3893_v55 }
 0xd6c   :  { %v3897_v2 = vsel %vm3896_vm14, %v3893_v55, %v3895_v14 }
 0xd6d   :  { %v3900_v40 = vsel %vm3898_vm15, %v3899_v46, %v3897_v2  ;;  %v4019_v2 = vld [vmem:[#allocation5 + $0x7c0] sm:$0xff] }
 0xd6e   :  { %v3901_v18 = vadd.f32 1e-06, %v3900_v40  ;;  %v4020_v40 = vld [vmem:[#allocation5 + $0x7c8] sm:$0xff] }
 0xd70   :  { %4277 = vrcp.f32 %v3901_v18 }
 0xd7a   :  { %v4278_v60 = vpop.eup %4277 }
 0xd7b   :  { %4279 = vlog2.f32 %v4278_v60  ;;  %v6467_v52 = vmul.f32 %v4278_v60, %v3906_v26  ;;  %v6469_v11 = vmul.f32 %v4278_v60, %v3907_v59  ;;  %v6471_v28 = vmul.f32 %v4278_v60, %v3908_v21 }
 0xd7c   :  { %v6473_v47 = vmul.f32 %v4278_v60, %v3909_v4 }
 0xd7d   :  { %v3920_v8 = vrot.slane %v6467_v52, %v4433_v33  ;;  %v3924_v32 = vrot.slane %v6469_v11, %v4433_v33  ;;  %v3928_v6 = vrot.slane %v6471_v28, %v4433_v33  ;;  %v3943_v0 = vrot.slane %v6467_v52, %v4435_v34 }
 0xd7e   :  { %v3932_v37 = vrot.slane %v6473_v47, %v4433_v33  ;;  %v3947_v16 = vrot.slane %v6469_v11, %v4435_v34  ;;  %v3951_v36 = vrot.slane %v6471_v28, %v4435_v34  ;;  %v3955_v35 = vrot.slane %v6473_v47, %v4435_v34 }
 0xd7f   :  { %v3933_v53 = vmul.f32 %v3920_v8, %v3915_v41  ;;  %v3934_v12 = vmul.f32 %v3924_v32, %v3916_v27  ;;  %v3935_v22 = vmul.f32 %v3928_v6, %v3915_v41  ;;  %v3956_v9 = vmul.f32 %v3943_v0, %v3938_v58  ;;  %v4042_v6 = vld [vmem:[#allocation5 + $0x7d0] sm:$0xff] }
 0xd80   :  { %v3936_v57 = vmul.f32 %v3932_v37, %v3916_v27  ;;  %v3957_v54 = vmul.f32 %v3947_v16, %v3939_v5  ;;  %v3958_v31 = vmul.f32 %v3951_v36, %v3938_v58  ;;  %v3959_v42 = vmul.f32 %v3955_v35, %v3939_v5  ;;  %v4043_v5 = vld [vmem:[#allocation5 + $0x7d8] sm:$0xff]  ;;  %v4069_v36 = vld [vmem:[#allocation5 + $0x7e0] sm:$0xff] }
 0xd81   :  { %v3960_v33 = vadd.f32 %v3956_v9, %v3933_v53  ;;  %v3970_v19 = vrot.slane %v6467_v52, %v4439_v38  ;;  %v3974_v25 = vrot.slane %v6469_v11, %v4439_v38  ;;  %v3978_v34 = vrot.slane %v6471_v28, %v4439_v38 }
 0xd82   :  { %v3961_v10 = vadd.f32 %v3957_v54, %v3934_v12  ;;  %v3962_v15 = vadd.f32 %v3958_v31, %v3935_v22  ;;  %v3982_v62 = vrot.slane %v6473_v47, %v4439_v38  ;;  %v3963_v56 = vadd.f32 %v3959_v42, %v3936_v57  ;;  %v4070_v12 = vld [vmem:[#allocation5 + $0x7e8] sm:$0xff] }
 0xd83   :  { %v3983_v23 = vmul.f32 %v3970_v19, %v3965_v24  ;;  %v3984_v7 = vmul.f32 %v3974_v25, %v3966_v17  ;;  %v3997_v30 = vrot.slane %v6467_v52, %v4441_v39  ;;  %v3985_v3 = vmul.f32 %v3978_v34, %v3965_v24 }
 0xd84   :  { %v4001_v13 = vrot.slane %v6469_v11, %v4441_v39  ;;  %v4005_v1 = vrot.slane %v6471_v28, %v4441_v39  ;;  %v4009_v61 = vrot.slane %v6473_v47, %v4441_v39  ;;  %v3986_v38 = vmul.f32 %v3982_v62, %v3966_v17 }
 0xd85   :  { %v4280_v29 = vpop.eup %4279  ;;  %v3987_v51 = vadd.f32 %v3983_v23, %v3960_v33  ;;  %v3988_v63 = vadd.f32 %v3984_v7, %v3961_v10  ;;  %v3989_v14 = vadd.f32 %v3985_v3, %v3962_v15  ;;  %v4010_v46 = vmul.f32 %v3997_v30, %v3992_v20  ;;  %v4096_v10 = vld [vmem:[#allocation5 + $0x7f0] sm:$0xff]  ;;  %v4097_v23 = vld [vmem:[#allocation5 + $0x7f8] sm:$0xff] }
 0xd86   :  { %v3904_v55 = vmul.f32 0.6931472, %v4280_v29  ;;  %v3990_v18 = vadd.f32 %v3986_v38, %v3963_v56  ;;  %v4011_v26 = vmul.f32 %v4001_v13, %v3993_v43  ;;  %v4024_v59 = vrot.slane %v6467_v52, %v4453_v44 }
 0xd87   :  { %v4028_v21 = vrot.slane %v6469_v11, %v4453_v44  ;;  %v4012_v60 = vmul.f32 %v4005_v1, %v3992_v20  ;;  %v4013_v4 = vmul.f32 %v4009_v61, %v3993_v43  ;;  %v4032_v41 = vrot.slane %v6471_v28, %v4453_v44 }
 0xd88   :  { %v3905_v39 = vadd.f32 %v3904_v55, %v6463_v48  ;;  %v4014_v27 = vadd.f32 %v4010_v46, %v3987_v51  ;;  %v4036_v58 = vrot.slane %v6473_v47, %v4453_v44  ;;  %v4037_v8 = vmul.f32 %v4024_v59, %v4019_v2 }
 0xd89   :  { %v4038_v32 = vmul.f32 %v4028_v21, %v4020_v40  ;;  %v4039_v37 = vmul.f32 %v4032_v41, %v4019_v2  ;;  %v4047_v16 = vrot.slane %v6467_v52, %v4455_v45  ;;  %v4051_v48 = vrot.slane %v6469_v11, %v4455_v45 }
 0xd8a   :  { %v4131_v0 = vsel %vm4130_vm0, %v3905_v39, 0.0  ;;  %v4040_v35 = vmul.f32 %v4036_v58, %v4020_v40  ;;  %v4055_v53 = vrot.slane %v6471_v28, %v4455_v45  ;;  %v4059_v44 = vrot.slane %v6473_v47, %v4455_v45 }
 0xd8b   :  { %4132 = vadd.xlane.f32.xlu0 %v4131_v0  ;;  %v4074_v22 = vrot.slane %v6467_v52, %v4463_v49  ;;  %v4060_v9 = vmul.f32 %v4047_v16, %v4042_v6  ;;  %v4061_v57 = vmul.f32 %v4051_v48, %v4043_v5  ;;  %v4078_v54 = vrot.slane %v6469_v11, %v4463_v49 }
 0xd8c   :  { %v4082_v31 = vrot.slane %v6471_v28, %v4463_v49  ;;  %v4062_v42 = vmul.f32 %v4055_v53, %v4042_v6  ;;  %v4063_v24 = vmul.f32 %v4059_v44, %v4043_v5  ;;  %v4086_v17 = vrot.slane %v6473_v47, %v4463_v49 }
 0xd8d   :  { %v4087_v33 = vmul.f32 %v4074_v22, %v4069_v36  ;;  %v4064_v19 = vadd.f32 %v4060_v9, %v4037_v8  ;;  %v4065_v45 = vadd.f32 %v4061_v57, %v4038_v32  ;;  %v4088_v25 = vmul.f32 %v4078_v54, %v4070_v12 }
 0xd8e   :  { %v4089_v34 = vmul.f32 %v4082_v31, %v4069_v36  ;;  %v4066_v15 = vadd.f32 %v4062_v42, %v4039_v37  ;;  %v4067_v62 = vadd.f32 %v4063_v24, %v4040_v35  ;;  %v4090_v56 = vmul.f32 %v4086_v17, %v4070_v12 }
 0xd8f   :  { %v4101_v7 = vrot.slane %v6467_v52, %v4465_v50  ;;  %v4091_v20 = vadd.f32 %v4087_v33, %v4064_v19  ;;  %v4092_v30 = vadd.f32 %v4088_v25, %v4065_v45  ;;  %v4105_v3 = vrot.slane %v6469_v11, %v4465_v50 }
 0xd90   :  { %v4109_v49 = vrot.slane %v6471_v28, %v4465_v50  ;;  %v4093_v43 = vadd.f32 %v4089_v34, %v4066_v15  ;;  %v4094_v13 = vadd.f32 %v4090_v56, %v4067_v62  ;;  %v4113_v1 = vrot.slane %v6473_v47, %v4465_v50 }
 0xd91   :  { %v4114_v61 = vmul.f32 %v4101_v7, %v4096_v10  ;;  %v4015_v29 = vadd.f32 %v4011_v26, %v3988_v63  ;;  %v4016_v38 = vadd.f32 %v4012_v60, %v3989_v14  ;;  %v4115_v51 = vmul.f32 %v4105_v3, %v4097_v23 }
 0xd92   :  { %v4116_v55 = vmul.f32 %v4109_v49, %v4096_v10  ;;  %v4017_v46 = vadd.f32 %v4013_v4, %v3990_v18  ;;  %v4117_v52 = vmul.f32 %v4113_v1, %v4097_v23 }
 0xd93   :  { %v4118_v2 = vadd.f32 %v4114_v61, %v4091_v20  ;;  %v4119_v40 = vadd.f32 %v4115_v51, %v4092_v30 }
 0xd94   :  { %v4120_v59 = vadd.f32 %v4116_v55, %v4093_v43  ;;  %v4121_v21 = vadd.f32 %v4117_v52, %v4094_v13 }
 0xd95   :  { %v4122_v11 = vadd.f32 %v4118_v2, %v4014_v27  ;;  %v4123_v39 = vadd.f32 %v4119_v40, %v4015_v29 }
 0xd96   :  { %v4124_v41 = vadd.f32 %v4120_v59, %v4016_v38  ;;  %v4125_v28 = vadd.f32 %v4121_v21, %v4017_v46 }
 0xd97   :  { %4126 = vst [vmem:[#allocation7] sm:$0xff] %v4122_v11  ;;  %4127 = vst [vmem:[#allocation7 + $0x8] sm:$0xff] %v4123_v39 }
 0xd98   :  { %4128 = vst [vmem:[#allocation7 + $0x10] sm:$0xff] %v4124_v41  ;;  %4129 = vst [vmem:[#allocation7 + $0x18] sm:$0xff] %v4125_v28 }
 0xd99   :  { %4336 = shalt.err (!%p4333_p6)
}
 0xd9a   :  { %s4337_s14 = scalar_lea.hbm %s6570_s2, 512 }
 0xd9b   :  { %p4338_p7 = scmp.ne.s32.totalorder %s6570_s2, %s4337_s14  ;;  %p4341_p8 = scmp.lt.u32.totalorder %s4337_s14, %s6570_s2 }
 0xd9d   :  { %p4343_p9 = pnand %p4341_p8, %p4338_p7 }
 0xd9f   :  { %4346 = shalt.err (!%p4343_p9)
}
 0xda0   :  { %4156 = dma.vmem_to_hbm [thread:$0]  %s4151_s10, 512, %s6570_s2, [#allocation4], %s4378_s22, %s4378_s22, %s4379_s23   ;;  %vm4143_vm1 = vcmask 0  }
 0xda1   :  { %s4382_s21 = smov [#allocation8]  }
 0xda2   :  { %s4163_s24 = sshll.u32 %s4382_s21, 4  ;;  %s4164_s24 = int_to_ptr.vmem [resolvable:$true] %s4163_s24 }
 0xda3   :  { %s4347_s27 = scalar_lea.vmem %s4164_s24, 16  ;;  %s4351_s28 = scalar_lea.vmem %s4164_s24, 32 }
 0xda4   :  { %p4348_p10 = scmp.ne.s32.totalorder %s4164_s24, %s4347_s27  ;;  %p4352_p11 = scmp.lt.s32.totalorder %s4164_s24, %s4164_s24 }
 0xda5   :  { %p4353_p12 = scmp.lt.s32.totalorder %s4351_s28, %s4347_s27 }
 0xda7   :  { %p4354_p13 = por %p4353_p12, %p4352_p11 }
 0xda9   :  { %p4355_p0 = pnand %p4354_p13, %p4348_p10 }
 0xe18   :  { %v4133_v50 = vpop.xlane.xlu0 %4132 }
 0xe19   :  { %v4134_v47 = vrot.slane %v4133_v50, 4 }
 0xe1b   :  { %v4135_v63 = vadd.f32 %v4134_v47, %v4133_v50 }
 0xe1d   :  { %v4136_v14 = vrot.slane %v4135_v63, 2 }
 0xe1f   :  { %v4137_v18 = vadd.f32 %v4136_v14, %v4135_v63 }
 0xe21   :  { %v4138_v26 = vrot.slane %v4137_v18, 1 }
 0xe23   :  { %v4139_v60 = vadd.f32 %v4138_v26, %v4137_v18 }
 0xe25   :  { %4177 = vpush %v4139_v60 }
 0xe56   :  { %s4178_s25 = spop %4177 }
 0xe57   :  { %s4141_s26 = smul.f32 256.0, %s4178_s25 }
 0xe59   :  { %v4142_v4 = vstv %s4141_s26 }
 0xe5a   :  { %4144 = vst.msk [vmem:[#allocation8] sm:$0x1] %vm4143_vm1, %v4142_v4 }
 0xe5b   :  { %4358 = shalt.err (!%p4355_p0)
}
 0xe5c   :  { %s4359_s23 = scalar_lea.hbm %s6571_s3, 16 }
 0xe5d   :  { %p4360_p1 = scmp.ne.s32.totalorder %s6571_s3, %s4359_s23  ;;  %p4363_p2 = scmp.lt.u32.totalorder %s4359_s23, %s6571_s3 }
 0xe5f   :  { %p4365_p3 = pnand %p4363_p2, %p4360_p1 }
 0xe61   :  { %4368 = shalt.err (!%p4365_p3)
}
 0xe62   :  { %4166 = dma.vmem_to_hbm [thread:$0]  %s4164_s24, 16, %s6571_s3, [#allocation9]  }
 0xe63   :  { %4373 = dma.done.wait [#allocation4], 512  }
 0xe64   :  { %4374 = vsyncadd [#allocation4], 4294966784 }
 0xe65   :  { %4375 = dma.done.wait [#allocation9], 16  }
 0xe66   :  { %4376 = vsyncadd [#allocation9], 4294967280 }
 0xe67   :  { %4173 = vsyncpa [#allocation3], 1 }
 0xe68   :  { %4174 = vsyncpa [#allocation6], 1 }
 0xe69   :  { %4175 = vsyncpa [#allocation4], 1 }
 0xe6a   :  { %4176 = vsyncpa [#allocation9], 1 }

</bundles_post_ra>
